<compile_context>
chip_gen: v7x
topology: tpu7x:2x2x1
jax: 0.10.0
libtpu: 0.0.40
codegen_flags: <defaults>
</compile_context>

<pallas_src>
import numpy as np
import jax
import jax.numpy as jnp
from jax.experimental import pallas as pl
from jax.experimental.pallas import tpu as pltpu

_NTAPS = 35  # 1 (1x1) + 9 (3x3) + 25 (5x5)


def fuse_kernel(x_ref, w_ref, c_ref, mask_ref, o_ref):
    _, H, W, C2 = x_ref.shape            # C2 = 2C
    C = o_ref.shape[3]
    T = w_ref.shape[1] - 2 * C           # number of conv-tap channels (35)

    x = x_ref[0].reshape(H * W, C2)      # bf16, (H*W, 2C)

    # Single fused MXU pass (bf16 x bf16 -> f32): columns = [taps | F1' | F2'].
    y = (jnp.dot(x, w_ref[...], preferred_element_type=jnp.float32)
         + c_ref[...])                                          # (H*W, T+2C) f32

    taps = y[:, :T].reshape(H, W, T)          # per-pixel tap values (all biases folded)
    f1p = y[:, T:T + C].reshape(H, W, C)      # proj2(F1) + bias
    f2p = y[:, T + C:].reshape(H, W, C)       # proj3(F2) + bias

    # Reflection pad the 35-channel tap map ONCE by 2 on H and W.
    # (The pad-1 window needed by the 3x3 conv is the interior of this map.)
    t = jnp.concatenate([taps[2:3], taps[1:2], taps,
                         taps[H - 2:H - 1], taps[H - 3:H - 2]], axis=0)
    t = jnp.concatenate([t[:, 2:3], t[:, 1:2], t,
                         t[:, W - 2:W - 1], t[:, W - 3:W - 2]], axis=1)
    # t: (H+4, W+4, T)

    # Spatial conv = 25 masked shifted adds on the tap map.  The misaligned
    # sublane shift (dx) is hoisted: only 5 realignments of the slab; the
    # inner dy loop slices the leading (untiled) axis, which is free.
    mask = mask_ref[...]                      # (25, T) shift -> tap-channel selector
    acc = jnp.zeros((H, W, T), jnp.float32)
    for dx in range(5):
        t_dx = t[:, dx:dx + W, :]             # (H+4, W, T), one realign per dx
        for dy in range(5):
            acc = acc + t_dx[dy:dy + H] * mask[dy * 5 + dx]

    # Group the taps into the three conv logits (biases already folded in),
    # then ONE sigmoid over the concatenated (H, W, 3) logit map.
    l1 = acc[:, :, 0:1]                                       # 1x1 (center shift)
    l3 = jnp.sum(acc[:, :, 1:10], axis=-1, keepdims=True)     # 3x3
    l5 = jnp.sum(acc[:, :, 10:], axis=-1, keepdims=True)      # 5x5
    logits = jnp.concatenate([l1, l3, l5], axis=-1)           # (H, W, 3)

    fusion = jnp.sum(jax.nn.sigmoid(logits), axis=-1, keepdims=True) * (1.0 / 3.0)
    a = jnp.clip(fusion, 0.0, 1.0)
    b = jnp.clip(1.0 - fusion, 0.0, 1.0)
    o_ref[0] = (a * f1p + b * f2p).astype(o_ref.dtype)


def pack_params(p):
    """Host-side, ONE-TIME repacking of the module weights (f64 for accuracy).

    Returns (wmat, cvec, mask):
      wmat (2C, T+2C) bf16 : rows = [F1 channels ; F2 channels],
                             cols = [35 conv taps | proj2(F1) | proj3(F2)]
      cvec (1, T+2C)  f32  : fused bias row (bp1-folded tap bias + b1x/b3x/b5x,
                             bp2, bp3)
      mask (25, T)    f32  : per-shift tap-channel selector for the 3x3/5x5
                             convs (+ the 1x1 tap routed through the center shift)
    """
    g = {k: np.asarray(v, np.float64) for k, v in p.items()}
    C = g["wp2"].shape[0]
    T = _NTAPS

    # (C, 35): col 0 = 1x1 tap, cols 1..9 = 3x3 taps, cols 10..34 = 5x5 taps.
    wtaps = np.concatenate([g["w1x"].T, g["w3x"].T, g["w5x"].T], axis=1)
    zc = np.zeros((C, C))
    wmat = np.concatenate([
        np.concatenate([g["wp1a"] @ wtaps, g["wp2"], zc], axis=1),   # F1 rows
        np.concatenate([g["wp1b"] @ wtaps, zc, g["wp3"]], axis=1),   # F2 rows
    ], axis=0)                                                       # (2C, T+2C)

    tap_bias = g["bp1"] @ wtaps              # (1, T): proj1 bias folded into taps
    tap_bias[0, 0] += g["b1x"][0, 0]         # 1x1 conv bias
    tap_bias[0, 1] += g["b3x"][0, 0]         # 3x3 conv bias (one tap column, exact)
    tap_bias[0, 10] += g["b5x"][0, 0]        # 5x5 conv bias (one tap column, exact)
    cvec = np.concatenate([tap_bias, g["bp2"], g["bp3"]], axis=1)    # (1, T+2C)

    # Per-shift tap-channel selection mask.
    m = np.zeros((25, T))
    m[2 * 5 + 2, 0] = 1.0                    # 1x1 tap: center of the pad-2 window
    for dy in range(5):
        for dx in range(5):
            s = dy * 5 + dx
            m[s, 10 + s] = 1.0               # 5x5 tap for this shift
            if 1 <= dy <= 3 and 1 <= dx <= 3:
                m[s, 1 + (dy - 1) * 3 + (dx - 1)] = 1.0   # 3x3 tap (pad-1 interior)

    return (jnp.asarray(wmat, jnp.bfloat16),
            jnp.asarray(cvec, jnp.float32),
            jnp.asarray(m, jnp.float32))


def fuse_unit_pallas(f1_nchw, f2_nchw, packed):
    """NCHW in / NCHW out, matching the PyTorch module interface. Jit-able."""
    wmat, cvec, mask = packed
    N, C, H, W = f1_nchw.shape
    assert H >= 3 and W >= 3, "reflection pad by 2 requires H, W >= 3"

    # Concat on channels first (cheap in NCHW), cast to bf16 BEFORE the NHWC
    # relayout so the transpose moves half the bytes, then one transpose.
    x = jnp.concatenate([f1_nchw, f2_nchw], axis=1).astype(jnp.bfloat16)
    x = jnp.transpose(x, (0, 2, 3, 1))                      # (N, H, W, 2C)

    spatial_in = pl.BlockSpec((1, H, W, 2 * C), lambda n: (n, 0, 0, 0))
    spatial_out = pl.BlockSpec((1, H, W, C), lambda n: (n, 0, 0, 0))
    wspecs = [pl.BlockSpec(w.shape, lambda n: (0, 0)) for w in (wmat, cvec, mask)]

    out = pl.pallas_call(
        fuse_kernel,
        out_shape=jax.ShapeDtypeStruct((N, H, W, C), jnp.float32),
        grid_spec=pltpu.PrefetchScalarGridSpec(
            num_scalar_prefetch=0,
            grid=(N,),
            in_specs=[spatial_in] + wspecs,
            out_specs=spatial_out,
        ),
        compiler_params=pltpu.CompilerParams(dimension_semantics=("parallel",)),
    )(x, wmat, cvec, mask)

    return jnp.transpose(out, (0, 3, 1, 2))                 # -> NCHW


def init_params(key, C):
    ks = jax.random.split(key, 13)

    def w(k, shape, fan_in):
        return (jax.random.normal(k, shape, jnp.float32) / np.sqrt(fan_in)).astype(jnp.float32)

    def b(k, shape):
        return (0.1 * jax.random.normal(k, shape, jnp.float32)).astype(jnp.float32)

    return {
        # proj1 weight (2C -> C) stored as two (Cin=C, Cout=C) halves (F1 part, F2 part)
        "wp1a": w(ks[0], (C, C), 2 * C),
        "wp1b": w(ks[1], (C, C), 2 * C),
        "bp1":  b(ks[2], (1, C)),
        "wp2":  w(ks[3], (C, C), C),
        "bp2":  b(ks[4], (1, C)),
        "wp3":  w(ks[5], (C, C), C),
        "bp3":  b(ks[6], (1, C)),
        "w1x":  w(ks[7], (1, C), C),          # fuse1x weight, (1, Cin)
        "b1x":  b(ks[8], (1, 1)),
        "w3x":  w(ks[9], (9, C), 9 * C),      # fuse3x weight, (kh*kw, Cin)
        "b3x":  b(ks[10], (1, 1)),
        "w5x":  w(ks[11], (25, C), 25 * C),   # fuse5x weight, (kh*kw, Cin)
        "b5x":  b(ks[12], (1, 1)),
    }


def _sigmoid_np(x):
    return 1.0 / (1.0 + np.exp(-x))


def reference_np(f1_nchw, f2_nchw, p):
    """Pure numpy float64 reference mirroring the PyTorch module semantics."""
    x1 = np.transpose(np.asarray(f1_nchw, np.float64), (0, 2, 3, 1))
    x2 = np.transpose(np.asarray(f2_nchw, np.float64), (0, 2, 3, 1))
    g = {k: np.asarray(v, np.float64) for k, v in p.items()}
    N, H, W, C = x1.shape

    fcat = x1 @ g["wp1a"] + x2 @ g["wp1b"] + g["bp1"]
    f1p = x1 @ g["wp2"] + g["bp2"]
    f2p = x2 @ g["wp3"] + g["bp3"]

    l1 = np.sum(fcat * g["w1x"], axis=-1, keepdims=True) + g["b1x"]

    pad3 = np.pad(fcat, ((0, 0), (1, 1), (1, 1), (0, 0)), mode="reflect")
    l3 = np.zeros((N, H, W, 1))
    for dy in range(3):
        for dx in range(3):
            l3 += np.sum(pad3[:, dy:dy + H, dx:dx + W, :] * g["w3x"][dy * 3 + dx],
                         axis=-1, keepdims=True)
    l3 += g["b3x"]

    pad5 = np.pad(fcat, ((0, 0), (2, 2), (2, 2), (0, 0)), mode="reflect")
    l5 = np.zeros((N, H, W, 1))
    for dy in range(5):
        for dx in range(5):
            l5 += np.sum(pad5[:, dy:dy + H, dx:dx + W, :] * g["w5x"][dy * 5 + dx],
                         axis=-1, keepdims=True)
    l5 += g["b5x"]

    fusion = (_sigmoid_np(l1) + _sigmoid_np(l3) + _sigmoid_np(l5)) / 3.0
    a = np.clip(fusion, 0.0, 1.0)
    b = np.clip(1.0 - fusion, 0.0, 1.0)
    out = a * f1p + b * f2p
    return np.transpose(out, (0, 3, 1, 2))


if __name__ == "__main__":
    N, C, H, W = 2, 4, 16, 16
    key = jax.random.PRNGKey(0)
    k1, k2, kp = jax.random.split(key, 3)

    F1 = jax.random.normal(k1, (N, C, H, W), jnp.float32)
    F2 = jax.random.normal(k2, (N, C, H, W), jnp.float32)
    params = init_params(kp, C)

    packed = pack_params(params)              # one-time host-side packing
    fuse_fn = jax.jit(fuse_unit_pallas)       # wrapper is now fully jittable
    out = jax.block_until_ready(fuse_fn(F1, F2, packed))

    ref = reference_np(F1, F2, params)
    assert out.shape == (N, C, H, W), out.shape
    # Tolerance sized for bf16 MXU operands (single-pass matmul).
    assert np.allclose(np.asarray(out, np.float64), ref, atol=2e-2, rtol=2e-2)
    print("KERNEL_OK")
</pallas_src>

<mosaic_0001>
module attributes {stable_mosaic.version = 11 : i64} {
  func.func @fuse_kernel(%arg0: i32, %arg1: memref<1x16x16x8xbf16, #tpu.memory_space<vmem>>, %arg2: memref<8x43xbf16, #tpu.memory_space<vmem>>, %arg3: memref<1x43xf32, #tpu.memory_space<vmem>>, %arg4: memref<25x35xf32, #tpu.memory_space<vmem>>, %arg5: memref<1x16x16x4xf32, #tpu.memory_space<vmem>>) attributes {dimension_semantics = [#tpu.dimension_semantics<parallel>], iteration_bounds = array<i64: 2>, scalar_prefetch = 0 : i64, scratch_operands = 0 : i64, tpu.core_type = #tpu.core_type<tc>, window_params = [{transform_indices = @transform_0, window_bounds = array<i64: 1, 16, 16, 8>}, {pipeline_mode = #tpu.pipeline_mode<synchronous>, transform_indices = @transform_1, window_bounds = array<i64: 8, 43>}, {pipeline_mode = #tpu.pipeline_mode<synchronous>, transform_indices = @transform_2, window_bounds = array<i64: 1, 43>}, {pipeline_mode = #tpu.pipeline_mode<synchronous>, transform_indices = @transform_3, window_bounds = array<i64: 25, 35>}, {transform_indices = @transform_4, window_bounds = array<i64: 1, 16, 16, 4>}]} {
    %c0 = arith.constant 0 : index
    %c0_0 = arith.constant 0 : index
    %c0_1 = arith.constant 0 : index
    %c0_2 = arith.constant 0 : index
    %0 = vector.load %arg1[%c0, %c0_0, %c0_1, %c0_2] : memref<1x16x16x8xbf16, #tpu.memory_space<vmem>>, vector<1x16x16x8xbf16>
    %1 = vector.shape_cast %0 : vector<1x16x16x8xbf16> to vector<16x16x8xbf16>
    %2 = vector.shape_cast %1 : vector<16x16x8xbf16> to vector<256x8xbf16>
    %c0_3 = arith.constant 0 : index
    %c0_4 = arith.constant 0 : index
    %3 = vector.load %arg2[%c0_3, %c0_4] : memref<8x43xbf16, #tpu.memory_space<vmem>>, vector<8x43xbf16>
    %cst = arith.constant dense<0.000000e+00> : vector<256x43xf32>
    %4 = tpu.matmul %2, %3, %cst {dimension_numbers = #tpu.dot_dimension_numbers<[1], [0], [0], [1], [0, 0, 1, 1], [], []>} : vector<256x8xbf16>, vector<8x43xbf16>, vector<256x43xf32> -> vector<256x43xf32>
    %c0_5 = arith.constant 0 : index
    %c0_6 = arith.constant 0 : index
    %5 = vector.load %arg3[%c0_5, %c0_6] : memref<1x43xf32, #tpu.memory_space<vmem>>, vector<1x43xf32>
    %6 = vector.broadcast %5 : vector<1x43xf32> to vector<256x43xf32>
    %7 = arith.addf %4, %6 : vector<256x43xf32>
    %8 = vector.extract_strided_slice %7 {offsets = [0, 0], sizes = [256, 35], strides = [1, 1]} : vector<256x43xf32> to vector<256x35xf32>
    %9 = vector.shape_cast %8 : vector<256x35xf32> to vector<16x16x35xf32>
    %10 = vector.extract_strided_slice %7 {offsets = [0, 35], sizes = [256, 4], strides = [1, 1]} : vector<256x43xf32> to vector<256x4xf32>
    %11 = vector.shape_cast %10 : vector<256x4xf32> to vector<16x16x4xf32>
    %12 = vector.extract_strided_slice %7 {offsets = [0, 39], sizes = [256, 4], strides = [1, 1]} : vector<256x43xf32> to vector<256x4xf32>
    %13 = vector.shape_cast %12 : vector<256x4xf32> to vector<16x16x4xf32>
    %14 = vector.extract_strided_slice %9 {offsets = [2, 0, 0], sizes = [1, 16, 35], strides = [1, 1, 1]} : vector<16x16x35xf32> to vector<1x16x35xf32>
    %15 = vector.extract_strided_slice %9 {offsets = [1, 0, 0], sizes = [1, 16, 35], strides = [1, 1, 1]} : vector<16x16x35xf32> to vector<1x16x35xf32>
    %16 = vector.extract_strided_slice %9 {offsets = [14, 0, 0], sizes = [1, 16, 35], strides = [1, 1, 1]} : vector<16x16x35xf32> to vector<1x16x35xf32>
    %17 = vector.extract_strided_slice %9 {offsets = [13, 0, 0], sizes = [1, 16, 35], strides = [1, 1, 1]} : vector<16x16x35xf32> to vector<1x16x35xf32>
    %18 = tpu.concatenate %14, %15, %9, %16, %17 in 0 : vector<1x16x35xf32>, vector<1x16x35xf32>, vector<16x16x35xf32>, vector<1x16x35xf32>, vector<1x16x35xf32> -> vector<20x16x35xf32>
    %19 = vector.extract_strided_slice %18 {offsets = [0, 2, 0], sizes = [20, 1, 35], strides = [1, 1, 1]} : vector<20x16x35xf32> to vector<20x1x35xf32>
    %20 = vector.extract_strided_slice %18 {offsets = [0, 1, 0], sizes = [20, 1, 35], strides = [1, 1, 1]} : vector<20x16x35xf32> to vector<20x1x35xf32>
    %21 = vector.extract_strided_slice %18 {offsets = [0, 14, 0], sizes = [20, 1, 35], strides = [1, 1, 1]} : vector<20x16x35xf32> to vector<20x1x35xf32>
    %22 = vector.extract_strided_slice %18 {offsets = [0, 13, 0], sizes = [20, 1, 35], strides = [1, 1, 1]} : vector<20x16x35xf32> to vector<20x1x35xf32>
    %23 = tpu.concatenate %19, %20, %18, %21, %22 in 1 : vector<20x1x35xf32>, vector<20x1x35xf32>, vector<20x16x35xf32>, vector<20x1x35xf32>, vector<20x1x35xf32> -> vector<20x20x35xf32>
    %c0_7 = arith.constant 0 : index
    %c0_8 = arith.constant 0 : index
    %24 = vector.load %arg4[%c0_7, %c0_8] : memref<25x35xf32, #tpu.memory_space<vmem>>, vector<25x35xf32>
    %cst_9 = arith.constant 0.000000e+00 : f32
    %25 = vector.broadcast %cst_9 : f32 to vector<16x16x35xf32>
    %26 = vector.extract_strided_slice %23 {offsets = [0, 0, 0], sizes = [20, 16, 35], strides = [1, 1, 1]} : vector<20x20x35xf32> to vector<20x16x35xf32>
    %27 = vector.extract_strided_slice %26 {offsets = [0, 0, 0], sizes = [16, 16, 35], strides = [1, 1, 1]} : vector<20x16x35xf32> to vector<16x16x35xf32>
    %28 = vector.extract_strided_slice %24 {offsets = [0, 0], sizes = [1, 35], strides = [1, 1]} : vector<25x35xf32> to vector<1x35xf32>
    %29 = vector.shape_cast %28 : vector<1x35xf32> to vector<35xf32>
    %30 = vector.shape_cast %29 : vector<35xf32> to vector<1x1x35xf32>
    %31 = vector.broadcast %30 : vector<1x1x35xf32> to vector<16x16x35xf32>
    %32 = arith.mulf %27, %31 : vector<16x16x35xf32>
    %33 = arith.addf %25, %32 : vector<16x16x35xf32>
    %34 = vector.extract_strided_slice %26 {offsets = [1, 0, 0], sizes = [16, 16, 35], strides = [1, 1, 1]} : vector<20x16x35xf32> to vector<16x16x35xf32>
    %35 = vector.extract_strided_slice %24 {offsets = [5, 0], sizes = [1, 35], strides = [1, 1]} : vector<25x35xf32> to vector<1x35xf32>
    %36 = vector.shape_cast %35 : vector<1x35xf32> to vector<35xf32>
    %37 = vector.shape_cast %36 : vector<35xf32> to vector<1x1x35xf32>
    %38 = vector.broadcast %37 : vector<1x1x35xf32> to vector<16x16x35xf32>
    %39 = arith.mulf %34, %38 : vector<16x16x35xf32>
    %40 = arith.addf %33, %39 : vector<16x16x35xf32>
    %41 = vector.extract_strided_slice %26 {offsets = [2, 0, 0], sizes = [16, 16, 35], strides = [1, 1, 1]} : vector<20x16x35xf32> to vector<16x16x35xf32>
    %42 = vector.extract_strided_slice %24 {offsets = [10, 0], sizes = [1, 35], strides = [1, 1]} : vector<25x35xf32> to vector<1x35xf32>
    %43 = vector.shape_cast %42 : vector<1x35xf32> to vector<35xf32>
    %44 = vector.shape_cast %43 : vector<35xf32> to vector<1x1x35xf32>
    %45 = vector.broadcast %44 : vector<1x1x35xf32> to vector<16x16x35xf32>
    %46 = arith.mulf %41, %45 : vector<16x16x35xf32>
    %47 = arith.addf %40, %46 : vector<16x16x35xf32>
    %48 = vector.extract_strided_slice %26 {offsets = [3, 0, 0], sizes = [16, 16, 35], strides = [1, 1, 1]} : vector<20x16x35xf32> to vector<16x16x35xf32>
    %49 = vector.extract_strided_slice %24 {offsets = [15, 0], sizes = [1, 35], strides = [1, 1]} : vector<25x35xf32> to vector<1x35xf32>
    %50 = vector.shape_cast %49 : vector<1x35xf32> to vector<35xf32>
    %51 = vector.shape_cast %50 : vector<35xf32> to vector<1x1x35xf32>
    %52 = vector.broadcast %51 : vector<1x1x35xf32> to vector<16x16x35xf32>
    %53 = arith.mulf %48, %52 : vector<16x16x35xf32>
    %54 = arith.addf %47, %53 : vector<16x16x35xf32>
    %55 = vector.extract_strided_slice %26 {offsets = [4, 0, 0], sizes = [16, 16, 35], strides = [1, 1, 1]} : vector<20x16x35xf32> to vector<16x16x35xf32>
    %56 = vector.extract_strided_slice %24 {offsets = [20, 0], sizes = [1, 35], strides = [1, 1]} : vector<25x35xf32> to vector<1x35xf32>
    %57 = vector.shape_cast %56 : vector<1x35xf32> to vector<35xf32>
    %58 = vector.shape_cast %57 : vector<35xf32> to vector<1x1x35xf32>
    %59 = vector.broadcast %58 : vector<1x1x35xf32> to vector<16x16x35xf32>
    %60 = arith.mulf %55, %59 : vector<16x16x35xf32>
    %61 = arith.addf %54, %60 : vector<16x16x35xf32>
    %62 = vector.extract_strided_slice %23 {offsets = [0, 1, 0], sizes = [20, 16, 35], strides = [1, 1, 1]} : vector<20x20x35xf32> to vector<20x16x35xf32>
    %63 = vector.extract_strided_slice %62 {offsets = [0, 0, 0], sizes = [16, 16, 35], strides = [1, 1, 1]} : vector<20x16x35xf32> to vector<16x16x35xf32>
    %64 = vector.extract_strided_slice %24 {offsets = [1, 0], sizes = [1, 35], strides = [1, 1]} : vector<25x35xf32> to vector<1x35xf32>
    %65 = vector.shape_cast %64 : vector<1x35xf32> to vector<35xf32>
    %66 = vector.shape_cast %65 : vector<35xf32> to vector<1x1x35xf32>
    %67 = vector.broadcast %66 : vector<1x1x35xf32> to vector<16x16x35xf32>
    %68 = arith.mulf %63, %67 : vector<16x16x35xf32>
    %69 = arith.addf %61, %68 : vector<16x16x35xf32>
    %70 = vector.extract_strided_slice %62 {offsets = [1, 0, 0], sizes = [16, 16, 35], strides = [1, 1, 1]} : vector<20x16x35xf32> to vector<16x16x35xf32>
    %71 = vector.extract_strided_slice %24 {offsets = [6, 0], sizes = [1, 35], strides = [1, 1]} : vector<25x35xf32> to vector<1x35xf32>
    %72 = vector.shape_cast %71 : vector<1x35xf32> to vector<35xf32>
    %73 = vector.shape_cast %72 : vector<35xf32> to vector<1x1x35xf32>
    %74 = vector.broadcast %73 : vector<1x1x35xf32> to vector<16x16x35xf32>
    %75 = arith.mulf %70, %74 : vector<16x16x35xf32>
    %76 = arith.addf %69, %75 : vector<16x16x35xf32>
    %77 = vector.extract_strided_slice %62 {offsets = [2, 0, 0], sizes = [16, 16, 35], strides = [1, 1, 1]} : vector<20x16x35xf32> to vector<16x16x35xf32>
    %78 = vector.extract_strided_slice %24 {offsets = [11, 0], sizes = [1, 35], strides = [1, 1]} : vector<25x35xf32> to vector<1x35xf32>
    %79 = vector.shape_cast %78 : vector<1x35xf32> to vector<35xf32>
    %80 = vector.shape_cast %79 : vector<35xf32> to vector<1x1x35xf32>
    %81 = vector.broadcast %80 : vector<1x1x35xf32> to vector<16x16x35xf32>
    %82 = arith.mulf %77, %81 : vector<16x16x35xf32>
    %83 = arith.addf %76, %82 : vector<16x16x35xf32>
    %84 = vector.extract_strided_slice %62 {offsets = [3, 0, 0], sizes = [16, 16, 35], strides = [1, 1, 1]} : vector<20x16x35xf32> to vector<16x16x35xf32>
    %85 = vector.extract_strided_slice %24 {offsets = [16, 0], sizes = [1, 35], strides = [1, 1]} : vector<25x35xf32> to vector<1x35xf32>
    %86 = vector.shape_cast %85 : vector<1x35xf32> to vector<35xf32>
    %87 = vector.shape_cast %86 : vector<35xf32> to vector<1x1x35xf32>
    %88 = vector.broadcast %87 : vector<1x1x35xf32> to vector<16x16x35xf32>
    %89 = arith.mulf %84, %88 : vector<16x16x35xf32>
    %90 = arith.addf %83, %89 : vector<16x16x35xf32>
    %91 = vector.extract_strided_slice %62 {offsets = [4, 0, 0], sizes = [16, 16, 35], strides = [1, 1, 1]} : vector<20x16x35xf32> to vector<16x16x35xf32>
    %92 = vector.extract_strided_slice %24 {offsets = [21, 0], sizes = [1, 35], strides = [1, 1]} : vector<25x35xf32> to vector<1x35xf32>
    %93 = vector.shape_cast %92 : vector<1x35xf32> to vector<35xf32>
    %94 = vector.shape_cast %93 : vector<35xf32> to vector<1x1x35xf32>
    %95 = vector.broadcast %94 : vector<1x1x35xf32> to vector<16x16x35xf32>
    %96 = arith.mulf %91, %95 : vector<16x16x35xf32>
    %97 = arith.addf %90, %96 : vector<16x16x35xf32>
    %98 = vector.extract_strided_slice %23 {offsets = [0, 2, 0], sizes = [20, 16, 35], strides = [1, 1, 1]} : vector<20x20x35xf32> to vector<20x16x35xf32>
    %99 = vector.extract_strided_slice %98 {offsets = [0, 0, 0], sizes = [16, 16, 35], strides = [1, 1, 1]} : vector<20x16x35xf32> to vector<16x16x35xf32>
    %100 = vector.extract_strided_slice %24 {offsets = [2, 0], sizes = [1, 35], strides = [1, 1]} : vector<25x35xf32> to vector<1x35xf32>
    %101 = vector.shape_cast %100 : vector<1x35xf32> to vector<35xf32>
    %102 = vector.shape_cast %101 : vector<35xf32> to vector<1x1x35xf32>
    %103 = vector.broadcast %102 : vector<1x1x35xf32> to vector<16x16x35xf32>
    %104 = arith.mulf %99, %103 : vector<16x16x35xf32>
    %105 = arith.addf %97, %104 : vector<16x16x35xf32>
    %106 = vector.extract_strided_slice %98 {offsets = [1, 0, 0], sizes = [16, 16, 35], strides = [1, 1, 1]} : vector<20x16x35xf32> to vector<16x16x35xf32>
    %107 = vector.extract_strided_slice %24 {offsets = [7, 0], sizes = [1, 35], strides = [1, 1]} : vector<25x35xf32> to vector<1x35xf32>
    %108 = vector.shape_cast %107 : vector<1x35xf32> to vector<35xf32>
    %109 = vector.shape_cast %108 : vector<35xf32> to vector<1x1x35xf32>
    %110 = vector.broadcast %109 : vector<1x1x35xf32> to vector<16x16x35xf32>
    %111 = arith.mulf %106, %110 : vector<16x16x35xf32>
    %112 = arith.addf %105, %111 : vector<16x16x35xf32>
    %113 = vector.extract_strided_slice %98 {offsets = [2, 0, 0], sizes = [16, 16, 35], strides = [1, 1, 1]} : vector<20x16x35xf32> to vector<16x16x35xf32>
    %114 = vector.extract_strided_slice %24 {offsets = [12, 0], sizes = [1, 35], strides = [1, 1]} : vector<25x35xf32> to vector<1x35xf32>
    %115 = vector.shape_cast %114 : vector<1x35xf32> to vector<35xf32>
    %116 = vector.shape_cast %115 : vector<35xf32> to vector<1x1x35xf32>
    %117 = vector.broadcast %116 : vector<1x1x35xf32> to vector<16x16x35xf32>
    %118 = arith.mulf %113, %117 : vector<16x16x35xf32>
    %119 = arith.addf %112, %118 : vector<16x16x35xf32>
    %120 = vector.extract_strided_slice %98 {offsets = [3, 0, 0], sizes = [16, 16, 35], strides = [1, 1, 1]} : vector<20x16x35xf32> to vector<16x16x35xf32>
    %121 = vector.extract_strided_slice %24 {offsets = [17, 0], sizes = [1, 35], strides = [1, 1]} : vector<25x35xf32> to vector<1x35xf32>
    %122 = vector.shape_cast %121 : vector<1x35xf32> to vector<35xf32>
    %123 = vector.shape_cast %122 : vector<35xf32> to vector<1x1x35xf32>
    %124 = vector.broadcast %123 : vector<1x1x35xf32> to vector<16x16x35xf32>
    %125 = arith.mulf %120, %124 : vector<16x16x35xf32>
    %126 = arith.addf %119, %125 : vector<16x16x35xf32>
    %127 = vector.extract_strided_slice %98 {offsets = [4, 0, 0], sizes = [16, 16, 35], strides = [1, 1, 1]} : vector<20x16x35xf32> to vector<16x16x35xf32>
    %128 = vector.extract_strided_slice %24 {offsets = [22, 0], sizes = [1, 35], strides = [1, 1]} : vector<25x35xf32> to vector<1x35xf32>
    %129 = vector.shape_cast %128 : vector<1x35xf32> to vector<35xf32>
    %130 = vector.shape_cast %129 : vector<35xf32> to vector<1x1x35xf32>
    %131 = vector.broadcast %130 : vector<1x1x35xf32> to vector<16x16x35xf32>
    %132 = arith.mulf %127, %131 : vector<16x16x35xf32>
    %133 = arith.addf %126, %132 : vector<16x16x35xf32>
    %134 = vector.extract_strided_slice %23 {offsets = [0, 3, 0], sizes = [20, 16, 35], strides = [1, 1, 1]} : vector<20x20x35xf32> to vector<20x16x35xf32>
    %135 = vector.extract_strided_slice %134 {offsets = [0, 0, 0], sizes = [16, 16, 35], strides = [1, 1, 1]} : vector<20x16x35xf32> to vector<16x16x35xf32>
    %136 = vector.extract_strided_slice %24 {offsets = [3, 0], sizes = [1, 35], strides = [1, 1]} : vector<25x35xf32> to vector<1x35xf32>
    %137 = vector.shape_cast %136 : vector<1x35xf32> to vector<35xf32>
    %138 = vector.shape_cast %137 : vector<35xf32> to vector<1x1x35xf32>
    %139 = vector.broadcast %138 : vector<1x1x35xf32> to vector<16x16x35xf32>
    %140 = arith.mulf %135, %139 : vector<16x16x35xf32>
    %141 = arith.addf %133, %140 : vector<16x16x35xf32>
    %142 = vector.extract_strided_slice %134 {offsets = [1, 0, 0], sizes = [16, 16, 35], strides = [1, 1, 1]} : vector<20x16x35xf32> to vector<16x16x35xf32>
    %143 = vector.extract_strided_slice %24 {offsets = [8, 0], sizes = [1, 35], strides = [1, 1]} : vector<25x35xf32> to vector<1x35xf32>
    %144 = vector.shape_cast %143 : vector<1x35xf32> to vector<35xf32>
    %145 = vector.shape_cast %144 : vector<35xf32> to vector<1x1x35xf32>
    %146 = vector.broadcast %145 : vector<1x1x35xf32> to vector<16x16x35xf32>
    %147 = arith.mulf %142, %146 : vector<16x16x35xf32>
    %148 = arith.addf %141, %147 : vector<16x16x35xf32>
    %149 = vector.extract_strided_slice %134 {offsets = [2, 0, 0], sizes = [16, 16, 35], strides = [1, 1, 1]} : vector<20x16x35xf32> to vector<16x16x35xf32>
    %150 = vector.extract_strided_slice %24 {offsets = [13, 0], sizes = [1, 35], strides = [1, 1]} : vector<25x35xf32> to vector<1x35xf32>
    %151 = vector.shape_cast %150 : vector<1x35xf32> to vector<35xf32>
    %152 = vector.shape_cast %151 : vector<35xf32> to vector<1x1x35xf32>
    %153 = vector.broadcast %152 : vector<1x1x35xf32> to vector<16x16x35xf32>
    %154 = arith.mulf %149, %153 : vector<16x16x35xf32>
    %155 = arith.addf %148, %154 : vector<16x16x35xf32>
    %156 = vector.extract_strided_slice %134 {offsets = [3, 0, 0], sizes = [16, 16, 35], strides = [1, 1, 1]} : vector<20x16x35xf32> to vector<16x16x35xf32>
    %157 = vector.extract_strided_slice %24 {offsets = [18, 0], sizes = [1, 35], strides = [1, 1]} : vector<25x35xf32> to vector<1x35xf32>
    %158 = vector.shape_cast %157 : vector<1x35xf32> to vector<35xf32>
    %159 = vector.shape_cast %158 : vector<35xf32> to vector<1x1x35xf32>
    %160 = vector.broadcast %159 : vector<1x1x35xf32> to vector<16x16x35xf32>
    %161 = arith.mulf %156, %160 : vector<16x16x35xf32>
    %162 = arith.addf %155, %161 : vector<16x16x35xf32>
    %163 = vector.extract_strided_slice %134 {offsets = [4, 0, 0], sizes = [16, 16, 35], strides = [1, 1, 1]} : vector<20x16x35xf32> to vector<16x16x35xf32>
    %164 = vector.extract_strided_slice %24 {offsets = [23, 0], sizes = [1, 35], strides = [1, 1]} : vector<25x35xf32> to vector<1x35xf32>
    %165 = vector.shape_cast %164 : vector<1x35xf32> to vector<35xf32>
    %166 = vector.shape_cast %165 : vector<35xf32> to vector<1x1x35xf32>
    %167 = vector.broadcast %166 : vector<1x1x35xf32> to vector<16x16x35xf32>
    %168 = arith.mulf %163, %167 : vector<16x16x35xf32>
    %169 = arith.addf %162, %168 : vector<16x16x35xf32>
    %170 = vector.extract_strided_slice %23 {offsets = [0, 4, 0], sizes = [20, 16, 35], strides = [1, 1, 1]} : vector<20x20x35xf32> to vector<20x16x35xf32>
    %171 = vector.extract_strided_slice %170 {offsets = [0, 0, 0], sizes = [16, 16, 35], strides = [1, 1, 1]} : vector<20x16x35xf32> to vector<16x16x35xf32>
    %172 = vector.extract_strided_slice %24 {offsets = [4, 0], sizes = [1, 35], strides = [1, 1]} : vector<25x35xf32> to vector<1x35xf32>
    %173 = vector.shape_cast %172 : vector<1x35xf32> to vector<35xf32>
    %174 = vector.shape_cast %173 : vector<35xf32> to vector<1x1x35xf32>
    %175 = vector.broadcast %174 : vector<1x1x35xf32> to vector<16x16x35xf32>
    %176 = arith.mulf %171, %175 : vector<16x16x35xf32>
    %177 = arith.addf %169, %176 : vector<16x16x35xf32>
    %178 = vector.extract_strided_slice %170 {offsets = [1, 0, 0], sizes = [16, 16, 35], strides = [1, 1, 1]} : vector<20x16x35xf32> to vector<16x16x35xf32>
    %179 = vector.extract_strided_slice %24 {offsets = [9, 0], sizes = [1, 35], strides = [1, 1]} : vector<25x35xf32> to vector<1x35xf32>
    %180 = vector.shape_cast %179 : vector<1x35xf32> to vector<35xf32>
    %181 = vector.shape_cast %180 : vector<35xf32> to vector<1x1x35xf32>
    %182 = vector.broadcast %181 : vector<1x1x35xf32> to vector<16x16x35xf32>
    %183 = arith.mulf %178, %182 : vector<16x16x35xf32>
    %184 = arith.addf %177, %183 : vector<16x16x35xf32>
    %185 = vector.extract_strided_slice %170 {offsets = [2, 0, 0], sizes = [16, 16, 35], strides = [1, 1, 1]} : vector<20x16x35xf32> to vector<16x16x35xf32>
    %186 = vector.extract_strided_slice %24 {offsets = [14, 0], sizes = [1, 35], strides = [1, 1]} : vector<25x35xf32> to vector<1x35xf32>
    %187 = vector.shape_cast %186 : vector<1x35xf32> to vector<35xf32>
    %188 = vector.shape_cast %187 : vector<35xf32> to vector<1x1x35xf32>
    %189 = vector.broadcast %188 : vector<1x1x35xf32> to vector<16x16x35xf32>
    %190 = arith.mulf %185, %189 : vector<16x16x35xf32>
    %191 = arith.addf %184, %190 : vector<16x16x35xf32>
    %192 = vector.extract_strided_slice %170 {offsets = [3, 0, 0], sizes = [16, 16, 35], strides = [1, 1, 1]} : vector<20x16x35xf32> to vector<16x16x35xf32>
    %193 = vector.extract_strided_slice %24 {offsets = [19, 0], sizes = [1, 35], strides = [1, 1]} : vector<25x35xf32> to vector<1x35xf32>
    %194 = vector.shape_cast %193 : vector<1x35xf32> to vector<35xf32>
    %195 = vector.shape_cast %194 : vector<35xf32> to vector<1x1x35xf32>
    %196 = vector.broadcast %195 : vector<1x1x35xf32> to vector<16x16x35xf32>
    %197 = arith.mulf %192, %196 : vector<16x16x35xf32>
    %198 = arith.addf %191, %197 : vector<16x16x35xf32>
    %199 = vector.extract_strided_slice %170 {offsets = [4, 0, 0], sizes = [16, 16, 35], strides = [1, 1, 1]} : vector<20x16x35xf32> to vector<16x16x35xf32>
    %200 = vector.extract_strided_slice %24 {offsets = [24, 0], sizes = [1, 35], strides = [1, 1]} : vector<25x35xf32> to vector<1x35xf32>
    %201 = vector.shape_cast %200 : vector<1x35xf32> to vector<35xf32>
    %202 = vector.shape_cast %201 : vector<35xf32> to vector<1x1x35xf32>
    %203 = vector.broadcast %202 : vector<1x1x35xf32> to vector<16x16x35xf32>
    %204 = arith.mulf %199, %203 : vector<16x16x35xf32>
    %205 = arith.addf %198, %204 : vector<16x16x35xf32>
    %206 = vector.extract_strided_slice %205 {offsets = [0, 0, 0], sizes = [16, 16, 1], strides = [1, 1, 1]} : vector<16x16x35xf32> to vector<16x16x1xf32>
    %207 = vector.extract_strided_slice %205 {offsets = [0, 0, 1], sizes = [16, 16, 9], strides = [1, 1, 1]} : vector<16x16x35xf32> to vector<16x16x9xf32>
    %cst_10 = arith.constant dense<0.000000e+00> : vector<16x16xf32>
    %208 = vector.multi_reduction <add>, %207, %cst_10 [2] : vector<16x16x9xf32> to vector<16x16xf32>
    %209 = vector.shape_cast %208 : vector<16x16xf32> to vector<16x16x1xf32>
    %210 = vector.extract_strided_slice %205 {offsets = [0, 0, 10], sizes = [16, 16, 25], strides = [1, 1, 1]} : vector<16x16x35xf32> to vector<16x16x25xf32>
    %cst_11 = arith.constant dense<0.000000e+00> : vector<16x16xf32>
    %211 = vector.multi_reduction <add>, %210, %cst_11 [2] : vector<16x16x25xf32> to vector<16x16xf32>
    %212 = vector.shape_cast %211 : vector<16x16xf32> to vector<16x16x1xf32>
    %213 = tpu.concatenate %206, %209, %212 in 2 : vector<16x16x1xf32>, vector<16x16x1xf32>, vector<16x16x1xf32> -> vector<16x16x3xf32>
    %214 = arith.negf %213 : vector<16x16x3xf32>
    %215 = math.exp %214 : vector<16x16x3xf32>
    %cst_12 = arith.constant 1.000000e+00 : f32
    %216 = vector.broadcast %cst_12 : f32 to vector<16x16x3xf32>
    %217 = arith.addf %216, %215 : vector<16x16x3xf32>
    %218 = arith.divf %216, %217 : vector<16x16x3xf32>
    %cst_13 = arith.constant dense<0.000000e+00> : vector<16x16xf32>
    %219 = vector.multi_reduction <add>, %218, %cst_13 [2] : vector<16x16x3xf32> to vector<16x16xf32>
    %220 = vector.shape_cast %219 : vector<16x16xf32> to vector<16x16x1xf32>
    %cst_14 = arith.constant 0.333333343 : f32
    %221 = vector.broadcast %cst_14 : f32 to vector<16x16x1xf32>
    %222 = arith.mulf %220, %221 : vector<16x16x1xf32>
    %cst_15 = arith.constant 0.000000e+00 : f32
    %cst_16 = arith.constant 1.000000e+00 : f32
    %223 = vector.broadcast %cst_15 : f32 to vector<16x16x1xf32>
    %224 = arith.maximumf %223, %222 : vector<16x16x1xf32>
    %225 = vector.broadcast %cst_16 : f32 to vector<16x16x1xf32>
    %226 = arith.minimumf %225, %224 : vector<16x16x1xf32>
    %cst_17 = arith.constant 1.000000e+00 : f32
    %227 = vector.broadcast %cst_17 : f32 to vector<16x16x1xf32>
    %228 = arith.subf %227, %222 : vector<16x16x1xf32>
    %cst_18 = arith.constant 0.000000e+00 : f32
    %cst_19 = arith.constant 1.000000e+00 : f32
    %229 = vector.broadcast %cst_18 : f32 to vector<16x16x1xf32>
    %230 = arith.maximumf %229, %228 : vector<16x16x1xf32>
    %231 = vector.broadcast %cst_19 : f32 to vector<16x16x1xf32>
    %232 = arith.minimumf %231, %230 : vector<16x16x1xf32>
    %233 = vector.broadcast %226 : vector<16x16x1xf32> to vector<16x16x4xf32>
    %234 = arith.mulf %233, %11 : vector<16x16x4xf32>
    %235 = vector.broadcast %232 : vector<16x16x1xf32> to vector<16x16x4xf32>
    %236 = arith.mulf %235, %13 : vector<16x16x4xf32>
    %237 = arith.addf %234, %236 : vector<16x16x4xf32>
    %c0_20 = arith.constant 0 : index
    %c0_21 = arith.constant 0 : index
    %c0_22 = arith.constant 0 : index
    %c0_23 = arith.constant 0 : index
    %238 = vector.load %arg5[%c0_20, %c0_21, %c0_22, %c0_23] : memref<1x16x16x4xf32, #tpu.memory_space<vmem>>, vector<1x16x16x4xf32>
    %239 = vector.shape_cast %238 : vector<1x16x16x4xf32> to vector<16x16x4xf32>
    %240 = vector.shape_cast %237 : vector<16x16x4xf32> to vector<1x16x16x4xf32>
    tpu.vector_store %arg5[%c0_20, %c0_21, %c0_22, %c0_23], %240 {strides = array<i32>} : memref<1x16x16x4xf32, #tpu.memory_space<vmem>>, vector<1x16x16x4xf32>,
    return
  }
  func.func @transform_0(%arg0: i32) -> (i32, i32, i32, i32) {
    %c0_i32 = arith.constant 0 : i32
    %c0_i32_0 = arith.constant 0 : i32
    %c0_i32_1 = arith.constant 0 : i32
    %c0_i32_2 = arith.constant 0 : i32
    return %arg0, %c0_i32, %c0_i32_0, %c0_i32_1 : i32, i32, i32, i32
  }
  func.func @transform_1(%arg0: i32) -> (i32, i32) {
    %c0_i32 = arith.constant 0 : i32
    %c0_i32_0 = arith.constant 0 : i32
    %c0_i32_1 = arith.constant 0 : i32
    return %c0_i32, %c0_i32_0 : i32, i32
  }
  func.func @transform_2(%arg0: i32) -> (i32, i32) {
    %c0_i32 = arith.constant 0 : i32
    %c0_i32_0 = arith.constant 0 : i32
    %c0_i32_1 = arith.constant 0 : i32
    return %c0_i32, %c0_i32_0 : i32, i32
  }
  func.func @transform_3(%arg0: i32) -> (i32, i32) {
    %c0_i32 = arith.constant 0 : i32
    %c0_i32_0 = arith.constant 0 : i32
    %c0_i32_1 = arith.constant 0 : i32
    return %c0_i32, %c0_i32_0 : i32, i32
  }
  func.func @transform_4(%arg0: i32) -> (i32, i32, i32, i32) {
    %c0_i32 = arith.constant 0 : i32
    %c0_i32_0 = arith.constant 0 : i32
    %c0_i32_1 = arith.constant 0 : i32
    %c0_i32_2 = arith.constant 0 : i32
    return %arg0, %c0_i32, %c0_i32_0, %c0_i32_1 : i32, i32, i32, i32
  }
}

</mosaic_0001>

<bundles_post_ra>
// kernel: fuse_unit_pallas.1
= control target key start
LH: loop header
LB: loop body
LE: loop exit
PB: predicated region body
PF: predicated region fallthrough
CT: control target
= control target key end

     0   :  { %s7460_s15 = smov 0   ;;  %s14031_s0 = inlined_call_operand.vmem [shape: bf16[2,16,16,8], index: 0, kind: input, shape index: {}]   ;;  %s14032_s1 = inlined_call_operand.vmem [shape: bf16[8,43], index: 1, kind: input, shape index: {}]   ;;  %s14033_s2 = inlined_call_operand.vmem [shape: f32[1,43], index: 2, kind: input, shape index: {}]   ;;  %s14034_s3 = inlined_call_operand.vmem [shape: f32[25,35], index: 3, kind: input, shape index: {}]   ;;  %s14035_s4 = inlined_call_operand.vmem [shape: f32[2,16,16,4], index: 4, kind: output, shape index: {}]  }
   0x1 LB: > { %s7128_s16 = sadd.s32 4294967295, %s7429_s15   ;;  %p7132_p0 = scmp.ge.s32.totalorder %s7429_s15, 1  ;;  %s7429_s15 = sphi %s7460_s15, %s14_s15  }
   0x2   : > { %p162_p1 = scmp.lt.s32.totalorder %s7429_s15, 3 }
   0x4   : > { %p163_p2 = pnand %p7132_p0, %p162_p1 }
   0x6   : > { %166 = sbr.rel (%p163_p2) target bundleno = 1916 (0x77c), region = 36 }
   0xd   : > { %v231_v0 = vld [vmem:[%s14032_s1] sm:$0xf]  ;;  %vm368_vm0 = vcmask 1043456   ;;  %p188_p3 = scmp.lt.s32.totalorder %s7128_s16, 1  ;;  %vm319_vm1 = vcmask 64512   ;;  %v828_v18 = vlaneseq  ;;  %v825_v25 = vld [vmem:[%s14034_s3 + $0x8] sm:$0xff] }
   0xe   : > { %7260 = vmatprep.subr.msk.bf16.mxu0 %vm368_vm0, %v231_v0  ;;  %7261 = vmatprep.subr.msk.bf16.mxu1 %vm368_vm0, %v231_v0  ;;  %v370_v1 = vsel %vm368_vm0, %v231_v0, 0  ;;  %v824_v24 = vld [vmem:[%s14034_s3] sm:$0xff]  ;;  %v826_v29 = vld [vmem:[%s14034_s3 + $0x10] sm:$0xff]  ;;  %vm597_vm2 = vcmask 1041408   ;;  %vm758_vm3 = vcmask 1040384   ;;  %vm807_vm4 = vcmask 1042432  }
   0xf   : > { %7225 = vmatpush3.bf16.msra.mxu0 %v370_v1  ;;  %7259 = vmatpush3.bf16.msra.mxu1 %v370_v1  ;;  %s16422_s16 = smov (!%p188_p3, %s7128_s16), 1  ;;  %v829_v19 = vshrl.u32 %v828_v18, 7  ;;  %v7537_v35 = vld [vmem:[%s14033_s2] ss:$0 sm:$0xff]  ;;  %vm1240_vm5 = vcmask 1046528   ;;  %vm2383_vm6 = vcmask 1045504  }
  0x10   : > { %s7205_s19 = sshll.u32 %s16422_s16, 7  ;;  %vm3526_vm7 = vcmask 1044480   ;;  %s7431_s7 = smov 127   ;;  %vm5851_vm8 = vcmask 72704   ;;  %vm6044_vm9 = vcmask 203776   ;;  %vm6141_vm10 = vcmask 7168  }
  0x11   : > { %s7480_s22 = scalar_lea.vmem %s14031_s0, %s7205_s19  ;;  %v830_v20 = vsub.s32 0, %v829_v19  ;;  %v890_v21 = vsub.s32 5, %v829_v19  ;;  %v956_v22 = vsub.s32 2, %v829_v19  ;;  %v7514_v23 = vsub.s32 7, %v829_v19  ;;  %s7432_s8 = smov 118  }
  0x12   : > { %v7274_v2 = vld [vmem:[%s7480_s22] sm:$0xff]   ;;  %v7276_v4 = vld [vmem:[%s7480_s22 + $0x8] sm:$0xff]   ;;  %v7278_v6 = vld [vmem:[%s7480_s22 + $0x10] sm:$0xff]   ;;  %v1154_v26 = vsub.s32 1, %v829_v19  ;;  %v1373_v27 = vsub.s32 6, %v829_v19  ;;  %v1604_v28 = vsub.s32 3, %v829_v19 }
  0x13   : > { %v7275_v3 = vld [vmem:[%s7480_s22 + $0x40] sm:$0xff]   ;;  %7226 = vmatprep.mubr.msk.bf16.mxu0 %vm319_vm1, %v7274_v2  ;;  %v7277_v5 = vld [vmem:[%s7480_s22 + $0x48] sm:$0xff]   ;;  %v7279_v7 = vld [vmem:[%s7480_s22 + $0x50] sm:$0xff]   ;;  %v1090_v30 = vsub.s32 4, %v829_v19  ;;  %v7525_v31 = vrot.slane %v824_v24, %v830_v20  ;;  %v7527_v32 = vrot.slane %v824_v24, %v890_v21  ;;  %v7529_v33 = vrot.slane %v825_v25, %v956_v22  ;;  %s7433_s21 = smov 124   ;;  %s7206_s23 = sshll.u32 %s16422_s16, 8 }
  0x14   : > { %7242 = vmatprep.mubr.msk.bf16.mxu1 %vm319_vm1, %v7275_v3  ;;  %7227 = vmatmul.mubr.msk.bf16.vlgmr.msra.gmra.mrb[0].mxu0 %vm319_vm1, %v7276_v4  ;;  %v7280_v8 = vld [vmem:[%s7480_s22 + $0x18] sm:$0xff]   ;;  %v7282_v10 = vld [vmem:[%s7480_s22 + $0x20] sm:$0xff]   ;;  %v7284_v12 = vld [vmem:[%s7480_s22 + $0x28] sm:$0xff]   ;;  %v7532_v34 = vrot.slane %v825_v25, %v7514_v23  ;;  %v7539_v36 = vrot.slane %v824_v24, %v1154_v26  ;;  %v7541_v37 = vrot.slane %v824_v24, %v1373_v27  ;;  %vm6174_vm11 = vcmask 15360   ;;  %s13960_s26 = scalar_lea.vmem %s14035_s4, %s7206_s23 }
  0x15   : > { %7243 = vmatmul.mubr.msk.bf16.vlgmr.msra.gmra.mrb[0].mxu1 %vm319_vm1, %v7277_v5  ;;  %7230 = vmatprep.mubr.msk.bf16.mxu0 %vm319_vm1, %v7278_v6  ;;  %v7281_v9 = vld [vmem:[%s7480_s22 + $0x58] sm:$0xff]   ;;  %v7283_v11 = vld [vmem:[%s7480_s22 + $0x60] sm:$0xff]   ;;  %v7285_v13 = vld [vmem:[%s7480_s22 + $0x68] sm:$0xff]   ;;  %14860 = vst [vmem:[#allocation2_spill] sm:$0xff] %v7525_v31  ;;  %v7543_v38 = vrot.slane %v825_v25, %v1604_v28  ;;  %v7545_v39 = vrot.slane %v826_v29, %v830_v20  ;;  %vm6399_vm12 = vcmask 23552   ;;  %vm7040_vm13 = vcmask 31744  }
  0x16   : > { %7246 = vmatprep.mubr.msk.bf16.mxu1 %vm319_vm1, %v7279_v7  ;;  %v7286_v14 = vld [vmem:[%s7480_s22 + $0x30] sm:$0xff]   ;;  %v7288_v16 = vld [vmem:[%s7480_s22 + $0x38] sm:$0xff]   ;;  %14861 = vst [vmem:[#allocation3_spill] sm:$0xff] %v7527_v32  ;;  %14862 = vst [vmem:[#allocation4_spill] sm:$0xff] %v7529_v33  ;;  %v7547_v40 = vrot.slane %v826_v29, %v1090_v30  ;;  %v7549_v41 = vrot.slane %v824_v24, %v956_v22  ;;  %v7552_v42 = vrot.slane %v824_v24, %v7514_v23 }
  0x17   : > { %v7287_v15 = vld [vmem:[%s7480_s22 + $0x70] sm:$0xff]   ;;  %v7289_v17 = vld [vmem:[%s7480_s22 + $0x78] sm:$0xff]   ;;  %14863 = vst [vmem:[#allocation5_spill] sm:$0xff] %v7532_v34  ;;  %14864 = vst [vmem:[#allocation6_spill] sm:$0xff] %v7539_v36  ;;  %v7554_v43 = vrot.slane %v825_v25, %v1090_v30  ;;  %v7556_v45 = vrot.slane %v826_v29, %v890_v21  ;;  %v7558_v46 = vrot.slane %v826_v29, %v1154_v26  ;;  %s7434_s22 = smov 93  }
  0x18   : > { %14865 = vst [vmem:[#allocation7_spill] sm:$0xff] %v7541_v37  ;;  %14866 = vst [vmem:[#allocation8_spill] sm:$0xff] %v7543_v38  ;;  %v7560_v47 = vrot.slane %v824_v24, %v1604_v28  ;;  %v7562_v48 = vrot.slane %v825_v25, %v830_v20  ;;  %v7567_v52 = vrot.slane %v825_v25, %v890_v21 }
  0x19   : > { %14867 = vst [vmem:[#allocation9_spill] sm:$0xff] %v7545_v39  ;;  %14868 = vst [vmem:[#allocation10_spill] sm:$0xff] %v7547_v40  ;;  %v7569_v53 = vrot.slane %v826_v29, %v956_v22  ;;  %v7571_v54 = vrot.slane %v824_v24, %v1090_v30  ;;  %v7579_v59 = vrot.slane %v826_v29, %v1373_v27 }
  0x1a   : > { %14869 = vst [vmem:[#allocation11_spill] sm:$0xff] %v7549_v41  ;;  %14870 = vst [vmem:[#allocation12_spill] sm:$0xff] %v7552_v42  ;;  %v7581_v60 = vrot.slane %v825_v25, %v1154_v26  ;;  %v7596_v7 = vrot.slane %v825_v25, %v1373_v27  ;;  %v7617_v19 = vrot.slane %v826_v29, %v7514_v23 }
  0x1b   : > { %14871 = vst [vmem:[#allocation13_spill] sm:$0xff] %v7554_v43  ;;  %14872 = vst [vmem:[#allocation14_spill] sm:$0xff] %v7556_v45 }
  0x1c   : > { %7231 = vmatmul.mubr.msk.bf16.gmra.mrb[4].mxu0 %vm319_vm1, %v7280_v8  ;;  %14873 = vst [vmem:[#allocation15_spill] sm:$0xff] %v7560_v47  ;;  %14874 = vst [vmem:[#allocation16_spill] sm:$0xff] %v7562_v48 }
  0x1d   : > { %7247 = vmatmul.mubr.msk.bf16.gmra.mrb[4].mxu1 %vm319_vm1, %v7281_v9  ;;  %7234 = vmatprep.mubr.msk.bf16.mxu0 %vm319_vm1, %v7282_v10  ;;  %14876 = vst [vmem:[#allocation18_spill] sm:$0xff] %v7567_v52  ;;  %14877 = vst [vmem:[#allocation19_spill] sm:$0xff] %v7569_v53 }
  0x1e   : > { %7250 = vmatprep.mubr.msk.bf16.mxu1 %vm319_vm1, %v7283_v11  ;;  %14878 = vst [vmem:[#allocation20_spill] sm:$0xff] %v7571_v54  ;;  %14881 = vst [vmem:[#allocation23_spill] sm:$0xff] %v7579_v59 }
  0x1f   : > { %14882 = vst [vmem:[#allocation24_spill] sm:$0xff] %v7581_v60  ;;  %14886 = vst [vmem:[#allocation28_spill] sm:$0xff] %v7596_v7 }
  0x20   : > { %14890 = vst [vmem:[#allocation32_spill] sm:$0xff] %v7617_v19 }
  0x24   : > { %7235 = vmatmul.mubr.msk.bf16.gmra.mrb[8].mxu0 %vm319_vm1, %v7284_v12 }
  0x25   : > { %7251 = vmatmul.mubr.msk.bf16.gmra.mrb[8].mxu1 %vm319_vm1, %v7285_v13  ;;  %7238 = vmatprep.mubr.msk.bf16.mxu0 %vm319_vm1, %v7286_v14 }
  0x26   : > { %7254 = vmatprep.mubr.msk.bf16.mxu1 %vm319_vm1, %v7287_v15  ;;  %v7607_v15 = vrot.slane %v826_v29, %v1604_v28 }
  0x28   : > { %14887 = vst [vmem:[#allocation29_spill] sm:$0xff] %v7607_v15 }
  0x2c   : > { %7239 = vmatmul.mubr.msk.bf16.gmra.mrb[12].mxu0 %vm319_vm1, %v7288_v16 }
  0x2d   : > { %7255 = vmatmul.mubr.msk.bf16.gmra.mrb[12].mxu1 %vm319_vm1, %v7289_v17 }
  0xe7   : > { %v7228_v44 = vpop.f32.mrb[0].mxu0 }
  0xe8   : > { %v7565_v49 = vadd.f32 %v7228_v44, %v7537_v35  ;;  %v406_v50 = vpop.f32.mrb[1].mxu0  ;;  %v7244_v51 = vpop.f32.mrb[0].mxu1 }
  0xe9   : > { %v7574_v55 = vadd.f32 %v7537_v35, %v406_v50  ;;  %v7229_v56 = vpop.f32.mrb[2].mxu0  ;;  %v7577_v57 = vadd.f32 %v7244_v51, %v7537_v35  ;;  %v470_v58 = vpop.f32.mrb[1].mxu1 }
  0xea   : > { %14875 = vst [vmem:[#allocation17_spill] sm:$0xff] %v7565_v49  ;;  %v550_v61 = vrot.slane %v7565_v49, 2  ;;  %v601_v62 = vrot.slane %v7565_v49, 6  ;;  %v7586_v63 = vadd.f32 %v7229_v56, %v7537_v35  ;;  %v409_v0 = vpop.f32.mrb[3].mxu0  ;;  %v7589_v1 = vadd.f32 %v7537_v35, %v470_v58  ;;  %v7245_v2 = vpop.f32.mrb[2].mxu1 }
  0xeb   : > { %14879 = vst [vmem:[#allocation21_spill] sm:$0xff] %v7574_v55  ;;  %14880 = vst [vmem:[#allocation22_spill] sm:$0xff] %v7577_v57  ;;  %v551_v3 = vrot.slane %v7574_v55, 2  ;;  %v604_v4 = vrot.slane %v7574_v55, 6  ;;  %v7594_v5 = vadd.f32 %v7537_v35, %v409_v0  ;;  %v473_v6 = vpop.f32.mrb[3].mxu1  ;;  %v558_v11 = vrot.slane %v7577_v57, 2 }
  0xec   : > { %14883 = vst [vmem:[#allocation25_spill] sm:$0xff] %v7586_v63  ;;  %14884 = vst [vmem:[#allocation26_spill] sm:$0xff] %v7589_v1  ;;  %v760_v8 = vsel %vm758_vm3, %v550_v61, %v7565_v49  ;;  %v602_v9 = vrot.slane %v7586_v63, 6  ;;  %v695_v10 = vrot.slane %v7586_v63, 4  ;;  %v727_v18 = vrot.slane %v7586_v63, 2 }
  0xed   : > { %14885 = vst [vmem:[#allocation27_spill] sm:$0xff] %v7594_v5  ;;  %v761_v12 = vsel %vm758_vm3, %v551_v3, %v7574_v55  ;;  %v605_v13 = vrot.slane %v7594_v5, 6  ;;  %v696_v14 = vrot.slane %v7594_v5, 4  ;;  %v7610_v16 = vsel %vm597_vm2, %v760_v8, %v601_v62 }
  0xee   : > { %14888 = vst [vmem:[#allocation30_spill] sm:$0xff] %v7610_v16  ;;  %v7613_v17 = vsel %vm597_vm2, %v761_v12, %v604_v4  ;;  %v7620_v20 = vsel %vm597_vm2, %v601_v62, %v602_v9  ;;  %v792_v21 = vsel %vm597_vm2, %v602_v9, %v695_v10  ;;  %v728_v22 = vrot.slane %v7594_v5, 2 }
  0xef   : > { %14889 = vst [vmem:[#allocation31_spill] sm:$0xff] %v7613_v17  ;;  %14891 = vst [vmem:[#allocation33_spill] sm:$0xff] %v7620_v20  ;;  %v7232_v24 = vpop.f32.mrb[4].mxu0  ;;  %v625_v25 = vrot.slane %v7577_v57, 6  ;;  %v793_v26 = vsel %vm597_vm2, %v605_v13, %v696_v14  ;;  %v768_v28 = vsel %vm758_vm3, %v558_v11, %v7577_v57  ;;  %v557_v29 = vrot.slane %v7589_v1, 2 }
  0xf0   : > { %v7627_v27 = vadd.f32 %v7232_v24, %v7537_v35  ;;  %v422_v23 = vpop.f32.mrb[5].mxu0  ;;  %v7248_v30 = vpop.f32.mrb[4].mxu1  ;;  %v14036_v51 = vrot.slane %v7589_v1, 6  ;;  %v7640_v58 = vadd.f32 %v7245_v2, %v7537_v35  ;;  %v7650_v11 = vsel %vm807_vm4, %v792_v21, %v727_v18 }
  0xf1   : > { %v7633_v44 = vsel %vm597_vm2, %v768_v28, %v625_v25  ;;  %v7636_v50 = vadd.f32 %v7537_v35, %v422_v23  ;;  %v7233_v56 = vpop.f32.mrb[6].mxu0  ;;  %v486_v61 = vpop.f32.mrb[5].mxu1  ;;  %v767_v3 = vsel %vm758_vm3, %v557_v29, %v7589_v1  ;;  %14897 = vst [vmem:[#allocation39_spill] sm:$0xff] %v7650_v11  ;;  %v7660_v28 = vsel %vm597_vm2, %v604_v4, %v605_v13 }
  0xf2   : > { %14892 = vst [vmem:[#allocation34_spill] sm:$0xff] %v7627_v27  ;;  %14893 = vst [vmem:[#allocation35_spill] sm:$0xff] %v7633_v44  ;;  %v552_v62 = vrot.slane %v7627_v27, 2  ;;  %v607_v0 = vrot.slane %v7627_v27, 6  ;;  %v7647_v8 = vadd.f32 %v7233_v56, %v7537_v35  ;;  %v425_v9 = vpop.f32.mrb[7].mxu0  ;;  %v7249_v10 = vpop.f32.mrb[6].mxu1  ;;  %v7656_v2 = vsel %vm597_vm2, %v767_v3, %v14036_v51 }
  0xf3   : > { %14894 = vst [vmem:[#allocation36_spill] sm:$0xff] %v7636_v50  ;;  %14895 = vst [vmem:[#allocation37_spill] sm:$0xff] %v7640_v58  ;;  %v549_v12 = vrot.slane %v7636_v50, 2  ;;  %v626_v14 = vrot.slane %v7640_v58, 6  ;;  %v489_v24 = vpop.f32.mrb[7].mxu1  ;;  %v7667_v21 = vsel %vm807_vm4, %v793_v26, %v728_v22  ;;  %v598_v56 = vrot.slane %v7636_v50, 6 }
  0xf4   : > { %14896 = vst [vmem:[#allocation38_spill] sm:$0xff] %v7647_v8  ;;  %14898 = vst [vmem:[#allocation40_spill] sm:$0xff] %v7656_v2  ;;  %v762_v23 = vsel %vm758_vm3, %v552_v62, %v7627_v27  ;;  %v608_v29 = vrot.slane %v7647_v8, 6  ;;  %v697_v18 = vrot.slane %v7647_v8, 4  ;;  %v729_v3 = vrot.slane %v7647_v8, 2 }
  0xf5   : > { %14899 = vst [vmem:[#allocation41_spill] sm:$0xff] %v7660_v28  ;;  %14900 = vst [vmem:[#allocation42_spill] sm:$0xff] %v7667_v21  ;;  %v703_v51 = vrot.slane %v7640_v58, 4  ;;  %v7673_v57 = vsel %vm597_vm2, %v762_v23, %v607_v0  ;;  %v759_v4 = vsel %vm758_vm3, %v549_v12, %v7636_v50  ;;  %v7678_v13 = vsel %vm597_vm2, %v625_v25, %v626_v14 }
  0xf6   : > { %14901 = vst [vmem:[#allocation43_spill] sm:$0xff] %v7673_v57  ;;  %14902 = vst [vmem:[#allocation44_spill] sm:$0xff] %v7678_v13  ;;  %v735_v62 = vrot.slane %v7640_v58, 2  ;;  %v794_v22 = vsel %vm597_vm2, %v608_v29, %v697_v18  ;;  %v7684_v27 = vadd.f32 %v7537_v35, %v425_v9  ;;  %v7687_v8 = vadd.f32 %v7537_v35, %v473_v6 }
  0xf7   : > { %v800_v26 = vsel %vm597_vm2, %v626_v14, %v703_v51  ;;  %v7236_v23 = vpop.f32.mrb[8].mxu0  ;;  %v7693_v12 = vadd.f32 %v7248_v30, %v7537_v35  ;;  %v7696_v25 = vadd.f32 %v7537_v35, %v486_v61  ;;  %v7699_v18 = vadd.f32 %v7249_v10, %v7537_v35 }
  0xf8   : > { %14903 = vst [vmem:[#allocation45_spill] sm:$0xff] %v7684_v27  ;;  %14904 = vst [vmem:[#allocation46_spill] sm:$0xff] %v7687_v8  ;;  %v7690_v5 = vsel %vm807_vm4, %v800_v26, %v735_v62  ;;  %v7252_v51 = vpop.f32.mrb[8].mxu1  ;;  %v438_v14 = vpop.f32.mrb[9].mxu0  ;;  %v7702_v9 = vsel %vm597_vm2, %v759_v4, %v598_v56  ;;  %v7705_v6 = vsel %vm597_vm2, %v607_v0, %v608_v29  ;;  %v599_v62 = vrot.slane %v7684_v27, 6 }
  0xf9   : > { %14905 = vst [vmem:[#allocation47_spill] sm:$0xff] %v7690_v5  ;;  %14906 = vst [vmem:[#allocation48_spill] sm:$0xff] %v7693_v12  ;;  %v623_v26 = vrot.slane %v7687_v8, 6  ;;  %v502_v30 = vpop.f32.mrb[9].mxu1  ;;  %v7237_v58 = vpop.f32.mrb[10].mxu0  ;;  %v702_v61 = vrot.slane %v7687_v8, 4  ;;  %v7714_v49 = vsel %vm807_vm4, %v794_v22, %v729_v3 }
  0xfa   : > { %14907 = vst [vmem:[#allocation49_spill] sm:$0xff] %v7696_v25  ;;  %14908 = vst [vmem:[#allocation50_spill] sm:$0xff] %v7699_v18  ;;  %v734_v50 = vrot.slane %v7687_v8, 2  ;;  %v560_v10 = vrot.slane %v7693_v12, 2  ;;  %v7253_v63 = vpop.f32.mrb[10].mxu1  ;;  %v441_v4 = vpop.f32.mrb[11].mxu0  ;;  %v7720_v44 = vsel %vm597_vm2, %v598_v56, %v599_v62 }
  0xfb   : > { %14909 = vst [vmem:[#allocation51_spill] sm:$0xff] %v7702_v9  ;;  %14910 = vst [vmem:[#allocation52_spill] sm:$0xff] %v7705_v6  ;;  %v694_v0 = vrot.slane %v7684_v27, 4  ;;  %v726_v29 = vrot.slane %v7684_v27, 2  ;;  %v559_v5 = vrot.slane %v7696_v25, 2  ;;  %v505_v13 = vpop.f32.mrb[11].mxu1  ;;  %v799_v8 = vsel %vm597_vm2, %v623_v26, %v702_v61 }
  0xfc   : > { %14911 = vst [vmem:[#allocation53_spill] sm:$0xff] %v7714_v49  ;;  %14912 = vst [vmem:[#allocation54_spill] sm:$0xff] %v7720_v44  ;;  %v770_v55 = vsel %vm758_vm3, %v560_v10, %v7693_v12  ;;  %v628_v2 = vrot.slane %v7696_v25, 6  ;;  %v7727_v3 = vsel %vm807_vm4, %v799_v8, %v734_v50  ;;  %v14914_v22 = vrot.slane %v7693_v12, 6 }
  0xfd   : > { %14913 = vst [vmem:[#allocation55_spill] sm:$0xff] %v7727_v3  ;;  %v769_v49 = vsel %vm758_vm3, %v559_v5, %v7696_v25  ;;  %v632_v56 = vrot.slane %v7699_v18, 6  ;;  %v705_v10 = vrot.slane %v7699_v18, 4  ;;  %v737_v21 = vrot.slane %v7699_v18, 2 }
  0xfe   : > { %v7732_v27 = vsel %vm597_vm2, %v770_v55, %v14914_v22  ;;  %v7738_v61 = vsel %vm597_vm2, %v769_v49, %v628_v2  ;;  %v7743_v50 = vadd.f32 %v7537_v35, %v489_v24  ;;  %v791_v8 = vsel %vm597_vm2, %v599_v62, %v694_v0 }
  0xff   : > { %14915 = vst [vmem:[#allocation56_spill] sm:$0xff] %v7732_v27  ;;  %14916 = vst [vmem:[#allocation57_spill] sm:$0xff] %v7738_v61  ;;  %v7747_v55 = vadd.f32 %v7236_v23, %v7537_v35  ;;  %v7750_v22 = vadd.f32 %v7252_v51, %v7537_v35  ;;  %v7753_v5 = vadd.f32 %v7537_v35, %v438_v14  ;;  %v7240_v49 = vpop.f32.mrb[12].mxu0 }
 0x100   : > { %14917 = vst [vmem:[#allocation58_spill] sm:$0xff] %v7743_v50  ;;  %v802_v25 = vsel %vm597_vm2, %v632_v56, %v705_v10  ;;  %v629_v3 = vrot.slane %v7743_v50, 6  ;;  %v704_v18 = vrot.slane %v7743_v50, 4  ;;  %v736_v24 = vrot.slane %v7743_v50, 2  ;;  %v7256_v27 = vpop.f32.mrb[12].mxu1  ;;  %v454_v62 = vpop.f32.mrb[13].mxu0 }
 0x101   : > { %14918 = vst [vmem:[#allocation59_spill] sm:$0xff] %v7747_v55  ;;  %14919 = vst [vmem:[#allocation60_spill] sm:$0xff] %v7750_v22  ;;  %v7760_v23 = vsel %vm807_vm4, %v802_v25, %v737_v21  ;;  %v554_v51 = vrot.slane %v7747_v55, 2  ;;  %v613_v0 = vrot.slane %v7747_v55, 6  ;;  %v562_v14 = vrot.slane %v7750_v22, 2  ;;  %v518_v61 = vpop.f32.mrb[13].mxu1 }
 0x102   : > { %14920 = vst [vmem:[#allocation61_spill] sm:$0xff] %v7753_v5  ;;  %14921 = vst [vmem:[#allocation62_spill] sm:$0xff] %v7760_v23  ;;  %v7241_v11 = vpop.f32.mrb[14].mxu0  ;;  %v14922_v10 = vrot.slane %v7589_v1, 6  ;;  %v801_v50 = vsel %vm597_vm2, %v629_v3, %v704_v18  ;;  %v553_v21 = vrot.slane %v7753_v5, 2  ;;  %v7773_v25 = vpop.f32.mrb[14].mxu1 }
 0x103   : > { %v7775_v23 = vpop.f32.mrb[15].mxu0  ;;  %v7778_v60 = vsel %vm807_vm4, %v801_v50, %v736_v24  ;;  %v764_v54 = vsel %vm758_vm3, %v554_v51, %v7747_v55  ;;  %v7785_v18 = vpop.f32.mrb[15].mxu1  ;;  %v14926_v1 = vrot.slane %v7750_v22, 6  ;;  %v7798_v24 = vadd.f32 %v7537_v35, %v502_v30 }
 0x104   : > { %v7768_v15 = vsel %vm597_vm2, %v14922_v10, %v623_v26  ;;  %14924 = vst [vmem:[#allocation64_spill] sm:$0xff] %v7778_v60  ;;  %v772_v26 = vsel %vm758_vm3, %v562_v14, %v7750_v22  ;;  %v14085_v10 = vrot.slane %v7753_v5, 6  ;;  %v7788_v7 = vsel %vm597_vm2, %v764_v54, %v613_v0 }
 0x105   : > { %14923 = vst [vmem:[#allocation63_spill] sm:$0xff] %v7768_v15  ;;  %14925 = vst [vmem:[#allocation65_spill] sm:$0xff] %v7788_v7  ;;  %v7793_v15 = vsel %vm597_vm2, %v772_v26, %v14926_v1  ;;  %v763_v50 = vsel %vm758_vm3, %v553_v21, %v7753_v5  ;;  %v7806_v14 = vadd.f32 %v7237_v58, %v7537_v35  ;;  %v561_v26 = vrot.slane %v7798_v24, 2 }
 0x106   : > { %14927 = vst [vmem:[#allocation66_spill] sm:$0xff] %v7793_v15  ;;  %14928 = vst [vmem:[#allocation67_spill] sm:$0xff] %v7798_v24  ;;  %v7803_v51 = vsel %vm597_vm2, %v763_v50, %v14085_v10  ;;  %v7809_v54 = vadd.f32 %v7253_v63, %v7537_v35  ;;  %v7812_v1 = vadd.f32 %v7537_v35, %v441_v4  ;;  %v14939_v7 = vrot.slane %v7798_v24, 6 }
 0x107   : > { %14929 = vst [vmem:[#allocation68_spill] sm:$0xff] %v7803_v51  ;;  %14930 = vst [vmem:[#allocation69_spill] sm:$0xff] %v7806_v14  ;;  %v7817_v30 = vadd.f32 %v7537_v35, %v505_v13  ;;  %v7820_v55 = vadd.f32 %v7240_v49, %v7537_v35  ;;  %v7823_v50 = vsel %vm807_vm4, %v791_v8, %v726_v29  ;;  %v614_v58 = vrot.slane %v7806_v14, 6  ;;  %v14989_v51 = vld [vmem:[#allocation24_spill] sm:$0xff] }
 0x108   : > { %14931 = vst [vmem:[#allocation70_spill] sm:$0xff] %v7809_v54  ;;  %14932 = vst [vmem:[#allocation71_spill] sm:$0xff] %v7812_v1  ;;  %v699_v63 = vrot.slane %v7806_v14, 4  ;;  %v731_v4 = vrot.slane %v7806_v14, 2  ;;  %v771_v10 = vsel %vm758_vm3, %v561_v26, %v7798_v24  ;;  %v638_v21 = vrot.slane %v7809_v54, 6 }
 0x109   : > { %14933 = vst [vmem:[#allocation72_spill] sm:$0xff] %v7817_v30  ;;  %14934 = vst [vmem:[#allocation73_spill] sm:$0xff] %v7820_v55  ;;  %v707_v13 = vrot.slane %v7809_v54, 4  ;;  %v739_v15 = vrot.slane %v7809_v54, 2  ;;  %v14936_v49 = vrot.slane %v7693_v12, 6  ;;  %v7839_v8 = vsel %vm597_vm2, %v628_v2, %v629_v3 }
 0x10a   : > { %14935 = vst [vmem:[#allocation74_spill] sm:$0xff] %v7823_v50  ;;  %14938 = vst [vmem:[#allocation76_spill] sm:$0xff] %v7839_v8  ;;  %v7844_v14 = vsel %vm597_vm2, %v771_v10, %v14939_v7  ;;  %v796_v26 = vsel %vm597_vm2, %v614_v58, %v699_v63  ;;  %v611_v12 = vrot.slane %v7812_v1, 6  ;;  %v730_v2 = vrot.slane %v7812_v1, 2 }
 0x10b   : > { %v7836_v29 = vsel %vm597_vm2, %v14936_v49, %v632_v56  ;;  %14940 = vst [vmem:[#allocation77_spill] sm:$0xff] %v7844_v14  ;;  %v7848_v60 = vsel %vm807_vm4, %v796_v26, %v731_v4  ;;  %v804_v54 = vsel %vm597_vm2, %v638_v21, %v707_v13  ;;  %v698_v56 = vrot.slane %v7812_v1, 4 }
 0x10c   : > { %14937 = vst [vmem:[#allocation75_spill] sm:$0xff] %v7836_v29  ;;  %14941 = vst [vmem:[#allocation78_spill] sm:$0xff] %v7848_v60  ;;  %v7854_v49 = vsel %vm807_vm4, %v804_v54, %v739_v15  ;;  %v635_v3 = vrot.slane %v7817_v30, 6  ;;  %v706_v7 = vrot.slane %v7817_v30, 4  ;;  %v738_v63 = vrot.slane %v7817_v30, 2 }
 0x10d   : > { %14942 = vst [vmem:[#allocation79_spill] sm:$0xff] %v7854_v49  ;;  %v795_v10 = vsel %vm597_vm2, %v611_v12, %v698_v56  ;;  %v556_v4 = vrot.slane %v7820_v55, 2  ;;  %v619_v13 = vrot.slane %v7820_v55, 6  ;;  %v7864_v26 = vsel %vm597_vm2, %v613_v0, %v614_v58 }
 0x10e   : > { %14943 = vst [vmem:[#allocation80_spill] sm:$0xff] %v7864_v26  ;;  %v7867_v15 = vsel %vm807_vm4, %v795_v10, %v730_v2  ;;  %v803_v54 = vsel %vm597_vm2, %v635_v3, %v706_v7  ;;  %v7871_v1 = vadd.f32 %v7256_v27, %v7537_v35  ;;  %v7879_v30 = vadd.f32 %v7537_v35, %v454_v62 }
 0x10f   : > { %14944 = vst [vmem:[#allocation81_spill] sm:$0xff] %v7867_v15  ;;  %v7874_v49 = vsel %vm807_vm4, %v803_v54, %v738_v63  ;;  %v766_v56 = vsel %vm758_vm3, %v556_v4, %v7820_v55  ;;  %v7882_v0 = vadd.f32 %v7537_v35, %v518_v61  ;;  %v7890_v7 = vadd.f32 %v7241_v11, %v7537_v35 }
 0x110   : > { %14945 = vst [vmem:[#allocation82_spill] sm:$0xff] %v7871_v1  ;;  %14946 = vst [vmem:[#allocation83_spill] sm:$0xff] %v7874_v49  ;;  %v7885_v58 = vsel %vm597_vm2, %v766_v56, %v619_v13  ;;  %v564_v2 = vrot.slane %v7871_v1, 2  ;;  %v555_v10 = vrot.slane %v7879_v30, 2  ;;  %v616_v63 = vrot.slane %v7879_v30, 6 }
 0x111   : > { %14947 = vst [vmem:[#allocation84_spill] sm:$0xff] %v7879_v30  ;;  %14948 = vst [vmem:[#allocation85_spill] sm:$0xff] %v7882_v0  ;;  %v563_v62 = vrot.slane %v7882_v0, 2  ;;  %v620_v54 = vrot.slane %v7890_v7, 6  ;;  %v701_v56 = vrot.slane %v7890_v7, 4  ;;  %v733_v27 = vrot.slane %v7890_v7, 2 }
 0x112   : > { %14949 = vst [vmem:[#allocation86_spill] sm:$0xff] %v7885_v58  ;;  %14950 = vst [vmem:[#allocation87_spill] sm:$0xff] %v7890_v7  ;;  %v774_v61 = vsel %vm758_vm3, %v564_v2, %v7871_v1  ;;  %v14951_v11 = vrot.slane %v7871_v1, 6  ;;  %v765_v58 = vsel %vm758_vm3, %v555_v10, %v7879_v30  ;;  %v7912_v2 = vadd.f32 %v7773_v25, %v7537_v35 }
 0x113   : > { %v773_v4 = vsel %vm758_vm3, %v563_v62, %v7882_v0  ;;  %v14954_v60 = vrot.slane %v7750_v22, 6  ;;  %v7920_v7 = vsel %vm597_vm2, %v765_v58, %v616_v63  ;;  %v798_v10 = vsel %vm597_vm2, %v620_v54, %v701_v56 }
 0x114   : > { %v7904_v55 = vsel %vm597_vm2, %v774_v61, %v14951_v11  ;;  %14953 = vst [vmem:[#allocation89_spill] sm:$0xff] %v7912_v2  ;;  %14956 = vst [vmem:[#allocation91_spill] sm:$0xff] %v7920_v7  ;;  %v14957_v61 = vrot.slane %v7882_v0, 6  ;;  %v7929_v62 = vsel %vm807_vm4, %v798_v10, %v733_v27  ;;  %v14114_v25 = vrot.slane %v7912_v2, 6 }
 0x115   : > { %14952 = vst [vmem:[#allocation88_spill] sm:$0xff] %v7904_v55  ;;  %v7917_v26 = vsel %vm597_vm2, %v14954_v60, %v638_v21  ;;  %14959 = vst [vmem:[#allocation93_spill] sm:$0xff] %v7929_v62  ;;  %v709_v30 = vrot.slane %v7912_v2, 4  ;;  %v741_v60 = vrot.slane %v7912_v2, 2  ;;  %v7936_v21 = vadd.f32 %v7537_v35, %v7775_v23 }
 0x116   : > { %14955 = vst [vmem:[#allocation90_spill] sm:$0xff] %v7917_v26  ;;  %v7925_v11 = vsel %vm597_vm2, %v773_v4, %v14957_v61  ;;  %v7940_v58 = vadd.f32 %v7537_v35, %v7785_v18  ;;  %v7944_v4 = vmul.f32 %v7525_v31, %v7610_v16  ;;  %v894_v27 = vmul.f32 %v7527_v32, %v7613_v17 }
 0x117   : > { %14958 = vst [vmem:[#allocation92_spill] sm:$0xff] %v7925_v11  ;;  %14960 = vst [vmem:[#allocation94_spill] sm:$0xff] %v7936_v21  ;;  %v14963_v56 = vrot.slane %v7753_v5, 6  ;;  %v806_v23 = vsel %vm597_vm2, %v14114_v25, %v709_v30  ;;  %v960_v35 = vmul.f32 %v7529_v33, %v7610_v16  ;;  %v1028_v18 = vmul.f32 %v7532_v34, %v7702_v9 }
 0x118   : > { %14961 = vst [vmem:[#allocation95_spill] sm:$0xff] %v7940_v58  ;;  %14962 = vst [vmem:[#allocation96_spill] sm:$0xff] %v7944_v4  ;;  %v7961_v10 = vsel %vm807_vm4, %v806_v23, %v741_v60  ;;  %v617_v22 = vrot.slane %v7936_v21, 6  ;;  %v700_v5 = vrot.slane %v7936_v21, 4  ;;  %v708_v62 = vrot.slane %v7940_v58, 4 }
 0x119   : > { %v7951_v61 = vsel %vm597_vm2, %v14963_v56, %v611_v12  ;;  %14965 = vst [vmem:[#allocation98_spill] sm:$0xff] %v7961_v10  ;;  %v732_v12 = vrot.slane %v7936_v21, 2  ;;  %v641_v56 = vrot.slane %v7940_v58, 6  ;;  %v740_v30 = vrot.slane %v7940_v58, 2 }
 0x11a   : > { %14964 = vst [vmem:[#allocation97_spill] sm:$0xff] %v7951_v61  ;;  %v924_v25 = vadd.f32 %v894_v27, %v7944_v4  ;;  %v14966_v55 = vrot.slane %v7798_v24, 6  ;;  %v7976_v60 = vsel %vm597_vm2, %v619_v13, %v620_v54  ;;  %v797_v23 = vsel %vm597_vm2, %v617_v22, %v700_v5 }
 0x11b   : > { %14968 = vst [vmem:[#allocation100_spill] sm:$0xff] %v7976_v60  ;;  %v1159_v21 = vmul.f32 %v7539_v36, %v7610_v16  ;;  %v7982_v10 = vsel %vm807_vm4, %v797_v23, %v732_v12  ;;  %v805_v58 = vsel %vm597_vm2, %v641_v56, %v708_v62  ;;  %v1094_v27 = vmul.f32 %v7547_v40, %v7673_v57 }
 0x11c   : > { %v7973_v1 = vsel %vm597_vm2, %v14966_v55, %v635_v3  ;;  %14969 = vst [vmem:[#allocation101_spill] sm:$0xff] %v7982_v10  ;;  %v992_v2 = vadd.f32 %v960_v35, %v924_v25  ;;  %v7988_v55 = vsel %vm807_vm4, %v805_v58, %v740_v30  ;;  %v7992_v3 = vmul.f32 %v7539_v36, %v7620_v20 }
 0x11d   : > { %14967 = vst [vmem:[#allocation99_spill] sm:$0xff] %v7973_v1  ;;  %14970 = vst [vmem:[#allocation102_spill] sm:$0xff] %v7988_v55  ;;  %v1246_v5 = vrot.slane %v1159_v21, 1  ;;  %v1378_v13 = vmul.f32 %v7541_v37, %v7613_v17  ;;  %v7998_v62 = vmul.f32 %v7541_v37, %v7660_v28  ;;  %v1609_v25 = vmul.f32 %v7543_v38, %v7610_v16 }
 0x11e   : > { %v1058_v54 = vadd.f32 %v1028_v18, %v992_v2  ;;  %v8004_v58 = vmul.f32 %v7543_v38, %v7620_v20  ;;  %v14132_v35 = vrot.slane %v7992_v3, 1  ;;  %v1853_v21 = vmul.f32 %v7545_v39, %v7702_v9 }
 0x11f   : > { %v1470_v12 = vrot.slane %v1378_v13, 1  ;;  %v8011_v2 = vmul.f32 %v7545_v39, %v7720_v44  ;;  %v14131_v30 = vrot.slane %v7998_v62, 1  ;;  %v1707_v23 = vrot.slane %v1609_v25, 1 }
 0x120   : > { %v1122_v18 = vadd.f32 %v1094_v27, %v1058_v54  ;;  %v14133_v24 = vrot.slane %v8004_v58, 1  ;;  %v8016_v60 = vsel %vm597_vm2, %v616_v63, %v617_v22  ;;  %v8021_v13 = vsel %vm1240_vm5, %v1246_v5, %v14132_v35 }
 0x121   : > { %14971 = vst [vmem:[#allocation103_spill] sm:$0xff] %v8016_v60  ;;  %14972 = vst [vmem:[#allocation104_spill] sm:$0xff] %v8021_v13  ;;  %v1945_v55 = vrot.slane %v1853_v21, 1  ;;  %v2084_v10 = vmul.f32 %v7556_v45, %v7673_v57  ;;  %v1472_v27 = vsel %vm1240_vm5, %v1470_v12, %v14131_v30  ;;  %v8032_v22 = vmul.f32 %v7556_v45, %v7705_v6 }
 0x122   : > { %v1341_v11 = vadd.f32 %v8021_v13, %v1122_v18  ;;  %v1709_v63 = vsel %vm1240_vm5, %v1707_v23, %v14133_v24  ;;  %v2302_v25 = vmul.f32 %v7549_v41, %v7610_v16  ;;  %v8041_v21 = vmul.f32 %v7549_v41, %v7620_v20 }
 0x123   : > { %v2170_v5 = vrot.slane %v2084_v10, 1  ;;  %v2521_v30 = vmul.f32 %v7552_v42, %v7613_v17  ;;  %v8048_v35 = vmul.f32 %v7552_v42, %v7660_v28  ;;  %v2752_v23 = vmul.f32 %v7554_v43, %v7610_v16 }
 0x124   : > { %v1572_v18 = vadd.f32 %v1472_v27, %v1341_v11  ;;  %v2389_v54 = vrot.slane %v2302_v25, 2  ;;  %v8055_v24 = vmul.f32 %v7554_v43, %v7620_v20  ;;  %v14973_v11 = vrot.slane %v7882_v0, 6 }
 0x125   : > { %v2613_v60 = vrot.slane %v2521_v30, 2  ;;  %v14140_v7 = vrot.slane %v8048_v35, 2  ;;  %v14975_v25 = vrot.slane %v8011_v2, 1  ;;  %v14976_v26 = vrot.slane %v8032_v22, 1 }
 0x126   : > { %v8060_v27 = vsel %vm597_vm2, %v14973_v11, %v641_v56  ;;  %v1816_v12 = vadd.f32 %v1709_v63, %v1572_v18  ;;  %v14977_v4 = vrot.slane %v8041_v21, 2  ;;  %v2996_v56 = vmul.f32 %v7558_v46, %v7702_v9 }
 0x127   : > { %14974 = vst [vmem:[#allocation105_spill] sm:$0xff] %v8060_v27  ;;  %v1947_v10 = vsel %vm1240_vm5, %v1945_v55, %v14975_v25  ;;  %v2172_v13 = vsel %vm1240_vm5, %v2170_v5, %v14976_v26  ;;  %v2850_v30 = vrot.slane %v2752_v23, 2  ;;  %v8078_v18 = vmul.f32 %v7558_v46, %v7720_v44 }
 0x128   : > { %v8072_v49 = vsel %vm2383_vm6, %v2389_v54, %v14977_v4  ;;  %v2047_v63 = vadd.f32 %v1947_v10, %v1816_v12  ;;  %v3227_v55 = vmul.f32 %v7579_v59, %v7673_v57  ;;  %v2615_v26 = vsel %vm2383_vm6, %v2613_v60, %v14140_v7 }
 0x129   : > { %14978 = vst [vmem:[#allocation106_spill] sm:$0xff] %v8072_v49  ;;  %v8088_v4 = vmul.f32 %v7579_v59, %v7705_v6  ;;  %v3445_v54 = vmul.f32 %v7560_v47, %v7610_v16  ;;  %v3088_v10 = vrot.slane %v2996_v56, 2  ;;  %v8095_v11 = vmul.f32 %v7560_v47, %v7620_v20 }
 0x12a   : > { %v2265_v12 = vadd.f32 %v2172_v13, %v2047_v63  ;;  %v3313_v25 = vrot.slane %v3227_v55, 2  ;;  %v3664_v7 = vmul.f32 %v7562_v48, %v7613_v17  ;;  %v8102_v5 = vmul.f32 %v7562_v48, %v7660_v28 }
 0x12b   : > { %14979 = vst [vmem:[#allocation107_spill] sm:$0xff] %v8095_v11  ;;  %v3532_v13 = vrot.slane %v3445_v54, 3  ;;  %v3895_v63 = vmul.f32 %v7567_v52, %v7610_v16  ;;  %v14981_v23 = vrot.slane %v8055_v24, 2  ;;  %v8114_v15 = vmul.f32 %v7567_v52, %v7620_v20 }
 0x12c   : > { %14980 = vst [vmem:[#allocation108_spill] sm:$0xff] %v8102_v5  ;;  %v2484_v0 = vadd.f32 %v8072_v49, %v2265_v12  ;;  %v3756_v60 = vrot.slane %v3664_v7, 3  ;;  %v14153_v27 = vrot.slane %v8102_v5, 3  ;;  %v14983_v12 = vrot.slane %v8078_v18, 2 }
 0x12d   : > { %v2852_v55 = vsel %vm2383_vm6, %v2850_v30, %v14981_v23  ;;  %14982 = vst [vmem:[#allocation109_spill] sm:$0xff] %v8114_v15  ;;  %v3993_v56 = vrot.slane %v3895_v63, 3  ;;  %v4139_v49 = vmul.f32 %v7569_v53, %v7702_v9  ;;  %v14984_v29 = vrot.slane %v8088_v4, 2 }
 0x12e   : > { %v2715_v1 = vadd.f32 %v2615_v26, %v2484_v0  ;;  %v3090_v54 = vsel %vm2383_vm6, %v3088_v10, %v14983_v12  ;;  %v8127_v23 = vmul.f32 %v7569_v53, %v7720_v44  ;;  %v4370_v0 = vmul.f32 %v7617_v19, %v7673_v57 }
 0x12f   : > { %v3315_v30 = vsel %vm2383_vm6, %v3313_v25, %v14984_v29  ;;  %v14985_v10 = vrot.slane %v8095_v11, 3  ;;  %v8138_v12 = vmul.f32 %v7617_v19, %v7705_v6  ;;  %v14987_v29 = vld [vmem:[#allocation20_spill] sm:$0xff]  ;;  %v3758_v7 = vsel %vm3526_vm7, %v3756_v60, %v14153_v27  ;;  %v8158_v60 = vld [vmem:[%s14034_s3 + $0x18] ss:$0 sm:$0xff] }
 0x130   : > { %v2959_v26 = vadd.f32 %v2852_v55, %v2715_v1  ;;  %v4588_v25 = vmul.f32 %v14987_v29, %v7610_v16  ;;  %v4231_v8 = vrot.slane %v4139_v49, 3  ;;  %v8148_v1 = vmul.f32 %v14987_v29, %v7620_v20  ;;  %14990 = vst [vmem:[#allocation111_spill] sm:$0xff] %v8158_v60 }
 0x131   : > { %v8134_v63 = vsel %vm3526_vm7, %v3532_v13, %v14985_v10  ;;  %v14988_v55 = vrot.slane %v8114_v15, 3  ;;  %v4456_v61 = vrot.slane %v4370_v0, 3  ;;  %v4806_v11 = vmul.f32 %v14989_v51, %v7613_v17 }
 0x132   : > { %14986 = vst [vmem:[#allocation110_spill] sm:$0xff] %v8134_v63  ;;  %v3190_v13 = vadd.f32 %v3090_v54, %v2959_v26  ;;  %v4674_v27 = vrot.slane %v4588_v25, 4  ;;  %v8163_v14 = vmul.f32 %v14989_v51, %v7660_v28  ;;  %v14991_v54 = vld [vmem:[#allocation28_spill] sm:$0xff]  ;;  %v14992_v15 = vrot.slane %v8127_v23, 3  ;;  %v14993_v51 = vld [vmem:[#allocation29_spill] sm:$0xff] }
 0x133   : > { %v3995_v10 = vsel %vm3526_vm7, %v3993_v56, %v14988_v55  ;;  %v5037_v26 = vmul.f32 %v14991_v54, %v7610_v16  ;;  %v4898_v55 = vrot.slane %v4806_v11, 4  ;;  %v8170_v17 = vmul.f32 %v14991_v54, %v7620_v20 }
 0x134   : > { %v3408_v56 = vadd.f32 %v3315_v30, %v3190_v13  ;;  %v4233_v49 = vsel %vm3526_vm7, %v4231_v8, %v14992_v15  ;;  %v5281_v29 = vmul.f32 %v14993_v51, %v7702_v9  ;;  %v8182_v11 = vmul.f32 %v14993_v51, %v7720_v44 }
 0x135   : > { %v5135_v5 = vrot.slane %v5037_v26, 4  ;;  %v5512_v13 = vmul.f32 %v8158_v60, %v7673_v57  ;;  %v14995_v0 = vrot.slane %v8138_v12, 3  ;;  %v8191_v26 = vmul.f32 %v8158_v60, %v7705_v6 }
 0x136   : > { %v3627_v16 = vadd.f32 %v8134_v63, %v3408_v56  ;;  %14994 = vst [vmem:[#allocation28_spill] sm:$0xff] %v8182_v11  ;;  %v5373_v15 = vrot.slane %v5281_v29, 4  ;;  %v8195_v56 = vmul.f32 %v7525_v31, %v7620_v20  ;;  %v14997_v25 = vrot.slane %v8148_v1, 4 }
 0x137   : > { %v4458_v8 = vsel %vm3526_vm7, %v4456_v61, %v14995_v0  ;;  %v14999_v57 = vrot.slane %v8163_v14, 4  ;;  %v14184_v61 = vrot.slane %v8182_v11, 4  ;;  %v15000_v29 = vrot.slane %v8170_v17, 4 }
 0x138   : > { %14996 = vst [vmem:[#allocation112_spill] sm:$0xff] %v8195_v56  ;;  %v3858_v30 = vadd.f32 %v3758_v7, %v3627_v16  ;;  %v8200_v63 = vsel %vm368_vm0, %v4674_v27, %v14997_v25  ;;  %v5598_v60 = vrot.slane %v5512_v13, 4  ;;  %v895_v16 = vmul.f32 %v7527_v32, %v7660_v28 }
 0x139   : > { %14998 = vst [vmem:[#allocation113_spill] sm:$0xff] %v8200_v63  ;;  %v4900_v9 = vsel %vm368_vm0, %v4898_v55, %v14999_v57  ;;  %v5137_v0 = vsel %vm368_vm0, %v5135_v5, %v15000_v29  ;;  %v961_v27 = vmul.f32 %v7529_v33, %v7620_v20  ;;  %v1029_v25 = vmul.f32 %v7532_v34, %v7720_v44  ;;  %v15001_v57 = vld [vmem:[#allocation39_spill] sm:$0xff]  ;;  %v15002_v29 = vld [vmem:[#allocation42_spill] sm:$0xff]  ;;  %v15003_v44 = vld [vmem:[#allocation53_spill] sm:$0xff] }
 0x13a   : > { %v4102_v7 = vadd.f32 %v3995_v10, %v3858_v30  ;;  %v1161_v55 = vmul.f32 %v7539_v36, %v15001_v57  ;;  %v5375_v5 = vsel %vm368_vm0, %v5373_v15, %v14184_v61  ;;  %v925_v13 = vadd.f32 %v895_v16, %v8195_v56 }
 0x13b   : > { %v1380_v31 = vmul.f32 %v7541_v37, %v15002_v29  ;;  %v1611_v10 = vmul.f32 %v7543_v38, %v15001_v57  ;;  %v1855_v20 = vmul.f32 %v7545_v39, %v7823_v50  ;;  %v2086_v34 = vmul.f32 %v7556_v45, %v15003_v44 }
 0x13c   : > { %v4333_v30 = vadd.f32 %v4233_v49, %v4102_v7  ;;  %v1249_v28 = vrot.slane %v1161_v55, 1  ;;  %v993_v36 = vadd.f32 %v961_v27, %v925_v13  ;;  %v2304_v15 = vmul.f32 %v7549_v41, %v15001_v57 }
 0x13d   : > { %v1473_v33 = vrot.slane %v1380_v31, 1  ;;  %v1710_v11 = vrot.slane %v1611_v10, 1  ;;  %v15004_v61 = vrot.slane %v8191_v26, 4  ;;  %v1095_v49 = vmul.f32 %v7547_v40, %v7705_v6 }
 0x13e   : > { %v4551_v16 = vadd.f32 %v4458_v8, %v4333_v30  ;;  %v1948_v7 = vrot.slane %v1855_v20, 1  ;;  %v1059_v55 = vadd.f32 %v1029_v25, %v993_v36  ;;  %v15005_v39 = vrot.slane %v7992_v3, 1 }
 0x13f   : > { %v5600_v56 = vsel %vm368_vm0, %v5598_v60, %v15004_v61  ;;  %v15007_v31 = vrot.slane %v7998_v62, 1  ;;  %v2173_v13 = vrot.slane %v2086_v34, 1  ;;  %v15008_v10 = vrot.slane %v8004_v58, 1 }
 0x140   : > { %v8240_v45 = vsel %vm1240_vm5, %v15005_v39, %v1249_v28  ;;  %v4769_v8 = vadd.f32 %v8200_v63, %v4551_v16  ;;  %v2392_v61 = vrot.slane %v2304_v15, 2  ;;  %v2523_v36 = vmul.f32 %v7552_v42, %v15002_v29  ;;  %v15049_v63 = vld [vmem:[#allocation41_spill] sm:$0xff] }
 0x141   : > { %15006 = vst [vmem:[#allocation39_spill] sm:$0xff] %v8240_v45  ;;  %v1474_v27 = vsel %vm1240_vm5, %v15007_v31, %v1473_v33  ;;  %v1711_v60 = vsel %vm1240_vm5, %v15008_v10, %v1710_v11  ;;  %v1123_v20 = vadd.f32 %v1095_v49, %v1059_v55  ;;  %v15009_v3 = vrot.slane %v8011_v2, 1 }
 0x142   : > { %v2754_v28 = vmul.f32 %v7554_v43, %v15001_v57  ;;  %v2998_v33 = vmul.f32 %v7558_v46, %v7823_v50  ;;  %v5000_v34 = vadd.f32 %v4900_v9, %v4769_v8  ;;  %v2616_v62 = vrot.slane %v2523_v36, 2 }
 0x143   : > { %v1949_v39 = vsel %vm1240_vm5, %v15009_v3, %v1948_v7  ;;  %v3229_v58 = vmul.f32 %v7579_v59, %v15003_v44  ;;  %v3447_v11 = vmul.f32 %v7560_v47, %v15001_v57  ;;  %v1342_v25 = vadd.f32 %v8240_v45, %v1123_v20 }
 0x144   : > { %v2853_v30 = vrot.slane %v2754_v28, 2  ;;  %v3091_v2 = vrot.slane %v2998_v33, 2  ;;  %v3666_v15 = vmul.f32 %v7562_v48, %v15002_v29  ;;  %v5244_v16 = vadd.f32 %v5137_v0, %v5000_v34 }
 0x145   : > { %v15010_v49 = vrot.slane %v8032_v22, 1  ;;  %v15011_v9 = vrot.slane %v8041_v21, 2  ;;  %v3316_v31 = vrot.slane %v3229_v58, 2  ;;  %v1573_v8 = vadd.f32 %v1474_v27, %v1342_v25 }
 0x146   : > { %v15013_v10 = vrot.slane %v8048_v35, 2  ;;  %v15014_v20 = vrot.slane %v8055_v24, 2  ;;  %v3535_v0 = vrot.slane %v3447_v11, 3  ;;  %v5475_v28 = vadd.f32 %v5375_v5, %v5244_v16  ;;  %v15019_v11 = vld [vmem:[#allocation24_spill] sm:$0xff] }
 0x147   : > { %v2174_v7 = vsel %vm1240_vm5, %v15010_v49, %v2173_v13  ;;  %v8271_v55 = vsel %vm2383_vm6, %v15011_v9, %v2392_v61  ;;  %v15015_v22 = vrot.slane %v8078_v18, 2  ;;  %v3759_v21 = vrot.slane %v3666_v15, 3  ;;  %v15020_v15 = vld [vmem:[#allocation107_spill] sm:$0xff] }
 0x148   : > { %15012 = vst [vmem:[#allocation114_spill] sm:$0xff] %v8271_v55  ;;  %v2617_v36 = vsel %vm2383_vm6, %v15013_v10, %v2616_v62  ;;  %v2854_v3 = vsel %vm2383_vm6, %v15014_v20, %v2853_v30  ;;  %v3897_v61 = vmul.f32 %v7567_v52, %v15001_v57  ;;  %v1817_v33 = vadd.f32 %v1711_v60, %v1573_v8  ;;  %v15018_v62 = vld [vmem:[#allocation20_spill] sm:$0xff] }
 0x149   : > { %v3092_v13 = vsel %vm2383_vm6, %v15015_v22, %v3091_v2  ;;  %v15016_v27 = vrot.slane %v8088_v4, 2  ;;  %v4141_v24 = vmul.f32 %v7569_v53, %v7823_v50  ;;  %v4372_v34 = vmul.f32 %v7617_v19, %v15003_v44  ;;  %v15023_v8 = vld [vmem:[#allocation108_spill] sm:$0xff] }
 0x14a   : > { %v8291_v5 = vadd.f32 %v5600_v56, %v5475_v28  ;;  %v3996_v18 = vrot.slane %v3897_v61, 3  ;;  %v4590_v58 = vmul.f32 %v15018_v62, %v15001_v57  ;;  %v4808_v25 = vmul.f32 %v15019_v11, %v15002_v29  ;;  %v15025_v28 = vld [vmem:[#allocation109_spill] sm:$0xff] }
 0x14b   : > { %v3317_v35 = vsel %vm2383_vm6, %v15016_v27, %v3316_v31  ;;  %v2048_v60 = vadd.f32 %v1949_v39, %v1817_v33  ;;  %v4234_v30 = vrot.slane %v4141_v24, 3  ;;  %v4459_v4 = vrot.slane %v4372_v34, 3 }
 0x14c   : > { %15017 = vst [vmem:[#allocation115_spill] sm:$0xff] %v8291_v5  ;;  %v5039_v2 = vmul.f32 %v14991_v54, %v15001_v57  ;;  %5759 = vrot.lane.b32.xlu1 %v8291_v5, %s7431_s7  ;;  %v15021_v56 = vrot.slane %v15020_v15, 3  ;;  %v4677_v49 = vrot.slane %v4590_v58, 4  ;;  %v4901_v9 = vrot.slane %v4808_v25, 4  ;;  %v15029_v58 = vld [vmem:[#allocation111_spill] sm:$0xff]  ;;  %v15035_v15 = vld [vmem:[#allocation30_spill] sm:$0xff] }
 0x14d   : > { %v5283_v31 = vmul.f32 %v14993_v51, %v7823_v50  ;;  %v2266_v39 = vadd.f32 %v2174_v7, %v2048_v60  ;;  %v15024_v10 = vrot.slane %v15023_v8, 3  ;;  %v15026_v22 = vrot.slane %v15025_v28, 3 }
 0x14e   : > { %v8304_v16 = vsel %vm3526_vm7, %v15021_v56, %v3535_v0  ;;  %v5138_v33 = vrot.slane %v5039_v2, 4  ;;  %v15027_v27 = vrot.slane %v8127_v23, 3  ;;  %v15028_v24 = vrot.slane %v8138_v12, 3  ;;  %v15032_v23 = vld [vmem:[#allocation51_spill] sm:$0xff]  ;;  %v15033_v2 = vld [vmem:[#allocation2_spill] sm:$0xff] }
 0x14f   : > { %15022 = vst [vmem:[#allocation107_spill] sm:$0xff] %v8304_v16  ;;  %v3760_v20 = vsel %vm3526_vm7, %v15024_v10, %v3759_v21  ;;  %v8314_v61 = vsel %vm3526_vm7, %v15026_v22, %v3996_v18  ;;  %v5376_v7 = vrot.slane %v5283_v31, 4  ;;  %v5514_v21 = vmul.f32 %v15029_v58, %v15003_v44  ;;  %v15042_v22 = vld [vmem:[#allocation4_spill] sm:$0xff] }
 0x150   : > { %v8319_v0 = vsel %vm3526_vm7, %v15027_v27, %v4234_v30  ;;  %v8324_v34 = vsel %vm3526_vm7, %v15028_v24, %v4459_v4  ;;  %v2485_v25 = vadd.f32 %v8271_v55, %v2266_v39  ;;  %v15030_v18 = vrot.slane %v8148_v1, 4  ;;  %5952 = vrot.lane.b32.xlu1 %v8291_v5, %s7432_s8  ;;  %v15044_v24 = vld [vmem:[#allocation5_spill] sm:$0xff] }
 0x151   : > { %v8336_v30 = vmul.f32 %v15033_v2, %v15032_v23  ;;  %v8340_v12 = vmul.f32 %v7527_v32, %v15035_v15  ;;  %v15037_v4 = vrot.slane %v8163_v14, 4  ;;  %v15038_v31 = vrot.slane %v8170_v17, 4 }
 0x152   : > { %v8332_v60 = vsel %vm368_vm0, %v15030_v18, %v4677_v49  ;;  %v15039_v49 = vld [vmem:[#allocation28_spill] sm:$0xff]  ;;  %v5601_v10 = vrot.slane %v5514_v21, 4  ;;  %v2716_v28 = vadd.f32 %v2617_v36, %v2485_v25  ;;  %v1026_v18 = vmul.f32 %v15044_v24, %v15035_v15  ;;  %v15047_v36 = vld [vmem:[#allocation33_spill] sm:$0xff] }
 0x153   : > { %15031 = vst [vmem:[#allocation108_spill] sm:$0xff] %v8332_v60  ;;  %15034 = vst [vmem:[#allocation109_spill] sm:$0xff] %v8336_v30  ;;  %v8345_v56 = vsel %vm368_vm0, %v15037_v4, %v4901_v9  ;;  %v8350_v1 = vsel %vm368_vm0, %v15038_v31, %v5138_v33  ;;  %v15040_v39 = vrot.slane %v15039_v49, 4  ;;  %v922_v14 = vadd.f32 %v8340_v12, %v8336_v30  ;;  %v15041_v9 = vld [vmem:[#allocation31_spill] sm:$0xff]  ;;  %v15043_v33 = vld [vmem:[#allocation6_spill] sm:$0xff] }
 0x154   : > { %15036 = vst [vmem:[#allocation111_spill] sm:$0xff] %v8340_v12  ;;  %v958_v17 = vmul.f32 %v15042_v22, %v15041_v9  ;;  %v1156_v27 = vmul.f32 %v15043_v33, %v15032_v23  ;;  %v1375_v4 = vmul.f32 %v7541_v37, %v15035_v15  ;;  %v8375_v25 = vmul.f32 %v7541_v37, %v15047_v36 }
 0x155   : > { %v8355_v8 = vsel %vm368_vm0, %v15040_v39, %v5376_v7  ;;  %v15045_v7 = vld [vmem:[#allocation54_spill] sm:$0xff]  ;;  %v2960_v31 = vadd.f32 %v2854_v3, %v2716_v28  ;;  %v1606_v5 = vmul.f32 %v7543_v38, %v15041_v9  ;;  %v8383_v44 = vmul.f32 %v7543_v38, %v15049_v63  ;;  %v15050_v3 = vld [vmem:[#allocation9_spill] sm:$0xff] }
 0x156   : > { %v8369_v21 = vmul.f32 %v15043_v33, %v15045_v7  ;;  %15048 = vst [vmem:[#allocation28_spill] sm:$0xff] %v8375_v25  ;;  %v990_v49 = vadd.f32 %v958_v17, %v922_v14  ;;  %v1241_v39 = vrot.slane %v1156_v27, 1  ;;  %v1465_v55 = vrot.slane %v1375_v4, 1 }
 0x157   : > { %v3191_v6 = vadd.f32 %v3092_v13, %v2960_v31  ;;  %v1092_v29 = vmul.f32 %v7547_v40, %v15032_v23  ;;  %v1850_v28 = vmul.f32 %v15050_v3, %v15035_v15  ;;  %v15051_v14 = vrot.slane %v8191_v26, 4 }
 0x158   : > { %15046 = vst [vmem:[#allocation30_spill] sm:$0xff] %v8369_v21  ;;  %v14200_v30 = vrot.slane %v8369_v21, 1  ;;  %v1056_v12 = vadd.f32 %v1026_v18, %v990_v49  ;;  %v1702_v27 = vrot.slane %v1606_v5, 1  ;;  %v8397_v45 = vmul.f32 %v15050_v3, %v15047_v36  ;;  %v15053_v49 = vld [vmem:[#allocation14_spill] sm:$0xff] }
 0x159   : > { %v8392_v17 = vsel %vm368_vm0, %v15051_v14, %v5601_v10  ;;  %v3409_v13 = vadd.f32 %v3317_v35, %v3191_v6  ;;  %v2081_v26 = vmul.f32 %v15053_v49, %v15032_v23  ;;  %v15054_v10 = vrot.slane %v8375_v25, 1 }
 0x15a   : > { %v1120_v18 = vadd.f32 %v1092_v29, %v1056_v12  ;;  %v8402_v31 = vsel %vm1240_vm5, %v1241_v39, %v14200_v30  ;;  %v1940_v14 = vrot.slane %v1850_v28, 1  ;;  %v8413_v4 = vmul.f32 %v15053_v49, %v15045_v7 }
 0x15b   : > { %15052 = vst [vmem:[#allocation4_spill] sm:$0xff] %v8402_v31  ;;  %v8409_v5 = vsel %vm1240_vm5, %v1465_v55, %v15054_v10  ;;  %v2299_v6 = vmul.f32 %v7549_v41, %v15032_v23  ;;  %v3628_v29 = vadd.f32 %v8304_v16, %v3409_v13  ;;  %v8422_v39 = vmul.f32 %v7549_v41, %v15045_v7 }
 0x15c   : > { %15055 = vst [vmem:[#allocation33_spill] sm:$0xff] %v8409_v5  ;;  %v1339_v35 = vadd.f32 %v8402_v31, %v1120_v18  ;;  %v15056_v55 = vrot.slane %v8383_v44, 1  ;;  %v2165_v10 = vrot.slane %v2081_v26, 1  ;;  %v2518_v25 = vmul.f32 %v7552_v42, %v15035_v15 }
 0x15d   : > { %v3859_v21 = vadd.f32 %v3760_v20, %v3628_v29  ;;  %v2384_v18 = vrot.slane %v2299_v6, 2  ;;  %v8433_v12 = vmul.f32 %v7552_v42, %v15047_v36  ;;  %v8440_v26 = vmul.f32 %v7554_v43, %v15049_v63 }
 0x15e   : > { %v1704_v28 = vsel %vm1240_vm5, %v1702_v27, %v15056_v55  ;;  %v1570_v13 = vadd.f32 %v8409_v5, %v1339_v35  ;;  %v2608_v16 = vrot.slane %v2518_v25, 2  ;;  %v2749_v27 = vmul.f32 %v7554_v43, %v15041_v9 }
 0x15f   : > { %15057 = vst [vmem:[#allocation116_spill] sm:$0xff] %v8440_v26  ;;  %v4103_v55 = vadd.f32 %v8314_v61, %v3859_v21  ;;  %v15058_v29 = vrot.slane %v8397_v45, 1  ;;  %v14209_v35 = vrot.slane %v8433_v12, 2  ;;  %v14208_v31 = vrot.slane %v8440_v26, 2 }
 0x160   : > { %v1814_v20 = vadd.f32 %v1704_v28, %v1570_v13  ;;  %v2845_v30 = vrot.slane %v2749_v27, 2  ;;  %v2993_v25 = vmul.f32 %v7558_v46, %v15035_v15  ;;  %v8452_v5 = vmul.f32 %v7558_v46, %v15047_v36 }
 0x161   : > { %v1942_v6 = vsel %vm1240_vm5, %v1940_v14, %v15058_v29  ;;  %v4334_v43 = vadd.f32 %v8319_v0, %v4103_v55  ;;  %v15059_v21 = vrot.slane %v8413_v4, 1  ;;  %v3224_v14 = vmul.f32 %v7579_v59, %v15032_v23 }
 0x162   : > { %v2045_v61 = vadd.f32 %v1942_v6, %v1814_v20  ;;  %v15060_v13 = vrot.slane %v8422_v39, 2  ;;  %v8468_v29 = vsel %vm2383_vm6, %v2608_v16, %v14209_v35  ;;  %v2847_v0 = vsel %vm2383_vm6, %v2845_v30, %v14208_v31 }
 0x163   : > { %v2167_v28 = vsel %vm1240_vm5, %v2165_v10, %v15059_v21  ;;  %15062 = vst [vmem:[#allocation118_spill] sm:$0xff] %v8468_v29  ;;  %v8475_v10 = vmul.f32 %v7579_v59, %v15045_v7  ;;  %v4552_v55 = vadd.f32 %v8324_v34, %v4334_v43  ;;  %v3083_v6 = vrot.slane %v2993_v25, 2 }
 0x164   : > { %v8463_v27 = vsel %vm2383_vm6, %v2384_v18, %v15060_v13  ;;  %v2263_v20 = vadd.f32 %v2167_v28, %v2045_v61  ;;  %v3442_v18 = vmul.f32 %v7560_v47, %v15032_v23  ;;  %v3308_v13 = vrot.slane %v3224_v14, 2 }
 0x165   : > { %15061 = vst [vmem:[#allocation117_spill] sm:$0xff] %v8463_v27  ;;  %v8483_v16 = vmul.f32 %v7560_v47, %v15045_v7  ;;  %v3661_v30 = vmul.f32 %v7562_v48, %v15035_v15  ;;  %v4770_v31 = vadd.f32 %v8332_v60, %v4552_v55  ;;  %v8492_v34 = vmul.f32 %v7562_v48, %v15047_v36 }
 0x166   : > { %v2482_v35 = vadd.f32 %v8463_v27, %v2263_v20  ;;  %v3527_v25 = vrot.slane %v3442_v18, 3  ;;  %v3892_v14 = vmul.f32 %v7567_v52, %v15041_v9  ;;  %v8502_v20 = vmul.f32 %v7567_v52, %v15049_v63 }
 0x167   : > { %15063 = vst [vmem:[#allocation119_spill] sm:$0xff] %v8492_v34  ;;  %v3751_v28 = vrot.slane %v3661_v30, 3  ;;  %v5001_v21 = vadd.f32 %v8345_v56, %v4770_v31  ;;  %v15064_v43 = vrot.slane %v8452_v5, 2  ;;  %v4136_v30 = vmul.f32 %v7569_v53, %v15035_v15 }
 0x168   : > { %v2713_v26 = vadd.f32 %v8468_v29, %v2482_v35  ;;  %v3988_v27 = vrot.slane %v3892_v14, 3  ;;  %v8511_v61 = vmul.f32 %v7569_v53, %v15047_v36  ;;  %v15065_v35 = vrot.slane %v8475_v10, 2 }
 0x169   : > { %v3085_v18 = vsel %vm2383_vm6, %v3083_v6, %v15064_v43  ;;  %v5245_v56 = vadd.f32 %v8350_v1, %v5001_v21  ;;  %v14215_v60 = vrot.slane %v8502_v20, 3  ;;  %v15066_v29 = vrot.slane %v8483_v16, 3 }
 0x16a   : > { %v2957_v31 = vadd.f32 %v2847_v0, %v2713_v26  ;;  %v3310_v55 = vsel %vm2383_vm6, %v3308_v13, %v15065_v35  ;;  %v15068_v43 = vrot.slane %v8492_v34, 3  ;;  %v4367_v1 = vmul.f32 %v7617_v19, %v15032_v23 }
 0x16b   : > { %v8521_v6 = vsel %vm3526_vm7, %v3527_v25, %v15066_v29  ;;  %v8532_v26 = vmul.f32 %v7617_v19, %v15045_v7  ;;  %v5476_v0 = vadd.f32 %v8355_v8, %v5245_v56  ;;  %v4226_v13 = vrot.slane %v4136_v30, 3 }
 0x16c   : > { %15067 = vst [vmem:[#allocation120_spill] sm:$0xff] %v8521_v6  ;;  %v8526_v14 = vsel %vm3526_vm7, %v3751_v28, %v15068_v43  ;;  %v3188_v21 = vadd.f32 %v3085_v18, %v2957_v31  ;;  %v4585_v29 = vmul.f32 %v15018_v62, %v15032_v23  ;;  %v3990_v25 = vsel %vm3526_vm7, %v3988_v27, %v14215_v60 }
 0x16d   : > { %15069 = vst [vmem:[#allocation121_spill] sm:$0xff] %v8526_v14  ;;  %v14219_v28 = vrot.slane %v8511_v61, 3  ;;  %v4451_v35 = vrot.slane %v4367_v1, 3  ;;  %v8543_v43 = vmul.f32 %v15018_v62, %v15045_v7  ;;  %v8546_v34 = vadd.f32 %v8392_v17, %v5476_v0 }
 0x16e   : > { %v3406_v8 = vadd.f32 %v3310_v55, %v3188_v21  ;;  %v4803_v30 = vmul.f32 %v15019_v11, %v15035_v15  ;;  %v4669_v56 = vrot.slane %v4585_v29, 4  ;;  %v8554_v27 = vmul.f32 %v15019_v11, %v15047_v36 }
 0x16f   : > { %15070 = vst [vmem:[#allocation122_spill] sm:$0xff] %v8546_v34  ;;  %v5034_v1 = vmul.f32 %v14991_v54, %v15041_v9  ;;  %5954 = vrot.lane.b32.xlu0 %v8546_v34, %s7432_s8  ;;  %v8563_v0 = vmul.f32 %v14991_v54, %v15049_v63  ;;  %v5278_v21 = vmul.f32 %v14993_v51, %v15035_v15 }
 0x170   : > { %v3625_v17 = vadd.f32 %v8521_v6, %v3406_v8  ;;  %v4893_v55 = vrot.slane %v4803_v30, 4  ;;  %5761 = vrot.lane.b32.xlu1 %v8546_v34, %s7431_s7  ;;  %v4228_v29 = vsel %vm3526_vm7, %v4226_v13, %v14219_v28  ;;  %v14222_v60 = vrot.slane %v8554_v27, 4 }
 0x171   : > { %v5130_v31 = vrot.slane %v5034_v1, 4  ;;  %v8575_v8 = vmul.f32 %v14993_v51, %v15047_v36  ;;  %v5368_v6 = vrot.slane %v5278_v21, 4  ;;  %v5509_v15 = vmul.f32 %v15029_v58, %v15032_v23 }
 0x172   : > { %v3856_v30 = vadd.f32 %v8526_v14, %v3625_v17  ;;  %v15072_v34 = vrot.slane %v8532_v26, 3  ;;  %v8587_v1 = vmul.f32 %v15029_v58, %v15045_v7  ;;  %v8591_v28 = vmul.f32 %v15033_v2, %v15045_v7 }
 0x173   : > { %15071 = vst [vmem:[#allocation123_spill] sm:$0xff] %v8575_v8  ;;  %v15074_v21 = vrot.slane %v8543_v43, 4  ;;  %v15078_v13 = vrot.slane %v8563_v0, 4  ;;  %v5593_v23 = vrot.slane %v5509_v15, 4 }
 0x174   : > { %v4453_v9 = vsel %vm3526_vm7, %v4451_v35, %v15072_v34  ;;  %15073 = vst [vmem:[#allocation124_spill] sm:$0xff] %v8591_v28  ;;  %v4100_v17 = vadd.f32 %v3990_v25, %v3856_v30  ;;  %v8601_v34 = vsel %vm368_vm0, %v4893_v55, %v14222_v60  ;;  %v8605_v35 = vmul.f32 %v7527_v32, %v15047_v36 }
 0x175   : > { %v8596_v18 = vsel %vm368_vm0, %v4669_v56, %v15074_v21  ;;  %15076 = vst [vmem:[#allocation126_spill] sm:$0xff] %v8601_v34  ;;  %v5132_v14 = vsel %vm368_vm0, %v5130_v31, %v15078_v13  ;;  %v15079_v25 = vrot.slane %v8575_v8, 4  ;;  %v959_v60 = vmul.f32 %v15042_v22, %v15049_v63 }
 0x176   : > { %15075 = vst [vmem:[#allocation125_spill] sm:$0xff] %v8596_v18  ;;  %15077 = vst [vmem:[#allocation127_spill] sm:$0xff] %v8605_v35  ;;  %v4331_v21 = vadd.f32 %v4228_v29, %v4100_v17  ;;  %v923_v55 = vadd.f32 %v8605_v35, %v8591_v28  ;;  %v1158_v32 = vmul.f32 %v15043_v33, %v7823_v50  ;;  %v15081_v33 = vrot.slane %v8587_v1, 4 }
 0x177   : > { %v5370_v30 = vsel %vm368_vm0, %v5368_v6, %v15079_v25  ;;  %v1027_v31 = vmul.f32 %v15044_v24, %v15047_v36  ;;  %v1377_v13 = vmul.f32 %v7541_v37, %v15001_v57  ;;  %v15080_v6 = vld [vmem:[#allocation42_spill] sm:$0xff]  ;;  %v1852_v29 = vmul.f32 %v15050_v3, %v15001_v57 }
 0x178   : > { %v1608_v15 = vmul.f32 %v7543_v38, %v15080_v6  ;;  %v4549_v17 = vadd.f32 %v4453_v9, %v4331_v21  ;;  %v991_v25 = vadd.f32 %v959_v60, %v923_v55  ;;  %v1244_v56 = vrot.slane %v1158_v32, 1  ;;  %v15082_v32 = vld [vmem:[#allocation30_spill] sm:$0xff]  ;;  %v15085_v55 = vld [vmem:[#allocation28_spill] sm:$0xff] }
 0x179   : > { %v2083_v28 = vmul.f32 %v15053_v49, %v7823_v50  ;;  %v1468_v35 = vrot.slane %v1377_v13, 1  ;;  %v1943_v63 = vrot.slane %v1852_v29, 1  ;;  %v2301_v36 = vmul.f32 %v7549_v41, %v7823_v50 }
 0x17a   : > { %v1705_v8 = vrot.slane %v1608_v15, 1  ;;  %v4767_v37 = vadd.f32 %v8596_v18, %v4549_v17  ;;  %v5595_v38 = vsel %vm368_vm0, %v5593_v23, %v15081_v33  ;;  %v1057_v24 = vadd.f32 %v1027_v31, %v991_v25 }
 0x17b   : > { %v1093_v60 = vmul.f32 %v7547_v40, %v15045_v7  ;;  %v15083_v9 = vrot.slane %v15082_v32, 1  ;;  %v15086_v13 = vrot.slane %v15085_v55, 1  ;;  %v15088_v29 = vrot.slane %v8383_v44, 1 }
 0x17c   : > { %v2168_v18 = vrot.slane %v2083_v28, 1  ;;  %v4998_v23 = vadd.f32 %v8601_v34, %v4767_v37  ;;  %v2387_v31 = vrot.slane %v2301_v36, 2  ;;  %v2520_v25 = vmul.f32 %v7552_v42, %v15001_v57 }
 0x17d   : > { %v8641_v21 = vsel %vm1240_vm5, %v15083_v9, %v1244_v56  ;;  %v8646_v15 = vsel %vm1240_vm5, %v15086_v13, %v1468_v35  ;;  %v1706_v17 = vsel %vm1240_vm5, %v15088_v29, %v1705_v8  ;;  %v1121_v33 = vadd.f32 %v1093_v60, %v1057_v24  ;;  %v15090_v9 = vld [vmem:[#allocation13_spill] sm:$0xff] }
 0x17e   : > { %15084 = vst [vmem:[#allocation30_spill] sm:$0xff] %v8641_v21  ;;  %15087 = vst [vmem:[#allocation28_spill] sm:$0xff] %v8646_v15  ;;  %v15089_v56 = vrot.slane %v8397_v45, 1  ;;  %v2751_v35 = vmul.f32 %v15090_v9, %v15080_v6  ;;  %v2995_v44 = vmul.f32 %v7558_v46, %v15001_v57  ;;  %v3226_v28 = vmul.f32 %v7579_v59, %v7823_v50 }
 0x17f   : > { %v5242_v8 = vadd.f32 %v5132_v14, %v4998_v23  ;;  %v1340_v37 = vadd.f32 %v8641_v21, %v1121_v33  ;;  %v2611_v24 = vrot.slane %v2520_v25, 2  ;;  %v3444_v36 = vmul.f32 %v7560_v47, %v7823_v50 }
 0x180   : > { %v1944_v32 = vsel %vm1240_vm5, %v15089_v56, %v1943_v63  ;;  %v2848_v60 = vrot.slane %v2751_v35, 2  ;;  %v3086_v45 = vrot.slane %v2995_v44, 2  ;;  %v3311_v55 = vrot.slane %v3226_v28, 2  ;;  %v15096_v35 = vld [vmem:[#allocation116_spill] sm:$0xff] }
 0x181   : > { %v3663_v63 = vmul.f32 %v7562_v48, %v15001_v57  ;;  %v5473_v13 = vadd.f32 %v5370_v30, %v5242_v8  ;;  %v1571_v29 = vadd.f32 %v8646_v15, %v1340_v37  ;;  %v15091_v56 = vrot.slane %v8413_v4, 1 }
 0x182   : > { %v15092_v14 = vrot.slane %v8422_v39, 2  ;;  %v15094_v33 = vrot.slane %v8433_v12, 2  ;;  %v15097_v44 = vrot.slane %v15096_v35, 2  ;;  %v15098_v28 = vrot.slane %v8452_v5, 2 }
 0x183   : > { %v2169_v34 = vsel %vm1240_vm5, %v15091_v56, %v2168_v18  ;;  %v3530_v8 = vrot.slane %v3444_v36, 3  ;;  %v8688_v18 = vadd.f32 %v5595_v38, %v5473_v13  ;;  %v1815_v39 = vadd.f32 %v1706_v17, %v1571_v29 }
 0x184   : > { %v8675_v23 = vsel %vm2383_vm6, %v15092_v14, %v2387_v31  ;;  %v8680_v25 = vsel %vm2383_vm6, %v15094_v33, %v2611_v24  ;;  %v2849_v30 = vsel %vm2383_vm6, %v15097_v44, %v2848_v60  ;;  %v3087_v4 = vsel %vm2383_vm6, %v15098_v28, %v3086_v45  ;;  %v15103_v44 = vld [vmem:[#allocation119_spill] sm:$0xff] }
 0x185   : > { %15093 = vst [vmem:[#allocation128_spill] sm:$0xff] %v8675_v23  ;;  %15095 = vst [vmem:[#allocation129_spill] sm:$0xff] %v8680_v25  ;;  %v15100_v31 = vrot.slane %v8475_v10, 2  ;;  %v3894_v12 = vmul.f32 %v7567_v52, %v15080_v6  ;;  %v3754_v24 = vrot.slane %v3663_v63, 3  ;;  %v4138_v56 = vmul.f32 %v7569_v53, %v15001_v57  ;;  %5755 = vrot.lane.b32.xlu0 %v8688_v18, %s7431_s7 }
 0x186   : > { %15099 = vst [vmem:[#allocation116_spill] sm:$0xff] %v8688_v18  ;;  %v4369_v5 = vmul.f32 %v7617_v19, %v7823_v50  ;;  %v4587_v36 = vmul.f32 %v15018_v62, %v7823_v50  ;;  %v2046_v38 = vadd.f32 %v1944_v32, %v1815_v39  ;;  %v4805_v17 = vmul.f32 %v15019_v11, %v15001_v57 }
 0x187   : > { %v3312_v37 = vsel %vm2383_vm6, %v15100_v31, %v3311_v55  ;;  %v3991_v10 = vrot.slane %v3894_v12, 3  ;;  %v5036_v60 = vmul.f32 %v14991_v54, %v15080_v6  ;;  %v4229_v45 = vrot.slane %v4138_v56, 3 }
 0x188   : > { %v4454_v55 = vrot.slane %v4369_v5, 3  ;;  %v4672_v63 = vrot.slane %v4587_v36, 4  ;;  %v5280_v13 = vmul.f32 %v14993_v51, %v15001_v57  ;;  %v2264_v29 = vadd.f32 %v2169_v34, %v2046_v38 }
 0x189   : > { %v15101_v14 = vrot.slane %v8483_v16, 3  ;;  %v4896_v32 = vrot.slane %v4805_v17, 4  ;;  %v5133_v35 = vrot.slane %v5036_v60, 4  ;;  %v15104_v28 = vrot.slane %v15103_v44, 3  ;;  %5948 = vrot.lane.b32.xlu0 %v8688_v18, %s7432_s8  ;;  %v15114_v17 = vld [vmem:[#allocation31_spill] sm:$0xff] }
 0x18a   : > { %v15106_v31 = vrot.slane %v8502_v20, 3  ;;  %v15107_v56 = vrot.slane %v8511_v61, 3  ;;  %v15108_v16 = vrot.slane %v8532_v26, 3  ;;  %v5371_v5 = vrot.slane %v5280_v13, 4  ;;  %v15115_v60 = vld [vmem:[#allocation51_spill] sm:$0xff] }
 0x18b   : > { %v8712_v33 = vsel %vm3526_vm7, %v15101_v14, %v3530_v8  ;;  %v8717_v39 = vsel %vm3526_vm7, %v15104_v28, %v3754_v24  ;;  %v2483_v8 = vadd.f32 %v8675_v23, %v2264_v29  ;;  %v15109_v24 = vrot.slane %v8543_v43, 4  ;;  %v15116_v13 = vld [vmem:[#allocation43_spill] sm:$0xff]  ;;  %v15117_v29 = vld [vmem:[#allocation5_spill] sm:$0xff]  ;;  %v15118_v14 = vld [vmem:[#allocation6_spill] sm:$0xff] }
 0x18c   : > { %15102 = vst [vmem:[#allocation130_spill] sm:$0xff] %v8712_v33  ;;  %15105 = vst [vmem:[#allocation119_spill] sm:$0xff] %v8717_v39  ;;  %v3992_v12 = vsel %vm3526_vm7, %v15106_v31, %v3991_v10  ;;  %v8725_v57 = vsel %vm3526_vm7, %v15107_v56, %v4229_v45  ;;  %v8730_v34 = vsel %vm3526_vm7, %v15108_v16, %v4454_v55  ;;  %v15111_v36 = vrot.slane %v8554_v27, 4  ;;  %v15119_v44 = vld [vmem:[#allocation111_spill] sm:$0xff]  ;;  %v15120_v28 = vld [vmem:[#allocation41_spill] sm:$0xff] }
 0x18d   : > { %v8738_v20 = vsel %vm368_vm0, %v15109_v24, %v4672_v63  ;;  %v5511_v61 = vmul.f32 %v15029_v58, %v7823_v50  ;;  %v15113_v38 = vrot.slane %v8563_v0, 4  ;;  %v836_v43 = vmul.f32 %v15033_v2, %v15114_v17  ;;  %v15122_v31 = vld [vmem:[#allocation8_spill] sm:$0xff] }
 0x18e   : > { %15110 = vst [vmem:[#allocation131_spill] sm:$0xff] %v8738_v20  ;;  %v8745_v26 = vsel %vm368_vm0, %v15111_v36, %v4896_v32  ;;  %v962_v45 = vmul.f32 %v15042_v22, %v15115_v60  ;;  %v2714_v55 = vadd.f32 %v8680_v25, %v2483_v8  ;;  %v1030_v27 = vmul.f32 %v15117_v29, %v15116_v13  ;;  %v15124_v24 = vld [vmem:[#allocation68_spill] sm:$0xff]  ;;  %v15125_v25 = vld [vmem:[#allocation123_spill] sm:$0xff] }
 0x18f   : > { %15112 = vst [vmem:[#allocation132_spill] sm:$0xff] %v8745_v26  ;;  %v8750_v10 = vsel %vm368_vm0, %v15113_v38, %v5133_v35  ;;  %v5596_v63 = vrot.slane %v5511_v61, 4  ;;  %v1162_v32 = vmul.f32 %v15118_v14, %v15114_v17  ;;  %v926_v0 = vadd.f32 %v15119_v44, %v836_v43 }
 0x190   : > { %v8764_v35 = vmul.f32 %v15118_v14, %v15120_v28  ;;  %v1612_v56 = vmul.f32 %v15122_v31, %v15115_v60  ;;  %v8770_v16 = vmul.f32 %v15122_v31, %v15045_v7  ;;  %v2958_v8 = vadd.f32 %v2849_v30, %v2714_v55  ;;  %v15127_v30 = vld [vmem:[#allocation52_spill] sm:$0xff] }
 0x191   : > { %v1096_v61 = vmul.f32 %v7547_v40, %v15124_v24  ;;  %v1251_v36 = vrot.slane %v1162_v32, 1  ;;  %v1856_v38 = vmul.f32 %v15050_v3, %v15116_v13  ;;  %v994_v43 = vadd.f32 %v962_v45, %v926_v0 }
 0x192   : > { %15121 = vst [vmem:[#allocation31_spill] sm:$0xff] %v8764_v35  ;;  %15123 = vst [vmem:[#allocation5_spill] sm:$0xff] %v8770_v16  ;;  %v14245_v44 = vrot.slane %v8764_v35, 1  ;;  %v1712_v18 = vrot.slane %v1612_v56, 1  ;;  %v3189_v21 = vadd.f32 %v3087_v4, %v2958_v8  ;;  %v15126_v15 = vrot.slane %v15125_v25, 4  ;;  %v15130_v4 = vld [vmem:[#allocation97_spill] sm:$0xff] }
 0x193   : > { %v8785_v55 = vmul.f32 %v15050_v3, %v15127_v30  ;;  %v2087_v32 = vmul.f32 %v15053_v49, %v15124_v24  ;;  %v15129_v45 = vrot.slane %v8587_v1, 4  ;;  %v1060_v56 = vadd.f32 %v1030_v27, %v994_v43  ;;  %v15136_v43 = vld [vmem:[#allocation33_spill] sm:$0xff] }
 0x194   : > { %v8781_v50 = vsel %vm368_vm0, %v15126_v15, %v5371_v5  ;;  %v1950_v23 = vrot.slane %v1856_v38, 1  ;;  %v8796_v25 = vmul.f32 %v15053_v49, %v15130_v4  ;;  %v3407_v15 = vadd.f32 %v3312_v37, %v3189_v21 }
 0x195   : > { %15128 = vst [vmem:[#allocation111_spill] sm:$0xff] %v8785_v55  ;;  %v8792_v0 = vsel %vm368_vm0, %v15129_v45, %v5596_v63  ;;  %v1253_v5 = vsel %vm1240_vm5, %v1251_v36, %v14245_v44  ;;  %v14248_v8 = vrot.slane %v8785_v55, 1  ;;  %v2305_v6 = vmul.f32 %v7549_v41, %v15114_v17 }
 0x196   : > { %15131 = vst [vmem:[#allocation41_spill] sm:$0xff] %v8796_v25  ;;  %v1124_v1 = vadd.f32 %v1096_v61, %v1060_v56  ;;  %v15132_v63 = vrot.slane %v8770_v16, 1  ;;  %v8809_v38 = vmul.f32 %v7549_v41, %v15120_v28  ;;  %v2755_v21 = vmul.f32 %v15090_v9, %v15115_v60 }
 0x197   : > { %v3626_v37 = vadd.f32 %v8712_v33, %v3407_v15  ;;  %v2175_v36 = vrot.slane %v2087_v32, 1  ;;  %v8817_v45 = vmul.f32 %v15090_v9, %v15045_v7  ;;  %v2394_v56 = vrot.slane %v2305_v6, 2 }
 0x198   : > { %v1714_v27 = vsel %vm1240_vm5, %v1712_v18, %v15132_v63  ;;  %15133 = vst [vmem:[#allocation123_spill] sm:$0xff] %v8809_v38  ;;  %v1343_v61 = vadd.f32 %v1253_v5, %v1124_v1  ;;  %v1952_v18 = vsel %vm1240_vm5, %v1950_v23, %v14248_v8  ;;  %v2855_v16 = vrot.slane %v2755_v21, 2 }
 0x199   : > { %15134 = vst [vmem:[#allocation133_spill] sm:$0xff] %v8817_v45  ;;  %v3857_v44 = vadd.f32 %v8717_v39, %v3626_v37  ;;  %v2999_v32 = vmul.f32 %v7558_v46, %v15116_v13  ;;  %v8828_v15 = vmul.f32 %v7558_v46, %v15127_v30  ;;  %v3230_v23 = vmul.f32 %v7579_v59, %v15124_v24 }
 0x19a   : > { %v1574_v33 = vadd.f32 %v15136_v43, %v1343_v61  ;;  %v8836_v6 = vmul.f32 %v7579_v59, %v15130_v4  ;;  %v15138_v21 = vrot.slane %v8796_v25, 1  ;;  %v3448_v61 = vmul.f32 %v7560_v47, %v15114_v17 }
 0x19b   : > { %15135 = vst [vmem:[#allocation134_spill] sm:$0xff] %v8828_v15  ;;  %v4101_v1 = vadd.f32 %v3992_v12, %v3857_v44  ;;  %v3093_v8 = vrot.slane %v2999_v32, 2  ;;  %v14253_v63 = vrot.slane %v8828_v15, 2  ;;  %v3318_v55 = vrot.slane %v3230_v23, 2 }
 0x19c   : > { %15137 = vst [vmem:[#allocation33_spill] sm:$0xff] %v8836_v6  ;;  %v2177_v37 = vsel %vm1240_vm5, %v2175_v36, %v15138_v21  ;;  %v1818_v39 = vadd.f32 %v1714_v27, %v1574_v33  ;;  %v14252_v43 = vrot.slane %v8836_v6, 2  ;;  %v15139_v35 = vrot.slane %v8809_v38, 2 }
 0x19d   : > { %v4332_v5 = vadd.f32 %v8725_v57, %v4101_v1  ;;  %v8851_v44 = vmul.f32 %v7560_v47, %v15120_v28  ;;  %v3898_v36 = vmul.f32 %v7567_v52, %v15115_v60  ;;  %v15141_v27 = vrot.slane %v8817_v45, 2 }
 0x19e   : > { %v2396_v12 = vsel %vm2383_vm6, %v2394_v56, %v15139_v35  ;;  %v2049_v33 = vadd.f32 %v1952_v18, %v1818_v39  ;;  %v3537_v23 = vrot.slane %v3448_v61, 3  ;;  %v8860_v57 = vmul.f32 %v7567_v52, %v15045_v7  ;;  %v15146_v61 = vld [vmem:[#allocation118_spill] sm:$0xff] }
 0x19f   : > { %15140 = vst [vmem:[#allocation135_spill] sm:$0xff] %v8851_v44  ;;  %v2857_v32 = vsel %vm2383_vm6, %v2855_v16, %v15141_v27  ;;  %v4550_v1 = vadd.f32 %v8730_v34, %v4332_v5  ;;  %v3095_v35 = vsel %vm2383_vm6, %v3093_v8, %v14253_v63  ;;  %v14256_v56 = vrot.slane %v8851_v44, 3 }
 0x1a0   : > { %15142 = vst [vmem:[#allocation136_spill] sm:$0xff] %v8860_v57  ;;  %v4142_v39 = vmul.f32 %v7569_v53, %v15116_v13  ;;  %v2267_v18 = vadd.f32 %v2177_v37, %v2049_v33  ;;  %v3320_v16 = vsel %vm2383_vm6, %v3318_v55, %v14252_v43  ;;  %v8874_v21 = vmul.f32 %v7569_v53, %v15127_v30 }
 0x1a1   : > { %v4373_v34 = vmul.f32 %v7617_v19, %v15124_v24  ;;  %v4768_v5 = vadd.f32 %v8738_v20, %v4550_v1  ;;  %v3998_v8 = vrot.slane %v3898_v36, 3  ;;  %v8882_v27 = vmul.f32 %v7617_v19, %v15130_v4 }
 0x1a2   : > { %15143 = vst [vmem:[#allocation137_spill] sm:$0xff] %v8874_v21  ;;  %v2486_v37 = vadd.f32 %v2396_v12, %v2267_v18  ;;  %v3539_v55 = vsel %vm3526_vm7, %v3537_v23, %v14256_v56  ;;  %v4236_v33 = vrot.slane %v4142_v39, 3  ;;  %v4591_v36 = vmul.f32 %v15018_v62, %v15114_v17 }
 0x1a3   : > { %15144 = vst [vmem:[#allocation138_spill] sm:$0xff] %v8882_v27  ;;  %v4999_v63 = vadd.f32 %v8745_v26, %v4768_v5  ;;  %v4461_v6 = vrot.slane %v4373_v34, 3  ;;  %v8893_v1 = vmul.f32 %v15018_v62, %v15120_v28  ;;  %v5040_v23 = vmul.f32 %v14991_v54, %v15115_v60 }
 0x1a4   : > { %v2717_v20 = vadd.f32 %v15146_v61, %v2486_v37  ;;  %v8901_v39 = vmul.f32 %v14991_v54, %v15045_v7  ;;  %v15148_v34 = vrot.slane %v8860_v57, 3  ;;  %v4679_v5 = vrot.slane %v4591_v36, 4 }
 0x1a5   : > { %15145 = vst [vmem:[#allocation139_spill] sm:$0xff] %v8893_v1  ;;  %v5243_v18 = vadd.f32 %v8750_v10, %v4999_v63  ;;  %v14260_v56 = vrot.slane %v8893_v1, 4  ;;  %v5140_v61 = vrot.slane %v5040_v23, 4  ;;  %v5284_v12 = vmul.f32 %v14993_v51, %v15116_v13  ;;  %v15158_v13 = vld [vmem:[#allocation77_spill] sm:$0xff] }
 0x1a6   : > { %15147 = vst [vmem:[#allocation118_spill] sm:$0xff] %v8901_v39  ;;  %v4000_v17 = vsel %vm3526_vm7, %v3998_v8, %v15148_v34  ;;  %v2961_v43 = vadd.f32 %v2857_v32, %v2717_v20  ;;  %v14259_v37 = vrot.slane %v8901_v39, 4  ;;  %v15149_v60 = vrot.slane %v8874_v21, 3  ;;  %v15153_v34 = vld [vmem:[#allocation40_spill] sm:$0xff] }
 0x1a7   : > { %v5474_v26 = vadd.f32 %v8781_v50, %v5243_v18  ;;  %v8917_v63 = vmul.f32 %v14993_v51, %v15127_v30  ;;  %v5515_v8 = vmul.f32 %v15029_v58, %v15124_v24  ;;  %v15151_v32 = vrot.slane %v8882_v27, 3 }
 0x1a8   : > { %v4238_v10 = vsel %vm3526_vm7, %v4236_v33, %v15149_v60  ;;  %v3192_v20 = vadd.f32 %v3095_v35, %v2961_v43  ;;  %v5378_v23 = vrot.slane %v5284_v12, 4  ;;  %v8926_v50 = vmul.f32 %v15029_v58, %v15130_v4  ;;  %v15154_v58 = vld [vmem:[#allocation35_spill] sm:$0xff] }
 0x1a9   : > { %15150 = vst [vmem:[#allocation140_spill] sm:$0xff] %v8917_v63  ;;  %v4463_v36 = vsel %vm3526_vm7, %v4461_v6, %v15151_v32  ;;  %v8929_v18 = vadd.f32 %v8792_v0, %v5474_v26  ;;  %v4681_v60 = vsel %vm368_vm0, %v4679_v5, %v14260_v56  ;;  %v14267_v33 = vrot.slane %v8917_v63, 4  ;;  %v15155_v12 = vld [vmem:[#allocation3_spill] sm:$0xff]  ;;  %v15156_v26 = vld [vmem:[#allocation57_spill] sm:$0xff] }
 0x1aa   : > { %v848_v43 = vmul.f32 %v15033_v2, %v15153_v34  ;;  %v3410_v35 = vadd.f32 %v3320_v16, %v3192_v20  ;;  %v8940_v6 = vsel %vm368_vm0, %v5140_v61, %v14259_v37  ;;  %v910_v32 = vmul.f32 %v15155_v12, %v15154_v58  ;;  %v15157_v20 = vld [vmem:[#allocation56_spill] sm:$0xff] }
 0x1ab   : > { %15152 = vst [vmem:[#allocation141_spill] sm:$0xff] %v8929_v18  ;;  %v978_v0 = vmul.f32 %v15042_v22, %v15156_v26  ;;  %5950 = vrot.lane.b32.xlu1 %v8929_v18, %s7432_s8  ;;  %5757 = vrot.lane.b32.xlu0 %v8929_v18, %s7431_s7  ;;  %v8953_v16 = vsel %vm368_vm0, %v5378_v23, %v14267_v33  ;;  %v5603_v5 = vrot.slane %v5515_v8, 4  ;;  %v15159_v18 = vld [vmem:[#allocation63_spill] sm:$0xff]  ;;  %v15162_v33 = vld [vmem:[#allocation44_spill] sm:$0xff]  ;;  %v15166_v57 = vrot.slane %v8926_v50, 4 }
 0x1ac   : > { %v1046_v37 = vmul.f32 %v15117_v29, %v15157_v20  ;;  %v3629_v56 = vadd.f32 %v3539_v55, %v3410_v35  ;;  %v942_v24 = vadd.f32 %v910_v32, %v848_v43  ;;  %v1112_v39 = vmul.f32 %v7547_v40, %v15158_v13  ;;  %v15161_v23 = vld [vmem:[#allocation7_spill] sm:$0xff]  ;;  %v15163_v43 = vld [vmem:[#allocation121_spill] sm:$0xff]  ;;  %v15164_v12 = vld [vmem:[#allocation76_spill] sm:$0xff] }
 0x1ad   : > { %v1180_v1 = vmul.f32 %v15118_v14, %v15153_v34  ;;  %v8964_v63 = vmul.f32 %v15118_v14, %v15159_v18  ;;  %v1402_v8 = vmul.f32 %v15161_v23, %v15154_v58  ;;  %v8970_v61 = vmul.f32 %v15161_v23, %v15162_v33 }
 0x1ae   : > { %v1636_v55 = vmul.f32 %v15122_v31, %v15156_v26  ;;  %v3860_v35 = vadd.f32 %v15163_v43, %v3629_v56  ;;  %v1010_v32 = vadd.f32 %v978_v0, %v942_v24  ;;  %v8977_v21 = vmul.f32 %v15122_v31, %v15164_v12  ;;  %v15167_v0 = vld [vmem:[#allocation75_spill] sm:$0xff] }
 0x1af   : > { %15160 = vst [vmem:[#allocation142_spill] sm:$0xff] %v8964_v63  ;;  %v1281_v27 = vrot.slane %v1180_v1, 1  ;;  %v5605_v44 = vsel %vm368_vm0, %v5603_v5, %v15166_v57  ;;  %v14278_v15 = vrot.slane %v8964_v63, 1  ;;  %v1510_v45 = vrot.slane %v1402_v8, 1 }
 0x1b0   : > { %15165 = vst [vmem:[#allocation121_spill] sm:$0xff] %v8977_v21  ;;  %v14280_v23 = vrot.slane %v8970_v61, 1  ;;  %v4104_v38 = vadd.f32 %v4000_v17, %v3860_v35  ;;  %v1076_v25 = vadd.f32 %v1046_v37, %v1010_v32  ;;  %v1752_v14 = vrot.slane %v1636_v55, 1  ;;  %v15168_v35 = vld [vmem:[#allocation99_spill] sm:$0xff] }
 0x1b1   : > { %v1880_v24 = vmul.f32 %v15050_v3, %v15157_v20  ;;  %v1283_v56 = vsel %vm1240_vm5, %v1281_v27, %v14278_v15  ;;  %v8992_v57 = vmul.f32 %v15050_v3, %v15167_v0  ;;  %v2111_v5 = vmul.f32 %v15053_v49, %v15158_v13 }
 0x1b2   : > { %v4335_v8 = vadd.f32 %v4238_v10, %v4104_v38  ;;  %v1140_v17 = vadd.f32 %v1112_v39, %v1076_v25  ;;  %v1512_v37 = vsel %vm1240_vm5, %v1510_v45, %v14280_v23  ;;  %v9002_v27 = vmul.f32 %v15053_v49, %v15168_v35 }
 0x1b3   : > { %v1990_v55 = vrot.slane %v1880_v24, 1  ;;  %v14282_v43 = vrot.slane %v8992_v57, 1  ;;  %v2215_v32 = vrot.slane %v2111_v5, 1  ;;  %v2323_v15 = vmul.f32 %v7549_v41, %v15153_v34 }
 0x1b4   : > { %v4553_v1 = vadd.f32 %v4463_v36, %v4335_v8  ;;  %v1359_v63 = vadd.f32 %v1283_v56, %v1140_v17  ;;  %v9008_v25 = vmul.f32 %v7549_v41, %v15159_v18  ;;  %v2545_v38 = vmul.f32 %v7552_v42, %v15154_v58 }
 0x1b5   : > { %v15170_v45 = vrot.slane %v8977_v21, 1  ;;  %v2424_v24 = vrot.slane %v2323_v15, 2  ;;  %v9018_v5 = vmul.f32 %v7552_v42, %v15162_v33  ;;  %v1992_v23 = vsel %vm1240_vm5, %v1990_v55, %v14282_v43 }
 0x1b6   : > { %15169 = vst [vmem:[#allocation143_spill] sm:$0xff] %v9008_v25  ;;  %v4771_v36 = vadd.f32 %v4681_v60, %v4553_v1  ;;  %v1590_v56 = vadd.f32 %v1512_v37, %v1359_v63  ;;  %v14283_v8 = vrot.slane %v9008_v25, 2  ;;  %v2653_v17 = vrot.slane %v2545_v38, 2 }
 0x1b7   : > { %v1754_v39 = vsel %vm1240_vm5, %v1752_v14, %v15170_v45  ;;  %15171 = vst [vmem:[#allocation144_spill] sm:$0xff] %v9018_v5  ;;  %v2779_v14 = vmul.f32 %v15090_v9, %v15156_v26  ;;  %v9029_v15 = vmul.f32 %v15090_v9, %v15164_v12  ;;  %v15173_v45 = vld [vmem:[#allocation126_spill] sm:$0xff]  ;;  %v15174_v63 = vrot.slane %v9002_v27, 1 }
 0x1b8   : > { %v5002_v10 = vadd.f32 %v15173_v45, %v4771_v36  ;;  %v1834_v60 = vadd.f32 %v1754_v39, %v1590_v56  ;;  %v3023_v37 = vmul.f32 %v7558_v46, %v15157_v20  ;;  %v2426_v55 = vsel %vm2383_vm6, %v2424_v24, %v14283_v8 }
 0x1b9   : > { %15172 = vst [vmem:[#allocation145_spill] sm:$0xff] %v9029_v15  ;;  %v2217_v1 = vsel %vm1240_vm5, %v2215_v32, %v15174_v63  ;;  %v2895_v38 = vrot.slane %v2779_v14, 2  ;;  %v14286_v43 = vrot.slane %v9029_v15, 2  ;;  %v9043_v21 = vmul.f32 %v7558_v46, %v15167_v0 }
 0x1ba   : > { %v5246_v39 = vadd.f32 %v8940_v6, %v5002_v10  ;;  %v2065_v36 = vadd.f32 %v1992_v23, %v1834_v60  ;;  %v15176_v56 = vrot.slane %v9018_v5, 2  ;;  %v3254_v45 = vmul.f32 %v7579_v59, %v15158_v13 }
 0x1bb   : > { %15175 = vst [vmem:[#allocation126_spill] sm:$0xff] %v9043_v21  ;;  %v3133_v63 = vrot.slane %v3023_v37, 2  ;;  %v9054_v14 = vmul.f32 %v7579_v59, %v15168_v35  ;;  %v3466_v8 = vmul.f32 %v7560_v47, %v15153_v34  ;;  %v2897_v60 = vsel %vm2383_vm6, %v2895_v38, %v14286_v43 }
 0x1bc   : > { %v2655_v32 = vsel %vm2383_vm6, %v2653_v17, %v15176_v56  ;;  %v5477_v6 = vadd.f32 %v8953_v16, %v5246_v39  ;;  %v2283_v23 = vadd.f32 %v2217_v1, %v2065_v36  ;;  %v3358_v10 = vrot.slane %v3254_v45, 2 }
 0x1bd   : > { %15177 = vst [vmem:[#allocation146_spill] sm:$0xff] %v9054_v14  ;;  %v9061_v17 = vmul.f32 %v7560_v47, %v15159_v18  ;;  %v14287_v37 = vrot.slane %v9054_v14, 2  ;;  %v3567_v56 = vrot.slane %v3466_v8, 3  ;;  %v3688_v24 = vmul.f32 %v7562_v48, %v15154_v58 }
 0x1be   : > { %v9069_v5 = vadd.f32 %v5605_v44, %v5477_v6  ;;  %v2502_v25 = vadd.f32 %v2426_v55, %v2283_v23  ;;  %v9074_v1 = vmul.f32 %v7562_v48, %v15162_v33  ;;  %v15181_v39 = vrot.slane %v9043_v21, 2  ;;  %v15201_v48 = vld [vmem:[#allocation5_spill] sm:$0xff] }
 0x1bf   : > { %15178 = vst [vmem:[#allocation147_spill] sm:$0xff] %v9061_v17  ;;  %v14290_v16 = vrot.slane %v9061_v17, 3  ;;  %v3796_v38 = vrot.slane %v3688_v24, 3  ;;  %v3922_v8 = vmul.f32 %v7567_v52, %v15156_v26  ;;  %v9083_v45 = vmul.f32 %v7567_v52, %v15164_v12 }
 0x1c0   : > { %15179 = vst [vmem:[#allocation148_spill] sm:$0xff] %v9069_v5  ;;  %15180 = vst [vmem:[#allocation149_spill] sm:$0xff] %v9074_v1  ;;  %v3135_v36 = vsel %vm2383_vm6, %v3133_v63, %v15181_v39  ;;  %5956 = vrot.lane.b32.xlu1 %v9069_v5, %s7432_s8  ;;  %5763 = vrot.lane.b32.xlu0 %v9069_v5, %s7431_s7  ;;  %v2733_v44 = vadd.f32 %v2655_v32, %v2502_v25  ;;  %v14291_v63 = vrot.slane %v9074_v1, 3 }
 0x1c1   : > { %15182 = vst [vmem:[#allocation150_spill] sm:$0xff] %v9083_v45  ;;  %v3360_v55 = vsel %vm2383_vm6, %v3358_v10, %v14287_v37  ;;  %v4166_v24 = vmul.f32 %v7569_v53, %v15157_v20  ;;  %v4038_v6 = vrot.slane %v3922_v8, 3  ;;  %v9098_v39 = vmul.f32 %v7569_v53, %v15167_v0 }
 0x1c2   : > { %v4397_v43 = vmul.f32 %v7617_v19, %v15158_v13  ;;  %v2977_v25 = vadd.f32 %v2897_v60, %v2733_v44  ;;  %v3569_v32 = vsel %vm3526_vm7, %v3567_v56, %v14290_v16  ;;  %v9107_v37 = vmul.f32 %v7617_v19, %v15168_v35 }
 0x1c3   : > { %15183 = vst [vmem:[#allocation151_spill] sm:$0xff] %v9098_v39  ;;  %v4276_v10 = vrot.slane %v4166_v24, 3  ;;  %v3798_v8 = vsel %vm3526_vm7, %v3796_v38, %v14291_v63  ;;  %v14296_v23 = vrot.slane %v9098_v39, 3  ;;  %v4609_v14 = vmul.f32 %v15018_v62, %v15153_v34 }
 0x1c4   : > { %15184 = vst [vmem:[#allocation152_spill] sm:$0xff] %v9107_v37  ;;  %v4501_v5 = vrot.slane %v4397_v43, 3  ;;  %v3208_v60 = vadd.f32 %v3135_v36, %v2977_v25  ;;  %v9118_v56 = vmul.f32 %v15018_v62, %v15159_v18  ;;  %v4830_v24 = vmul.f32 %v15019_v11, %v15154_v58 }
 0x1c5   : > { %v15186_v16 = vrot.slane %v9083_v45, 3  ;;  %v4709_v63 = vrot.slane %v4609_v14, 4  ;;  %v9127_v43 = vmul.f32 %v15019_v11, %v15162_v33  ;;  %v5064_v36 = vmul.f32 %v14991_v54, %v15156_v26 }
 0x1c6   : > { %15185 = vst [vmem:[#allocation153_spill] sm:$0xff] %v9118_v56  ;;  %v3426_v25 = vadd.f32 %v3360_v55, %v3208_v60  ;;  %v4278_v44 = vsel %vm3526_vm7, %v4276_v10, %v14296_v23  ;;  %v14300_v34 = vrot.slane %v9118_v56, 4  ;;  %v4938_v58 = vrot.slane %v4830_v24, 4  ;;  %v9152_v24 = vld [vmem:[%s14034_s3 + $0x18] ss:$0 sm:$0xff] }
 0x1c7   : > { %v4040_v38 = vsel %vm3526_vm7, %v4038_v6, %v15186_v16  ;;  %15187 = vst [vmem:[#allocation154_spill] sm:$0xff] %v9127_v43  ;;  %v14302_v45 = vrot.slane %v9127_v43, 4  ;;  %v9138_v14 = vmul.f32 %v14991_v54, %v15164_v12  ;;  %v5180_v16 = vrot.slane %v5064_v36, 4 }
 0x1c8   : > { %v5308_v6 = vmul.f32 %v14993_v51, %v15157_v20  ;;  %v3645_v1 = vadd.f32 %v3569_v32, %v3426_v25  ;;  %v15189_v55 = vrot.slane %v9107_v37, 3  ;;  %v9147_v10 = vmul.f32 %v14993_v51, %v15167_v0 }
 0x1c9   : > { %15188 = vst [vmem:[#allocation155_spill] sm:$0xff] %v9138_v14  ;;  %v5539_v36 = vmul.f32 %v9152_v24, %v15158_v13  ;;  %v4711_v32 = vsel %vm368_vm0, %v4709_v63, %v14300_v34  ;;  %v14304_v25 = vrot.slane %v9138_v14, 4  ;;  %v4940_v20 = vsel %vm368_vm0, %v4938_v58, %v14302_v45 }
 0x1ca   : > { %v4503_v60 = vsel %vm3526_vm7, %v4501_v5, %v15189_v55  ;;  %15190 = vst [vmem:[#allocation156_spill] sm:$0xff] %v9147_v10  ;;  %v5418_v23 = vrot.slane %v5308_v6, 4  ;;  %v9162_v5 = vmul.f32 %v9152_v24, %v15168_v35  ;;  %v3876_v55 = vadd.f32 %v3798_v8, %v3645_v1  ;;  %v15192_v8 = vld [vmem:[#allocation127_spill] sm:$0xff]  ;;  %v15195_v6 = vld [vmem:[#allocation74_spill] sm:$0xff] }
 0x1cb   : > { %v14308_v26 = vrot.slane %v9147_v10, 4  ;;  %v837_v13 = vmul.f32 %v15033_v2, %v15120_v28  ;;  %v5182_v63 = vsel %vm368_vm0, %v5180_v16, %v14304_v25  ;;  %v5643_v34 = vrot.slane %v5539_v36, 4  ;;  %v15193_v16 = vld [vmem:[#allocation42_spill] sm:$0xff] }
 0x1cc   : > { %15191 = vst [vmem:[#allocation157_spill] sm:$0xff] %v9162_v5  ;;  %v963_v56 = vmul.f32 %v15042_v22, %v15045_v7  ;;  %v4120_v1 = vadd.f32 %v4040_v38, %v3876_v55  ;;  %v1031_v28 = vmul.f32 %v15117_v29, %v15127_v30  ;;  %v1097_v14 = vmul.f32 %v7547_v40, %v15130_v4  ;;  %v15194_v36 = vld [vmem:[#allocation6_spill] sm:$0xff]  ;;  %v15196_v7 = vld [vmem:[#allocation53_spill] sm:$0xff] }
 0x1cd   : > { %v5420_v58 = vsel %vm368_vm0, %v5418_v23, %v14308_v26  ;;  %v927_v45 = vadd.f32 %v15192_v8, %v837_v13  ;;  %v1164_v25 = vmul.f32 %v15194_v36, %v15193_v16  ;;  %v1614_v43 = vmul.f32 %v15122_v31, %v15195_v6  ;;  %v15197_v23 = vld [vmem:[#allocation81_spill] sm:$0xff] }
 0x1ce   : > { %v1858_v38 = vmul.f32 %v15050_v3, %v15196_v7  ;;  %v4351_v55 = vadd.f32 %v4278_v44, %v4120_v1  ;;  %v2089_v13 = vmul.f32 %v15053_v49, %v15197_v23  ;;  %v2307_v8 = vmul.f32 %v7549_v41, %v15193_v16  ;;  %v15199_v44 = vld [vmem:[#allocation31_spill] sm:$0xff] }
 0x1cf   : > { %v995_v10 = vadd.f32 %v963_v56, %v927_v45  ;;  %v1254_v26 = vrot.slane %v1164_v25, 1  ;;  %v1715_v30 = vrot.slane %v1614_v43, 1  ;;  %v2757_v37 = vmul.f32 %v15090_v9, %v15195_v6  ;;  %v15203_v25 = vld [vmem:[#allocation111_spill] sm:$0xff] }
 0x1d0   : > { %v1953_v4 = vrot.slane %v1858_v38, 1  ;;  %v4569_v39 = vadd.f32 %v4503_v60, %v4351_v55  ;;  %v2178_v17 = vrot.slane %v2089_v13, 1  ;;  %v2397_v21 = vrot.slane %v2307_v8, 2 }
 0x1d1   : > { %v1061_v11 = vadd.f32 %v1031_v28, %v995_v10  ;;  %v15198_v15 = vrot.slane %v9162_v5, 4  ;;  %v15200_v56 = vrot.slane %v15199_v44, 1  ;;  %v15202_v42 = vrot.slane %v15201_v48, 1  ;;  %v15205_v28 = vld [vmem:[#allocation41_spill] sm:$0xff] }
 0x1d2   : > { %v15204_v38 = vrot.slane %v15203_v25, 1  ;;  %v4787_v60 = vadd.f32 %v4711_v32, %v4569_v39  ;;  %v15206_v55 = vrot.slane %v15205_v28, 1  ;;  %v2858_v8 = vrot.slane %v2757_v37, 2 }
 0x1d3   : > { %v5645_v45 = vsel %vm368_vm0, %v5643_v34, %v15198_v15  ;;  %v1255_v1 = vsel %vm1240_vm5, %v15200_v56, %v1254_v26  ;;  %v1716_v43 = vsel %vm1240_vm5, %v15202_v42, %v1715_v30  ;;  %v1125_v10 = vadd.f32 %v1097_v14, %v1061_v11  ;;  %v15207_v34 = vld [vmem:[#allocation123_spill] sm:$0xff]  ;;  %v15209_v56 = vld [vmem:[#allocation28_spill] sm:$0xff] }
 0x1d4   : > { %v1954_v9 = vsel %vm1240_vm5, %v15204_v38, %v1953_v4  ;;  %v2179_v13 = vsel %vm1240_vm5, %v15206_v55, %v2178_v17  ;;  %v15208_v15 = vrot.slane %v15207_v34, 2  ;;  %v3001_v48 = vmul.f32 %v7558_v46, %v15196_v7  ;;  %v15210_v55 = vld [vmem:[#allocation133_spill] sm:$0xff] }
 0x1d5   : > { %v3232_v42 = vmul.f32 %v7579_v59, %v15197_v23  ;;  %v3450_v30 = vmul.f32 %v7560_v47, %v15193_v16  ;;  %v5018_v4 = vadd.f32 %v4940_v20, %v4787_v60  ;;  %v1344_v11 = vadd.f32 %v1255_v1, %v1125_v10  ;;  %v15212_v60 = vld [vmem:[#allocation134_spill] sm:$0xff] }
 0x1d6   : > { %v2398_v44 = vsel %vm2383_vm6, %v15208_v15, %v2397_v21  ;;  %v3900_v26 = vmul.f32 %v7567_v52, %v15195_v6  ;;  %v4144_v17 = vmul.f32 %v7569_v53, %v15196_v7  ;;  %v3096_v37 = vrot.slane %v3001_v48, 2  ;;  %v15214_v15 = vld [vmem:[#allocation33_spill] sm:$0xff] }
 0x1d7   : > { %v3321_v39 = vrot.slane %v3232_v42, 2  ;;  %v3540_v21 = vrot.slane %v3450_v30, 3  ;;  %v4375_v14 = vmul.f32 %v7617_v19, %v15197_v23  ;;  %v5262_v32 = vadd.f32 %v5182_v63, %v5018_v4  ;;  %v15216_v30 = vld [vmem:[#allocation135_spill] sm:$0xff] }
 0x1d8   : > { %v1575_v25 = vadd.f32 %v15209_v56, %v1344_v11  ;;  %v4001_v38 = vrot.slane %v3900_v26, 3  ;;  %v4239_v28 = vrot.slane %v4144_v17, 3  ;;  %v15211_v20 = vrot.slane %v15210_v55, 2  ;;  %v15218_v26 = vld [vmem:[#allocation136_spill] sm:$0xff]  ;;  %v15220_v55 = vld [vmem:[#allocation137_spill] sm:$0xff] }
 0x1d9   : > { %v15213_v10 = vrot.slane %v15212_v60, 2  ;;  %v15215_v48 = vrot.slane %v15214_v15, 2  ;;  %v15217_v5 = vrot.slane %v15216_v30, 3  ;;  %v5493_v4 = vadd.f32 %v5420_v58, %v5262_v32 }
 0x1da   : > { %v2859_v1 = vsel %vm2383_vm6, %v15211_v20, %v2858_v8  ;;  %v1819_v11 = vadd.f32 %v1716_v43, %v1575_v25  ;;  %v15219_v17 = vrot.slane %v15218_v26, 3  ;;  %v4464_v8 = vrot.slane %v4375_v14, 3 }
 0x1db   : > { %v3097_v34 = vsel %vm2383_vm6, %v15213_v10, %v3096_v37  ;;  %v3322_v42 = vsel %vm2383_vm6, %v15215_v48, %v3321_v39  ;;  %v9239_v63 = vsel %vm3526_vm7, %v15217_v5, %v3540_v21  ;;  %v15221_v20 = vrot.slane %v15220_v55, 3 }
 0x1dc   : > { %v9244_v56 = vsel %vm3526_vm7, %v15219_v17, %v4001_v38  ;;  %v4593_v39 = vmul.f32 %v15018_v62, %v15193_v16  ;;  %v5042_v5 = vmul.f32 %v14991_v54, %v15195_v6  ;;  %v5286_v58 = vmul.f32 %v14993_v51, %v15196_v7  ;;  %v15223_v16 = vld [vmem:[#allocation3_spill] sm:$0xff]  ;;  %v15228_v17 = vld [vmem:[#allocation118_spill] sm:$0xff] }
 0x1dd   : > { %v9249_v37 = vsel %vm3526_vm7, %v15221_v20, %v4239_v28  ;;  %v9257_v43 = vadd.f32 %v5645_v45, %v5493_v4  ;;  %v2050_v21 = vadd.f32 %v1954_v9, %v1819_v11  ;;  %v5517_v14 = vmul.f32 %v9152_v24, %v15197_v23  ;;  %v15224_v9 = vld [vmem:[#allocation138_spill] sm:$0xff]  ;;  %v15226_v4 = vld [vmem:[#allocation139_spill] sm:$0xff] }
 0x1de   : > { %v849_v32 = vmul.f32 %v15033_v2, %v15159_v18  ;;  %v4682_v25 = vrot.slane %v4593_v39, 4  ;;  %v5143_v38 = vrot.slane %v5042_v5, 4  ;;  %v5381_v28 = vrot.slane %v5286_v58, 4  ;;  %v15230_v5 = vld [vmem:[#allocation140_spill] sm:$0xff] }
 0x1df   : > { %15222 = vst [vmem:[#allocation127_spill] sm:$0xff] %v9257_v43  ;;  %v911_v60 = vmul.f32 %v15223_v16, %v15162_v33  ;;  %5988 = vrot.lane.b32.xlu1 %v9257_v43, %s7432_s8  ;;  %5795 = vrot.lane.b32.xlu0 %v9257_v43, %s7431_s7  ;;  %v2268_v45 = vadd.f32 %v2179_v13, %v2050_v21  ;;  %v15225_v10 = vrot.slane %v15224_v9, 3  ;;  %v5606_v48 = vrot.slane %v5517_v14, 4 }
 0x1e0   : > { %v979_v30 = vmul.f32 %v15042_v22, %v15164_v12  ;;  %v15227_v11 = vrot.slane %v15226_v4, 4  ;;  %v15229_v55 = vrot.slane %v15228_v17, 4  ;;  %v1047_v39 = vmul.f32 %v15117_v29, %v15167_v0  ;;  %v15233_v4 = vld [vmem:[#allocation47_spill] sm:$0xff]  ;;  %v15236_v17 = vld [vmem:[#allocation62_spill] sm:$0xff] }
 0x1e1   : > { %v9272_v15 = vsel %vm3526_vm7, %v15225_v10, %v4464_v8  ;;  %v943_v13 = vadd.f32 %v911_v60, %v849_v32  ;;  %v2487_v8 = vadd.f32 %v2398_v44, %v2268_v45  ;;  %v15231_v58 = vrot.slane %v15230_v5, 4  ;;  %v15235_v32 = vld [vmem:[#allocation64_spill] sm:$0xff]  ;;  %v15237_v45 = vld [vmem:[#allocation129_spill] sm:$0xff]  ;;  %v15238_v5 = vld [vmem:[#allocation83_spill] sm:$0xff] }
 0x1e2   : > { %v9279_v26 = vsel %vm368_vm0, %v15227_v11, %v4682_v25  ;;  %v9284_v20 = vsel %vm368_vm0, %v15229_v55, %v5143_v38  ;;  %v1113_v14 = vmul.f32 %v7547_v40, %v15168_v35  ;;  %v15232_v25 = vld [vmem:[#allocation55_spill] sm:$0xff]  ;;  %v1638_v60 = vmul.f32 %v15122_v31, %v15235_v32  ;;  %v15240_v0 = vld [vmem:[#allocation142_spill] sm:$0xff] }
 0x1e3   : > { %v9291_v21 = vsel %vm368_vm0, %v15231_v58, %v5381_v28  ;;  %v1182_v9 = vmul.f32 %v15194_v36, %v15232_v25  ;;  %v1011_v10 = vadd.f32 %v979_v30, %v943_v13  ;;  %v15234_v38 = vld [vmem:[#allocation7_spill] sm:$0xff]  ;;  %v1882_v44 = vmul.f32 %v15050_v3, %v15236_v17 }
 0x1e4   : > { %v1404_v11 = vmul.f32 %v15234_v38, %v15233_v4  ;;  %v2718_v55 = vadd.f32 %v15237_v45, %v2487_v8  ;;  %v2113_v58 = vmul.f32 %v15053_v49, %v15238_v5  ;;  %v2325_v43 = vmul.f32 %v7549_v41, %v15232_v25 }
 0x1e5   : > { %v1284_v28 = vrot.slane %v1182_v9, 1  ;;  %v1077_v18 = vadd.f32 %v1047_v39, %v1011_v10  ;;  %v1755_v13 = vrot.slane %v1638_v60, 1  ;;  %v1993_v23 = vrot.slane %v1882_v44, 1  ;;  %v15243_v39 = vld [vmem:[#allocation121_spill] sm:$0xff] }
 0x1e6   : > { %v1513_v30 = vrot.slane %v1404_v11, 1  ;;  %v2962_v7 = vadd.f32 %v2859_v1, %v2718_v55  ;;  %v15239_v6 = vrot.slane %v8926_v50, 4  ;;  %v15241_v12 = vrot.slane %v15240_v0, 1 }
 0x1e7   : > { %v2218_v9 = vrot.slane %v2113_v58, 1  ;;  %v1141_v45 = vadd.f32 %v1113_v14, %v1077_v18  ;;  %v15242_v33 = vrot.slane %v8970_v61, 1  ;;  %v15244_v10 = vrot.slane %v15243_v39, 1  ;;  %v15247_v18 = vld [vmem:[#allocation12_spill] sm:$0xff] }
 0x1e8   : > { %v9311_v35 = vsel %vm368_vm0, %v15239_v6, %v5606_v48  ;;  %v1285_v8 = vsel %vm1240_vm5, %v15241_v12, %v1284_v28  ;;  %v2427_v1 = vrot.slane %v2325_v43, 2  ;;  %v3193_v60 = vadd.f32 %v3097_v34, %v2962_v7  ;;  %v15252_v39 = vld [vmem:[#allocation144_spill] sm:$0xff] }
 0x1e9   : > { %v1514_v41 = vsel %vm1240_vm5, %v15242_v33, %v1513_v30  ;;  %v1756_v11 = vsel %vm1240_vm5, %v15244_v10, %v1755_v13  ;;  %v15245_v50 = vrot.slane %v8992_v57, 1  ;;  %v15246_v0 = vrot.slane %v9002_v27, 1  ;;  %v15248_v33 = vld [vmem:[#allocation13_spill] sm:$0xff] }
 0x1ea   : > { %v2547_v48 = vmul.f32 %v15247_v18, %v15233_v4  ;;  %v1360_v61 = vadd.f32 %v1285_v8, %v1141_v45  ;;  %v2781_v14 = vmul.f32 %v15248_v33, %v15235_v32  ;;  %v3025_v44 = vmul.f32 %v7558_v46, %v15236_v17  ;;  %v15250_v8 = vld [vmem:[#allocation143_spill] sm:$0xff] }
 0x1eb   : > { %v1994_v6 = vsel %vm1240_vm5, %v15245_v50, %v1993_v23  ;;  %v2219_v12 = vsel %vm1240_vm5, %v15246_v0, %v2218_v9  ;;  %v3256_v7 = vmul.f32 %v7579_v59, %v15238_v5  ;;  %v3411_v57 = vadd.f32 %v3322_v42, %v3193_v60  ;;  %v15249_v23 = vld [vmem:[#allocation16_spill] sm:$0xff]  ;;  %v15254_v0 = vld [vmem:[#allocation145_spill] sm:$0xff] }
 0x1ec   : > { %v2656_v34 = vrot.slane %v2547_v48, 2  ;;  %v3468_v27 = vmul.f32 %v7560_v47, %v15232_v25  ;;  %v3690_v43 = vmul.f32 %v15249_v23, %v15233_v4  ;;  %v1591_v55 = vadd.f32 %v1514_v41, %v1360_v61  ;;  %v15256_v41 = vld [vmem:[#allocation126_spill] sm:$0xff] }
 0x1ed   : > { %v2898_v28 = vrot.slane %v2781_v14, 2  ;;  %v3136_v58 = vrot.slane %v3025_v44, 2  ;;  %v3361_v30 = vrot.slane %v3256_v7, 2  ;;  %v3630_v13 = vadd.f32 %v9239_v63, %v3411_v57  ;;  %v15258_v63 = vld [vmem:[#allocation119_spill] sm:$0xff]  ;;  %v15259_v57 = vld [vmem:[#allocation146_spill] sm:$0xff] }
 0x1ee   : > { %v15251_v9 = vrot.slane %v15250_v8, 2  ;;  %v15253_v10 = vrot.slane %v15252_v39, 2  ;;  %v3570_v60 = vrot.slane %v3468_v27, 3  ;;  %v1835_v50 = vadd.f32 %v1756_v11, %v1591_v55 }
 0x1ef   : > { %v15255_v48 = vrot.slane %v15254_v0, 2  ;;  %v15257_v61 = vrot.slane %v15256_v41, 2  ;;  %v3799_v44 = vrot.slane %v3690_v43, 3  ;;  %v3861_v7 = vadd.f32 %v15258_v63, %v3630_v13  ;;  %v15263_v13 = vld [vmem:[#allocation24_spill] sm:$0xff] }
 0x1f0   : > { %v2428_v45 = vsel %vm2383_vm6, %v15251_v9, %v2427_v1  ;;  %v2657_v42 = vsel %vm2383_vm6, %v15253_v10, %v2656_v34  ;;  %v15260_v8 = vrot.slane %v15259_v57, 2  ;;  %v15261_v9 = vld [vmem:[#allocation147_spill] sm:$0xff]  ;;  %v3924_v11 = vmul.f32 %v7567_v52, %v15235_v32 }
 0x1f1   : > { %v2899_v47 = vsel %vm2383_vm6, %v15255_v48, %v2898_v28  ;;  %v3137_v14 = vsel %vm2383_vm6, %v15257_v61, %v3136_v58  ;;  %v15262_v39 = vrot.slane %v15261_v9, 3  ;;  %v2066_v27 = vadd.f32 %v1994_v6, %v1835_v50  ;;  %v15264_v61 = vld [vmem:[#allocation149_spill] sm:$0xff] }
 0x1f2   : > { %v3362_v1 = vsel %vm2383_vm6, %v15260_v8, %v3361_v30  ;;  %v4168_v55 = vmul.f32 %v7569_v53, %v15236_v17  ;;  %v4399_v43 = vmul.f32 %v7617_v19, %v15238_v5  ;;  %v4611_v28 = vmul.f32 %v15018_v62, %v15232_v25  ;;  %v15268_v25 = vld [vmem:[#allocation151_spill] sm:$0xff] }
 0x1f3   : > { %v3571_v34 = vsel %vm3526_vm7, %v15262_v39, %v3570_v60  ;;  %v4105_v58 = vadd.f32 %v9244_v56, %v3861_v7  ;;  %v4041_v30 = vrot.slane %v3924_v11, 3  ;;  %v4832_v10 = vmul.f32 %v15263_v13, %v15233_v4  ;;  %v15266_v7 = vld [vmem:[#allocation150_spill] sm:$0xff] }
 0x1f4   : > { %v5066_v60 = vmul.f32 %v14991_v54, %v15235_v32  ;;  %v2284_v0 = vadd.f32 %v2219_v12, %v2066_v27  ;;  %v4279_v6 = vrot.slane %v4168_v55, 3  ;;  %v4504_v50 = vrot.slane %v4399_v43, 3  ;;  %v15270_v27 = vld [vmem:[#allocation152_spill] sm:$0xff] }
 0x1f5   : > { %v4712_v48 = vrot.slane %v4611_v28, 4  ;;  %v4336_v41 = vadd.f32 %v9249_v37, %v4105_v58  ;;  %v15265_v63 = vrot.slane %v15264_v61, 3  ;;  %v4941_v8 = vrot.slane %v4832_v10, 4  ;;  %v15274_v58 = vld [vmem:[#allocation154_spill] sm:$0xff] }
 0x1f6   : > { %v5183_v9 = vrot.slane %v5066_v60, 4  ;;  %v2503_v56 = vadd.f32 %v2428_v45, %v2284_v0  ;;  %v15267_v39 = vrot.slane %v15266_v7, 3  ;;  %v15269_v4 = vrot.slane %v15268_v25, 3  ;;  %v15276_v60 = vld [vmem:[#allocation155_spill] sm:$0xff]  ;;  %v15280_v7 = vld [vmem:[#allocation68_spill] sm:$0xff] }
 0x1f7   : > { %v3800_v57 = vsel %vm3526_vm7, %v15265_v63, %v3799_v44  ;;  %v15271_v55 = vrot.slane %v15270_v27, 3  ;;  %v4554_v43 = vadd.f32 %v9272_v15, %v4336_v41  ;;  %v15272_v44 = vld [vmem:[#allocation153_spill] sm:$0xff]  ;;  %v15275_v10 = vrot.slane %v15274_v58, 4  ;;  %v15279_v63 = vld [vmem:[#allocation43_spill] sm:$0xff] }
 0x1f8   : > { %v4042_v11 = vsel %vm3526_vm7, %v15267_v39, %v4041_v30  ;;  %v9383_v12 = vsel %vm3526_vm7, %v15269_v4, %v4279_v6  ;;  %v15273_v28 = vrot.slane %v15272_v44, 4  ;;  %v5310_v25 = vmul.f32 %v14993_v51, %v15236_v17  ;;  %v15281_v39 = vld [vmem:[#allocation96_spill] sm:$0xff] }
 0x1f9   : > { %v9388_v37 = vsel %vm3526_vm7, %v15271_v55, %v4504_v50  ;;  %v9399_v30 = vsel %vm368_vm0, %v15275_v10, %v4941_v8  ;;  %v2734_v4 = vadd.f32 %v2657_v42, %v2503_v56  ;;  %v15277_v0 = vrot.slane %v15276_v60, 4  ;;  %v15278_v50 = vld [vmem:[#allocation51_spill] sm:$0xff] }
 0x1fa   : > { %v9394_v45 = vsel %vm368_vm0, %v15273_v28, %v4712_v48  ;;  %v5541_v15 = vmul.f32 %v9152_v24, %v15238_v5  ;;  %v896_v48 = vmul.f32 %v15223_v16, %v15278_v50  ;;  %v4772_v41 = vadd.f32 %v9279_v26, %v4554_v43  ;;  %v15283_v28 = vld [vmem:[#allocation132_spill] sm:$0xff]  ;;  %v15284_v26 = vld [vmem:[#allocation54_spill] sm:$0xff] }
 0x1fb   : > { %v9406_v6 = vsel %vm368_vm0, %v15277_v0, %v5183_v9  ;;  %v5421_v61 = vrot.slane %v5310_v25, 4  ;;  %v964_v8 = vmul.f32 %v15042_v22, %v15279_v63  ;;  %v1032_v42 = vmul.f32 %v15117_v29, %v15280_v7  ;;  %v15282_v9 = vld [vmem:[#allocation65_spill] sm:$0xff] }
 0x1fc   : > { %v2978_v56 = vadd.f32 %v2899_v47, %v2734_v4  ;;  %v928_v27 = vadd.f32 %v896_v48, %v15281_v39  ;;  %v1098_v55 = vmul.f32 %v7547_v40, %v15282_v9  ;;  %v1381_v44 = vmul.f32 %v15234_v38, %v15278_v50  ;;  %v15285_v47 = vld [vmem:[#allocation156_spill] sm:$0xff] }
 0x1fd   : > { %v5003_v58 = vadd.f32 %v15283_v28, %v4772_v41  ;;  %v5646_v10 = vrot.slane %v5541_v15, 4  ;;  %v9425_v43 = vmul.f32 %v15234_v38, %v15284_v26  ;;  %v1615_v25 = vmul.f32 %v15122_v31, %v15279_v63  ;;  %v15287_v15 = vld [vmem:[#allocation52_spill] sm:$0xff] }
 0x1fe   : > { %v3209_v60 = vadd.f32 %v3137_v14, %v2978_v56  ;;  %v15286_v4 = vrot.slane %v15285_v47, 4  ;;  %v996_v48 = vadd.f32 %v964_v8, %v928_v27  ;;  %v1475_v39 = vrot.slane %v1381_v44, 1  ;;  %v15288_v56 = vld [vmem:[#allocation97_spill] sm:$0xff] }
 0x1ff   : > { %v5247_v5 = vadd.f32 %v9284_v20, %v5003_v58  ;;  %v14343_v41 = vrot.slane %v9425_v43, 1  ;;  %v9438_v28 = vmul.f32 %v15122_v31, %v15287_v15  ;;  %v1717_v17 = vrot.slane %v1615_v25, 1  ;;  %v15290_v27 = vld [vmem:[#allocation157_spill] sm:$0xff] }
 0x200   : > { %v9432_v0 = vsel %vm368_vm0, %v15286_v4, %v5421_v61  ;;  %v3427_v32 = vadd.f32 %v3362_v1, %v3209_v60  ;;  %v1062_v62 = vadd.f32 %v1032_v42, %v996_v48  ;;  %v1859_v14 = vmul.f32 %v15050_v3, %v15280_v7 }
 0x201   : > { %v9444_v61 = vmul.f32 %v15050_v3, %v15288_v56  ;;  %v5478_v8 = vadd.f32 %v9291_v21, %v5247_v5  ;;  %v15291_v20 = vrot.slane %v15290_v27, 4  ;;  %v14342_v58 = vrot.slane %v9438_v28, 1 }
 0x202   : > { %v2090_v1 = vmul.f32 %v15053_v49, %v15282_v9  ;;  %v3646_v42 = vadd.f32 %v3571_v34, %v3427_v32  ;;  %v1126_v25 = vadd.f32 %v1098_v55, %v1062_v62  ;;  %v1477_v60 = vsel %vm1240_vm5, %v1475_v39, %v14343_v41  ;;  %v15295_v62 = vld [vmem:[#allocation104_spill] sm:$0xff] }
 0x203   : > { %15289 = vst [vmem:[#allocation42_spill] sm:$0xff] %v9444_v61  ;;  %v9450_v44 = vsel %vm368_vm0, %v15291_v20, %v5646_v10  ;;  %v1955_v47 = vrot.slane %v1859_v14, 1  ;;  %v9459_v4 = vadd.f32 %v9311_v35, %v5478_v8  ;;  %v1719_v21 = vsel %vm1240_vm5, %v1717_v17, %v14342_v58  ;;  %v15293_v10 = vld [vmem:[#allocation80_spill] sm:$0xff] }
 0x204   : > { %v14345_v5 = vrot.slane %v9444_v61, 1  ;;  %v9467_v48 = vmul.f32 %v15053_v49, %v15293_v10  ;;  %v3877_v32 = vadd.f32 %v3800_v57, %v3646_v42  ;;  %v1345_v34 = vadd.f32 %v15295_v62, %v1126_v25 }
 0x205   : > { %15292 = vst [vmem:[#allocation31_spill] sm:$0xff] %v9459_v4  ;;  %v2180_v55 = vrot.slane %v2090_v1, 1  ;;  %v2524_v39 = vmul.f32 %v15247_v18, %v15278_v50  ;;  %5765 = vrot.lane.b32.xlu1 %v9459_v4, %s7431_s7  ;;  %5958 = vrot.lane.b32.xlu0 %v9459_v4, %s7432_s8  ;;  %v9479_v17 = vmul.f32 %v15247_v18, %v15284_v26 }
 0x206   : > { %15294 = vst [vmem:[#allocation5_spill] sm:$0xff] %v9467_v48  ;;  %v2758_v57 = vmul.f32 %v15248_v33, %v15279_v63  ;;  %v9485_v14 = vmul.f32 %v15248_v33, %v15287_v15  ;;  %v4121_v8 = vadd.f32 %v4042_v11, %v3877_v32  ;;  %v1576_v27 = vadd.f32 %v1477_v60, %v1345_v34 }
 0x207   : > { %15296 = vst [vmem:[#allocation111_spill] sm:$0xff] %v9479_v17  ;;  %v2618_v20 = vrot.slane %v2524_v39, 2  ;;  %v3002_v1 = vmul.f32 %v7558_v46, %v15280_v7  ;;  %v1957_v42 = vsel %vm1240_vm5, %v1955_v47, %v14345_v5  ;;  %v14344_v25 = vrot.slane %v9479_v17, 2 }
 0x208   : > { %15297 = vst [vmem:[#allocation41_spill] sm:$0xff] %v9485_v14  ;;  %v2860_v62 = vrot.slane %v2758_v57, 2  ;;  %v14348_v58 = vrot.slane %v9485_v14, 2  ;;  %v4352_v41 = vadd.f32 %v9383_v12, %v4121_v8  ;;  %v1820_v35 = vadd.f32 %v1719_v21, %v1576_v27 }
 0x209   : > { %v9497_v11 = vmul.f32 %v7558_v46, %v15288_v56  ;;  %v3098_v60 = vrot.slane %v3002_v1, 2  ;;  %v15299_v32 = vrot.slane %v9467_v48, 1  ;;  %v2620_v47 = vsel %vm2383_vm6, %v2618_v20, %v14344_v25 }
 0x20a   : > { %v3233_v39 = vmul.f32 %v7579_v59, %v15282_v9  ;;  %v9509_v12 = vmul.f32 %v7579_v59, %v15293_v10  ;;  %v4570_v21 = vadd.f32 %v9388_v37, %v4352_v41  ;;  %v2051_v57 = vadd.f32 %v1957_v42, %v1820_v35 }
 0x20b   : > { %15298 = vst [vmem:[#allocation123_spill] sm:$0xff] %v9497_v11  ;;  %v2182_v34 = vsel %vm1240_vm5, %v2180_v55, %v15299_v32  ;;  %v14347_v8 = vrot.slane %v9497_v11, 2  ;;  %v3667_v27 = vmul.f32 %v15249_v23, %v15278_v50  ;;  %v9518_v20 = vmul.f32 %v15249_v23, %v15284_v26 }
 0x20c   : > { %15300 = vst [vmem:[#allocation28_spill] sm:$0xff] %v9509_v12  ;;  %v3323_v55 = vrot.slane %v3233_v39, 2  ;;  %v3901_v32 = vmul.f32 %v7567_v52, %v15279_v63  ;;  %v4788_v25 = vadd.f32 %v9394_v45, %v4570_v21  ;;  %v2269_v5 = vadd.f32 %v2182_v34, %v2051_v57  ;;  %v15303_v45 = vld [vmem:[#allocation106_spill] sm:$0xff] }
 0x20d   : > { %15301 = vst [vmem:[#allocation133_spill] sm:$0xff] %v9518_v20  ;;  %v2862_v37 = vsel %vm2383_vm6, %v2860_v62, %v14348_v58  ;;  %v3100_v41 = vsel %vm2383_vm6, %v3098_v60, %v14347_v8  ;;  %v3761_v35 = vrot.slane %v3667_v27, 3  ;;  %v14355_v42 = vrot.slane %v9518_v20, 3 }
 0x20e   : > { %v9532_v39 = vmul.f32 %v7567_v52, %v15287_v15  ;;  %v4003_v1 = vrot.slane %v3901_v32, 3  ;;  %v5019_v4 = vadd.f32 %v9399_v30, %v4788_v25  ;;  %v2488_v34 = vadd.f32 %v15303_v45, %v2269_v5 }
 0x20f   : > { %v4145_v21 = vmul.f32 %v7569_v53, %v15280_v7  ;;  %v9540_v62 = vmul.f32 %v7569_v53, %v15288_v56  ;;  %v15305_v60 = vrot.slane %v9509_v12, 2  ;;  %v4376_v32 = vmul.f32 %v7617_v19, %v15282_v9 }
 0x210   : > { %15302 = vst [vmem:[#allocation134_spill] sm:$0xff] %v9532_v39  ;;  %v14353_v27 = vrot.slane %v9532_v39, 3  ;;  %v9550_v30 = vmul.f32 %v7617_v19, %v15293_v10  ;;  %v5263_v5 = vadd.f32 %v9406_v6, %v5019_v4  ;;  %v2719_v25 = vadd.f32 %v2620_v47, %v2488_v34 }
 0x211   : > { %15304 = vst [vmem:[#allocation33_spill] sm:$0xff] %v9540_v62  ;;  %v3325_v57 = vsel %vm2383_vm6, %v3323_v55, %v15305_v60  ;;  %v4241_v45 = vrot.slane %v4145_v21, 3  ;;  %v14352_v8 = vrot.slane %v9540_v62, 3  ;;  %v3763_v58 = vsel %vm3526_vm7, %v3761_v35, %v14355_v42  ;;  %v15323_v62 = vld [vmem:[#allocation75_spill] sm:$0xff] }
 0x212   : > { %15306 = vst [vmem:[#allocation135_spill] sm:$0xff] %v9550_v30  ;;  %v4005_v55 = vsel %vm3526_vm7, %v4003_v1, %v14353_v27  ;;  %v4466_v60 = vrot.slane %v4376_v32, 3  ;;  %v4809_v12 = vmul.f32 %v15263_v13, %v15278_v50  ;;  %v5494_v11 = vadd.f32 %v9432_v0, %v5263_v5 }
 0x213   : > { %v2963_v14 = vadd.f32 %v2862_v37, %v2719_v25  ;;  %v14354_v6 = vrot.slane %v9550_v30, 3  ;;  %v9566_v4 = vmul.f32 %v15263_v13, %v15284_v26  ;;  %v4243_v47 = vsel %vm3526_vm7, %v4241_v45, %v14352_v8  ;;  %v15312_v8 = vld [vmem:[#allocation35_spill] sm:$0xff] }
 0x214   : > { %v4903_v35 = vrot.slane %v4809_v12, 4  ;;  %v5043_v1 = vmul.f32 %v14991_v54, %v15279_v63  ;;  %v9575_v50 = vmul.f32 %v14991_v54, %v15287_v15  ;;  %v9578_v0 = vadd.f32 %v9450_v44, %v5494_v11 }
 0x215   : > { %15307 = vst [vmem:[#allocation136_spill] sm:$0xff] %v9566_v4  ;;  %v3194_v37 = vadd.f32 %v3100_v41, %v2963_v14  ;;  %v14359_v34 = vrot.slane %v9566_v4, 4  ;;  %v5287_v21 = vmul.f32 %v14993_v51, %v15280_v7  ;;  %v9586_v12 = vmul.f32 %v14993_v51, %v15288_v56 }
 0x216   : > { %15308 = vst [vmem:[#allocation137_spill] sm:$0xff] %v9575_v50  ;;  %15309 = vst [vmem:[#allocation3_spill] sm:$0xff] %v9578_v0  ;;  %v5145_v32 = vrot.slane %v5043_v1, 4  ;;  %v14360_v5 = vrot.slane %v9575_v50, 4  ;;  %v5518_v25 = vmul.f32 %v9152_v24, %v15282_v9  ;;  %5797 = vrot.lane.b32.xlu1 %v9578_v0, %s7431_s7  ;;  %5990 = vrot.lane.b32.xlu0 %v9578_v0, %s7432_s8  ;;  %v15315_v0 = vld [vmem:[#allocation56_spill] sm:$0xff] }
 0x217   : > { %15310 = vst [vmem:[#allocation138_spill] sm:$0xff] %v9586_v12  ;;  %v3412_v44 = vadd.f32 %v3325_v57, %v3194_v37  ;;  %v4468_v14 = vsel %vm3526_vm7, %v4466_v60, %v14354_v6  ;;  %v9599_v11 = vmul.f32 %v9152_v24, %v15293_v10  ;;  %v4905_v41 = vsel %vm368_vm0, %v4903_v35, %v14359_v34  ;;  %v15313_v37 = vld [vmem:[#allocation110_spill] sm:$0xff]  ;;  %v15314_v6 = vld [vmem:[#allocation57_spill] sm:$0xff]  ;;  %v15319_v60 = vld [vmem:[#allocation44_spill] sm:$0xff] }
 0x218   : > { %v5147_v45 = vsel %vm368_vm0, %v5145_v32, %v14360_v5  ;;  %v5383_v1 = vrot.slane %v5287_v21, 4  ;;  %v850_v57 = vmul.f32 %v15033_v2, %v15312_v8  ;;  %v912_v42 = vmul.f32 %v15223_v16, %v15314_v6  ;;  %v15316_v34 = vld [vmem:[#allocation77_spill] sm:$0xff]  ;;  %v15321_v35 = vld [vmem:[#allocation76_spill] sm:$0xff] }
 0x219   : > { %15311 = vst [vmem:[#allocation139_spill] sm:$0xff] %v9599_v11  ;;  %v3631_v27 = vadd.f32 %v15313_v37, %v3412_v44  ;;  %v980_v9 = vmul.f32 %v15042_v22, %v15315_v0  ;;  %v5608_v7 = vrot.slane %v5518_v25, 4  ;;  %v1048_v32 = vmul.f32 %v15117_v29, %v15316_v34  ;;  %v15317_v44 = vld [vmem:[#allocation66_spill] sm:$0xff] }
 0x21a   : > { %v1183_v21 = vmul.f32 %v15194_v36, %v15312_v8  ;;  %v944_v63 = vadd.f32 %v912_v42, %v850_v57  ;;  %v9622_v37 = vmul.f32 %v7547_v40, %v15317_v44  ;;  %v9626_v50 = vmul.f32 %v15194_v36, %v15319_v60 }
 0x21b   : > { %v3862_v5 = vadd.f32 %v3763_v58, %v3631_v27  ;;  %v1405_v25 = vmul.f32 %v15234_v38, %v15314_v6  ;;  %v9632_v30 = vmul.f32 %v15234_v38, %v15321_v35  ;;  %v1639_v58 = vmul.f32 %v15122_v31, %v15315_v0 }
 0x21c   : > { %15318 = vst [vmem:[#allocation118_spill] sm:$0xff] %v9622_v37  ;;  %15320 = vst [vmem:[#allocation140_spill] sm:$0xff] %v9626_v50  ;;  %v1286_v4 = vrot.slane %v1183_v21, 1  ;;  %v1012_v27 = vadd.f32 %v980_v9, %v944_v63  ;;  %v14374_v57 = vrot.slane %v9626_v50, 1  ;;  %v9639_v39 = vmul.f32 %v15122_v31, %v15323_v62 }
 0x21d   : > { %15322 = vst [vmem:[#allocation129_spill] sm:$0xff] %v9632_v30  ;;  %v4106_v42 = vadd.f32 %v4005_v55, %v3862_v5  ;;  %v15324_v21 = vrot.slane %v9586_v12, 4  ;;  %v1515_v2 = vrot.slane %v1405_v25, 1  ;;  %v14376_v20 = vrot.slane %v9632_v30, 1 }
 0x21e   : > { %v1883_v17 = vmul.f32 %v15050_v3, %v15316_v34  ;;  %v1078_v61 = vadd.f32 %v1048_v32, %v1012_v27  ;;  %v1757_v55 = vrot.slane %v1639_v58, 1  ;;  %v15325_v9 = vrot.slane %v9599_v11, 4 }
 0x21f   : > { %v5385_v36 = vsel %vm368_vm0, %v5383_v1, %v15324_v21  ;;  %v4337_v48 = vadd.f32 %v4243_v47, %v4106_v42  ;;  %v1288_v12 = vsel %vm1240_vm5, %v1286_v4, %v14374_v57  ;;  %v15326_v1 = vld [vmem:[#allocation99_spill] sm:$0xff]  ;;  %v2114_v21 = vmul.f32 %v15053_v49, %v15317_v44  ;;  %v15327_v42 = vld [vmem:[#allocation90_spill] sm:$0xff] }
 0x220   : > { %v5610_v5 = vsel %vm368_vm0, %v5608_v7, %v15325_v9  ;;  %v9656_v25 = vmul.f32 %v15050_v3, %v15326_v1  ;;  %v1142_v32 = vadd.f32 %v9622_v37, %v1078_v61  ;;  %v1517_v58 = vsel %vm1240_vm5, %v1515_v2, %v14376_v20  ;;  %v15329_v9 = vld [vmem:[#allocation11_spill] sm:$0xff] }
 0x221   : > { %v4555_v47 = vadd.f32 %v4468_v14, %v4337_v48  ;;  %v9666_v7 = vmul.f32 %v15053_v49, %v15327_v42  ;;  %v1995_v27 = vrot.slane %v1883_v17, 1  ;;  %v2326_v57 = vmul.f32 %v15329_v9, %v15312_v8  ;;  %v15330_v48 = vld [vmem:[#allocation113_spill] sm:$0xff] }
 0x222   : > { %v9673_v63 = vmul.f32 %v15329_v9, %v15319_v60  ;;  %v1361_v14 = vadd.f32 %v1288_v12, %v1142_v32  ;;  %v15331_v37 = vrot.slane %v9639_v39, 1  ;;  %v2548_v20 = vmul.f32 %v15247_v18, %v15314_v6 }
 0x223   : > { %15328 = vst [vmem:[#allocation142_spill] sm:$0xff] %v9666_v7  ;;  %v4773_v61 = vadd.f32 %v15330_v48, %v4555_v47  ;;  %v2220_v17 = vrot.slane %v2114_v21, 1  ;;  %v2429_v30 = vrot.slane %v2326_v57, 2  ;;  %v9684_v50 = vmul.f32 %v15247_v18, %v15321_v35 }
 0x224   : > { %v1759_v2 = vsel %vm1240_vm5, %v1757_v55, %v15331_v37  ;;  %v1592_v9 = vadd.f32 %v1517_v58, %v1361_v14  ;;  %v14383_v47 = vrot.slane %v9673_v63, 2  ;;  %v2658_v12 = vrot.slane %v2548_v20, 2 }
 0x225   : > { %15332 = vst [vmem:[#allocation121_spill] sm:$0xff] %v9684_v50  ;;  %v5004_v11 = vadd.f32 %v4905_v41, %v4773_v61  ;;  %v15333_v32 = vrot.slane %v9656_v25, 1  ;;  %v14382_v55 = vrot.slane %v9684_v50, 2  ;;  %v2782_v21 = vmul.f32 %v15248_v33, %v15315_v0 }
 0x226   : > { %v9695_v57 = vmul.f32 %v15248_v33, %v15323_v62  ;;  %v1836_v4 = vadd.f32 %v1759_v2, %v1592_v9  ;;  %v3026_v41 = vmul.f32 %v7558_v46, %v15316_v34  ;;  %v9701_v20 = vmul.f32 %v7558_v46, %v15326_v1 }
 0x227   : > { %v1997_v37 = vsel %vm1240_vm5, %v1995_v27, %v15333_v32  ;;  %v5248_v48 = vadd.f32 %v5147_v45, %v5004_v11  ;;  %v15336_v58 = vrot.slane %v9666_v7, 1  ;;  %v2900_v61 = vrot.slane %v2782_v21, 2 }
 0x228   : > { %15334 = vst [vmem:[#allocation12_spill] sm:$0xff] %v9695_v57  ;;  %15335 = vst [vmem:[#allocation13_spill] sm:$0xff] %v9701_v20  ;;  %v3257_v32 = vmul.f32 %v7579_v59, %v15317_v44  ;;  %v2067_v45 = vadd.f32 %v1997_v37, %v1836_v4  ;;  %v2431_v9 = vsel %vm2383_vm6, %v2429_v30, %v14383_v47  ;;  %v3138_v7 = vrot.slane %v3026_v41, 2 }
 0x229   : > { %v9706_v27 = vsel %vm1240_vm5, %v2220_v17, %v15336_v58  ;;  %v5479_v11 = vadd.f32 %v5385_v36, %v5248_v48  ;;  %v2660_v2 = vsel %vm2383_vm6, %v2658_v12, %v14382_v55  ;;  %v14389_v17 = vrot.slane %v9701_v20, 2  ;;  %v15339_v58 = vld [vmem:[#allocation15_spill] sm:$0xff] }
 0x22a   : > { %15337 = vst [vmem:[#allocation143_spill] sm:$0xff] %v9706_v27  ;;  %v9720_v21 = vmul.f32 %v7579_v59, %v15327_v42  ;;  %v3469_v14 = vmul.f32 %v15339_v58, %v15312_v8  ;;  %v2285_v4 = vadd.f32 %v9706_v27, %v2067_v45  ;;  %v3363_v37 = vrot.slane %v3257_v32, 2 }
 0x22b   : > { %v9724_v36 = vadd.f32 %v5610_v5, %v5479_v11  ;;  %v9729_v30 = vmul.f32 %v15339_v58, %v15319_v60  ;;  %v15342_v12 = vrot.slane %v9695_v57, 2  ;;  %v3691_v55 = vmul.f32 %v15249_v23, %v15314_v6 }
 0x22c   : > { %15338 = vst [vmem:[#allocation144_spill] sm:$0xff] %v9720_v21  ;;  %v9739_v5 = vmul.f32 %v15249_v23, %v15321_v35  ;;  %v2504_v32 = vadd.f32 %v2431_v9, %v2285_v4  ;;  %v3925_v11 = vmul.f32 %v7567_v52, %v15315_v0  ;;  %v3140_v45 = vsel %vm2383_vm6, %v3138_v7, %v14389_v17 }
 0x22d   : > { %15340 = vst [vmem:[#allocation145_spill] sm:$0xff] %v9724_v36  ;;  %15341 = vst [vmem:[#allocation126_spill] sm:$0xff] %v9729_v30  ;;  %v2902_v48 = vsel %vm2383_vm6, %v2900_v61, %v15342_v12  ;;  %5960 = vrot.lane.b32.xlu1 %v9724_v36, %s7432_s8  ;;  %5767 = vrot.lane.b32.xlu0 %v9724_v36, %s7431_s7  ;;  %v9749_v61 = vmul.f32 %v7567_v52, %v15323_v62  ;;  %v3572_v12 = vrot.slane %v3469_v14, 3 }
 0x22e   : > { %15343 = vst [vmem:[#allocation119_spill] sm:$0xff] %v9739_v5  ;;  %v4169_v41 = vmul.f32 %v7569_v53, %v15316_v34  ;;  %v2735_v27 = vadd.f32 %v2660_v2, %v2504_v32  ;;  %v15345_v9 = vrot.slane %v9720_v21, 2  ;;  %v3801_v36 = vrot.slane %v3691_v55, 3  ;;  %v15349_v55 = vld [vmem:[#allocation20_spill] sm:$0xff] }
 0x22f   : > { %15344 = vst [vmem:[#allocation146_spill] sm:$0xff] %v9749_v61  ;;  %v4043_v50 = vrot.slane %v3925_v11, 3  ;;  %v9766_v7 = vmul.f32 %v7569_v53, %v15326_v1  ;;  %v4400_v14 = vmul.f32 %v7617_v19, %v15317_v44  ;;  %v9772_v32 = vmul.f32 %v7617_v19, %v15327_v42 }
 0x230   : > { %v9760_v4 = vsel %vm2383_vm6, %v3363_v37, %v15345_v9  ;;  %v2979_v17 = vadd.f32 %v2902_v48, %v2735_v27  ;;  %v4281_v2 = vrot.slane %v4169_v41, 3  ;;  %v4612_v37 = vmul.f32 %v15349_v55, %v15312_v8 }
 0x231   : > { %15346 = vst [vmem:[#allocation147_spill] sm:$0xff] %v9760_v4  ;;  %15347 = vst [vmem:[#allocation24_spill] sm:$0xff] %v9766_v7  ;;  %v4506_v9 = vrot.slane %v4400_v14, 3  ;;  %v9779_v20 = vmul.f32 %v15349_v55, %v15319_v60  ;;  %v4833_v57 = vmul.f32 %v15263_v13, %v15314_v6  ;;  %v9786_v41 = vmul.f32 %v15263_v13, %v15321_v35 }
 0x232   : > { %15348 = vst [vmem:[#allocation149_spill] sm:$0xff] %v9772_v32  ;;  %v3210_v47 = vadd.f32 %v3140_v45, %v2979_v17  ;;  %v4714_v48 = vrot.slane %v4612_v37, 4  ;;  %v15352_v8 = vrot.slane %v9729_v30, 3  ;;  %v5067_v55 = vmul.f32 %v14991_v54, %v15315_v0 }
 0x233   : > { %15350 = vst [vmem:[#allocation150_spill] sm:$0xff] %v9779_v20  ;;  %15351 = vst [vmem:[#allocation151_spill] sm:$0xff] %v9786_v41  ;;  %v4943_v21 = vrot.slane %v4833_v57, 4  ;;  %v15353_v17 = vrot.slane %v9739_v5, 3  ;;  %v9801_v27 = vmul.f32 %v14991_v54, %v15323_v62  ;;  %v15356_v57 = vrot.slane %v9766_v7, 3  ;;  %v15364_v7 = vld [vmem:[#allocation74_spill] sm:$0xff] }
 0x234   : > { %v3574_v11 = vsel %vm3526_vm7, %v3572_v12, %v15352_v8  ;;  %v3428_v6 = vadd.f32 %v9760_v4, %v3210_v47  ;;  %v15355_v8 = vrot.slane %v9749_v61, 3  ;;  %v5311_v47 = vmul.f32 %v14993_v51, %v15316_v34 }
 0x235   : > { %v3803_v45 = vsel %vm3526_vm7, %v3801_v36, %v15353_v17  ;;  %15354 = vst [vmem:[#allocation152_spill] sm:$0xff] %v9801_v27  ;;  %v4283_v14 = vsel %vm3526_vm7, %v4281_v2, %v15356_v57  ;;  %v9813_v36 = vmul.f32 %v14993_v51, %v15326_v1  ;;  %v15358_v37 = vrot.slane %v9772_v32, 3 }
 0x236   : > { %v4045_v12 = vsel %vm3526_vm7, %v4043_v50, %v15355_v8  ;;  %v3647_v17 = vadd.f32 %v3574_v11, %v3428_v6  ;;  %v15360_v0 = vrot.slane %v9779_v20, 4  ;;  %v5542_v2 = vmul.f32 %v9152_v24, %v15317_v44  ;;  %v15363_v44 = vld [vmem:[#allocation112_spill] sm:$0xff] }
 0x237   : > { %15357 = vst [vmem:[#allocation153_spill] sm:$0xff] %v9813_v36  ;;  %v9818_v4 = vsel %vm3526_vm7, %v4506_v9, %v15358_v37  ;;  %v15361_v8 = vrot.slane %v9786_v41, 4  ;;  %v5185_v34 = vrot.slane %v5067_v55, 4  ;;  %v9830_v6 = vmul.f32 %v9152_v24, %v15327_v42 }
 0x238   : > { %15359 = vst [vmem:[#allocation154_spill] sm:$0xff] %v9818_v4  ;;  %v4716_v50 = vsel %vm368_vm0, %v4714_v48, %v15360_v0  ;;  %v897_v11 = vmul.f32 %v15223_v16, %v15284_v26  ;;  %v3878_v9 = vadd.f32 %v3803_v45, %v3647_v17  ;;  %v5423_v20 = vrot.slane %v5311_v47, 4  ;;  %v15365_v45 = vld [vmem:[#allocation53_spill] sm:$0xff]  ;;  %v15367_v0 = vld [vmem:[#allocation78_spill] sm:$0xff] }
 0x239   : > { %v4945_v57 = vsel %vm368_vm0, %v4943_v21, %v15361_v8  ;;  %15362 = vst [vmem:[#allocation155_spill] sm:$0xff] %v9830_v6  ;;  %v5648_v48 = vrot.slane %v5542_v2, 4  ;;  %v965_v21 = vmul.f32 %v15042_v22, %v15287_v15  ;;  %v1033_v55 = vmul.f32 %v15117_v29, %v15288_v56 }
 0x23a   : > { %v929_v32 = vadd.f32 %v897_v11, %v15363_v44  ;;  %v4122_v8 = vadd.f32 %v4045_v12, %v3878_v9  ;;  %v1383_v26 = vmul.f32 %v15234_v38, %v15364_v7  ;;  %v1617_v47 = vmul.f32 %v15122_v31, %v15365_v45  ;;  %v15366_v44 = vld [vmem:[#allocation81_spill] sm:$0xff] }
 0x23b   : > { %v1099_v2 = vmul.f32 %v7547_v40, %v15293_v10  ;;  %v1861_v11 = vmul.f32 %v15050_v3, %v15366_v44  ;;  %v2092_v37 = vmul.f32 %v15053_v49, %v15367_v0  ;;  %v2526_v41 = vmul.f32 %v15247_v18, %v15364_v7 }
 0x23c   : > { %v997_v17 = vadd.f32 %v965_v21, %v929_v32  ;;  %v4353_v56 = vadd.f32 %v4283_v14, %v4122_v8  ;;  %v1478_v12 = vrot.slane %v1383_v26, 1  ;;  %v1720_v9 = vrot.slane %v1617_v47, 1 }
 0x23d   : > { %v15368_v15 = vrot.slane %v9801_v27, 4  ;;  %v1958_v21 = vrot.slane %v1861_v11, 1  ;;  %v2760_v10 = vmul.f32 %v15248_v33, %v15365_v45  ;;  %v15369_v30 = vrot.slane %v9813_v36, 4 }
 0x23e   : > { %v1063_v32 = vadd.f32 %v1033_v55, %v997_v17  ;;  %v4571_v5 = vadd.f32 %v9818_v4, %v4353_v56  ;;  %v15370_v8 = vrot.slane %v9830_v6, 4  ;;  %v2183_v47 = vrot.slane %v2092_v37, 1 }
 0x23f   : > { %v5187_v61 = vsel %vm368_vm0, %v5185_v34, %v15368_v15  ;;  %v5425_v14 = vsel %vm368_vm0, %v5423_v20, %v15369_v30  ;;  %v15372_v15 = vrot.slane %v9425_v43, 1  ;;  %v15373_v55 = vrot.slane %v9438_v28, 1 }
 0x240   : > { %v9866_v26 = vsel %vm368_vm0, %v5648_v48, %v15370_v8  ;;  %v1127_v27 = vadd.f32 %v1099_v2, %v1063_v32  ;;  %v2621_v56 = vrot.slane %v2526_v41, 2  ;;  %v4789_v11 = vadd.f32 %v4716_v50, %v4571_v5  ;;  %v15374_v48 = vld [vmem:[#allocation39_spill] sm:$0xff]  ;;  %v15375_v2 = vld [vmem:[#allocation42_spill] sm:$0xff]  ;;  %v15377_v8 = vld [vmem:[#allocation5_spill] sm:$0xff] }
 0x241   : > { %15371 = vst [vmem:[#allocation51_spill] sm:$0xff] %v9866_v26  ;;  %v1479_v34 = vsel %vm1240_vm5, %v15372_v15, %v1478_v12  ;;  %v1721_v17 = vsel %vm1240_vm5, %v15373_v55, %v1720_v9  ;;  %v2863_v4 = vrot.slane %v2760_v10, 2  ;;  %v3004_v20 = vmul.f32 %v7558_v46, %v15366_v44 }
 0x242   : > { %v3235_v30 = vmul.f32 %v7579_v59, %v15367_v0  ;;  %v1346_v37 = vadd.f32 %v15374_v48, %v1127_v27  ;;  %v15376_v32 = vrot.slane %v15375_v2, 1  ;;  %v3669_v28 = vmul.f32 %v15249_v23, %v15364_v7  ;;  %v15379_v2 = vld [vmem:[#allocation111_spill] sm:$0xff] }
 0x243   : > { %v3903_v41 = vmul.f32 %v7567_v52, %v15365_v45  ;;  %v5020_v5 = vadd.f32 %v4945_v57, %v4789_v11  ;;  %v3101_v10 = vrot.slane %v3004_v20, 2  ;;  %v4147_v12 = vmul.f32 %v7569_v53, %v15366_v44  ;;  %v15381_v57 = vld [vmem:[#allocation41_spill] sm:$0xff] }
 0x244   : > { %v1959_v43 = vsel %vm1240_vm5, %v15376_v32, %v1958_v21  ;;  %v3326_v50 = vrot.slane %v3235_v30, 2  ;;  %v1577_v9 = vadd.f32 %v1479_v34, %v1346_v37  ;;  %v15378_v15 = vrot.slane %v15377_v8, 1  ;;  %v15383_v34 = vld [vmem:[#allocation123_spill] sm:$0xff] }
 0x245   : > { %v3764_v55 = vrot.slane %v3669_v28, 3  ;;  %v4378_v21 = vmul.f32 %v7617_v19, %v15367_v0  ;;  %v5264_v48 = vadd.f32 %v5187_v61, %v5020_v5  ;;  %v15380_v32 = vrot.slane %v15379_v2, 2 }
 0x246   : > { %v2184_v27 = vsel %vm1240_vm5, %v15378_v15, %v2183_v47  ;;  %v15382_v11 = vrot.slane %v15381_v57, 2  ;;  %v4006_v30 = vrot.slane %v3903_v41, 3  ;;  %v1821_v36 = vadd.f32 %v1721_v17, %v1577_v9  ;;  %v15385_v47 = vld [vmem:[#allocation28_spill] sm:$0xff]  ;;  %v15387_v41 = vld [vmem:[#allocation133_spill] sm:$0xff] }
 0x247   : > { %v2622_v6 = vsel %vm2383_vm6, %v15380_v32, %v2621_v56  ;;  %v15384_v37 = vrot.slane %v15383_v34, 2  ;;  %v15386_v28 = vrot.slane %v15385_v47, 2  ;;  %v4244_v19 = vrot.slane %v4147_v12, 3  ;;  %v15393_v57 = vld [vmem:[#allocation33_spill] sm:$0xff] }
 0x248   : > { %v2864_v20 = vsel %vm2383_vm6, %v15382_v11, %v2863_v4  ;;  %v5495_v61 = vadd.f32 %v5425_v14, %v5264_v48  ;;  %v4469_v5 = vrot.slane %v4378_v21, 3  ;;  %v4811_v56 = vmul.f32 %v15263_v13, %v15364_v7  ;;  %v15390_v21 = vld [vmem:[#allocation2_spill] sm:$0xff] }
 0x249   : > { %v3102_v8 = vsel %vm2383_vm6, %v15384_v37, %v3101_v10  ;;  %v3327_v15 = vsel %vm2383_vm6, %v15386_v28, %v3326_v50  ;;  %v5045_v2 = vmul.f32 %v14991_v54, %v15365_v45  ;;  %v2052_v4 = vadd.f32 %v1959_v43, %v1821_v36  ;;  %v15391_v43 = vld [vmem:[#allocation134_spill] sm:$0xff] }
 0x24a   : > { %v15388_v17 = vrot.slane %v15387_v41, 3  ;;  %v5289_v10 = vmul.f32 %v14993_v51, %v15366_v44  ;;  %v5520_v50 = vmul.f32 %v9152_v24, %v15367_v0  ;;  %v9919_v14 = vadd.f32 %v9866_v26, %v5495_v61  ;;  %v15397_v61 = vld [vmem:[#allocation114_spill] sm:$0xff]  ;;  %v15409_v26 = vld [vmem:[#allocation11_spill] sm:$0xff] }
 0x24b   : > { %v4906_v12 = vrot.slane %v4811_v56, 4  ;;  %v5148_v7 = vrot.slane %v5045_v2, 4  ;;  %v851_v48 = vmul.f32 %v15390_v21, %v15319_v60  ;;  %v2270_v36 = vadd.f32 %v2184_v27, %v2052_v4  ;;  %v15395_v27 = vld [vmem:[#allocation135_spill] sm:$0xff]  ;;  %v15398_v2 = vld [vmem:[#allocation136_spill] sm:$0xff] }
 0x24c   : > { %v9912_v9 = vsel %vm3526_vm7, %v15388_v17, %v3764_v55  ;;  %15389 = vst [vmem:[#allocation96_spill] sm:$0xff] %v9919_v14  ;;  %v15392_v32 = vrot.slane %v15391_v43, 3  ;;  %v15394_v11 = vrot.slane %v15393_v57, 3  ;;  %v913_v24 = vmul.f32 %v15223_v16, %v15321_v35  ;;  %5992 = vrot.lane.b32.xlu1 %v9919_v14, %s7432_s8  ;;  %5799 = vrot.lane.b32.xlu0 %v9919_v14, %s7431_s7  ;;  %v15400_v17 = vld [vmem:[#allocation137_spill] sm:$0xff] }
 0x24d   : > { %v15396_v37 = vrot.slane %v15395_v27, 3  ;;  %v5611_v28 = vrot.slane %v5520_v50, 4  ;;  %v2489_v56 = vadd.f32 %v15397_v61, %v2270_v36  ;;  %v15399_v4 = vrot.slane %v15398_v2, 4  ;;  %v15403_v50 = vld [vmem:[#allocation47_spill] sm:$0xff]  ;;  %v15404_v36 = vld [vmem:[#allocation6_spill] sm:$0xff]  ;;  %v15405_v27 = vld [vmem:[#allocation64_spill] sm:$0xff] }
 0x24e   : > { %v9926_v55 = vsel %vm3526_vm7, %v15392_v32, %v4006_v30  ;;  %v9931_v34 = vsel %vm3526_vm7, %v15394_v11, %v4244_v19  ;;  %v5386_v30 = vrot.slane %v5289_v10, 4  ;;  %v981_v19 = vmul.f32 %v15042_v22, %v15323_v62  ;;  %v15406_v2 = vld [vmem:[#allocation62_spill] sm:$0xff] }
 0x24f   : > { %v9942_v47 = vsel %vm3526_vm7, %v15396_v37, %v4469_v5  ;;  %v9950_v41 = vsel %vm368_vm0, %v15399_v4, %v4906_v12  ;;  %v15401_v43 = vrot.slane %v15400_v17, 4  ;;  %v945_v57 = vadd.f32 %v913_v24, %v851_v48  ;;  %v15407_v4 = vld [vmem:[#allocation83_spill] sm:$0xff] }
 0x250   : > { %v1049_v5 = vmul.f32 %v15117_v29, %v15326_v1  ;;  %v9961_v10 = vmul.f32 %v7547_v40, %v15327_v42  ;;  %v1185_v11 = vmul.f32 %v15404_v36, %v15403_v50  ;;  %v1407_v12 = vmul.f32 %v15234_v38, %v15405_v27  ;;  %v15416_v36 = vld [vmem:[#allocation129_spill] sm:$0xff] }
 0x251   : > { %v9955_v32 = vsel %vm368_vm0, %v15401_v43, %v5148_v7  ;;  %v2720_v37 = vadd.f32 %v2622_v6, %v2489_v56  ;;  %v1013_v61 = vadd.f32 %v981_v19, %v945_v57  ;;  %v1641_v7 = vmul.f32 %v15122_v31, %v15406_v2  ;;  %v15408_v43 = vld [vmem:[#allocation79_spill] sm:$0xff]  ;;  %v15410_v6 = vld [vmem:[#allocation138_spill] sm:$0xff] }
 0x252   : > { %15402 = vst [vmem:[#allocation132_spill] sm:$0xff] %v9961_v10  ;;  %v1885_v48 = vmul.f32 %v15050_v3, %v15407_v4  ;;  %v1289_v24 = vrot.slane %v1185_v11, 1  ;;  %v1518_v17 = vrot.slane %v1407_v12, 1  ;;  %v2116_v14 = vmul.f32 %v15053_v49, %v15408_v43  ;;  %v15412_v57 = vld [vmem:[#allocation139_spill] sm:$0xff]  ;;  %v15414_v12 = vld [vmem:[#allocation140_spill] sm:$0xff] }
 0x253   : > { %v2328_v60 = vmul.f32 %v15409_v26, %v15403_v50  ;;  %v2964_v0 = vadd.f32 %v2864_v20, %v2720_v37  ;;  %v1079_v44 = vadd.f32 %v1049_v5, %v1013_v61  ;;  %v1760_v45 = vrot.slane %v1641_v7, 1 }
 0x254   : > { %v1998_v42 = vrot.slane %v1885_v48, 1  ;;  %v15411_v19 = vrot.slane %v15410_v6, 4  ;;  %v15413_v1 = vrot.slane %v15412_v57, 4  ;;  %v15415_v62 = vrot.slane %v15414_v12, 1 }
 0x255   : > { %v15417_v26 = vrot.slane %v15416_v36, 1  ;;  %v3195_v5 = vadd.f32 %v3102_v8, %v2964_v0  ;;  %v1143_v37 = vadd.f32 %v9961_v10, %v1079_v44  ;;  %v2223_v61 = vrot.slane %v2116_v14, 1  ;;  %v15420_v8 = vld [vmem:[#allocation107_spill] sm:$0xff]  ;;  %v15440_v10 = vld [vmem:[#allocation146_spill] sm:$0xff] }
 0x256   : > { %v9978_v56 = vsel %vm368_vm0, %v15411_v19, %v5386_v30  ;;  %v9983_v11 = vsel %vm368_vm0, %v15413_v1, %v5611_v28  ;;  %v1290_v35 = vsel %vm1240_vm5, %v15415_v62, %v1289_v24  ;;  %v2432_v7 = vrot.slane %v2328_v60, 2 }
 0x257   : > { %v1519_v20 = vsel %vm1240_vm5, %v15417_v26, %v1518_v17  ;;  %v15418_v30 = vrot.slane %v9639_v39, 1  ;;  %v15419_v1 = vrot.slane %v9656_v25, 1  ;;  %v2550_v62 = vmul.f32 %v15247_v18, %v15405_v27 }
 0x258   : > { %v2784_v36 = vmul.f32 %v15248_v33, %v15406_v2  ;;  %v3413_v26 = vadd.f32 %v3327_v15, %v3195_v5  ;;  %v1362_v0 = vadd.f32 %v1290_v35, %v1143_v37  ;;  %v3028_v44 = vmul.f32 %v7558_v46, %v15407_v4  ;;  %v15421_v35 = vld [vmem:[#allocation142_spill] sm:$0xff]  ;;  %v15425_v5 = vld [vmem:[#allocation121_spill] sm:$0xff] }
 0x259   : > { %v1761_v48 = vsel %vm1240_vm5, %v15418_v30, %v1760_v45  ;;  %v1999_v28 = vsel %vm1240_vm5, %v15419_v1, %v1998_v42  ;;  %v3259_v39 = vmul.f32 %v7579_v59, %v15408_v43  ;;  %v2661_v60 = vrot.slane %v2550_v62, 2  ;;  %v15427_v1 = vld [vmem:[#allocation12_spill] sm:$0xff] }
 0x25a   : > { %v2903_v45 = vrot.slane %v2784_v36, 2  ;;  %v3471_v25 = vmul.f32 %v15339_v58, %v15403_v50  ;;  %v3693_v42 = vmul.f32 %v15249_v23, %v15405_v27  ;;  %v3632_v14 = vadd.f32 %v15420_v8, %v3413_v26 }
 0x25b   : > { %v1593_v24 = vadd.f32 %v1519_v20, %v1362_v0  ;;  %v3141_v17 = vrot.slane %v3028_v44, 2  ;;  %v3366_v15 = vrot.slane %v3259_v39, 2  ;;  %v15422_v6 = vrot.slane %v15421_v35, 1  ;;  %v15429_v39 = vld [vmem:[#allocation13_spill] sm:$0xff] }
 0x25c   : > { %v15424_v57 = vrot.slane %v9673_v63, 2  ;;  %v15426_v37 = vrot.slane %v15425_v5, 2  ;;  %v15428_v62 = vrot.slane %v15427_v1, 2  ;;  %v3863_v20 = vadd.f32 %v9912_v9, %v3632_v14  ;;  %v15431_v63 = vld [vmem:[#allocation144_spill] sm:$0xff]  ;;  %v15436_v1 = vld [vmem:[#allocation126_spill] sm:$0xff] }
 0x25d   : > { %v10014_v19 = vsel %vm1240_vm5, %v15422_v6, %v2223_v61  ;;  %v1837_v26 = vadd.f32 %v1761_v48, %v1593_v24  ;;  %v3575_v0 = vrot.slane %v3471_v25, 3  ;;  %v3804_v44 = vrot.slane %v3693_v42, 3  ;;  %v15434_v25 = vld [vmem:[#allocation32_spill] sm:$0xff] }
 0x25e   : > { %15423 = vst [vmem:[#allocation54_spill] sm:$0xff] %v10014_v19  ;;  %v2433_v12 = vsel %vm2383_vm6, %v15424_v57, %v2432_v7  ;;  %v2662_v30 = vsel %vm2383_vm6, %v15426_v37, %v2661_v60  ;;  %v2904_v36 = vsel %vm2383_vm6, %v15428_v62, %v2903_v45  ;;  %v15430_v61 = vrot.slane %v15429_v39, 2  ;;  %v15435_v14 = vld [vmem:[#allocation20_spill] sm:$0xff] }
 0x25f   : > { %v15432_v35 = vrot.slane %v15431_v63, 2  ;;  %v3927_v60 = vmul.f32 %v7567_v52, %v15406_v2  ;;  %v4171_v45 = vmul.f32 %v7569_v53, %v15407_v4  ;;  %v4107_v9 = vadd.f32 %v9926_v55, %v3863_v20 }
 0x260   : > { %v3142_v8 = vsel %vm2383_vm6, %v15430_v61, %v3141_v17  ;;  %v2068_v48 = vadd.f32 %v1999_v28, %v1837_v26  ;;  %v4402_v42 = vmul.f32 %v15434_v25, %v15408_v43  ;;  %v4614_v24 = vmul.f32 %v15435_v14, %v15403_v50  ;;  %v15438_v26 = vld [vmem:[#allocation119_spill] sm:$0xff]  ;;  %v15462_v14 = vld [vmem:[#allocation80_spill] sm:$0xff] }
 0x261   : > { %v10032_v7 = vsel %vm2383_vm6, %v15432_v35, %v3366_v15  ;;  %v4046_v17 = vrot.slane %v3927_v60, 3  ;;  %v4284_v6 = vrot.slane %v4171_v45, 3  ;;  %v4835_v15 = vmul.f32 %v15263_v13, %v15405_v27 }
 0x262   : > { %15433 = vst [vmem:[#allocation156_spill] sm:$0xff] %v10032_v7  ;;  %v5069_v57 = vmul.f32 %v14991_v54, %v15406_v2  ;;  %v4338_v5 = vadd.f32 %v9931_v34, %v4107_v9  ;;  %v2286_v37 = vadd.f32 %v10014_v19, %v2068_v48  ;;  %v4509_v55 = vrot.slane %v4402_v42, 3  ;;  %v15442_v9 = vld [vmem:[#allocation24_spill] sm:$0xff] }
 0x263   : > { %v4717_v28 = vrot.slane %v4614_v24, 4  ;;  %v15437_v62 = vrot.slane %v15436_v1, 3  ;;  %v15439_v39 = vrot.slane %v15438_v26, 3  ;;  %v4946_v63 = vrot.slane %v4835_v15, 4  ;;  %v15444_v24 = vld [vmem:[#allocation149_spill] sm:$0xff] }
 0x264   : > { %v5188_v35 = vrot.slane %v5069_v57, 4  ;;  %v4556_v60 = vadd.f32 %v9942_v47, %v4338_v5  ;;  %v2505_v45 = vadd.f32 %v2433_v12, %v2286_v37  ;;  %v15441_v50 = vrot.slane %v15440_v10, 3  ;;  %v10079_v10 = vld [vmem:[%s14034_s3 + $0x18] ss:$0 sm:$0xff]  ;;  %v15449_v12 = vld [vmem:[#allocation108_spill] sm:$0xff]  ;;  %v15450_v5 = vld [vmem:[#allocation43_spill] sm:$0xff] }
 0x265   : > { %v3576_v20 = vsel %vm3526_vm7, %v15437_v62, %v3575_v0  ;;  %v3805_v61 = vsel %vm3526_vm7, %v15439_v39, %v3804_v44  ;;  %v15443_v48 = vrot.slane %v15442_v9, 3  ;;  %v15445_v0 = vrot.slane %v15444_v24, 3  ;;  %v15447_v44 = vld [vmem:[#allocation150_spill] sm:$0xff]  ;;  %v15452_v62 = vld [vmem:[#allocation151_spill] sm:$0xff]  ;;  %v15454_v9 = vld [vmem:[#allocation152_spill] sm:$0xff] }
 0x266   : > { %v4047_v34 = vsel %vm3526_vm7, %v15441_v50, %v4046_v17  ;;  %v15448_v15 = vrot.slane %v15447_v44, 4  ;;  %v5313_v47 = vmul.f32 %v14993_v51, %v15407_v4  ;;  %v5544_v50 = vmul.f32 %v10079_v10, %v15408_v43  ;;  %v15456_v44 = vld [vmem:[#allocation65_spill] sm:$0xff] }
 0x267   : > { %v10062_v42 = vsel %vm3526_vm7, %v15443_v48, %v4284_v6  ;;  %v10067_v1 = vsel %vm3526_vm7, %v15445_v0, %v4509_v55  ;;  %v4774_v17 = vadd.f32 %v15449_v12, %v4556_v60  ;;  %v2736_v6 = vadd.f32 %v2662_v30, %v2505_v45  ;;  %v15451_v55 = vld [vmem:[#allocation68_spill] sm:$0xff] }
 0x268   : > { %15446 = vst [vmem:[#allocation157_spill] sm:$0xff] %v10067_v1  ;;  %v10072_v57 = vsel %vm368_vm0, %v15448_v15, %v4717_v28  ;;  %v898_v37 = vmul.f32 %v15223_v16, %v15450_v5  ;;  %v966_v28 = vmul.f32 %v15042_v22, %v15451_v55  ;;  %v15453_v26 = vrot.slane %v15452_v62, 4  ;;  %v15457_v15 = vld [vmem:[#allocation109_spill] sm:$0xff] }
 0x269   : > { %v15455_v48 = vrot.slane %v15454_v9, 4  ;;  %v5426_v0 = vrot.slane %v5313_v47, 4  ;;  %v1034_v30 = vmul.f32 %v15117_v29, %v15456_v44  ;;  %v5005_v60 = vadd.f32 %v9950_v41, %v4774_v17  ;;  %v15459_v9 = vld [vmem:[#allocation52_spill] sm:$0xff] }
 0x26a   : > { %v10091_v39 = vsel %vm368_vm0, %v15453_v26, %v4946_v63  ;;  %v2980_v45 = vadd.f32 %v2904_v36, %v2736_v6  ;;  %v930_v12 = vadd.f32 %v898_v37, %v15457_v15  ;;  %v1384_v62 = vmul.f32 %v15234_v38, %v15450_v5  ;;  %v15458_v63 = vld [vmem:[#allocation91_spill] sm:$0xff]  ;;  %v15460_v37 = vld [vmem:[#allocation97_spill] sm:$0xff] }
 0x26b   : > { %v10096_v24 = vsel %vm368_vm0, %v15455_v48, %v5188_v35  ;;  %v5651_v19 = vrot.slane %v5544_v50, 4  ;;  %v1100_v26 = vmul.f32 %v7547_v40, %v15458_v63  ;;  %v10108_v35 = vmul.f32 %v15234_v38, %v15459_v9 }
 0x26c   : > { %v1618_v47 = vmul.f32 %v15122_v31, %v15451_v55  ;;  %v5249_v48 = vadd.f32 %v9955_v32, %v5005_v60  ;;  %v3211_v41 = vadd.f32 %v3142_v8, %v2980_v45  ;;  %v998_v36 = vadd.f32 %v966_v28, %v930_v12  ;;  %v15464_v8 = vld [vmem:[#allocation153_spill] sm:$0xff]  ;;  %v15466_v45 = vld [vmem:[#allocation155_spill] sm:$0xff] }
 0x26d   : > { %v1480_v17 = vrot.slane %v1384_v62, 1  ;;  %v14431_v6 = vrot.slane %v10108_v35, 1  ;;  %v10116_v50 = vmul.f32 %v15122_v31, %v15460_v37  ;;  %v1862_v43 = vmul.f32 %v15050_v3, %v15456_v44 }
 0x26e   : > { %v1722_v15 = vrot.slane %v1618_v47, 1  ;;  %v5480_v4 = vadd.f32 %v9978_v56, %v5249_v48  ;;  %v3429_v2 = vadd.f32 %v10032_v7, %v3211_v41  ;;  %v1064_v27 = vadd.f32 %v1034_v30, %v998_v36 }
 0x26f   : > { %15461 = vst [vmem:[#allocation104_spill] sm:$0xff] %v10116_v50  ;;  %v10124_v32 = vmul.f32 %v15050_v3, %v15462_v14  ;;  %v15465_v28 = vrot.slane %v15464_v8, 4  ;;  %v15467_v12 = vrot.slane %v15466_v45, 4  ;;  %v14432_v47 = vrot.slane %v10116_v50, 1 }
 0x270   : > { %v2093_v56 = vmul.f32 %v15053_v49, %v15458_v63  ;;  %v10140_v30 = vadd.f32 %v9983_v11, %v5480_v4  ;;  %v3648_v48 = vadd.f32 %v3576_v20, %v3429_v2  ;;  %v1128_v41 = vadd.f32 %v1100_v26, %v1064_v27  ;;  %v15472_v2 = vld [vmem:[#allocation4_spill] sm:$0xff] }
 0x271   : > { %15463 = vst [vmem:[#allocation106_spill] sm:$0xff] %v10124_v32  ;;  %v10129_v60 = vsel %vm368_vm0, %v15465_v28, %v5426_v0  ;;  %v10134_v62 = vsel %vm368_vm0, %v15467_v12, %v5651_v19  ;;  %v1482_v0 = vsel %vm1240_vm5, %v1480_v17, %v14431_v6  ;;  %v1960_v36 = vrot.slane %v1862_v43, 1  ;;  %v15470_v28 = vld [vmem:[#allocation103_spill] sm:$0xff] }
 0x272   : > { %15468 = vst [vmem:[#allocation110_spill] sm:$0xff] %v10134_v62  ;;  %15469 = vst [vmem:[#allocation113_spill] sm:$0xff] %v10140_v30  ;;  %v10148_v19 = vmul.f32 %v15053_v49, %v15470_v28  ;;  %v2527_v45 = vmul.f32 %v15247_v18, %v15450_v5  ;;  %5769 = vrot.lane.b32.xlu1 %v10140_v30, %s7431_s7  ;;  %5962 = vrot.lane.b32.xlu0 %v10140_v30, %s7432_s8  ;;  %v2185_v11 = vrot.slane %v2093_v56, 1 }
 0x273   : > { %v3879_v27 = vadd.f32 %v3805_v61, %v3648_v48  ;;  %v1347_v4 = vadd.f32 %v15472_v2, %v1128_v41  ;;  %v1724_v43 = vsel %vm1240_vm5, %v1722_v15, %v14432_v47  ;;  %v10163_v26 = vmul.f32 %v15247_v18, %v15459_v9 }
 0x274   : > { %15471 = vst [vmem:[#allocation15_spill] sm:$0xff] %v10148_v19  ;;  %v14434_v20 = vrot.slane %v10148_v19, 1  ;;  %v2623_v17 = vrot.slane %v2527_v45, 2  ;;  %v2761_v12 = vmul.f32 %v15248_v33, %v15451_v55  ;;  %v10169_v61 = vmul.f32 %v15248_v33, %v15460_v37 }
 0x275   : > { %15473 = vst [vmem:[#allocation112_spill] sm:$0xff] %v10163_v26  ;;  %v4123_v6 = vadd.f32 %v4047_v34, %v3879_v27  ;;  %v1578_v8 = vadd.f32 %v1482_v0, %v1347_v4  ;;  %v3005_v15 = vmul.f32 %v7558_v46, %v15456_v44  ;;  %v15475_v56 = vrot.slane %v10124_v32, 1 }
 0x276   : > { %15474 = vst [vmem:[#allocation74_spill] sm:$0xff] %v10169_v61  ;;  %v14435_v41 = vrot.slane %v10163_v26, 2  ;;  %v2865_v2 = vrot.slane %v2761_v12, 2  ;;  %v10179_v45 = vmul.f32 %v7558_v46, %v15462_v14  ;;  %v14436_v27 = vrot.slane %v10169_v61, 2 }
 0x277   : > { %v1962_v48 = vsel %vm1240_vm5, %v1960_v36, %v15475_v56  ;;  %v4354_v34 = vadd.f32 %v10062_v42, %v4123_v6  ;;  %v1822_v0 = vadd.f32 %v1724_v43, %v1578_v8  ;;  %v3103_v4 = vrot.slane %v3005_v15, 2 }
 0x278   : > { %15476 = vst [vmem:[#allocation39_spill] sm:$0xff] %v10179_v45  ;;  %v2187_v47 = vsel %vm1240_vm5, %v2185_v11, %v14434_v20  ;;  %v14437_v30 = vrot.slane %v10179_v45, 2  ;;  %v3236_v36 = vmul.f32 %v7579_v59, %v15458_v63  ;;  %v10191_v12 = vmul.f32 %v7579_v59, %v15470_v28 }
 0x279   : > { %v4572_v56 = vadd.f32 %v10067_v1, %v4354_v34  ;;  %v2053_v42 = vadd.f32 %v1962_v48, %v1822_v0  ;;  %v2625_v6 = vsel %vm2383_vm6, %v2623_v17, %v14435_v41  ;;  %v3670_v8 = vmul.f32 %v15249_v23, %v15450_v5 }
 0x27a   : > { %15477 = vst [vmem:[#allocation42_spill] sm:$0xff] %v10191_v12  ;;  %v2867_v43 = vsel %vm2383_vm6, %v2865_v2, %v14436_v27  ;;  %v3328_v11 = vrot.slane %v3236_v36, 2  ;;  %v14440_v15 = vrot.slane %v10191_v12, 2  ;;  %v10205_v20 = vmul.f32 %v15249_v23, %v15459_v9 }
 0x27b   : > { %v4790_v48 = vadd.f32 %v10072_v57, %v4572_v56  ;;  %v2271_v34 = vadd.f32 %v2187_v47, %v2053_v42  ;;  %v3105_v17 = vsel %vm2383_vm6, %v3103_v4, %v14437_v30  ;;  %v3904_v0 = vmul.f32 %v7567_v52, %v15451_v55  ;;  %v15480_v47 = vld [vmem:[#allocation117_spill] sm:$0xff] }
 0x27c   : > { %15478 = vst [vmem:[#allocation5_spill] sm:$0xff] %v10205_v20  ;;  %v3766_v41 = vrot.slane %v3670_v8, 3  ;;  %v10216_v36 = vmul.f32 %v7567_v52, %v15460_v37  ;;  %v4148_v27 = vmul.f32 %v7569_v53, %v15456_v44  ;;  %v10224_v4 = vmul.f32 %v7569_v53, %v15462_v14 }
 0x27d   : > { %v5021_v57 = vadd.f32 %v10091_v39, %v4790_v48  ;;  %v2490_v56 = vadd.f32 %v15480_v47, %v2271_v34  ;;  %v4008_v42 = vrot.slane %v3904_v0, 3  ;;  %v3330_v8 = vsel %vm2383_vm6, %v3328_v11, %v14440_v15 }
 0x27e   : > { %15479 = vst [vmem:[#allocation111_spill] sm:$0xff] %v10216_v36  ;;  %15481 = vst [vmem:[#allocation41_spill] sm:$0xff] %v10224_v4  ;;  %v14442_v30 = vrot.slane %v10216_v36, 3  ;;  %v4246_v2 = vrot.slane %v4148_v27, 3  ;;  %v4379_v1 = vmul.f32 %v15434_v25, %v15458_v63  ;;  %v10236_v34 = vmul.f32 %v15434_v25, %v15470_v28 }
 0x27f   : > { %v5265_v7 = vadd.f32 %v10096_v24, %v5021_v57  ;;  %v2721_v39 = vadd.f32 %v2625_v6, %v2490_v56  ;;  %v15483_v0 = vrot.slane %v10205_v20, 3  ;;  %v4812_v27 = vmul.f32 %v15263_v13, %v15450_v5  ;;  %v15503_v20 = vld [vmem:[#allocation99_spill] sm:$0xff] }
 0x280   : > { %15482 = vst [vmem:[#allocation123_spill] sm:$0xff] %v10236_v34  ;;  %v4471_v11 = vrot.slane %v4379_v1, 3  ;;  %v10245_v15 = vmul.f32 %v15263_v13, %v15459_v9  ;;  %v4010_v57 = vsel %vm3526_vm7, %v4008_v42, %v14442_v30  ;;  %v14443_v56 = vrot.slane %v10236_v34, 3 }
 0x281   : > { %v3768_v47 = vsel %vm3526_vm7, %v3766_v41, %v15483_v0  ;;  %v5496_v24 = vadd.f32 %v10129_v60, %v5265_v7  ;;  %v2965_v6 = vadd.f32 %v2867_v43, %v2721_v39  ;;  %v4908_v48 = vrot.slane %v4812_v27, 4 }
 0x282   : > { %15484 = vst [vmem:[#allocation28_spill] sm:$0xff] %v10245_v15  ;;  %v5046_v1 = vmul.f32 %v14991_v54, %v15451_v55  ;;  %v10257_v0 = vmul.f32 %v14991_v54, %v15460_v37  ;;  %v15487_v60 = vrot.slane %v10224_v4, 3  ;;  %v5290_v42 = vmul.f32 %v14993_v51, %v15456_v44  ;;  %v15494_v55 = vld [vmem:[#allocation77_spill] sm:$0xff] }
 0x283   : > { %v10260_v5 = vadd.f32 %v10134_v62, %v5496_v24  ;;  %v3196_v7 = vadd.f32 %v3105_v17, %v2965_v6  ;;  %v4473_v39 = vsel %vm3526_vm7, %v4471_v11, %v14443_v56  ;;  %v10273_v41 = vmul.f32 %v14993_v51, %v15462_v14  ;;  %v15490_v56 = vld [vmem:[#allocation57_spill] sm:$0xff]  ;;  %v15491_v62 = vld [vmem:[#allocation56_spill] sm:$0xff] }
 0x284   : > { %15485 = vst [vmem:[#allocation133_spill] sm:$0xff] %v10257_v0  ;;  %v4248_v43 = vsel %vm3526_vm7, %v4246_v2, %v15487_v60  ;;  %v5150_v27 = vrot.slane %v5046_v1, 4  ;;  %v5388_v2 = vrot.slane %v5290_v42, 4  ;;  %v5521_v24 = vmul.f32 %v10079_v10, %v15458_v63 }
 0x285   : > { %15486 = vst [vmem:[#allocation134_spill] sm:$0xff] %v10260_v5  ;;  %15488 = vst [vmem:[#allocation33_spill] sm:$0xff] %v10273_v41  ;;  %5801 = vrot.lane.b32.xlu1 %v10260_v5, %s7431_s7  ;;  %5994 = vrot.lane.b32.xlu0 %v10260_v5, %s7432_s8  ;;  %v3414_v17 = vadd.f32 %v3330_v8, %v3196_v7  ;;  %v10283_v11 = vmul.f32 %v10079_v10, %v15470_v28  ;;  %v15489_v6 = vrot.slane %v10245_v15, 4  ;;  %v15492_v7 = vld [vmem:[#allocation120_spill] sm:$0xff] }
 0x286   : > { %v14456_v60 = vrot.slane %v10273_v41, 4  ;;  %v852_v30 = vmul.f32 %v15390_v21, %v15490_v56  ;;  %v914_v8 = vmul.f32 %v15223_v16, %v15491_v62  ;;  %v15493_v5 = vrot.slane %v10257_v0, 4  ;;  %v15495_v21 = vld [vmem:[#allocation66_spill] sm:$0xff] }
 0x287   : > { %v4910_v1 = vsel %vm368_vm0, %v4908_v48, %v15489_v6  ;;  %v3633_v42 = vadd.f32 %v15492_v7, %v3414_v17  ;;  %v5613_v44 = vrot.slane %v5521_v24, 4  ;;  %v982_v15 = vmul.f32 %v15042_v22, %v15494_v55  ;;  %v15496_v17 = vld [vmem:[#allocation92_spill] sm:$0xff] }
 0x288   : > { %v5152_v63 = vsel %vm368_vm0, %v5150_v27, %v15493_v5  ;;  %v5390_v48 = vsel %vm368_vm0, %v5388_v2, %v14456_v60  ;;  %v946_v34 = vadd.f32 %v914_v8, %v852_v30  ;;  %v1050_v4 = vmul.f32 %v15117_v29, %v15495_v21  ;;  %v15498_v5 = vld [vmem:[#allocation6_spill] sm:$0xff]  ;;  %v15499_v24 = vld [vmem:[#allocation76_spill] sm:$0xff]  ;;  %v15501_v30 = vld [vmem:[#allocation75_spill] sm:$0xff] }
 0x289   : > { %v3864_v36 = vadd.f32 %v3768_v47, %v3633_v42  ;;  %v10307_v7 = vmul.f32 %v7547_v40, %v15496_v17  ;;  %v1186_v27 = vmul.f32 %v15498_v5, %v15490_v56  ;;  %v10313_v0 = vmul.f32 %v15498_v5, %v15499_v24 }
 0x28a   : > { %v1014_v41 = vadd.f32 %v982_v15, %v946_v34  ;;  %v1408_v2 = vmul.f32 %v15234_v38, %v15491_v62  ;;  %v10319_v8 = vmul.f32 %v15234_v38, %v15501_v30  ;;  %v1642_v47 = vmul.f32 %v15122_v31, %v15494_v55 }
 0x28b   : > { %15497 = vst [vmem:[#allocation135_spill] sm:$0xff] %v10307_v7  ;;  %15500 = vst [vmem:[#allocation114_spill] sm:$0xff] %v10313_v0  ;;  %v4108_v42 = vadd.f32 %v4010_v57, %v3864_v36  ;;  %v1291_v60 = vrot.slane %v1186_v27, 1  ;;  %v14464_v6 = vrot.slane %v10313_v0, 1  ;;  %v10326_v12 = vmul.f32 %v15122_v31, %v15503_v20  ;;  %v15508_v0 = vld [vmem:[#allocation125_spill] sm:$0xff] }
 0x28c   : > { %15502 = vst [vmem:[#allocation136_spill] sm:$0xff] %v10319_v8  ;;  %v1080_v5 = vadd.f32 %v1050_v4, %v1014_v41  ;;  %v1520_v15 = vrot.slane %v1408_v2, 1  ;;  %v14465_v34 = vrot.slane %v10319_v8, 1  ;;  %v1762_v45 = vrot.slane %v1642_v47, 1  ;;  %v15505_v41 = vld [vmem:[#allocation90_spill] sm:$0xff] }
 0x28d   : > { %15504 = vst [vmem:[#allocation137_spill] sm:$0xff] %v10326_v12  ;;  %v4339_v61 = vadd.f32 %v4248_v43, %v4108_v42  ;;  %v1293_v26 = vsel %vm1240_vm5, %v1291_v60, %v14464_v6  ;;  %v14470_v19 = vrot.slane %v10326_v12, 1  ;;  %v1886_v36 = vmul.f32 %v15050_v3, %v15495_v21  ;;  %v15506_v42 = vld [vmem:[#allocation105_spill] sm:$0xff] }
 0x28e   : > { %v1144_v57 = vadd.f32 %v10307_v7, %v1080_v5  ;;  %v1522_v4 = vsel %vm1240_vm5, %v1520_v15, %v14465_v34  ;;  %v10341_v27 = vmul.f32 %v15050_v3, %v15505_v41  ;;  %v2117_v43 = vmul.f32 %v15053_v49, %v15496_v17  ;;  %v15507_v7 = vld [vmem:[#allocation11_spill] sm:$0xff] }
 0x28f   : > { %v4557_v2 = vadd.f32 %v4473_v39, %v4339_v61  ;;  %v1764_v60 = vsel %vm1240_vm5, %v1762_v45, %v14470_v19  ;;  %v2000_v47 = vrot.slane %v1886_v36, 1  ;;  %v10350_v5 = vmul.f32 %v15053_v49, %v15506_v42 }
 0x290   : > { %v1363_v6 = vadd.f32 %v1293_v26, %v1144_v57  ;;  %v14474_v15 = vrot.slane %v10341_v27, 1  ;;  %v2225_v34 = vrot.slane %v2117_v43, 1  ;;  %v2329_v8 = vmul.f32 %v15507_v7, %v15490_v56 }
 0x291   : > { %v4775_v32 = vadd.f32 %v15508_v0, %v4557_v2  ;;  %v10359_v39 = vmul.f32 %v15507_v7, %v15499_v24  ;;  %v2551_v45 = vmul.f32 %v15247_v18, %v15491_v62  ;;  %v15510_v36 = vrot.slane %v10283_v11, 4 }
 0x292   : > { %v1594_v57 = vadd.f32 %v1522_v4, %v1363_v6  ;;  %v2434_v43 = vrot.slane %v2329_v8, 2  ;;  %v10368_v19 = vmul.f32 %v15247_v18, %v15501_v30  ;;  %v2002_v2 = vsel %vm1240_vm5, %v2000_v47, %v14474_v15 }
 0x293   : > { %15509 = vst [vmem:[#allocation138_spill] sm:$0xff] %v10359_v39  ;;  %v5615_v26 = vsel %vm368_vm0, %v5613_v44, %v15510_v36  ;;  %v5006_v0 = vadd.f32 %v4910_v1, %v4775_v32  ;;  %v14476_v61 = vrot.slane %v10359_v39, 2  ;;  %v2663_v12 = vrot.slane %v2551_v45, 2 }
 0x294   : > { %15511 = vst [vmem:[#allocation139_spill] sm:$0xff] %v10368_v19  ;;  %v1838_v7 = vadd.f32 %v1764_v60, %v1594_v57  ;;  %v14475_v50 = vrot.slane %v10368_v19, 2  ;;  %v2785_v44 = vmul.f32 %v15248_v33, %v15494_v55  ;;  %v10379_v6 = vmul.f32 %v15248_v33, %v15503_v20  ;;  %v15544_v19 = vld [vmem:[#allocation104_spill] sm:$0xff] }
 0x295   : > { %v5250_v8 = vadd.f32 %v5152_v63, %v5006_v0  ;;  %v15513_v32 = vrot.slane %v10350_v5, 1  ;;  %v3029_v4 = vmul.f32 %v7558_v46, %v15495_v21  ;;  %v10390_v60 = vmul.f32 %v7558_v46, %v15505_v41 }
 0x296   : > { %15512 = vst [vmem:[#allocation140_spill] sm:$0xff] %v10379_v6  ;;  %v2069_v47 = vadd.f32 %v2002_v2, %v1838_v7  ;;  %v2436_v45 = vsel %vm2383_vm6, %v2434_v43, %v14476_v61  ;;  %v2905_v36 = vrot.slane %v2785_v44, 2  ;;  %v14477_v63 = vrot.slane %v10379_v6, 2 }
 0x297   : > { %v10384_v1 = vsel %vm1240_vm5, %v2225_v34, %v15513_v32  ;;  %15515 = vst [vmem:[#allocation107_spill] sm:$0xff] %v10390_v60  ;;  %v5481_v57 = vadd.f32 %v5390_v48, %v5250_v8  ;;  %v2665_v34 = vsel %vm2383_vm6, %v2663_v12, %v14475_v50  ;;  %v3143_v0 = vrot.slane %v3029_v4, 2 }
 0x298   : > { %15514 = vst [vmem:[#allocation129_spill] sm:$0xff] %v10384_v1  ;;  %v3260_v32 = vmul.f32 %v7579_v59, %v15496_v17  ;;  %v2287_v15 = vadd.f32 %v10384_v1, %v2069_v47  ;;  %v14483_v7 = vrot.slane %v10390_v60, 2  ;;  %v10405_v2 = vmul.f32 %v7579_v59, %v15506_v42 }
 0x299   : > { %v3472_v43 = vmul.f32 %v15339_v58, %v15490_v56  ;;  %v10409_v48 = vadd.f32 %v5615_v26, %v5481_v57  ;;  %v2907_v12 = vsel %vm2383_vm6, %v2905_v36, %v14477_v63  ;;  %v10416_v8 = vmul.f32 %v15339_v58, %v15499_v24 }
 0x29a   : > { %15516 = vst [vmem:[#allocation142_spill] sm:$0xff] %v10405_v2  ;;  %v3368_v44 = vrot.slane %v3260_v32, 2  ;;  %v2506_v4 = vadd.f32 %v2436_v45, %v2287_v15  ;;  %v14482_v47 = vrot.slane %v10405_v2, 2  ;;  %v3694_v61 = vmul.f32 %v15249_v23, %v15491_v62 }
 0x29b   : > { %15517 = vst [vmem:[#allocation121_spill] sm:$0xff] %v10409_v48  ;;  %15518 = vst [vmem:[#allocation12_spill] sm:$0xff] %v10416_v8  ;;  %v3577_v50 = vrot.slane %v3472_v43, 3  ;;  %5964 = vrot.lane.b32.xlu1 %v10409_v48, %s7432_s8  ;;  %5771 = vrot.lane.b32.xlu0 %v10409_v48, %s7431_s7  ;;  %v10428_v36 = vmul.f32 %v15249_v23, %v15501_v30  ;;  %v3928_v15 = vmul.f32 %v7567_v52, %v15494_v55 }
 0x29c   : > { %v10434_v45 = vmul.f32 %v7567_v52, %v15503_v20  ;;  %v2737_v57 = vadd.f32 %v2665_v34, %v2506_v4  ;;  %v3145_v32 = vsel %vm2383_vm6, %v3143_v0, %v14483_v7  ;;  %v3806_v43 = vrot.slane %v3694_v61, 3 }
 0x29d   : > { %15519 = vst [vmem:[#allocation13_spill] sm:$0xff] %v10428_v36  ;;  %v4172_v63 = vmul.f32 %v7569_v53, %v15495_v21  ;;  %v10444_v26 = vsel %vm2383_vm6, %v3368_v44, %v14482_v47  ;;  %v15522_v48 = vrot.slane %v10416_v8, 3  ;;  %v14486_v6 = vrot.slane %v10428_v36, 3 }
 0x29e   : > { %15520 = vst [vmem:[#allocation144_spill] sm:$0xff] %v10434_v45  ;;  %15521 = vst [vmem:[#allocation126_spill] sm:$0xff] %v10444_v26  ;;  %v4048_v34 = vrot.slane %v3928_v15, 3  ;;  %v2981_v4 = vadd.f32 %v2907_v12, %v2737_v57  ;;  %v10453_v61 = vmul.f32 %v7569_v53, %v15505_v41  ;;  %v4403_v0 = vmul.f32 %v15434_v25, %v15496_v17 }
 0x29f   : > { %v3579_v1 = vsel %vm3526_vm7, %v3577_v50, %v15522_v48  ;;  %v3808_v44 = vsel %vm3526_vm7, %v3806_v43, %v14486_v6  ;;  %v4286_v47 = vrot.slane %v4172_v63, 3  ;;  %v10462_v50 = vmul.f32 %v15434_v25, %v15506_v42  ;;  %v15525_v48 = vld [vmem:[#allocation20_spill] sm:$0xff] }
 0x2a0   : > { %15523 = vst [vmem:[#allocation119_spill] sm:$0xff] %v10453_v61  ;;  %v4615_v12 = vmul.f32 %v15525_v48, %v15490_v56  ;;  %v3212_v15 = vadd.f32 %v3145_v32, %v2981_v4  ;;  %v4511_v7 = vrot.slane %v4403_v0, 3  ;;  %v10469_v60 = vmul.f32 %v15525_v48, %v15499_v24 }
 0x2a1   : > { %15524 = vst [vmem:[#allocation146_spill] sm:$0xff] %v10462_v50  ;;  %v4836_v63 = vmul.f32 %v15263_v13, %v15491_v62  ;;  %v10476_v43 = vmul.f32 %v15263_v13, %v15501_v30  ;;  %v15528_v32 = vrot.slane %v10434_v45, 3  ;;  %v5070_v57 = vmul.f32 %v14991_v54, %v15494_v55 }
 0x2a2   : > { %15526 = vst [vmem:[#allocation24_spill] sm:$0xff] %v10469_v60  ;;  %v4719_v8 = vrot.slane %v4615_v12, 4  ;;  %v3430_v6 = vadd.f32 %v10444_v26, %v3212_v15  ;;  %v15529_v12 = vrot.slane %v10453_v61, 3  ;;  %v10491_v48 = vmul.f32 %v14991_v54, %v15503_v20 }
 0x2a3   : > { %15527 = vst [vmem:[#allocation149_spill] sm:$0xff] %v10476_v43  ;;  %v4050_v4 = vsel %vm3526_vm7, %v4048_v34, %v15528_v32  ;;  %v4948_v56 = vrot.slane %v4836_v63, 4  ;;  %v14496_v62 = vrot.slane %v10476_v43, 4  ;;  %v15531_v26 = vrot.slane %v10462_v50, 3 }
 0x2a4   : > { %v4288_v36 = vsel %vm3526_vm7, %v4286_v47, %v15529_v12  ;;  %15530 = vst [vmem:[#allocation150_spill] sm:$0xff] %v10491_v48  ;;  %v3649_v15 = vadd.f32 %v3579_v1, %v3430_v6  ;;  %v5190_v32 = vrot.slane %v5070_v57, 4  ;;  %v5314_v0 = vmul.f32 %v14993_v51, %v15495_v21 }
 0x2a5   : > { %v10496_v34 = vsel %vm3526_vm7, %v4511_v7, %v15531_v26  ;;  %v15533_v55 = vrot.slane %v10469_v60, 4  ;;  %v14498_v63 = vrot.slane %v10491_v48, 4  ;;  %v10506_v12 = vmul.f32 %v14993_v51, %v15505_v41  ;;  %v15537_v48 = vld [vmem:[#allocation53_spill] sm:$0xff] }
 0x2a6   : > { %15532 = vst [vmem:[#allocation108_spill] sm:$0xff] %v10496_v34  ;;  %v5545_v6 = vmul.f32 %v10079_v10, %v15496_v17  ;;  %v3880_v1 = vadd.f32 %v3808_v44, %v3649_v15  ;;  %v5428_v7 = vrot.slane %v5314_v0, 4  ;;  %v10512_v26 = vmul.f32 %v10079_v10, %v15506_v42  ;;  %v15536_v17 = vld [vmem:[#allocation124_spill] sm:$0xff] }
 0x2a7   : > { %v4721_v47 = vsel %vm368_vm0, %v4719_v8, %v15533_v55  ;;  %15534 = vst [vmem:[#allocation151_spill] sm:$0xff] %v10506_v12  ;;  %v899_v57 = vmul.f32 %v15223_v16, %v15459_v9  ;;  %v4950_v55 = vsel %vm368_vm0, %v4948_v56, %v14496_v62  ;;  %v5192_v8 = vsel %vm368_vm0, %v5190_v32, %v14498_v63  ;;  %v15538_v63 = vld [vmem:[#allocation81_spill] sm:$0xff] }
 0x2a8   : > { %15535 = vst [vmem:[#allocation152_spill] sm:$0xff] %v10512_v26  ;;  %v14503_v21 = vrot.slane %v10506_v12, 4  ;;  %v967_v44 = vmul.f32 %v15042_v22, %v15460_v37  ;;  %v4124_v0 = vadd.f32 %v4050_v4, %v3880_v1  ;;  %v5653_v15 = vrot.slane %v5545_v6, 4  ;;  %v15539_v6 = vld [vmem:[#allocation78_spill] sm:$0xff]  ;;  %v15540_v12 = vld [vmem:[#allocation101_spill] sm:$0xff] }
 0x2a9   : > { %v931_v60 = vadd.f32 %v899_v57, %v15536_v17  ;;  %v1035_v9 = vmul.f32 %v15117_v29, %v15462_v14  ;;  %v1386_v32 = vmul.f32 %v15234_v38, %v15537_v48  ;;  %v1620_v43 = vmul.f32 %v15122_v31, %v15538_v63 }
 0x2aa   : > { %v5430_v56 = vsel %vm368_vm0, %v5428_v7, %v14503_v21  ;;  %v4355_v37 = vadd.f32 %v4288_v36, %v4124_v0  ;;  %v1101_v17 = vmul.f32 %v7547_v40, %v15470_v28  ;;  %v1864_v1 = vmul.f32 %v15050_v3, %v15539_v6 }
 0x2ab   : > { %v999_v4 = vadd.f32 %v967_v44, %v931_v60  ;;  %v1483_v57 = vrot.slane %v1386_v32, 1  ;;  %v1725_v14 = vrot.slane %v1620_v43, 1  ;;  %v2095_v7 = vmul.f32 %v15053_v49, %v15540_v12 }
 0x2ac   : > { %v2529_v21 = vmul.f32 %v15247_v18, %v15537_v48  ;;  %v4573_v62 = vadd.f32 %v10496_v34, %v4355_v37  ;;  %v1963_v61 = vrot.slane %v1864_v1, 1  ;;  %v2763_v60 = vmul.f32 %v15248_v33, %v15538_v63 }
 0x2ad   : > { %v1065_v50 = vadd.f32 %v1035_v9, %v999_v4  ;;  %v15541_v36 = vrot.slane %v10512_v26, 4  ;;  %v15543_v43 = vrot.slane %v10108_v35, 1  ;;  %v2188_v32 = vrot.slane %v2095_v7, 1  ;;  %v15546_v4 = vld [vmem:[#allocation106_spill] sm:$0xff]  ;;  %v15548_v26 = vld [vmem:[#allocation15_spill] sm:$0xff] }
 0x2ae   : > { %v2626_v28 = vrot.slane %v2529_v21, 2  ;;  %v4791_v45 = vadd.f32 %v4721_v47, %v4573_v62  ;;  %v15545_v37 = vrot.slane %v15544_v19, 1  ;;  %v15547_v1 = vrot.slane %v15546_v4, 1  ;;  %v15551_v47 = vld [vmem:[#allocation112_spill] sm:$0xff] }
 0x2af   : > { %v10550_v44 = vsel %vm368_vm0, %v5653_v15, %v15541_v36  ;;  %v1484_v0 = vsel %vm1240_vm5, %v15543_v43, %v1483_v57  ;;  %v1129_v2 = vadd.f32 %v1101_v17, %v1065_v50  ;;  %v15549_v39 = vrot.slane %v15548_v26, 1  ;;  %v15550_v50 = vld [vmem:[#allocation30_spill] sm:$0xff] }
 0x2b0   : > { %15542 = vst [vmem:[#allocation109_spill] sm:$0xff] %v10550_v44  ;;  %v1726_v9 = vsel %vm1240_vm5, %v15545_v37, %v1725_v14  ;;  %v1964_v34 = vsel %vm1240_vm5, %v15547_v1, %v1963_v61  ;;  %v2868_v36 = vrot.slane %v2763_v60, 2  ;;  %v3007_v35 = vmul.f32 %v7558_v46, %v15539_v6  ;;  %v15555_v37 = vld [vmem:[#allocation39_spill] sm:$0xff] }
 0x2b1   : > { %v2189_v15 = vsel %vm1240_vm5, %v15549_v39, %v2188_v32  ;;  %v3238_v21 = vmul.f32 %v7579_v59, %v15540_v12  ;;  %v5022_v62 = vadd.f32 %v4950_v55, %v4791_v45  ;;  %v1348_v19 = vadd.f32 %v15550_v50, %v1129_v2  ;;  %v15553_v55 = vld [vmem:[#allocation74_spill] sm:$0xff] }
 0x2b2   : > { %v15552_v14 = vrot.slane %v15551_v47, 2  ;;  %v3672_v61 = vmul.f32 %v15249_v23, %v15537_v48  ;;  %v3106_v26 = vrot.slane %v3007_v35, 2  ;;  %v3906_v39 = vmul.f32 %v7567_v52, %v15538_v63 }
 0x2b3   : > { %v3331_v57 = vrot.slane %v3238_v21, 2  ;;  %v4150_v7 = vmul.f32 %v7569_v53, %v15539_v6  ;;  %v5266_v60 = vadd.f32 %v5192_v8, %v5022_v62  ;;  %v1579_v43 = vadd.f32 %v1484_v0, %v1348_v19  ;;  %v15559_v0 = vld [vmem:[#allocation5_spill] sm:$0xff] }
 0x2b4   : > { %v2627_v17 = vsel %vm2383_vm6, %v15552_v14, %v2626_v28  ;;  %v3769_v45 = vrot.slane %v3672_v61, 3  ;;  %v4381_v2 = vmul.f32 %v15434_v25, %v15540_v12  ;;  %v15554_v32 = vrot.slane %v15553_v55, 2  ;;  %v15557_v14 = vld [vmem:[#allocation42_spill] sm:$0xff]  ;;  %v15561_v61 = vld [vmem:[#allocation111_spill] sm:$0xff] }
 0x2b5   : > { %v15556_v4 = vrot.slane %v15555_v37, 2  ;;  %v4011_v35 = vrot.slane %v3906_v39, 3  ;;  %v4249_v21 = vrot.slane %v4150_v7, 3  ;;  %v5497_v50 = vadd.f32 %v5430_v56, %v5266_v60  ;;  %v15566_v37 = vld [vmem:[#allocation2_spill] sm:$0xff] }
 0x2b6   : > { %v2869_v28 = vsel %vm2383_vm6, %v15554_v32, %v2868_v36  ;;  %v1823_v47 = vadd.f32 %v1726_v9, %v1579_v43  ;;  %v15558_v53 = vrot.slane %v15557_v14, 2  ;;  %v15560_v62 = vrot.slane %v15559_v0, 3  ;;  %v15569_v0 = vld [vmem:[#allocation28_spill] sm:$0xff] }
 0x2b7   : > { %v3107_v1 = vsel %vm2383_vm6, %v15556_v4, %v3106_v26  ;;  %v15562_v55 = vrot.slane %v15561_v61, 3  ;;  %v4474_v32 = vrot.slane %v4381_v2, 3  ;;  %v4814_v26 = vmul.f32 %v15263_v13, %v15537_v48 }
 0x2b8   : > { %v3332_v8 = vsel %vm2383_vm6, %v15558_v53, %v3331_v57  ;;  %v10592_v19 = vsel %vm3526_vm7, %v15560_v62, %v3769_v45  ;;  %v5048_v56 = vmul.f32 %v14991_v54, %v15538_v63  ;;  %v10604_v9 = vadd.f32 %v10550_v44, %v5497_v50  ;;  %v15564_v57 = vld [vmem:[#allocation41_spill] sm:$0xff]  ;;  %v15567_v50 = vld [vmem:[#allocation123_spill] sm:$0xff] }
 0x2b9   : > { %v10597_v36 = vsel %vm3526_vm7, %v15562_v55, %v4011_v35  ;;  %v2054_v53 = vadd.f32 %v1964_v34, %v1823_v47  ;;  %v15565_v39 = vrot.slane %v15564_v57, 3  ;;  %v5292_v60 = vmul.f32 %v14993_v51, %v15539_v6  ;;  %v15571_v55 = vld [vmem:[#allocation133_spill] sm:$0xff]  ;;  %v15581_v6 = vld [vmem:[#allocation11_spill] sm:$0xff] }
 0x2ba   : > { %15563 = vst [vmem:[#allocation153_spill] sm:$0xff] %v10604_v9  ;;  %v4911_v43 = vrot.slane %v4814_v26, 4  ;;  %v5153_v45 = vrot.slane %v5048_v56, 4  ;;  %v5523_v2 = vmul.f32 %v10079_v10, %v15540_v12  ;;  %v853_v4 = vmul.f32 %v15566_v37, %v15499_v24  ;;  %5996 = vrot.lane.b32.xlu1 %v10604_v9, %s7432_s8  ;;  %5803 = vrot.lane.b32.xlu0 %v10604_v9, %s7431_s7 }
 0x2bb   : > { %v10609_v7 = vsel %vm3526_vm7, %v15565_v39, %v4249_v21  ;;  %v2272_v34 = vadd.f32 %v2189_v15, %v2054_v53  ;;  %v915_v35 = vmul.f32 %v15223_v16, %v15501_v30  ;;  %v983_v21 = vmul.f32 %v15042_v22, %v15503_v20  ;;  %v15573_v53 = vld [vmem:[#allocation128_spill] sm:$0xff]  ;;  %v15585_v30 = vld [vmem:[#allocation114_spill] sm:$0xff] }
 0x2bc   : > { %v15568_v47 = vrot.slane %v15567_v50, 3  ;;  %v15570_v62 = vrot.slane %v15569_v0, 4  ;;  %v15572_v26 = vrot.slane %v15571_v55, 4  ;;  %v5391_v56 = vrot.slane %v5292_v60, 4 }
 0x2bd   : > { %v2491_v57 = vadd.f32 %v15573_v53, %v2272_v34  ;;  %v5616_v39 = vrot.slane %v5523_v2, 4  ;;  %v947_v9 = vadd.f32 %v915_v35, %v853_v4  ;;  %v1051_v50 = vmul.f32 %v15117_v29, %v15505_v41  ;;  %v15579_v2 = vld [vmem:[#allocation79_spill] sm:$0xff]  ;;  %v15580_v35 = vld [vmem:[#allocation102_spill] sm:$0xff] }
 0x2be   : > { %v10628_v14 = vsel %vm3526_vm7, %v15568_v47, %v4474_v32  ;;  %v10633_v61 = vsel %vm368_vm0, %v15570_v62, %v4911_v43  ;;  %v10638_v15 = vsel %vm368_vm0, %v15572_v26, %v5153_v45  ;;  %v10645_v32 = vmul.f32 %v7547_v40, %v15506_v42  ;;  %v15575_v47 = vld [vmem:[#allocation64_spill] sm:$0xff]  ;;  %v15576_v43 = vld [vmem:[#allocation6_spill] sm:$0xff]  ;;  %v15578_v45 = vld [vmem:[#allocation83_spill] sm:$0xff] }
 0x2bf   : > { %v1188_v0 = vmul.f32 %v15576_v43, %v15575_v47  ;;  %v15577_v62 = vld [vmem:[#allocation62_spill] sm:$0xff]  ;;  %v1644_v60 = vmul.f32 %v15122_v31, %v15578_v45  ;;  %v2722_v26 = vadd.f32 %v2627_v17, %v2491_v57  ;;  %v1015_v34 = vadd.f32 %v983_v21, %v947_v9  ;;  %v15582_v42 = vld [vmem:[#allocation33_spill] sm:$0xff] }
 0x2c0   : > { %15574 = vst [vmem:[#allocation155_spill] sm:$0xff] %v10645_v32  ;;  %v1410_v55 = vmul.f32 %v15234_v38, %v15577_v62  ;;  %v1888_v4 = vmul.f32 %v15050_v3, %v15579_v2  ;;  %v2119_v53 = vmul.f32 %v15053_v49, %v15580_v35  ;;  %v2331_v63 = vmul.f32 %v15581_v6, %v15575_v47 }
 0x2c1   : > { %v1294_v24 = vrot.slane %v1188_v0, 1  ;;  %v1765_v12 = vrot.slane %v1644_v60, 1  ;;  %v2966_v48 = vadd.f32 %v2869_v28, %v2722_v26  ;;  %v15583_v41 = vrot.slane %v15582_v42, 4  ;;  %v15587_v60 = vld [vmem:[#allocation136_spill] sm:$0xff] }
 0x2c2   : > { %v1523_v44 = vrot.slane %v1410_v55, 1  ;;  %v1081_v17 = vadd.f32 %v1051_v50, %v1015_v34  ;;  %v2003_v9 = vrot.slane %v1888_v4, 1  ;;  %v15584_v21 = vrot.slane %v10283_v11, 4 }
 0x2c3   : > { %v10662_v20 = vsel %vm368_vm0, %v15583_v41, %v5391_v56  ;;  %v15586_v0 = vrot.slane %v15585_v30, 1  ;;  %v15588_v49 = vrot.slane %v15587_v60, 1  ;;  %v2228_v26 = vrot.slane %v2119_v53, 1  ;;  %v15589_v56 = vld [vmem:[#allocation137_spill] sm:$0xff] }
 0x2c4   : > { %v10667_v57 = vsel %vm368_vm0, %v15584_v21, %v5616_v39  ;;  %v3197_v42 = vadd.f32 %v3107_v1, %v2966_v48  ;;  %v1145_v41 = vadd.f32 %v10645_v32, %v1081_v17  ;;  %v15590_v50 = vrot.slane %v15589_v56, 1 }
 0x2c5   : > { %v1295_v55 = vsel %vm1240_vm5, %v15586_v0, %v1294_v24  ;;  %v1524_v28 = vsel %vm1240_vm5, %v15588_v49, %v1523_v44  ;;  %v2437_v11 = vrot.slane %v2331_v63, 2  ;;  %v15591_v39 = vrot.slane %v10341_v27, 1 }
 0x2c6   : > { %v1766_v34 = vsel %vm1240_vm5, %v15590_v50, %v1765_v12  ;;  %v2553_v24 = vmul.f32 %v15247_v18, %v15577_v62  ;;  %v2787_v30 = vmul.f32 %v15248_v33, %v15578_v45  ;;  %v3031_v49 = vmul.f32 %v7558_v46, %v15579_v2  ;;  %v15597_v50 = vld [vmem:[#allocation139_spill] sm:$0xff] }
 0x2c7   : > { %v2004_v4 = vsel %vm1240_vm5, %v15591_v39, %v2003_v9  ;;  %v3415_v48 = vadd.f32 %v3332_v8, %v3197_v42  ;;  %v1364_v44 = vadd.f32 %v1295_v55, %v1145_v41  ;;  %v3262_v1 = vmul.f32 %v7579_v59, %v15580_v35  ;;  %v15592_v9 = vld [vmem:[#allocation130_spill] sm:$0xff] }
 0x2c8   : > { %v3474_v63 = vmul.f32 %v15339_v58, %v15575_v47  ;;  %v2666_v27 = vrot.slane %v2553_v24, 2  ;;  %v2908_v12 = vrot.slane %v2787_v30, 2  ;;  %v3146_v53 = vrot.slane %v3031_v49, 2  ;;  %v15595_v42 = vld [vmem:[#allocation138_spill] sm:$0xff]  ;;  %v15599_v30 = vld [vmem:[#allocation140_spill] sm:$0xff] }
 0x2c9   : > { %v3696_v17 = vmul.f32 %v15249_v23, %v15577_v62  ;;  %v3634_v21 = vadd.f32 %v15592_v9, %v3415_v48  ;;  %v1595_v0 = vadd.f32 %v1524_v28, %v1364_v44  ;;  %v15593_v60 = vrot.slane %v10350_v5, 1  ;;  %v15601_v44 = vld [vmem:[#allocation107_spill] sm:$0xff] }
 0x2ca   : > { %v3371_v55 = vrot.slane %v3262_v1, 2  ;;  %v15596_v41 = vrot.slane %v15595_v42, 2  ;;  %v15598_v39 = vrot.slane %v15597_v50, 2  ;;  %v15600_v49 = vrot.slane %v15599_v30, 2 }
 0x2cb   : > { %v10698_v8 = vsel %vm1240_vm5, %v15593_v60, %v2228_v26  ;;  %v3580_v48 = vrot.slane %v3474_v63, 3  ;;  %v3865_v28 = vadd.f32 %v10592_v19, %v3634_v21  ;;  %v1839_v5 = vadd.f32 %v1766_v34, %v1595_v0  ;;  %v15603_v60 = vld [vmem:[#allocation142_spill] sm:$0xff] }
 0x2cc   : > { %15594 = vst [vmem:[#allocation4_spill] sm:$0xff] %v10698_v8  ;;  %v2438_v56 = vsel %vm2383_vm6, %v15596_v41, %v2437_v11  ;;  %v2667_v24 = vsel %vm2383_vm6, %v15598_v39, %v2666_v27  ;;  %v2909_v32 = vsel %vm2383_vm6, %v15600_v49, %v2908_v12  ;;  %v15602_v26 = vrot.slane %v15601_v44, 2  ;;  %v15606_v41 = vld [vmem:[#allocation19_spill] sm:$0xff] }
 0x2cd   : > { %v3809_v9 = vrot.slane %v3696_v17, 3  ;;  %v15604_v42 = vrot.slane %v15603_v60, 2  ;;  %v3930_v27 = vmul.f32 %v7567_v52, %v15578_v45  ;;  %v4174_v12 = vmul.f32 %v15606_v41, %v15579_v2 }
 0x2ce   : > { %v3147_v1 = vsel %vm2383_vm6, %v15602_v26, %v3146_v53  ;;  %v4405_v19 = vmul.f32 %v15434_v25, %v15580_v35  ;;  %v4109_v34 = vadd.f32 %v10597_v36, %v3865_v28  ;;  %v2070_v63 = vadd.f32 %v2004_v4, %v1839_v5  ;;  %v15607_v53 = vld [vmem:[#allocation20_spill] sm:$0xff]  ;;  %v15610_v5 = vld [vmem:[#allocation13_spill] sm:$0xff] }
 0x2cf   : > { %v10716_v11 = vsel %vm2383_vm6, %v15604_v42, %v3371_v55  ;;  %v4617_v17 = vmul.f32 %v15607_v53, %v15575_v47  ;;  %v4838_v21 = vmul.f32 %v15263_v13, %v15577_v62  ;;  %v4051_v0 = vrot.slane %v3930_v27, 3  ;;  %v15608_v36 = vld [vmem:[#allocation12_spill] sm:$0xff] }
 0x2d0   : > { %15605 = vst [vmem:[#allocation117_spill] sm:$0xff] %v10716_v11  ;;  %v4289_v55 = vrot.slane %v4174_v12, 3  ;;  %v4514_v50 = vrot.slane %v4405_v19, 3  ;;  %v5072_v39 = vmul.f32 %v14991_v54, %v15578_v45  ;;  %v4340_v30 = vadd.f32 %v10609_v7, %v4109_v34  ;;  %v15612_v27 = vld [vmem:[#allocation144_spill] sm:$0xff]  ;;  %v15614_v34 = vld [vmem:[#allocation119_spill] sm:$0xff] }
 0x2d1   : > { %v2288_v49 = vadd.f32 %v10698_v8, %v2070_v63  ;;  %v4722_v44 = vrot.slane %v4617_v17, 4  ;;  %v4951_v26 = vrot.slane %v4838_v21, 4  ;;  %v15609_v4 = vrot.slane %v15608_v36, 3  ;;  %v15616_v21 = vld [vmem:[#allocation146_spill] sm:$0xff] }
 0x2d2   : > { %v15611_v60 = vrot.slane %v15610_v5, 3  ;;  %v15613_v12 = vrot.slane %v15612_v27, 3  ;;  %v5193_v47 = vrot.slane %v5072_v39, 4  ;;  %v4558_v45 = vadd.f32 %v10628_v14, %v4340_v30  ;;  %v15625_v27 = vld [vmem:[#allocation68_spill] sm:$0xff] }
 0x2d3   : > { %v3581_v28 = vsel %vm3526_vm7, %v15609_v4, %v3580_v48  ;;  %v2507_v7 = vadd.f32 %v2438_v56, %v2288_v49  ;;  %v15615_v63 = vrot.slane %v15614_v34, 3  ;;  %v15617_v36 = vrot.slane %v15616_v21, 3  ;;  %v15619_v4 = vld [vmem:[#allocation24_spill] sm:$0xff]  ;;  %v15624_v49 = vld [vmem:[#allocation131_spill] sm:$0xff]  ;;  %v15626_v34 = vld [vmem:[#allocation65_spill] sm:$0xff] }
 0x2d4   : > { %v3810_v42 = vsel %vm3526_vm7, %v15611_v60, %v3809_v9  ;;  %v4052_v19 = vsel %vm3526_vm7, %v15613_v12, %v4051_v0  ;;  %v15620_v9 = vrot.slane %v15619_v4, 4  ;;  %v15621_v0 = vld [vmem:[#allocation149_spill] sm:$0xff]  ;;  %v5316_v56 = vmul.f32 %v14993_v51, %v15579_v2 }
 0x2d5   : > { %v10746_v17 = vsel %vm3526_vm7, %v15615_v63, %v4289_v55  ;;  %v10751_v48 = vsel %vm3526_vm7, %v15617_v36, %v4514_v50  ;;  %v15622_v39 = vrot.slane %v15621_v0, 4  ;;  %v15623_v55 = vld [vmem:[#allocation43_spill] sm:$0xff]  ;;  %v4776_v60 = vadd.f32 %v15624_v49, %v4558_v45  ;;  %v15627_v63 = vld [vmem:[#allocation150_spill] sm:$0xff] }
 0x2d6   : > { %15618 = vst [vmem:[#allocation120_spill] sm:$0xff] %v10751_v48  ;;  %v10756_v5 = vsel %vm368_vm0, %v15620_v9, %v4722_v44  ;;  %v838_v30 = vmul.f32 %v15566_v37, %v15623_v55  ;;  %v2738_v50 = vadd.f32 %v2667_v24, %v2507_v7  ;;  %v900_v12 = vmul.f32 %v15223_v16, %v15625_v27  ;;  %v15629_v9 = vld [vmem:[#allocation91_spill] sm:$0xff] }
 0x2d7   : > { %v10761_v14 = vsel %vm368_vm0, %v15622_v39, %v4951_v26  ;;  %v968_v44 = vmul.f32 %v15042_v22, %v15626_v34  ;;  %v15628_v21 = vrot.slane %v15627_v63, 4  ;;  %v5431_v36 = vrot.slane %v5316_v56, 4  ;;  %v15630_v49 = vld [vmem:[#allocation151_spill] sm:$0xff]  ;;  %v15632_v56 = vld [vmem:[#allocation86_spill] sm:$0xff] }
 0x2d8   : > { %v10779_v4 = vmul.f32 %v10079_v10, %v15580_v35  ;;  %v1036_v45 = vmul.f32 %v15117_v29, %v15629_v9  ;;  %v5007_v24 = vadd.f32 %v10633_v61, %v4776_v60  ;;  %v2982_v7 = vadd.f32 %v2909_v32, %v2738_v50  ;;  %v15633_v10 = vld [vmem:[#allocation52_spill] sm:$0xff] }
 0x2d9   : > { %v10775_v26 = vsel %vm368_vm0, %v15628_v21, %v5193_v47  ;;  %v932_v0 = vadd.f32 %v900_v12, %v838_v30  ;;  %v1165_v39 = vmul.f32 %v15576_v43, %v15623_v55  ;;  %v15631_v63 = vrot.slane %v15630_v49, 4  ;;  %v15635_v49 = vld [vmem:[#allocation97_spill] sm:$0xff] }
 0x2da   : > { %v1102_v21 = vmul.f32 %v7547_v40, %v15632_v56  ;;  %v10795_v8 = vmul.f32 %v15576_v43, %v15633_v10  ;;  %v1387_v61 = vmul.f32 %v15234_v38, %v15625_v27  ;;  %v5251_v32 = vadd.f32 %v10638_v15, %v5007_v24  ;;  %v15637_v43 = vld [vmem:[#allocation80_spill] sm:$0xff] }
 0x2db   : > { %v10789_v47 = vsel %vm368_vm0, %v15631_v63, %v5431_v36  ;;  %v3213_v30 = vadd.f32 %v3147_v1, %v2982_v7  ;;  %v1000_v60 = vadd.f32 %v968_v44, %v932_v0  ;;  %v1256_v50 = vrot.slane %v1165_v39, 1 }
 0x2dc   : > { %15634 = vst [vmem:[#allocation125_spill] sm:$0xff] %v10795_v8  ;;  %v14538_v12 = vrot.slane %v10795_v8, 1  ;;  %v10803_v36 = vmul.f32 %v15234_v38, %v15635_v49  ;;  %v1485_v63 = vrot.slane %v1387_v61, 1  ;;  %v1621_v35 = vmul.f32 %v15122_v31, %v15626_v34 }
 0x2dd   : > { %v5482_v2 = vadd.f32 %v10662_v20, %v5251_v32  ;;  %v3431_v62 = vadd.f32 %v10716_v11, %v3213_v30  ;;  %v1066_v40 = vadd.f32 %v1036_v45, %v1000_v60  ;;  %v10811_v15 = vmul.f32 %v15122_v31, %v15637_v43  ;;  %v15640_v32 = vld [vmem:[#allocation103_spill] sm:$0xff] }
 0x2de   : > { %15636 = vst [vmem:[#allocation124_spill] sm:$0xff] %v10803_v36  ;;  %v1258_v1 = vsel %vm1240_vm5, %v1256_v50, %v14538_v12  ;;  %v14537_v44 = vrot.slane %v10803_v36, 1  ;;  %v1727_v24 = vrot.slane %v1621_v35, 1  ;;  %v1865_v7 = vmul.f32 %v15050_v3, %v15629_v9  ;;  %v15642_v35 = vld [vmem:[#allocation14_spill] sm:$0xff] }
 0x2df   : > { %15638 = vst [vmem:[#allocation104_spill] sm:$0xff] %v10811_v15  ;;  %v10820_v0 = vadd.f32 %v10667_v57, %v5482_v2  ;;  %v3650_v20 = vadd.f32 %v3581_v28, %v3431_v62  ;;  %v1130_v39 = vadd.f32 %v1102_v21, %v1066_v40  ;;  %v14540_v45 = vrot.slane %v10811_v15, 1  ;;  %v15643_v21 = vld [vmem:[#allocation100_spill] sm:$0xff] }
 0x2e0   : > { %v1487_v61 = vsel %vm1240_vm5, %v1485_v63, %v14537_v44  ;;  %v10828_v30 = vmul.f32 %v15050_v3, %v15640_v32  ;;  %v1965_v60 = vrot.slane %v1865_v7, 1  ;;  %v2096_v50 = vmul.f32 %v15642_v35, %v15632_v56 }
 0x2e1   : > { %15639 = vst [vmem:[#allocation106_spill] sm:$0xff] %v10820_v0  ;;  %5773 = vrot.lane.b32.xlu1 %v10820_v0, %s7431_s7  ;;  %5966 = vrot.lane.b32.xlu0 %v10820_v0, %s7432_s8  ;;  %v3881_v40 = vadd.f32 %v3810_v42, %v3650_v20  ;;  %v5656_v62 = vrot.slane %v10779_v4, 4  ;;  %v1349_v2 = vadd.f32 %v1258_v1, %v1130_v39 }
 0x2e2   : > { %15641 = vst [vmem:[#allocation15_spill] sm:$0xff] %v10828_v30  ;;  %v1729_v57 = vsel %vm1240_vm5, %v1727_v24, %v14540_v45  ;;  %v14541_v28 = vrot.slane %v10828_v30, 1  ;;  %v10843_v63 = vmul.f32 %v15642_v35, %v15643_v21  ;;  %v2190_v7 = vrot.slane %v2096_v50, 1  ;;  %v15689_v30 = vld [vmem:[#allocation90_spill] sm:$0xff] }
 0x2e3   : > { %v2308_v44 = vmul.f32 %v15581_v6, %v15623_v55  ;;  %v4125_v12 = vadd.f32 %v4052_v19, %v3881_v40  ;;  %v1580_v0 = vadd.f32 %v1487_v61, %v1349_v2  ;;  %v10849_v42 = vmul.f32 %v15581_v6, %v15633_v10 }
 0x2e4   : > { %15644 = vst [vmem:[#allocation30_spill] sm:$0xff] %v10843_v63  ;;  %v2530_v4 = vmul.f32 %v15247_v18, %v15625_v27  ;;  %v1967_v1 = vsel %vm1240_vm5, %v1965_v60, %v14541_v28  ;;  %v14542_v24 = vrot.slane %v10843_v63, 1  ;;  %v10859_v39 = vmul.f32 %v15247_v18, %v15635_v49 }
 0x2e5   : > { %15645 = vst [vmem:[#allocation112_spill] sm:$0xff] %v10849_v42  ;;  %v2399_v20 = vrot.slane %v2308_v44, 2  ;;  %v4356_v19 = vadd.f32 %v10746_v17, %v4125_v12  ;;  %v1824_v61 = vadd.f32 %v1729_v57, %v1580_v0  ;;  %v14544_v50 = vrot.slane %v10849_v42, 2  ;;  %v15648_v17 = vld [vmem:[#allocation152_spill] sm:$0xff] }
 0x2e6   : > { %15646 = vst [vmem:[#allocation74_spill] sm:$0xff] %v10859_v39  ;;  %v2628_v40 = vrot.slane %v2530_v4, 2  ;;  %v2192_v2 = vsel %vm1240_vm5, %v2190_v7, %v14542_v24  ;;  %v2764_v60 = vmul.f32 %v15248_v33, %v15626_v34  ;;  %v10871_v44 = vmul.f32 %v15248_v33, %v15637_v43 }
 0x2e7   : > { %v4574_v28 = vadd.f32 %v10751_v48, %v4356_v19  ;;  %v15649_v12 = vrot.slane %v15648_v17, 4  ;;  %v2055_v57 = vadd.f32 %v1967_v1, %v1824_v61  ;;  %v3008_v7 = vmul.f32 %v7558_v46, %v15629_v9 }
 0x2e8   : > { %15647 = vst [vmem:[#allocation39_spill] sm:$0xff] %v10871_v44  ;;  %v2401_v4 = vsel %vm2383_vm6, %v2399_v20, %v14544_v50  ;;  %v2870_v24 = vrot.slane %v2764_v60, 2  ;;  %v14547_v45 = vrot.slane %v10871_v44, 2  ;;  %v10887_v11 = vmul.f32 %v7558_v46, %v15640_v32 }
 0x2e9   : > { %v10877_v0 = vsel %vm368_vm0, %v15649_v12, %v5656_v62  ;;  %v4792_v19 = vadd.f32 %v10756_v5, %v4574_v28  ;;  %v2273_v17 = vadd.f32 %v2192_v2, %v2055_v57  ;;  %v15652_v62 = vrot.slane %v10859_v39, 2 }
 0x2ea   : > { %15650 = vst [vmem:[#allocation42_spill] sm:$0xff] %v10877_v0  ;;  %15651 = vst [vmem:[#allocation5_spill] sm:$0xff] %v10887_v11  ;;  %v3239_v61 = vmul.f32 %v7579_v59, %v15632_v56  ;;  %v3108_v12 = vrot.slane %v3008_v7, 2  ;;  %v10898_v60 = vmul.f32 %v7579_v59, %v15643_v21  ;;  %v3451_v50 = vmul.f32 %v15339_v58, %v15623_v55 }
 0x2eb   : > { %v2630_v1 = vsel %vm2383_vm6, %v2628_v40, %v15652_v62  ;;  %v5023_v5 = vadd.f32 %v10761_v14, %v4792_v19  ;;  %v2492_v28 = vadd.f32 %v2401_v4, %v2273_v17  ;;  %v2872_v40 = vsel %vm2383_vm6, %v2870_v24, %v14547_v45 }
 0x2ec   : > { %15653 = vst [vmem:[#allocation111_spill] sm:$0xff] %v10898_v60  ;;  %v10908_v2 = vmul.f32 %v15339_v58, %v15633_v10  ;;  %v3333_v57 = vrot.slane %v3239_v61, 2  ;;  %v3542_v62 = vrot.slane %v3451_v50, 3  ;;  %v3673_v20 = vmul.f32 %v15249_v23, %v15625_v27 }
 0x2ed   : > { %v5267_v48 = vadd.f32 %v10775_v26, %v5023_v5  ;;  %v2723_v39 = vadd.f32 %v2630_v1, %v2492_v28  ;;  %v10917_v4 = vmul.f32 %v15249_v23, %v15635_v49  ;;  %v15656_v24 = vrot.slane %v10887_v11, 2  ;;  %v15658_v26 = vld [vmem:[#allocation89_spill] sm:$0xff]  ;;  %v15660_v5 = vld [vmem:[#allocation82_spill] sm:$0xff] }
 0x2ee   : > { %15654 = vst [vmem:[#allocation41_spill] sm:$0xff] %v10908_v2  ;;  %v3771_v17 = vrot.slane %v3673_v20, 3  ;;  %v3907_v50 = vmul.f32 %v7567_v52, %v15626_v34  ;;  %v10926_v61 = vmul.f32 %v7567_v52, %v15637_v43  ;;  %v15659_v1 = vrot.slane %v15658_v26, 6 }
 0x2ef   : > { %15655 = vst [vmem:[#allocation2_spill] sm:$0xff] %v10917_v4  ;;  %v3110_v19 = vsel %vm2383_vm6, %v3108_v12, %v15656_v24  ;;  %v15661_v28 = vrot.slane %v15660_v5, 6  ;;  %v5498_v14 = vadd.f32 %v10789_v47, %v5267_v48  ;;  %v2967_v7 = vadd.f32 %v2872_v40, %v2723_v39 }
 0x2f0   : > { %15657 = vst [vmem:[#allocation123_spill] sm:$0xff] %v10926_v61  ;;  %v14550_v12 = vrot.slane %v10917_v4, 3  ;;  %v15663_v20 = vrot.slane %v10898_v60, 2  ;;  %v15664_v11 = vrot.slane %v10908_v2, 3  ;;  %v4151_v26 = vmul.f32 %v15606_v41, %v15629_v9  ;;  %v15680_v2 = vld [vmem:[#allocation92_spill] sm:$0xff] }
 0x2f1   : > { %v10933_v45 = vsel %vm597_vm2, %v15661_v28, %v15659_v1  ;;  %v10947_v1 = vmul.f32 %v15606_v41, %v15640_v32  ;;  %v10950_v48 = vadd.f32 %v10877_v0, %v5498_v14  ;;  %v3198_v47 = vadd.f32 %v3110_v19, %v2967_v7 }
 0x2f2   : > { %15662 = vst [vmem:[#allocation28_spill] sm:$0xff] %v10933_v45  ;;  %v3335_v24 = vsel %vm2383_vm6, %v3333_v57, %v15663_v20  ;;  %v3544_v44 = vsel %vm3526_vm7, %v3542_v62, %v15664_v11  ;;  %v4013_v39 = vrot.slane %v3907_v50, 3  ;;  %v4382_v40 = vmul.f32 %v15434_v25, %v15632_v56 }
 0x2f3   : > { %15665 = vst [vmem:[#allocation133_spill] sm:$0xff] %v10947_v1  ;;  %15666 = vst [vmem:[#allocation128_spill] sm:$0xff] %v10950_v48  ;;  %v3773_v57 = vsel %vm3526_vm7, %v3771_v17, %v14550_v12  ;;  %v14554_v11 = vrot.slane %v10926_v61, 3  ;;  %v4251_v62 = vrot.slane %v4151_v26, 3  ;;  %v10960_v28 = vmul.f32 %v15434_v25, %v15643_v21  ;;  %5805 = vrot.lane.b32.xlu1 %v10950_v48, %s7431_s7 }
 0x2f4   : > { %5998 = vrot.lane.b32.xlu0 %v10950_v48, %s7432_s8  ;;  %v3416_v7 = vadd.f32 %v3335_v24, %v3198_v47  ;;  %v4594_v19 = vmul.f32 %v15607_v53, %v15623_v55  ;;  %v10971_v17 = vmul.f32 %v15607_v53, %v15633_v10  ;;  %v4476_v50 = vrot.slane %v4382_v40, 3 }
 0x2f5   : > { %15667 = vst [vmem:[#allocation33_spill] sm:$0xff] %v10960_v28  ;;  %v4815_v20 = vmul.f32 %v15263_v13, %v15625_v27  ;;  %v10978_v12 = vmul.f32 %v15263_v13, %v15635_v49  ;;  %v5049_v55 = vmul.f32 %v14991_v54, %v15626_v34  ;;  %v4015_v40 = vsel %vm3526_vm7, %v4013_v39, %v14554_v11 }
 0x2f6   : > { %15668 = vst [vmem:[#allocation114_spill] sm:$0xff] %v10971_v17  ;;  %v3635_v24 = vadd.f32 %v3544_v44, %v3416_v7  ;;  %v4684_v47 = vrot.slane %v4594_v19, 4  ;;  %v10989_v48 = vmul.f32 %v14991_v54, %v15637_v43  ;;  %v15671_v44 = vrot.slane %v10947_v1, 3  ;;  %v15679_v1 = vld [vmem:[#allocation66_spill] sm:$0xff] }
 0x2f7   : > { %15669 = vst [vmem:[#allocation136_spill] sm:$0xff] %v10978_v12  ;;  %v4913_v5 = vrot.slane %v4815_v20, 4  ;;  %v14565_v26 = vrot.slane %v10978_v12, 4  ;;  %v5155_v19 = vrot.slane %v5049_v55, 4  ;;  %v5293_v14 = vmul.f32 %v14993_v51, %v15629_v9 }
 0x2f8   : > { %15670 = vst [vmem:[#allocation137_spill] sm:$0xff] %v10989_v48  ;;  %v3866_v0 = vadd.f32 %v3773_v57, %v3635_v24  ;;  %v4253_v7 = vsel %vm3526_vm7, %v4251_v62, %v15671_v44  ;;  %v15672_v34 = vrot.slane %v10960_v28, 3  ;;  %v11002_v11 = vmul.f32 %v14993_v51, %v15640_v32  ;;  %v11007_v57 = vld [vmem:[%s14034_s3 + $0x18] ss:$0 sm:$0xff] }
 0x2f9   : > { %v5524_v62 = vmul.f32 %v11007_v57, %v15632_v56  ;;  %v15674_v55 = vrot.slane %v10971_v17, 4  ;;  %v4915_v9 = vsel %vm368_vm0, %v4913_v5, %v14565_v26  ;;  %v15677_v27 = vrot.slane %v10989_v48, 4  ;;  %v15683_v26 = vld [vmem:[#allocation88_spill] sm:$0xff]  ;;  %v15684_v48 = vld [vmem:[#allocation10_spill] sm:$0xff] }
 0x2fa   : > { %v4478_v39 = vsel %vm3526_vm7, %v4476_v50, %v15672_v34  ;;  %15673 = vst [vmem:[#allocation130_spill] sm:$0xff] %v11002_v11  ;;  %v4110_v24 = vadd.f32 %v4015_v40, %v3866_v0  ;;  %v11016_v34 = vmul.f32 %v11007_v57, %v15643_v21  ;;  %v15676_v50 = vld [vmem:[#allocation56_spill] sm:$0xff]  ;;  %v5393_v0 = vrot.slane %v5293_v14, 4  ;;  %v15678_v40 = vld [vmem:[#allocation77_spill] sm:$0xff] }
 0x2fb   : > { %v4686_v44 = vsel %vm368_vm0, %v4684_v47, %v15674_v55  ;;  %v854_v20 = vmul.f32 %v15566_v37, %v15676_v50  ;;  %v5157_v56 = vsel %vm368_vm0, %v5155_v19, %v15677_v27  ;;  %v916_v17 = vmul.f32 %v15223_v16, %v15678_v40  ;;  %v15682_v27 = vld [vmem:[#allocation6_spill] sm:$0xff] }
 0x2fc   : > { %15675 = vst [vmem:[#allocation138_spill] sm:$0xff] %v11016_v34  ;;  %v4341_v47 = vadd.f32 %v4253_v7, %v4110_v24  ;;  %v5618_v28 = vrot.slane %v5524_v62, 4  ;;  %v984_v61 = vmul.f32 %v15042_v22, %v15679_v1  ;;  %v11034_v5 = vmul.f32 %v15117_v29, %v15680_v2  ;;  %v15685_v24 = vld [vmem:[#allocation75_spill] sm:$0xff] }
 0x2fd   : > { %v948_v12 = vadd.f32 %v916_v17, %v854_v20  ;;  %v1189_v14 = vmul.f32 %v15682_v27, %v15676_v50  ;;  %v1118_v7 = vmul.f32 %v15684_v48, %v15683_v26  ;;  %v11042_v62 = vmul.f32 %v15682_v27, %v15685_v24  ;;  %v15687_v20 = vld [vmem:[#allocation99_spill] sm:$0xff] }
 0x2fe   : > { %15681 = vst [vmem:[#allocation139_spill] sm:$0xff] %v11034_v5  ;;  %v4559_v19 = vadd.f32 %v4478_v39, %v4341_v47  ;;  %v1411_v55 = vmul.f32 %v15234_v38, %v15678_v40  ;;  %v11048_v60 = vmul.f32 %v15234_v38, %v15687_v20  ;;  %v1645_v42 = vmul.f32 %v15122_v31, %v15679_v1 }
 0x2ff   : > { %15686 = vst [vmem:[#allocation140_spill] sm:$0xff] %v11042_v62  ;;  %v1016_v4 = vadd.f32 %v984_v61, %v948_v12  ;;  %v1296_v17 = vrot.slane %v1189_v14, 1  ;;  %v11055_v15 = vmul.f32 %v15122_v31, %v15689_v30  ;;  %v15691_v36 = vrot.slane %v11002_v11, 4 }
 0x300   : > { %15688 = vst [vmem:[#allocation107_spill] sm:$0xff] %v11048_v60  ;;  %v4777_v39 = vadd.f32 %v4686_v44, %v4559_v19  ;;  %v1525_v63 = vrot.slane %v1411_v55, 1  ;;  %v14577_v14 = vrot.slane %v11048_v60, 1  ;;  %v1889_v8 = vmul.f32 %v15050_v3, %v15680_v2  ;;  %v15692_v55 = vld [vmem:[#allocation105_spill] sm:$0xff] }
 0x301   : > { %15690 = vst [vmem:[#allocation142_spill] sm:$0xff] %v11055_v15  ;;  %v5395_v61 = vsel %vm368_vm0, %v5393_v0, %v15691_v36  ;;  %v1082_v12 = vadd.f32 %v11034_v5, %v1016_v4  ;;  %v1767_v44 = vrot.slane %v1645_v42, 1  ;;  %v11067_v47 = vmul.f32 %v15050_v3, %v15692_v55 }
 0x302   : > { %v5008_v38 = vadd.f32 %v4915_v9, %v4777_v39  ;;  %v15694_v11 = vrot.slane %v11042_v62, 1  ;;  %v1527_v4 = vsel %vm1240_vm5, %v1525_v63, %v14577_v14  ;;  %v2120_v0 = vmul.f32 %v15642_v35, %v15683_v26 }
 0x303   : > { %15693 = vst [vmem:[#allocation20_spill] sm:$0xff] %v11067_v47  ;;  %v1146_v31 = vadd.f32 %v1118_v7, %v1082_v12  ;;  %v2005_v42 = vrot.slane %v1889_v8, 1  ;;  %v11080_v19 = vmul.f32 %v15642_v35, %v10933_v45  ;;  %v15697_v14 = vrot.slane %v11055_v15, 1 }
 0x304   : > { %v1298_v36 = vsel %vm1240_vm5, %v1296_v17, %v15694_v11  ;;  %v5252_v9 = vadd.f32 %v5157_v56, %v5008_v38  ;;  %v2230_v12 = vrot.slane %v2120_v0, 1  ;;  %v2332_v11 = vmul.f32 %v15581_v6, %v15676_v50 }
 0x305   : > { %15695 = vst [vmem:[#allocation12_spill] sm:$0xff] %v11080_v19  ;;  %v1365_v7 = vadd.f32 %v1298_v36, %v1146_v31  ;;  %v11086_v17 = vmul.f32 %v15581_v6, %v15685_v24  ;;  %v1769_v38 = vsel %vm1240_vm5, %v1767_v44, %v15697_v14  ;;  %v2554_v56 = vmul.f32 %v15247_v18, %v15678_v40 }
 0x306   : > { %v5483_v63 = vadd.f32 %v5395_v61, %v5252_v9  ;;  %v15698_v31 = vrot.slane %v11016_v34, 4  ;;  %v11099_v39 = vmul.f32 %v15247_v18, %v15687_v20  ;;  %v15701_v61 = vrot.slane %v11067_v47, 1 }
 0x307   : > { %15696 = vst [vmem:[#allocation13_spill] sm:$0xff] %v11086_v17  ;;  %v1596_v0 = vadd.f32 %v1527_v4, %v1365_v7  ;;  %v2439_v44 = vrot.slane %v2332_v11, 2  ;;  %v2788_v9 = vmul.f32 %v15248_v33, %v15679_v1  ;;  %v15703_v15 = vrot.slane %v11080_v19, 1 }
 0x308   : > { %v5620_v36 = vsel %vm368_vm0, %v5618_v28, %v15698_v31  ;;  %15699 = vst [vmem:[#allocation144_spill] sm:$0xff] %v11099_v39  ;;  %v11106_v14 = vsel %vm1240_vm5, %v2005_v42, %v15701_v61  ;;  %v11116_v7 = vmul.f32 %v15248_v33, %v15689_v30  ;;  %v2668_v42 = vrot.slane %v2554_v56, 2 }
 0x309   : > { %v11101_v5 = vadd.f32 %v5620_v36, %v5483_v63  ;;  %15702 = vst [vmem:[#allocation146_spill] sm:$0xff] %v11106_v14  ;;  %v1840_v8 = vadd.f32 %v1769_v38, %v1596_v0  ;;  %v2232_v28 = vsel %vm1240_vm5, %v2230_v12, %v15703_v15  ;;  %v3032_v11 = vmul.f32 %v7558_v46, %v15680_v2 }
 0x30a   : > { %15704 = vst [vmem:[#allocation24_spill] sm:$0xff] %v11116_v7  ;;  %v11126_v63 = vmul.f32 %v7558_v46, %v15692_v55  ;;  %v3263_v15 = vmul.f32 %v7579_v59, %v15683_v26  ;;  %v2910_v31 = vrot.slane %v2788_v9, 2  ;;  %v11134_v36 = vmul.f32 %v7579_v59, %v10933_v45 }
 0x30b   : > { %15700 = vst [vmem:[#allocation119_spill] sm:$0xff] %v11101_v5  ;;  %5968 = vrot.lane.b32.xlu1 %v11101_v5, %s7432_s8  ;;  %5775 = vrot.lane.b32.xlu0 %v11101_v5, %s7431_s7  ;;  %v2071_v12 = vadd.f32 %v11106_v14, %v1840_v8  ;;  %v3148_v0 = vrot.slane %v3032_v11, 2  ;;  %v3475_v4 = vmul.f32 %v15339_v58, %v15676_v50  ;;  %v15708_v9 = vrot.slane %v11086_v17, 2 }
 0x30c   : > { %15705 = vst [vmem:[#allocation149_spill] sm:$0xff] %v11126_v63  ;;  %15706 = vst [vmem:[#allocation43_spill] sm:$0xff] %v11134_v36  ;;  %v3373_v19 = vrot.slane %v3263_v15, 2  ;;  %v11143_v8 = vmul.f32 %v15339_v58, %v15685_v24  ;;  %v3697_v11 = vmul.f32 %v15249_v23, %v15678_v40  ;;  %v11152_v61 = vmul.f32 %v15249_v23, %v15687_v20 }
 0x30d   : > { %v2289_v5 = vadd.f32 %v2232_v28, %v2071_v12  ;;  %v2441_v38 = vsel %vm2383_vm6, %v2439_v44, %v15708_v9  ;;  %v3582_v14 = vrot.slane %v3475_v4, 3  ;;  %v15710_v15 = vrot.slane %v11099_v39, 2 }
 0x30e   : > { %15707 = vst [vmem:[#allocation131_spill] sm:$0xff] %v11143_v8  ;;  %15709 = vst [vmem:[#allocation150_spill] sm:$0xff] %v11152_v61  ;;  %v3931_v56 = vmul.f32 %v7567_v52, %v15679_v1  ;;  %v15711_v44 = vrot.slane %v11116_v7, 2  ;;  %v15712_v9 = vrot.slane %v11126_v63, 2  ;;  %v3811_v7 = vrot.slane %v3697_v11, 3 }
 0x30f   : > { %v2508_v28 = vadd.f32 %v2441_v38, %v2289_v5  ;;  %v2670_v12 = vsel %vm2383_vm6, %v2668_v42, %v15710_v15  ;;  %v11170_v5 = vmul.f32 %v7567_v52, %v15689_v30  ;;  %v4175_v42 = vmul.f32 %v15606_v41, %v15680_v2 }
 0x310   : > { %v2912_v4 = vsel %vm2383_vm6, %v2910_v31, %v15711_v44  ;;  %v11166_v17 = vsel %vm2383_vm6, %v3148_v0, %v15712_v9  ;;  %v15715_v15 = vrot.slane %v11134_v36, 2  ;;  %v11179_v31 = vmul.f32 %v15606_v41, %v15692_v55 }
 0x311   : > { %15713 = vst [vmem:[#allocation151_spill] sm:$0xff] %v11166_v17  ;;  %15714 = vst [vmem:[#allocation52_spill] sm:$0xff] %v11170_v5  ;;  %v2739_v38 = vadd.f32 %v2670_v12, %v2508_v28  ;;  %v15717_v0 = vrot.slane %v11143_v8, 3  ;;  %v14593_v9 = vrot.slane %v11152_v61, 3  ;;  %v4053_v63 = vrot.slane %v3931_v56, 3 }
 0x312   : > { %v3375_v47 = vsel %vm2383_vm6, %v3373_v19, %v15715_v15  ;;  %15716 = vst [vmem:[#allocation152_spill] sm:$0xff] %v11179_v31  ;;  %v4406_v39 = vmul.f32 %v15434_v25, %v15683_v26  ;;  %v11190_v19 = vmul.f32 %v15434_v25, %v10933_v45  ;;  %v4618_v11 = vmul.f32 %v15607_v53, %v15676_v50 }
 0x313   : > { %v3584_v44 = vsel %vm3526_vm7, %v3582_v14, %v15717_v0  ;;  %v2983_v28 = vadd.f32 %v2912_v4, %v2739_v38  ;;  %v4291_v15 = vrot.slane %v4175_v42, 3  ;;  %v11197_v14 = vmul.f32 %v15607_v53, %v15685_v24 }
 0x314   : > { %15718 = vst [vmem:[#allocation6_spill] sm:$0xff] %v11190_v19  ;;  %v4839_v56 = vmul.f32 %v15263_v13, %v15678_v40  ;;  %v4516_v38 = vrot.slane %v4406_v39, 3  ;;  %v4724_v12 = vrot.slane %v4618_v11, 4  ;;  %v3813_v50 = vsel %vm3526_vm7, %v3811_v7, %v14593_v9 }
 0x315   : > { %15719 = vst [vmem:[#allocation158_spill] sm:$0xff] %v11197_v14  ;;  %v3214_v4 = vadd.f32 %v11166_v17, %v2983_v28  ;;  %v11209_v8 = vmul.f32 %v15263_v13, %v15687_v20  ;;  %v5073_v36 = vmul.f32 %v14991_v54, %v15679_v1  ;;  %v11215_v39 = vmul.f32 %v14991_v54, %v15689_v30 }
 0x316   : > { %v4953_v60 = vrot.slane %v4839_v56, 4  ;;  %v5317_v28 = vmul.f32 %v14993_v51, %v15680_v2  ;;  %v15722_v7 = vrot.slane %v11170_v5, 3  ;;  %v15723_v9 = vrot.slane %v11179_v31, 3 }
 0x317   : > { %15720 = vst [vmem:[#allocation159_spill] sm:$0xff] %v11209_v8  ;;  %v3432_v40 = vadd.f32 %v3375_v47, %v3214_v4  ;;  %15721 = vst [vmem:[#allocation160_spill] sm:$0xff] %v11215_v39  ;;  %v11230_v47 = vmul.f32 %v14993_v51, %v15692_v55  ;;  %v15726_v4 = vrot.slane %v11190_v19, 3  ;;  %v15727_v2 = vrot.slane %v11197_v14, 4  ;;  %v15734_v14 = vld [vmem:[#allocation8_spill] sm:$0xff]  ;;  %v15735_v19 = vld [vmem:[#allocation101_spill] sm:$0xff] }
 0x318   : > { %v4055_v11 = vsel %vm3526_vm7, %v4053_v63, %v15722_v7  ;;  %v11225_v42 = vsel %vm3526_vm7, %v4291_v15, %v15723_v9  ;;  %v5548_v7 = vmul.f32 %v11007_v57, %v15683_v26  ;;  %v5195_v9 = vrot.slane %v5073_v36, 4 }
 0x319   : > { %15724 = vst [vmem:[#allocation161_spill] sm:$0xff] %v11225_v42  ;;  %15725 = vst [vmem:[#allocation162_spill] sm:$0xff] %v11230_v47  ;;  %v3651_v56 = vadd.f32 %v3584_v44, %v3432_v40  ;;  %v4518_v17 = vsel %vm3526_vm7, %v4516_v38, %v15726_v4  ;;  %v4726_v63 = vsel %vm368_vm0, %v4724_v12, %v15727_v2  ;;  %v5433_v0 = vrot.slane %v5317_v28, 4 }
 0x31a   : > { %v11243_v1 = vmul.f32 %v11007_v57, %v10933_v45  ;;  %v15729_v44 = vrot.slane %v11209_v8, 4  ;;  %v839_v4 = vmul.f32 %v15566_v37, %v15633_v10  ;;  %v901_v2 = vmul.f32 %v15223_v16, %v15635_v49  ;;  %v15731_v49 = vld [vmem:[#allocation81_spill] sm:$0xff]  ;;  %v15732_v8 = vld [vmem:[#allocation7_spill] sm:$0xff] }
 0x31b   : > { %v3882_v40 = vadd.f32 %v3813_v50, %v3651_v56  ;;  %v5658_v12 = vrot.slane %v5548_v7, 4  ;;  %v969_v15 = vmul.f32 %v15042_v22, %v15637_v43  ;;  %v1037_v56 = vmul.f32 %v15117_v29, %v15640_v32  ;;  %v15733_v7 = vld [vmem:[#allocation78_spill] sm:$0xff] }
 0x31c   : > { %15728 = vst [vmem:[#allocation163_spill] sm:$0xff] %v11243_v1  ;;  %v4955_v38 = vsel %vm368_vm0, %v4953_v60, %v15729_v44  ;;  %v933_v50 = vadd.f32 %v901_v2, %v839_v4  ;;  %v15730_v60 = vld [vmem:[#allocation53_spill] sm:$0xff]  ;;  %v1103_v10 = vmul.f32 %v15684_v48, %v15643_v21  ;;  %v1389_v36 = vmul.f32 %v15732_v8, %v15731_v49 }
 0x31d   : > { %v4126_v26 = vadd.f32 %v4055_v11, %v3882_v40  ;;  %v1167_v44 = vmul.f32 %v15682_v27, %v15730_v60  ;;  %v1623_v28 = vmul.f32 %v15734_v14, %v15733_v7  ;;  %v1867_v43 = vmul.f32 %v15050_v3, %v15735_v19  ;;  %v15736_v2 = vld [vmem:[#allocation93_spill] sm:$0xff] }
 0x31e   : > { %v1001_v40 = vadd.f32 %v969_v15, %v933_v50  ;;  %v2098_v32 = vmul.f32 %v15642_v35, %v15736_v2  ;;  %v15737_v31 = vrot.slane %v11215_v39, 4  ;;  %v1488_v5 = vrot.slane %v1389_v36, 1 }
 0x31f   : > { %v4357_v11 = vadd.f32 %v11225_v42, %v4126_v26  ;;  %v1259_v4 = vrot.slane %v1167_v44, 1  ;;  %v1730_v61 = vrot.slane %v1623_v28, 1  ;;  %v2310_v62 = vmul.f32 %v15581_v6, %v15730_v60  ;;  %v15741_v44 = vld [vmem:[#allocation125_spill] sm:$0xff] }
 0x320   : > { %v5197_v21 = vsel %vm368_vm0, %v5195_v9, %v15737_v31  ;;  %v15738_v14 = vrot.slane %v11230_v47, 4  ;;  %v15740_v26 = vrot.slane %v11243_v1, 4  ;;  %v1067_v50 = vadd.f32 %v1037_v56, %v1001_v40  ;;  %v15743_v9 = vld [vmem:[#allocation124_spill] sm:$0xff] }
 0x321   : > { %v4575_v34 = vadd.f32 %v4518_v17, %v4357_v11  ;;  %v15742_v42 = vrot.slane %v15741_v44, 1  ;;  %v15744_v36 = vrot.slane %v15743_v9, 1  ;;  %v1968_v39 = vrot.slane %v1867_v43, 1  ;;  %v15749_v44 = vld [vmem:[#allocation30_spill] sm:$0xff] }
 0x322   : > { %v11279_v3 = vsel %vm368_vm0, %v5433_v0, %v15738_v14  ;;  %v5660_v15 = vsel %vm368_vm0, %v5658_v12, %v15740_v26  ;;  %v2193_v17 = vrot.slane %v2098_v32, 1  ;;  %v1131_v47 = vadd.f32 %v1103_v10, %v1067_v50  ;;  %v15745_v0 = vld [vmem:[#allocation104_spill] sm:$0xff] }
 0x323   : > { %15739 = vst [vmem:[#allocation53_spill] sm:$0xff] %v11279_v3  ;;  %v1260_v31 = vsel %vm1240_vm5, %v15742_v42, %v1259_v4  ;;  %v1489_v28 = vsel %vm1240_vm5, %v15744_v36, %v1488_v5  ;;  %v4793_v11 = vadd.f32 %v4726_v63, %v4575_v34  ;;  %v2402_v6 = vrot.slane %v2310_v62, 2  ;;  %v15747_v63 = vld [vmem:[#allocation15_spill] sm:$0xff] }
 0x324   : > { %v2532_v14 = vmul.f32 %v15247_v18, %v15731_v49  ;;  %v15746_v1 = vrot.slane %v15745_v0, 1  ;;  %v2766_v56 = vmul.f32 %v15248_v33, %v15733_v7  ;;  %v3010_v42 = vmul.f32 %v7558_v46, %v15735_v19 }
 0x325   : > { %v3241_v43 = vmul.f32 %v7579_v59, %v15736_v2  ;;  %v5024_v32 = vadd.f32 %v4955_v38, %v4793_v11  ;;  %v1350_v34 = vadd.f32 %v1260_v31, %v1131_v47  ;;  %v3453_v62 = vmul.f32 %v15339_v58, %v15730_v60  ;;  %v15751_v47 = vld [vmem:[#allocation112_spill] sm:$0xff]  ;;  %v15753_v11 = vld [vmem:[#allocation74_spill] sm:$0xff] }
 0x326   : > { %v1731_v12 = vsel %vm1240_vm5, %v15746_v1, %v1730_v61  ;;  %v2631_v5 = vrot.slane %v2532_v14, 2  ;;  %v15748_v10 = vrot.slane %v15747_v63, 1  ;;  %v2873_v1 = vrot.slane %v2766_v56, 2 }
 0x327   : > { %v3111_v61 = vrot.slane %v3010_v42, 2  ;;  %v3675_v4 = vmul.f32 %v15249_v23, %v15731_v49  ;;  %v5268_v26 = vadd.f32 %v5197_v21, %v5024_v32  ;;  %v1581_v50 = vadd.f32 %v1489_v28, %v1350_v34  ;;  %v15757_v32 = vld [vmem:[#allocation5_spill] sm:$0xff] }
 0x328   : > { %v1969_v40 = vsel %vm1240_vm5, %v15748_v10, %v1968_v39  ;;  %v15750_v9 = vrot.slane %v15749_v44, 1  ;;  %v15752_v31 = vrot.slane %v15751_v47, 2  ;;  %v15754_v14 = vrot.slane %v15753_v11, 2  ;;  %v15755_v39 = vld [vmem:[#allocation39_spill] sm:$0xff] }
 0x329   : > { %v15756_v56 = vrot.slane %v15755_v39, 2  ;;  %v3336_v63 = vrot.slane %v3241_v43, 2  ;;  %v3545_v10 = vrot.slane %v3453_v62, 3  ;;  %v5499_v21 = vadd.f32 %v11279_v3, %v5268_v26  ;;  %v15762_v39 = vld [vmem:[#allocation41_spill] sm:$0xff]  ;;  %v15783_v3 = vld [vmem:[#allocation98_spill] sm:$0xff] }
 0x32a   : > { %v2194_v38 = vsel %vm1240_vm5, %v15750_v9, %v2193_v17  ;;  %v2403_v36 = vsel %vm2383_vm6, %v15752_v31, %v2402_v6  ;;  %v2632_v0 = vsel %vm2383_vm6, %v15754_v14, %v2631_v5  ;;  %v1825_v28 = vadd.f32 %v1731_v12, %v1581_v50 }
 0x32b   : > { %v2874_v42 = vsel %vm2383_vm6, %v15756_v56, %v2873_v1  ;;  %v15758_v34 = vrot.slane %v15757_v32, 2  ;;  %v3909_v6 = vmul.f32 %v7567_v52, %v15733_v7  ;;  %v3774_v44 = vrot.slane %v3675_v4, 3 }
 0x32c   : > { %v4153_v5 = vmul.f32 %v15606_v41, %v15735_v19  ;;  %v4384_v9 = vmul.f32 %v15434_v25, %v15736_v2  ;;  %v4596_v43 = vmul.f32 %v15607_v53, %v15730_v60  ;;  %v11332_v62 = vadd.f32 %v5660_v15, %v5499_v21  ;;  %v15760_v15 = vld [vmem:[#allocation111_spill] sm:$0xff] }
 0x32d   : > { %v3112_v17 = vsel %vm2383_vm6, %v15758_v34, %v3111_v61  ;;  %v2056_v12 = vadd.f32 %v1969_v40, %v1825_v28  ;;  %v4016_v1 = vrot.slane %v3909_v6, 3  ;;  %v4817_v61 = vmul.f32 %v15263_v13, %v15731_v49  ;;  %v15764_v28 = vld [vmem:[#allocation2_spill] sm:$0xff]  ;;  %v15766_v6 = vld [vmem:[#allocation123_spill] sm:$0xff] }
 0x32e   : > { %15759 = vst [vmem:[#allocation7_spill] sm:$0xff] %v11332_v62  ;;  %v4254_v26 = vrot.slane %v4153_v5, 3  ;;  %v4479_v50 = vrot.slane %v4384_v9, 3  ;;  %v4687_v47 = vrot.slane %v4596_v43, 4  ;;  %v5051_v4 = vmul.f32 %v14991_v54, %v15733_v7  ;;  %6000 = vrot.lane.b32.xlu1 %v11332_v62, %s7432_s8  ;;  %5807 = vrot.lane.b32.xlu0 %v11332_v62, %s7431_s7  ;;  %v15768_v9 = vld [vmem:[#allocation133_spill] sm:$0xff]  ;;  %v15786_v49 = vld [vmem:[#allocation11_spill] sm:$0xff] }
 0x32f   : > { %v2274_v60 = vadd.f32 %v2194_v38, %v2056_v12  ;;  %v15761_v31 = vrot.slane %v15760_v15, 2  ;;  %v4916_v11 = vrot.slane %v4817_v61, 4  ;;  %v5295_v14 = vmul.f32 %v14993_v51, %v15735_v19  ;;  %v15770_v61 = vld [vmem:[#allocation33_spill] sm:$0xff] }
 0x330   : > { %v15763_v56 = vrot.slane %v15762_v39, 3  ;;  %v15765_v32 = vrot.slane %v15764_v28, 3  ;;  %v15767_v5 = vrot.slane %v15766_v6, 3  ;;  %v15769_v43 = vrot.slane %v15768_v9, 3  ;;  %v15784_v19 = vld [vmem:[#allocation137_spill] sm:$0xff] }
 0x331   : > { %v3337_v40 = vsel %vm2383_vm6, %v15761_v31, %v3336_v63  ;;  %v2493_v12 = vadd.f32 %v2403_v36, %v2274_v60  ;;  %v15771_v15 = vrot.slane %v15770_v61, 3  ;;  %v855_v28 = vmul.f32 %v15566_v37, %v15685_v24  ;;  %v15774_v60 = vld [vmem:[#allocation136_spill] sm:$0xff] }
 0x332   : > { %v3546_v21 = vsel %vm3526_vm7, %v15763_v56, %v3545_v10  ;;  %v3775_v34 = vsel %vm3526_vm7, %v15765_v32, %v3774_v44  ;;  %v4017_v38 = vsel %vm3526_vm7, %v15767_v5, %v4016_v1  ;;  %v11359_v63 = vsel %vm3526_vm7, %v15769_v43, %v4254_v26  ;;  %v15772_v10 = vld [vmem:[#allocation114_spill] sm:$0xff] }
 0x333   : > { %v11364_v31 = vsel %vm3526_vm7, %v15771_v15, %v4479_v50  ;;  %v15773_v39 = vrot.slane %v15772_v10, 4  ;;  %v5526_v44 = vmul.f32 %v11007_v57, %v15736_v2  ;;  %v5158_v1 = vrot.slane %v5051_v4, 4  ;;  %v15777_v43 = vld [vmem:[#allocation62_spill] sm:$0xff]  ;;  %v15778_v15 = vld [vmem:[#allocation83_spill] sm:$0xff] }
 0x334   : > { %v917_v36 = vmul.f32 %v15223_v16, %v15687_v20  ;;  %v985_v26 = vmul.f32 %v15042_v22, %v15689_v30  ;;  %v2724_v50 = vadd.f32 %v2632_v0, %v2493_v12  ;;  %v15775_v32 = vrot.slane %v15774_v60, 4  ;;  %v15779_v12 = vld [vmem:[#allocation79_spill] sm:$0xff] }
 0x335   : > { %v11369_v56 = vsel %vm368_vm0, %v15773_v39, %v4687_v47  ;;  %v5396_v47 = vrot.slane %v5295_v14, 4  ;;  %v5621_v5 = vrot.slane %v5526_v44, 4  ;;  %v11386_v4 = vmul.f32 %v15117_v29, %v15692_v55  ;;  %v15781_v14 = vld [vmem:[#allocation102_spill] sm:$0xff]  ;;  %v15782_v44 = vld [vmem:[#allocation9_spill] sm:$0xff] }
 0x336   : > { %v11382_v6 = vsel %vm368_vm0, %v15775_v32, %v4916_v11  ;;  %v949_v9 = vadd.f32 %v917_v36, %v855_v28  ;;  %v1191_v61 = vmul.f32 %v15682_v27, %v15777_v43  ;;  %v1413_v10 = vmul.f32 %v15732_v8, %v15778_v15  ;;  %v15780_v11 = vld [vmem:[#allocation8_spill] sm:$0xff]  ;;  %v15787_v55 = vld [vmem:[#allocation130_spill] sm:$0xff] }
 0x337   : > { %15776 = vst [vmem:[#allocation125_spill] sm:$0xff] %v11386_v4  ;;  %v2968_v39 = vadd.f32 %v2874_v42, %v2724_v50  ;;  %v1119_v0 = vmul.f32 %v15684_v48, %v10933_v45  ;;  %v1647_v60 = vmul.f32 %v15780_v11, %v15779_v12  ;;  %v1891_v28 = vmul.f32 %v15782_v44, %v15781_v14 }
 0x338   : > { %v1017_v36 = vadd.f32 %v985_v26, %v949_v9  ;;  %v1299_v32 = vrot.slane %v1191_v61, 1  ;;  %v1528_v62 = vrot.slane %v1413_v10, 1  ;;  %v2122_v24 = vmul.f32 %v15642_v35, %v15783_v3  ;;  %v15789_v26 = vld [vmem:[#allocation138_spill] sm:$0xff] }
 0x339   : > { %v3199_v2 = vadd.f32 %v3112_v17, %v2968_v39  ;;  %v15785_v7 = vrot.slane %v15784_v19, 4  ;;  %v1770_v50 = vrot.slane %v1647_v60, 1  ;;  %v2334_v45 = vmul.f32 %v15786_v49, %v15777_v43  ;;  %v15793_v60 = vld [vmem:[#allocation107_spill] sm:$0xff] }
 0x33a   : > { %v15788_v30 = vrot.slane %v15787_v55, 4  ;;  %v15790_v9 = vrot.slane %v15789_v26, 4  ;;  %v1083_v17 = vadd.f32 %v11386_v4, %v1017_v36  ;;  %v2008_v19 = vrot.slane %v1891_v28, 1  ;;  %v15795_v28 = vld [vmem:[#allocation142_spill] sm:$0xff] }
 0x33b   : > { %v11403_v42 = vsel %vm368_vm0, %v15785_v7, %v5158_v1  ;;  %v3417_v10 = vadd.f32 %v3337_v40, %v3199_v2  ;;  %v15791_v7 = vld [vmem:[#allocation140_spill] sm:$0xff]  ;;  %v15794_v49 = vrot.slane %v15793_v60, 1  ;;  %v2233_v35 = vrot.slane %v2122_v24, 1 }
 0x33c   : > { %v11410_v20 = vsel %vm368_vm0, %v15788_v30, %v5396_v47  ;;  %v11415_v61 = vsel %vm368_vm0, %v15790_v9, %v5621_v5  ;;  %v15792_v1 = vrot.slane %v15791_v7, 1  ;;  %v1147_v30 = vadd.f32 %v1119_v0, %v1083_v17  ;;  %v15797_v17 = vld [vmem:[#allocation20_spill] sm:$0xff] }
 0x33d   : > { %v1529_v55 = vsel %vm1240_vm5, %v15794_v49, %v1528_v62  ;;  %v2442_v47 = vrot.slane %v2334_v45, 2  ;;  %v2556_v26 = vmul.f32 %v15247_v18, %v15778_v15  ;;  %v2790_v5 = vmul.f32 %v15248_v33, %v15779_v12  ;;  %v15800_v60 = vld [vmem:[#allocation12_spill] sm:$0xff] }
 0x33e   : > { %v1300_v39 = vsel %vm1240_vm5, %v15792_v1, %v1299_v32  ;;  %v3636_v36 = vadd.f32 %v3546_v21, %v3417_v10  ;;  %v15796_v2 = vrot.slane %v15795_v28, 1  ;;  %v3034_v32 = vmul.f32 %v7558_v46, %v15781_v14 }
 0x33f   : > { %v3265_v49 = vmul.f32 %v7579_v59, %v15783_v3  ;;  %v1366_v24 = vadd.f32 %v1300_v39, %v1147_v30  ;;  %v2671_v62 = vrot.slane %v2556_v26, 2  ;;  %v2913_v45 = vrot.slane %v2790_v5, 2  ;;  %v15802_v30 = vld [vmem:[#allocation13_spill] sm:$0xff] }
 0x340   : > { %v1771_v40 = vsel %vm1240_vm5, %v15796_v2, %v1770_v50  ;;  %v3477_v0 = vmul.f32 %v15339_v58, %v15777_v43  ;;  %v3867_v9 = vadd.f32 %v3775_v34, %v3636_v36  ;;  %v15798_v7 = vrot.slane %v15797_v17, 1  ;;  %v15804_v36 = vld [vmem:[#allocation144_spill] sm:$0xff] }
 0x341   : > { %v3151_v10 = vrot.slane %v3034_v32, 2  ;;  %v3699_v50 = vmul.f32 %v15249_v23, %v15778_v15  ;;  %v1597_v1 = vadd.f32 %v1529_v55, %v1366_v24  ;;  %v15801_v28 = vrot.slane %v15800_v60, 1  ;;  %v15808_v24 = vld [vmem:[#allocation149_spill] sm:$0xff] }
 0x342   : > { %v11440_v21 = vsel %vm1240_vm5, %v15798_v7, %v2008_v19  ;;  %v15803_v26 = vrot.slane %v15802_v30, 2  ;;  %v3376_v2 = vrot.slane %v3265_v49, 2  ;;  %v4111_v34 = vadd.f32 %v4017_v38, %v3867_v9  ;;  %v15806_v7 = vld [vmem:[#allocation24_spill] sm:$0xff] }
 0x343   : > { %15799 = vst [vmem:[#allocation124_spill] sm:$0xff] %v11440_v21  ;;  %v2234_v39 = vsel %vm1240_vm5, %v15801_v28, %v2233_v35  ;;  %v15805_v17 = vrot.slane %v15804_v36, 2  ;;  %v15807_v32 = vrot.slane %v15806_v7, 2  ;;  %v3585_v23 = vrot.slane %v3477_v0, 3  ;;  %v15813_v7 = vld [vmem:[#allocation131_spill] sm:$0xff] }
 0x344   : > { %v2443_v5 = vsel %vm2383_vm6, %v15803_v26, %v2442_v47  ;;  %v1841_v55 = vadd.f32 %v1771_v40, %v1597_v1  ;;  %v15809_v60 = vrot.slane %v15808_v24, 2  ;;  %v3933_v47 = vmul.f32 %v7567_v52, %v15779_v12 }
 0x345   : > { %v2672_v19 = vsel %vm2383_vm6, %v15805_v17, %v2671_v62  ;;  %v2914_v4 = vsel %vm2383_vm6, %v15807_v32, %v2913_v45  ;;  %v4177_v38 = vmul.f32 %v15606_v41, %v15781_v14  ;;  %v4342_v49 = vadd.f32 %v11359_v63, %v4111_v34  ;;  %v15811_v34 = vld [vmem:[#allocation43_spill] sm:$0xff] }
 0x346   : > { %v11459_v35 = vsel %vm2383_vm6, %v15809_v60, %v3151_v10  ;;  %v3814_v62 = vrot.slane %v3699_v50, 3  ;;  %v4408_v9 = vmul.f32 %v15434_v25, %v15783_v3  ;;  %v4620_v40 = vmul.f32 %v15607_v53, %v15777_v43 }
 0x347   : > { %15810 = vst [vmem:[#allocation104_spill] sm:$0xff] %v11459_v35  ;;  %v2072_v45 = vadd.f32 %v11440_v21, %v1841_v55  ;;  %v4056_v0 = vrot.slane %v3933_v47, 3  ;;  %v4294_v10 = vrot.slane %v4177_v38, 3  ;;  %v4841_v1 = vmul.f32 %v15263_v13, %v15778_v15  ;;  %v15815_v47 = vld [vmem:[#allocation150_spill] sm:$0xff] }
 0x348   : > { %v4560_v28 = vadd.f32 %v11364_v31, %v4342_v49  ;;  %v4519_v30 = vrot.slane %v4408_v9, 3  ;;  %v4727_v26 = vrot.slane %v4620_v40, 4  ;;  %v5075_v63 = vmul.f32 %v14991_v54, %v15779_v12  ;;  %v15817_v49 = vld [vmem:[#allocation52_spill] sm:$0xff] }
 0x349   : > { %v2290_v50 = vadd.f32 %v2234_v39, %v2072_v45  ;;  %v15812_v36 = vrot.slane %v15811_v34, 2  ;;  %v15814_v32 = vrot.slane %v15813_v7, 3  ;;  %v4956_v24 = vrot.slane %v4841_v1, 4  ;;  %v15819_v34 = vld [vmem:[#allocation152_spill] sm:$0xff] }
 0x34a   : > { %v4778_v60 = vadd.f32 %v11369_v56, %v4560_v28  ;;  %v15816_v38 = vrot.slane %v15815_v47, 3  ;;  %v15818_v9 = vrot.slane %v15817_v49, 3  ;;  %v5198_v39 = vrot.slane %v5075_v63, 4  ;;  %v15824_v28 = vld [vmem:[#allocation158_spill] sm:$0xff]  ;;  %v15831_v49 = vld [vmem:[#allocation160_spill] sm:$0xff] }
 0x34b   : > { %v3377_v17 = vsel %vm2383_vm6, %v15812_v36, %v3376_v2  ;;  %v3586_v55 = vsel %vm3526_vm7, %v15814_v32, %v3585_v23  ;;  %v2509_v45 = vadd.f32 %v2443_v5, %v2290_v50  ;;  %v15820_v21 = vrot.slane %v15819_v34, 3  ;;  %v15822_v36 = vld [vmem:[#allocation6_spill] sm:$0xff]  ;;  %v15826_v5 = vld [vmem:[#allocation68_spill] sm:$0xff]  ;;  %v15828_v32 = vld [vmem:[#allocation159_spill] sm:$0xff] }
 0x34c   : > { %v3815_v31 = vsel %vm3526_vm7, %v15816_v38, %v3814_v62  ;;  %v4057_v40 = vsel %vm3526_vm7, %v15818_v9, %v4056_v0  ;;  %v15823_v23 = vrot.slane %v15822_v36, 3  ;;  %v5319_v56 = vmul.f32 %v14993_v51, %v15781_v14 }
 0x34d   : > { %v11492_v2 = vsel %vm3526_vm7, %v15820_v21, %v4294_v10  ;;  %v5009_v62 = vadd.f32 %v11382_v6, %v4778_v60  ;;  %v15825_v7 = vrot.slane %v15824_v28, 4  ;;  %v840_v63 = vmul.f32 %v15566_v37, %v15826_v5  ;;  %v15827_v21 = vld [vmem:[#allocation65_spill] sm:$0xff]  ;;  %v15830_v60 = vld [vmem:[#allocation91_spill] sm:$0xff]  ;;  %v15834_v28 = vld [vmem:[#allocation40_spill] sm:$0xff] }
 0x34e   : > { %15821 = vst [vmem:[#allocation15_spill] sm:$0xff] %v11492_v2  ;;  %v11497_v1 = vsel %vm3526_vm7, %v15823_v23, %v4519_v30  ;;  %v902_v10 = vmul.f32 %v15223_v16, %v15827_v21  ;;  %v2740_v50 = vadd.f32 %v2672_v19, %v2509_v45  ;;  %v15829_v30 = vrot.slane %v15828_v32, 4  ;;  %v15833_v45 = vld [vmem:[#allocation86_spill] sm:$0xff] }
 0x34f   : > { %v11505_v0 = vsel %vm368_vm0, %v15825_v7, %v4727_v26  ;;  %v11518_v6 = vmul.f32 %v11007_v57, %v15783_v3  ;;  %v970_v26 = vmul.f32 %v15042_v22, %v15830_v60  ;;  %v5253_v38 = vadd.f32 %v11403_v42, %v5009_v62  ;;  %v15835_v62 = vld [vmem:[#allocation97_spill] sm:$0xff]  ;;  %v15839_v3 = vld [vmem:[#allocation103_spill] sm:$0xff] }
 0x350   : > { %v11514_v47 = vsel %vm368_vm0, %v15829_v30, %v4956_v24  ;;  %v15832_v9 = vrot.slane %v15831_v49, 4  ;;  %v934_v19 = vadd.f32 %v902_v10, %v840_v63  ;;  %v1038_v36 = vmul.f32 %v15117_v29, %v15833_v45 }
 0x351   : > { %v2984_v24 = vadd.f32 %v2914_v4, %v2740_v50  ;;  %v5436_v23 = vrot.slane %v5319_v56, 4  ;;  %v1104_v7 = vmul.f32 %v15684_v48, %v15834_v28  ;;  %v1168_v32 = vmul.f32 %v15682_v27, %v15826_v5  ;;  %v15836_v56 = vld [vmem:[#allocation80_spill] sm:$0xff] }
 0x352   : > { %v11526_v34 = vsel %vm368_vm0, %v15832_v9, %v5198_v39  ;;  %v5484_v30 = vadd.f32 %v11410_v20, %v5253_v38  ;;  %v1002_v42 = vadd.f32 %v970_v26, %v934_v19  ;;  %v11537_v49 = vmul.f32 %v15682_v27, %v15835_v62 }
 0x353   : > { %v1390_v39 = vmul.f32 %v15732_v8, %v15827_v21  ;;  %v3215_v63 = vadd.f32 %v11459_v35, %v2984_v24  ;;  %v1261_v4 = vrot.slane %v1168_v32, 1  ;;  %v11544_v10 = vmul.f32 %v15732_v8, %v15836_v56 }
 0x354   : > { %v1624_v50 = vmul.f32 %v15780_v11, %v15830_v60  ;;  %v11549_v20 = vadd.f32 %v11415_v61, %v5484_v30  ;;  %v1068_v26 = vadd.f32 %v1038_v36, %v1002_v42  ;;  %v14636_v38 = vrot.slane %v11537_v49, 1 }
 0x355   : > { %15837 = vst [vmem:[#allocation30_spill] sm:$0xff] %v11544_v10  ;;  %v1490_v9 = vrot.slane %v1390_v39, 1  ;;  %v3433_v19 = vadd.f32 %v3377_v17, %v3215_v63  ;;  %v14637_v43 = vrot.slane %v11544_v10, 1  ;;  %v11555_v24 = vmul.f32 %v15780_v11, %v15839_v3  ;;  %v15846_v10 = vld [vmem:[#allocation162_spill] sm:$0xff] }
 0x356   : > { %15838 = vst [vmem:[#allocation112_spill] sm:$0xff] %v11549_v20  ;;  %v1732_v32 = vrot.slane %v1624_v50, 1  ;;  %5777 = vrot.lane.b32.xlu1 %v11549_v20, %s7431_s7  ;;  %5970 = vrot.lane.b32.xlu0 %v11549_v20, %s7432_s8  ;;  %v1132_v36 = vadd.f32 %v1104_v7, %v1068_v26  ;;  %v1263_v17 = vsel %vm1240_vm5, %v1261_v4, %v14636_v38  ;;  %v15840_v50 = vld [vmem:[#allocation100_spill] sm:$0xff]  ;;  %v15841_v26 = vld [vmem:[#allocation14_spill] sm:$0xff]  ;;  %v15842_v4 = vld [vmem:[#allocation63_spill] sm:$0xff] }
 0x357   : > { %v1868_v30 = vmul.f32 %v15782_v44, %v15833_v45  ;;  %v3652_v42 = vadd.f32 %v3586_v55, %v3433_v19  ;;  %v1492_v39 = vsel %vm1240_vm5, %v1490_v9, %v14637_v43  ;;  %v14642_v63 = vrot.slane %v11555_v24, 1  ;;  %v15844_v43 = vld [vmem:[#allocation11_spill] sm:$0xff] }
 0x358   : > { %v11573_v20 = vmul.f32 %v15782_v44, %v15840_v50  ;;  %v1351_v61 = vadd.f32 %v1263_v17, %v1132_v36  ;;  %v2099_v35 = vmul.f32 %v15841_v26, %v15834_v28  ;;  %v11579_v38 = vmul.f32 %v15841_v26, %v15842_v4 }
 0x359   : > { %v1970_v7 = vrot.slane %v1868_v30, 1  ;;  %v3883_v55 = vadd.f32 %v3815_v31, %v3652_v42  ;;  %v1734_v9 = vsel %vm1240_vm5, %v1732_v32, %v14642_v63  ;;  %v2311_v14 = vmul.f32 %v15844_v43, %v15826_v5 }
 0x35a   : > { %15843 = vst [vmem:[#allocation74_spill] sm:$0xff] %v11579_v38  ;;  %v14643_v19 = vrot.slane %v11573_v20, 1  ;;  %v1582_v12 = vadd.f32 %v1492_v39, %v1351_v61  ;;  %v2195_v36 = vrot.slane %v2099_v35, 1  ;;  %v11590_v30 = vmul.f32 %v15844_v43, %v15835_v62 }
 0x35b   : > { %v4127_v15 = vadd.f32 %v4057_v40, %v3883_v55  ;;  %v15847_v31 = vrot.slane %v15846_v10, 4  ;;  %v2533_v61 = vmul.f32 %v15247_v18, %v15827_v21  ;;  %v2404_v39 = vrot.slane %v2311_v14, 2 }
 0x35c   : > { %15845 = vst [vmem:[#allocation39_spill] sm:$0xff] %v11590_v30  ;;  %v1972_v32 = vsel %vm1240_vm5, %v1970_v7, %v14643_v19  ;;  %v1826_v35 = vadd.f32 %v1734_v9, %v1582_v12  ;;  %v11605_v17 = vmul.f32 %v15247_v18, %v15836_v56  ;;  %v11612_v7 = vmul.f32 %v15248_v33, %v15839_v3 }
 0x35d   : > { %v11595_v42 = vsel %vm368_vm0, %v15847_v31, %v5436_v23  ;;  %v4358_v40 = vadd.f32 %v11492_v2, %v4127_v15  ;;  %v2633_v10 = vrot.slane %v2533_v61, 2  ;;  %v2767_v23 = vmul.f32 %v15248_v33, %v15830_v60 }
 0x35e   : > { %15848 = vst [vmem:[#allocation5_spill] sm:$0xff] %v11595_v42  ;;  %15849 = vst [vmem:[#allocation111_spill] sm:$0xff] %v11605_v17  ;;  %v2057_v55 = vadd.f32 %v1972_v32, %v1826_v35  ;;  %v15851_v12 = vrot.slane %v11579_v38, 1  ;;  %v14645_v9 = vrot.slane %v11605_v17, 2  ;;  %v3011_v31 = vmul.f32 %v7558_v46, %v15833_v45 }
 0x35f   : > { %15850 = vst [vmem:[#allocation41_spill] sm:$0xff] %v11612_v7  ;;  %v4576_v15 = vadd.f32 %v11497_v1, %v4358_v40  ;;  %v2875_v61 = vrot.slane %v2767_v23, 2  ;;  %v11624_v63 = vmul.f32 %v7558_v46, %v15840_v50  ;;  %v15853_v32 = vrot.slane %v11590_v30, 2 }
 0x360   : > { %v2197_v14 = vsel %vm1240_vm5, %v2195_v36, %v15851_v12  ;;  %v2635_v36 = vsel %vm2383_vm6, %v2633_v10, %v14645_v9  ;;  %v3242_v12 = vmul.f32 %v7579_v59, %v15834_v28  ;;  %v3113_v40 = vrot.slane %v3011_v31, 2  ;;  %v15857_v9 = vld [vmem:[#allocation16_spill] sm:$0xff] }
 0x361   : > { %15852 = vst [vmem:[#allocation2_spill] sm:$0xff] %v11624_v63  ;;  %v2275_v2 = vadd.f32 %v2197_v14, %v2057_v55  ;;  %v2406_v35 = vsel %vm2383_vm6, %v2404_v39, %v15853_v32  ;;  %v4794_v1 = vadd.f32 %v11505_v0, %v4576_v15  ;;  %v11638_v19 = vmul.f32 %v7579_v59, %v15842_v4 }
 0x362   : > { %v15855_v14 = vrot.slane %v11612_v7, 2  ;;  %v3454_v10 = vmul.f32 %v15339_v58, %v15826_v5  ;;  %v11647_v32 = vmul.f32 %v15339_v58, %v15835_v62  ;;  %v3338_v31 = vrot.slane %v3242_v12, 2 }
 0x363   : > { %15854 = vst [vmem:[#allocation123_spill] sm:$0xff] %v11638_v19  ;;  %v2494_v55 = vadd.f32 %v2406_v35, %v2275_v2  ;;  %v5025_v0 = vadd.f32 %v11514_v47, %v4794_v1  ;;  %v3676_v23 = vmul.f32 %v15857_v9, %v15827_v21  ;;  %v15859_v17 = vrot.slane %v11624_v63, 2 }
 0x364   : > { %v2877_v39 = vsel %vm2383_vm6, %v2875_v61, %v15855_v14  ;;  %15856 = vst [vmem:[#allocation133_spill] sm:$0xff] %v11647_v32  ;;  %v3547_v35 = vrot.slane %v3454_v10, 3  ;;  %v11656_v61 = vmul.f32 %v15857_v9, %v15836_v56  ;;  %v3910_v1 = vmul.f32 %v7567_v52, %v15830_v60 }
 0x365   : > { %v2725_v2 = vadd.f32 %v2635_v36, %v2494_v55  ;;  %v5269_v14 = vadd.f32 %v11526_v34, %v5025_v0  ;;  %v3115_v47 = vsel %vm2383_vm6, %v3113_v40, %v15859_v17  ;;  %v3776_v12 = vrot.slane %v3676_v23, 3  ;;  %v15861_v36 = vld [vmem:[#allocation163_spill] sm:$0xff] }
 0x366   : > { %15858 = vst [vmem:[#allocation33_spill] sm:$0xff] %v11656_v61  ;;  %v15860_v15 = vrot.slane %v11518_v6, 4  ;;  %v15862_v55 = vrot.slane %v15861_v36, 4  ;;  %v14650_v30 = vrot.slane %v11656_v61, 3  ;;  %v11672_v34 = vmul.f32 %v7567_v52, %v15839_v3 }
 0x367   : > { %v2969_v7 = vadd.f32 %v2877_v39, %v2725_v2  ;;  %v5500_v0 = vadd.f32 %v11595_v42, %v5269_v14  ;;  %v15864_v17 = vrot.slane %v11638_v19, 2  ;;  %v4154_v6 = vmul.f32 %v15606_v41, %v15833_v45 }
 0x368   : > { %v5662_v10 = vsel %vm368_vm0, %v15862_v55, %v15860_v15  ;;  %15863 = vst [vmem:[#allocation114_spill] sm:$0xff] %v11672_v34  ;;  %v11682_v23 = vmul.f32 %v15606_v41, %v15840_v50  ;;  %v15866_v15 = vrot.slane %v11647_v32, 3  ;;  %v4018_v36 = vrot.slane %v3910_v1, 3 }
 0x369   : > { %v3340_v40 = vsel %vm2383_vm6, %v3338_v31, %v15864_v17  ;;  %v3200_v39 = vadd.f32 %v3115_v47, %v2969_v7  ;;  %v4385_v14 = vmul.f32 %v15434_v25, %v15834_v28  ;;  %v11689_v55 = vadd.f32 %v5662_v10, %v5500_v0 }
 0x36a   : > { %15865 = vst [vmem:[#allocation136_spill] sm:$0xff] %v11682_v23  ;;  %v3549_v2 = vsel %vm3526_vm7, %v3547_v35, %v15866_v15  ;;  %v3778_v31 = vsel %vm3526_vm7, %v3776_v12, %v14650_v30  ;;  %v14654_v17 = vrot.slane %v11672_v34, 3  ;;  %v11697_v42 = vmul.f32 %v15434_v25, %v15842_v4  ;;  %v15883_v34 = vld [vmem:[#allocation90_spill] sm:$0xff] }
 0x36b   : > { %15867 = vst [vmem:[#allocation8_spill] sm:$0xff] %v11689_v55  ;;  %v3418_v7 = vadd.f32 %v3340_v40, %v3200_v39  ;;  %v4256_v47 = vrot.slane %v4154_v6, 3  ;;  %v4597_v1 = vmul.f32 %v15607_v53, %v15826_v5  ;;  %5809 = vrot.lane.b32.xlu1 %v11689_v55, %s7431_s7  ;;  %6002 = vrot.lane.b32.xlu0 %v11689_v55, %s7432_s8  ;;  %v4481_v12 = vrot.slane %v4385_v14, 3 }
 0x36c   : > { %15868 = vst [vmem:[#allocation9_spill] sm:$0xff] %v11697_v42  ;;  %v11709_v0 = vmul.f32 %v15607_v53, %v15835_v62  ;;  %v4818_v40 = vmul.f32 %v15263_v13, %v15827_v21  ;;  %v11715_v5 = vmul.f32 %v15263_v13, %v15836_v56  ;;  %v5052_v15 = vmul.f32 %v14991_v54, %v15830_v60 }
 0x36d   : > { %v3637_v6 = vadd.f32 %v3549_v2, %v3418_v7  ;;  %v4689_v39 = vrot.slane %v4597_v1, 4  ;;  %v4020_v14 = vsel %vm3526_vm7, %v4018_v36, %v14654_v17  ;;  %v11725_v35 = vmul.f32 %v14991_v54, %v15839_v3 }
 0x36e   : > { %15869 = vst [vmem:[#allocation137_spill] sm:$0xff] %v11709_v0  ;;  %15870 = vst [vmem:[#allocation130_spill] sm:$0xff] %v11715_v5  ;;  %v14658_v30 = vrot.slane %v11709_v0, 4  ;;  %v4918_v10 = vrot.slane %v4818_v40, 4  ;;  %v5160_v1 = vrot.slane %v5052_v15, 4  ;;  %v5296_v55 = vmul.f32 %v14993_v51, %v15833_v45 }
 0x36f   : > { %15871 = vst [vmem:[#allocation138_spill] sm:$0xff] %v11725_v35  ;;  %v3868_v2 = vadd.f32 %v3778_v31, %v3637_v6  ;;  %v15872_v60 = vrot.slane %v11682_v23, 3  ;;  %v11736_v40 = vmul.f32 %v14993_v51, %v15840_v50  ;;  %v5527_v17 = vmul.f32 %v11007_v57, %v15834_v28  ;;  %v15877_v28 = vld [vmem:[#allocation77_spill] sm:$0xff] }
 0x370   : > { %v15874_v6 = vrot.slane %v11697_v42, 3  ;;  %v4691_v7 = vsel %vm368_vm0, %v4689_v39, %v14658_v30  ;;  %v15876_v45 = vrot.slane %v11725_v35, 4  ;;  %v15878_v39 = vld [vmem:[#allocation66_spill] sm:$0xff] }
 0x371   : > { %v4258_v21 = vsel %vm3526_vm7, %v4256_v47, %v15872_v60  ;;  %15873 = vst [vmem:[#allocation140_spill] sm:$0xff] %v11736_v40  ;;  %v4112_v31 = vadd.f32 %v4020_v14, %v3868_v2  ;;  %v11748_v60 = vmul.f32 %v11007_v57, %v15842_v4  ;;  %v15875_v47 = vrot.slane %v11715_v5, 4  ;;  %v15879_v57 = vld [vmem:[#allocation92_spill] sm:$0xff] }
 0x372   : > { %v4483_v15 = vsel %vm3526_vm7, %v4481_v12, %v15874_v6  ;;  %v5162_v14 = vsel %vm368_vm0, %v5160_v1, %v15876_v45  ;;  %v5398_v2 = vrot.slane %v5296_v55, 4  ;;  %v856_v12 = vmul.f32 %v15566_v37, %v15877_v28  ;;  %v15880_v45 = vld [vmem:[#allocation99_spill] sm:$0xff] }
 0x373   : > { %v4920_v36 = vsel %vm368_vm0, %v4918_v10, %v15875_v47  ;;  %v4343_v6 = vadd.f32 %v4258_v21, %v4112_v31  ;;  %v918_v30 = vmul.f32 %v15223_v16, %v15878_v39  ;;  %v986_v42 = vmul.f32 %v15042_v22, %v15879_v57  ;;  %v15882_v31 = vld [vmem:[#allocation88_spill] sm:$0xff] }
 0x374   : > { %v5623_v5 = vrot.slane %v5527_v17, 4  ;;  %v1192_v47 = vmul.f32 %v15682_v27, %v15877_v28  ;;  %v11768_v55 = vmul.f32 %v15682_v27, %v15880_v45  ;;  %v1054_v0 = vmul.f32 %v15117_v29, %v15882_v31 }
 0x375   : > { %v4561_v1 = vadd.f32 %v4483_v15, %v4343_v6  ;;  %v950_v21 = vadd.f32 %v918_v30, %v856_v12  ;;  %v1414_v35 = vmul.f32 %v15732_v8, %v15878_v39  ;;  %v11777_v10 = vmul.f32 %v15732_v8, %v15883_v34  ;;  %v15886_v6 = vld [vmem:[#allocation105_spill] sm:$0xff] }
 0x376   : > { %15881 = vst [vmem:[#allocation107_spill] sm:$0xff] %v11768_v55  ;;  %v1301_v23 = vrot.slane %v1192_v47, 1  ;;  %v1648_v61 = vmul.f32 %v15780_v11, %v15879_v57  ;;  %v15885_v15 = vrot.slane %v11736_v40, 4  ;;  %v11786_v25 = vmul.f32 %v15780_v11, %v15886_v6 }
 0x377   : > { %15884 = vst [vmem:[#allocation142_spill] sm:$0xff] %v11777_v10  ;;  %v4779_v32 = vadd.f32 %v4691_v7, %v4561_v1  ;;  %v1018_v12 = vadd.f32 %v986_v42, %v950_v21  ;;  %v1530_v47 = vrot.slane %v1414_v35, 1  ;;  %v14674_v17 = vrot.slane %v11777_v10, 1  ;;  %v15888_v1 = vld [vmem:[#allocation28_spill] sm:$0xff] }
 0x378   : > { %v5400_v30 = vsel %vm368_vm0, %v5398_v2, %v15885_v15  ;;  %15887 = vst [vmem:[#allocation20_spill] sm:$0xff] %v11786_v25  ;;  %v1772_v19 = vrot.slane %v1648_v61, 1  ;;  %v1892_v63 = vmul.f32 %v15782_v44, %v15882_v31  ;;  %v11794_v40 = vmul.f32 %v15782_v44, %v15888_v1  ;;  %v15893_v15 = vld [vmem:[#allocation135_spill] sm:$0xff] }
 0x379   : > { %v5010_v38 = vadd.f32 %v4920_v36, %v4779_v32  ;;  %v1084_v59 = vadd.f32 %v1054_v0, %v1018_v12  ;;  %v15890_v42 = vrot.slane %v11768_v55, 1  ;;  %v2335_v35 = vmul.f32 %v15844_v43, %v15877_v28 }
 0x37a   : > { %15889 = vst [vmem:[#allocation12_spill] sm:$0xff] %v11794_v40  ;;  %v2010_v21 = vrot.slane %v1892_v63, 1  ;;  %v11803_v61 = vmul.f32 %v15844_v43, %v15880_v45  ;;  %v15892_v0 = vrot.slane %v11748_v60, 4  ;;  %v14676_v7 = vrot.slane %v11794_v40, 1 }
 0x37b   : > { %v1303_v2 = vsel %vm1240_vm5, %v1301_v23, %v15890_v42  ;;  %v5254_v32 = vadd.f32 %v5162_v14, %v5010_v38  ;;  %v1148_v12 = vadd.f32 %v15893_v15, %v1084_v59  ;;  %v1532_v63 = vsel %vm1240_vm5, %v1530_v47, %v14674_v17 }
 0x37c   : > { %15891 = vst [vmem:[#allocation13_spill] sm:$0xff] %v11803_v61  ;;  %v5625_v36 = vsel %vm368_vm0, %v5623_v5, %v15892_v0  ;;  %v15894_v23 = vrot.slane %v11786_v25, 1  ;;  %v2557_v55 = vmul.f32 %v15247_v18, %v15878_v39  ;;  %v11820_v38 = vmul.f32 %v15247_v18, %v15883_v34 }
 0x37d   : > { %v5485_v5 = vadd.f32 %v5400_v30, %v5254_v32  ;;  %v1367_v14 = vadd.f32 %v1303_v2, %v1148_v12  ;;  %v2444_v59 = vrot.slane %v2335_v35, 2  ;;  %v2791_v0 = vmul.f32 %v15248_v33, %v15879_v57 }
 0x37e   : > { %v1774_v42 = vsel %vm1240_vm5, %v1772_v19, %v15894_v23  ;;  %15895 = vst [vmem:[#allocation144_spill] sm:$0xff] %v11820_v38  ;;  %v2012_v47 = vsel %vm1240_vm5, %v2010_v21, %v14676_v7  ;;  %v14679_v15 = vrot.slane %v11803_v61, 2  ;;  %v2673_v19 = vrot.slane %v2557_v55, 2 }
 0x37f   : > { %v11830_v23 = vmul.f32 %v15248_v33, %v15886_v6  ;;  %v11832_v17 = vadd.f32 %v5625_v36, %v5485_v5  ;;  %v1598_v25 = vadd.f32 %v1532_v63, %v1367_v14  ;;  %v14680_v30 = vrot.slane %v11820_v38, 2 }
 0x380   : > { %v3035_v2 = vmul.f32 %v7558_v46, %v15882_v31  ;;  %v2915_v35 = vrot.slane %v2791_v0, 2  ;;  %v11840_v21 = vmul.f32 %v7558_v46, %v15888_v1  ;;  %v3478_v55 = vmul.f32 %v15339_v58, %v15877_v28 }
 0x381   : > { %15896 = vst [vmem:[#allocation24_spill] sm:$0xff] %v11830_v23  ;;  %15897 = vst [vmem:[#allocation149_spill] sm:$0xff] %v11832_v17  ;;  %5972 = vrot.lane.b32.xlu1 %v11832_v17, %s7432_s8  ;;  %5779 = vrot.lane.b32.xlu0 %v11832_v17, %s7431_s7  ;;  %v1842_v36 = vadd.f32 %v1774_v42, %v1598_v25  ;;  %v11850_v63 = vmul.f32 %v15339_v58, %v15880_v45  ;;  %v15901_v61 = vrot.slane %v11830_v23, 2 }
 0x382   : > { %15898 = vst [vmem:[#allocation43_spill] sm:$0xff] %v11840_v21  ;;  %v3153_v12 = vrot.slane %v3035_v2, 2  ;;  %v3700_v5 = vmul.f32 %v15857_v9, %v15878_v39  ;;  %v2446_v14 = vsel %vm2383_vm6, %v2444_v59, %v14679_v15  ;;  %v3587_v7 = vrot.slane %v3478_v55, 3 }
 0x383   : > { %15899 = vst [vmem:[#allocation131_spill] sm:$0xff] %v11850_v63  ;;  %v11860_v32 = vmul.f32 %v15857_v9, %v15883_v34  ;;  %v2073_v25 = vadd.f32 %v2012_v47, %v1842_v36  ;;  %v2675_v42 = vsel %vm2383_vm6, %v2673_v19, %v14680_v30  ;;  %v3934_v17 = vmul.f32 %v7567_v52, %v15879_v57  ;;  %v15903_v36 = vld [vmem:[#allocation129_spill] sm:$0xff] }
 0x384   : > { %v2917_v59 = vsel %vm2383_vm6, %v2915_v35, %v15901_v61  ;;  %v3816_v15 = vrot.slane %v3700_v5, 3  ;;  %v11873_v55 = vmul.f32 %v7567_v52, %v15886_v6  ;;  %v4178_v47 = vmul.f32 %v15606_v41, %v15882_v31 }
 0x385   : > { %15900 = vst [vmem:[#allocation150_spill] sm:$0xff] %v11860_v32  ;;  %v2291_v0 = vadd.f32 %v15903_v36, %v2073_v25  ;;  %v15904_v19 = vrot.slane %v11840_v21, 2  ;;  %v11884_v23 = vmul.f32 %v15606_v41, %v15888_v1  ;;  %v15906_v61 = vrot.slane %v11850_v63, 3 }
 0x386   : > { %15902 = vst [vmem:[#allocation52_spill] sm:$0xff] %v11873_v55  ;;  %v4058_v5 = vrot.slane %v3934_v17, 3  ;;  %v14687_v38 = vrot.slane %v11873_v55, 3  ;;  %v4621_v25 = vmul.f32 %v15607_v53, %v15877_v28  ;;  %v4296_v21 = vrot.slane %v4178_v47, 3  ;;  %v15920_v55 = vld [vmem:[#allocation55_spill] sm:$0xff] }
 0x387   : > { %v3155_v30 = vsel %vm2383_vm6, %v3153_v12, %v15904_v19  ;;  %15905 = vst [vmem:[#allocation152_spill] sm:$0xff] %v11884_v23  ;;  %v3589_v35 = vsel %vm3526_vm7, %v3587_v7, %v15906_v61  ;;  %v2510_v36 = vadd.f32 %v2446_v14, %v2291_v0  ;;  %v11894_v12 = vmul.f32 %v15607_v53, %v15880_v45 }
 0x388   : > { %v4842_v19 = vmul.f32 %v15263_v13, %v15878_v39  ;;  %v4729_v63 = vrot.slane %v4621_v25, 4  ;;  %v11901_v17 = vmul.f32 %v15263_v13, %v15883_v34  ;;  %v5076_v7 = vmul.f32 %v14991_v54, %v15879_v57 }
 0x389   : > { %15907 = vst [vmem:[#allocation6_spill] sm:$0xff] %v11894_v12  ;;  %v2741_v28 = vadd.f32 %v2675_v42, %v2510_v36  ;;  %v15909_v14 = vrot.slane %v11860_v32, 3  ;;  %v14690_v47 = vrot.slane %v11894_v12, 4  ;;  %v4060_v2 = vsel %vm3526_vm7, %v4058_v5, %v14687_v38 }
 0x38a   : > { %15908 = vst [vmem:[#allocation158_spill] sm:$0xff] %v11901_v17  ;;  %v4958_v61 = vrot.slane %v4842_v19, 4  ;;  %v11915_v39 = vmul.f32 %v14991_v54, %v15886_v6  ;;  %v5320_v42 = vmul.f32 %v14993_v51, %v15882_v31  ;;  %v5200_v57 = vrot.slane %v5076_v7, 4 }
 0x38b   : > { %v3818_v0 = vsel %vm3526_vm7, %v3816_v15, %v15909_v14  ;;  %v2985_v36 = vadd.f32 %v2917_v59, %v2741_v28  ;;  %v11921_v15 = vmul.f32 %v14993_v51, %v15888_v1  ;;  %v841_v19 = vmul.f32 %v15566_v37, %v15835_v62 }
 0x38c   : > { %15910 = vst [vmem:[#allocation68_spill] sm:$0xff] %v11915_v39  ;;  %v15912_v5 = vrot.slane %v11884_v23, 3  ;;  %v4731_v38 = vsel %vm368_vm0, %v4729_v63, %v14690_v47  ;;  %v903_v59 = vmul.f32 %v15223_v16, %v15836_v56  ;;  %v15913_v28 = vrot.slane %v11901_v17, 4  ;;  %v15914_v47 = vld [vmem:[#allocation81_spill] sm:$0xff]  ;;  %v15915_v56 = vld [vmem:[#allocation126_spill] sm:$0xff] }
 0x38d   : > { %15911 = vst [vmem:[#allocation159_spill] sm:$0xff] %v11921_v15  ;;  %v3216_v7 = vadd.f32 %v3155_v30, %v2985_v36  ;;  %v5438_v62 = vrot.slane %v5320_v42, 4  ;;  %v971_v23 = vmul.f32 %v15042_v22, %v15839_v3  ;;  %v1039_v63 = vmul.f32 %v15117_v29, %v15840_v50  ;;  %v15917_v42 = vld [vmem:[#allocation78_spill] sm:$0xff]  ;;  %v15918_v3 = vld [vmem:[#allocation101_spill] sm:$0xff] }
 0x38e   : > { %v4298_v14 = vsel %vm3526_vm7, %v4296_v21, %v15912_v5  ;;  %v11937_v31 = vsel %vm368_vm0, %v4958_v61, %v15913_v28  ;;  %v935_v5 = vadd.f32 %v903_v59, %v841_v19  ;;  %v1170_v25 = vmul.f32 %v15682_v27, %v15914_v47  ;;  %v15919_v17 = vld [vmem:[#allocation93_spill] sm:$0xff] }
 0x38f   : > { %v3434_v30 = vadd.f32 %v15915_v56, %v3216_v7  ;;  %v15916_v36 = vrot.slane %v11915_v39, 4  ;;  %v1392_v28 = vmul.f32 %v15732_v8, %v15917_v42  ;;  %v1626_v21 = vmul.f32 %v15780_v11, %v15918_v3 }
 0x390   : > { %v1003_v19 = vadd.f32 %v971_v23, %v935_v5  ;;  %v1264_v59 = vrot.slane %v1170_v25, 1  ;;  %v1870_v12 = vmul.f32 %v15782_v44, %v15919_v17  ;;  %v2101_v32 = vmul.f32 %v15841_v26, %v15920_v55 }
 0x391   : > { %v11950_v61 = vsel %vm368_vm0, %v5200_v57, %v15916_v36  ;;  %v3653_v56 = vadd.f32 %v3589_v35, %v3434_v30  ;;  %v1493_v7 = vrot.slane %v1392_v28, 1  ;;  %v1735_v39 = vrot.slane %v1626_v21, 1  ;;  %v15923_v35 = vld [vmem:[#allocation30_spill] sm:$0xff] }
 0x392   : > { %v2313_v57 = vmul.f32 %v15844_v43, %v15914_v47  ;;  %v15921_v36 = vrot.slane %v11921_v15, 4  ;;  %v1069_v10 = vadd.f32 %v1039_v63, %v1003_v19  ;;  %v1105_v23 = vmul.f32 %v15684_v48, %v15842_v4 }
 0x393   : > { %v1973_v25 = vrot.slane %v1870_v12, 1  ;;  %v3884_v5 = vadd.f32 %v3818_v0, %v3653_v56  ;;  %v15922_v1 = vrot.slane %v11537_v49, 1  ;;  %v15924_v30 = vrot.slane %v15923_v35, 1 }
 0x394   : > { %v5440_v40 = vsel %vm368_vm0, %v5438_v62, %v15921_v36  ;;  %v2198_v28 = vrot.slane %v2101_v32, 1  ;;  %v1133_v34 = vadd.f32 %v1105_v23, %v1069_v10  ;;  %v15925_v15 = vrot.slane %v11555_v24, 1  ;;  %v15927_v24 = vld [vmem:[#allocation23_spill] sm:$0xff]  ;;  %v15928_v36 = vld [vmem:[#allocation74_spill] sm:$0xff] }
 0x395   : > { %v1265_v6 = vsel %vm1240_vm5, %v15922_v1, %v1264_v59  ;;  %v1494_v21 = vsel %vm1240_vm5, %v15924_v30, %v1493_v7  ;;  %v2407_v63 = vrot.slane %v2313_v57, 2  ;;  %v2535_v19 = vmul.f32 %v15247_v18, %v15917_v42  ;;  %v15932_v30 = vld [vmem:[#allocation108_spill] sm:$0xff] }
 0x396   : > { %v1736_v62 = vsel %vm1240_vm5, %v15925_v15, %v1735_v39  ;;  %v4128_v12 = vadd.f32 %v4060_v2, %v3884_v5  ;;  %v15926_v0 = vrot.slane %v11573_v20, 1  ;;  %v2769_v1 = vmul.f32 %v15248_v33, %v15918_v3  ;;  %v15930_v5 = vld [vmem:[#allocation39_spill] sm:$0xff] }
 0x397   : > { %v3013_v32 = vmul.f32 %v7558_v46, %v15919_v17  ;;  %v1352_v10 = vadd.f32 %v1265_v6, %v1133_v34  ;;  %v2636_v59 = vrot.slane %v2535_v19, 2  ;;  %v3244_v39 = vmul.f32 %v15927_v24, %v15920_v55 }
 0x398   : > { %v1974_v49 = vsel %vm1240_vm5, %v15926_v0, %v1973_v25  ;;  %v3456_v15 = vmul.f32 %v15339_v58, %v15914_v47  ;;  %v4359_v56 = vadd.f32 %v4298_v14, %v4128_v12  ;;  %v2878_v2 = vrot.slane %v2769_v1, 2  ;;  %v15933_v0 = vld [vmem:[#allocation111_spill] sm:$0xff]  ;;  %v15935_v12 = vld [vmem:[#allocation41_spill] sm:$0xff] }
 0x399   : > { %v3116_v7 = vrot.slane %v3013_v32, 2  ;;  %v3678_v20 = vmul.f32 %v15857_v9, %v15917_v42  ;;  %v1583_v57 = vadd.f32 %v1494_v21, %v1352_v10  ;;  %v15929_v23 = vrot.slane %v15928_v36, 1  ;;  %v15937_v36 = vld [vmem:[#allocation2_spill] sm:$0xff] }
 0x39a   : > { %v15931_v34 = vrot.slane %v15930_v5, 2  ;;  %v3341_v35 = vrot.slane %v3244_v39, 2  ;;  %v4577_v19 = vadd.f32 %v15932_v30, %v4359_v56  ;;  %v15934_v45 = vrot.slane %v15933_v0, 2  ;;  %v15939_v56 = vld [vmem:[#allocation123_spill] sm:$0xff] }
 0x39b   : > { %v2199_v25 = vsel %vm1240_vm5, %v15929_v23, %v2198_v28  ;;  %v15936_v1 = vrot.slane %v15935_v12, 2  ;;  %v3550_v21 = vrot.slane %v3456_v15, 3  ;;  %v1827_v10 = vadd.f32 %v1736_v62, %v1583_v57 }
 0x39c   : > { %v2408_v6 = vsel %vm2383_vm6, %v15931_v34, %v2407_v63  ;;  %v2637_v14 = vsel %vm2383_vm6, %v15934_v45, %v2636_v59  ;;  %v15938_v9 = vrot.slane %v15937_v36, 2  ;;  %v3779_v23 = vrot.slane %v3678_v20, 3  ;;  %v15941_v59 = vld [vmem:[#allocation32_spill] sm:$0xff] }
 0x39d   : > { %v2879_v32 = vsel %vm2383_vm6, %v15936_v1, %v2878_v2  ;;  %v3912_v63 = vmul.f32 %v7567_v52, %v15918_v3  ;;  %v4795_v39 = vadd.f32 %v4731_v38, %v4577_v19  ;;  %v15940_v5 = vrot.slane %v15939_v56, 2  ;;  %v15942_v19 = vld [vmem:[#allocation133_spill] sm:$0xff]  ;;  %v15946_v56 = vld [vmem:[#allocation114_spill] sm:$0xff] }
 0x39e   : > { %v3117_v28 = vsel %vm2383_vm6, %v15938_v9, %v3116_v7  ;;  %v4156_v45 = vmul.f32 %v15606_v41, %v15919_v17  ;;  %v4387_v15 = vmul.f32 %v15941_v59, %v15920_v55  ;;  %v2058_v62 = vadd.f32 %v1974_v49, %v1827_v10 }
 0x39f   : > { %v3342_v34 = vsel %vm2383_vm6, %v15940_v5, %v3341_v35  ;;  %v4021_v2 = vrot.slane %v3912_v63, 3  ;;  %v4599_v9 = vmul.f32 %v15607_v53, %v15914_v47  ;;  %v4820_v7 = vmul.f32 %v15263_v13, %v15917_v42  ;;  %v15944_v47 = vld [vmem:[#allocation33_spill] sm:$0xff]  ;;  %v15970_v42 = vld [vmem:[#allocation44_spill] sm:$0xff] }
 0x3a0   : > { %v5026_v38 = vadd.f32 %v11937_v31, %v4795_v39  ;;  %v4259_v20 = vrot.slane %v4156_v45, 3  ;;  %v4484_v57 = vrot.slane %v4387_v15, 3  ;;  %v5054_v35 = vmul.f32 %v14991_v54, %v15918_v3  ;;  %v15948_v15 = vld [vmem:[#allocation136_spill] sm:$0xff] }
 0x3a1   : > { %v2276_v30 = vadd.f32 %v2199_v25, %v2058_v62  ;;  %v15943_v0 = vrot.slane %v15942_v19, 3  ;;  %v4692_v49 = vrot.slane %v4599_v9, 4  ;;  %v4921_v1 = vrot.slane %v4820_v7, 4 }
 0x3a2   : > { %v5270_v10 = vadd.f32 %v11950_v61, %v5026_v38  ;;  %v15945_v36 = vrot.slane %v15944_v47, 3  ;;  %v15947_v31 = vrot.slane %v15946_v56, 3  ;;  %v5163_v5 = vrot.slane %v5054_v35, 4  ;;  %v15952_v38 = vld [vmem:[#allocation137_spill] sm:$0xff]  ;;  %v15955_v35 = vld [vmem:[#allocation86_spill] sm:$0xff]  ;;  %v15960_v56 = vld [vmem:[#allocation40_spill] sm:$0xff] }
 0x3a3   : > { %v3551_v12 = vsel %vm3526_vm7, %v15943_v0, %v3550_v21  ;;  %v2495_v45 = vadd.f32 %v2408_v6, %v2276_v30  ;;  %v15949_v25 = vrot.slane %v15948_v15, 3  ;;  %v15950_v21 = vld [vmem:[#allocation9_spill] sm:$0xff]  ;;  %v5298_v61 = vmul.f32 %v14993_v51, %v15919_v17  ;;  %v15956_v0 = vld [vmem:[#allocation130_spill] sm:$0xff]  ;;  %v15972_v17 = vld [vmem:[#allocation76_spill] sm:$0xff] }
 0x3a4   : > { %v3780_v63 = vsel %vm3526_vm7, %v15945_v36, %v3779_v23  ;;  %v4022_v39 = vsel %vm3526_vm7, %v15947_v31, %v4021_v2  ;;  %v15951_v9 = vrot.slane %v15950_v21, 3  ;;  %v5501_v23 = vadd.f32 %v5440_v40, %v5270_v10  ;;  %v12053_v6 = vld [vmem:[%s14034_s3 + $0x18] ss:$0 sm:$0xff]  ;;  %v15958_v10 = vld [vmem:[#allocation138_spill] sm:$0xff] }
 0x3a5   : > { %v12036_v62 = vsel %vm3526_vm7, %v15949_v25, %v4259_v20  ;;  %v15953_v19 = vrot.slane %v15952_v38, 4  ;;  %15954 = vst [vmem:[#allocation160_spill] sm:$0xff] %v12053_v6  ;;  %v5529_v20 = vmul.f32 %v12053_v6, %v15920_v55  ;;  %v2726_v30 = vadd.f32 %v2637_v14, %v2495_v45  ;;  %v15961_v15 = vld [vmem:[#allocation109_spill] sm:$0xff]  ;;  %v15963_v38 = vld [vmem:[#allocation35_spill] sm:$0xff] }
 0x3a6   : > { %v12041_v7 = vsel %vm3526_vm7, %v15951_v9, %v4484_v57  ;;  %v846_v57 = vmul.f32 %v15566_v37, %v15955_v35  ;;  %v15957_v47 = vrot.slane %v15956_v0, 4  ;;  %v908_v31 = vmul.f32 %v15223_v16, %v15960_v56 }
 0x3a7   : > { %v12048_v2 = vsel %vm368_vm0, %v15953_v19, %v4692_v49  ;;  %v15959_v49 = vrot.slane %v15958_v10, 4  ;;  %v12072_v25 = vadd.f32 %v15961_v15, %v5501_v23  ;;  %v5401_v21 = vrot.slane %v5298_v61, 4  ;;  %v15965_v23 = vld [vmem:[#allocation56_spill] sm:$0xff] }
 0x3a8   : > { %v12062_v40 = vsel %vm368_vm0, %v15957_v47, %v4921_v1  ;;  %v5626_v9 = vrot.slane %v5529_v20, 4  ;;  %v976_v14 = vmul.f32 %v15042_v22, %v15963_v38  ;;  %v2970_v45 = vadd.f32 %v2879_v32, %v2726_v30  ;;  %v15964_v1 = vld [vmem:[#allocation57_spill] sm:$0xff] }
 0x3a9   : > { %v12067_v36 = vsel %vm368_vm0, %v15959_v49, %v5163_v5  ;;  %15962 = vst [vmem:[#allocation97_spill] sm:$0xff] %v12072_v25  ;;  %v940_v19 = vadd.f32 %v908_v31, %v846_v57  ;;  %v1044_v0 = vmul.f32 %v15117_v29, %v15964_v1  ;;  %v1177_v5 = vmul.f32 %v15682_v27, %v15955_v35  ;;  %v15968_v49 = vld [vmem:[#allocation140_spill] sm:$0xff] }
 0x3aa   : > { %6004 = vrot.lane.b32.xlu1 %v12072_v25, %s7432_s8  ;;  %5811 = vrot.lane.b32.xlu0 %v12072_v25, %s7431_s7  ;;  %v1110_v61 = vmul.f32 %v15684_v48, %v15965_v23  ;;  %v12088_v20 = vmul.f32 %v15682_v27, %v15840_v50  ;;  %v1399_v32 = vmul.f32 %v15732_v8, %v15960_v56  ;;  %v15969_v31 = vrot.slane %v15968_v49, 4 }
 0x3ab   : > { %v3201_v57 = vadd.f32 %v3117_v28, %v2970_v45  ;;  %v1008_v30 = vadd.f32 %v976_v14, %v940_v19  ;;  %v1276_v47 = vrot.slane %v1177_v5, 1  ;;  %v12094_v10 = vmul.f32 %v15732_v8, %v15842_v4 }
 0x3ac   : > { %15966 = vst [vmem:[#allocation100_spill] sm:$0xff] %v12088_v20  ;;  %v12099_v15 = vsel %vm368_vm0, %v15969_v31, %v5401_v21  ;;  %v14713_v25 = vrot.slane %v12088_v20, 1  ;;  %v1633_v3 = vmul.f32 %v15780_v11, %v15963_v38  ;;  %v12106_v55 = vmul.f32 %v15780_v11, %v15970_v42  ;;  %v15973_v20 = vld [vmem:[#allocation75_spill] sm:$0xff] }
 0x3ad   : > { %15967 = vst [vmem:[#allocation162_spill] sm:$0xff] %v12094_v10  ;;  %v3419_v28 = vadd.f32 %v3342_v34, %v3201_v57  ;;  %v15971_v14 = vrot.slane %v11748_v60, 4  ;;  %v1074_v19 = vadd.f32 %v1044_v0, %v1008_v30  ;;  %v1877_v21 = vmul.f32 %v15782_v44, %v15964_v1 }
 0x3ae   : > { %v1278_v5 = vsel %vm1240_vm5, %v1276_v47, %v14713_v25  ;;  %v1505_v49 = vrot.slane %v1399_v32, 1  ;;  %v12121_v48 = vmul.f32 %v15782_v44, %v15972_v17  ;;  %v1747_v57 = vrot.slane %v1633_v3, 1 }
 0x3af   : > { %v12111_v45 = vsel %vm368_vm0, %v15971_v14, %v5626_v9  ;;  %v3638_v34 = vadd.f32 %v3551_v12, %v3419_v28  ;;  %v1138_v60 = vadd.f32 %v1110_v61, %v1074_v19  ;;  %v14717_v9 = vrot.slane %v12106_v55, 1 }
 0x3b0   : > { %v1985_v0 = vrot.slane %v1877_v21, 1  ;;  %v2108_v14 = vmul.f32 %v15841_v26, %v15965_v23  ;;  %v12129_v32 = vmul.f32 %v15841_v26, %v15973_v20  ;;  %v2320_v31 = vmul.f32 %v15844_v43, %v15955_v35 }
 0x3b1   : > { %v3869_v47 = vadd.f32 %v3780_v63, %v3638_v34  ;;  %v1357_v25 = vadd.f32 %v1278_v5, %v1138_v60  ;;  %v12135_v3 = vmul.f32 %v15844_v43, %v15840_v50  ;;  %v15976_v12 = vrot.slane %v12094_v10, 1 }
 0x3b2   : > { %15974 = vst [vmem:[#allocation163_spill] sm:$0xff] %v12129_v32  ;;  %v2210_v28 = vrot.slane %v2108_v14, 1  ;;  %v14716_v19 = vrot.slane %v12129_v32, 1  ;;  %v2542_v21 = vmul.f32 %v15247_v18, %v15960_v56  ;;  %v2419_v5 = vrot.slane %v2320_v31, 2 }
 0x3b3   : > { %15975 = vst [vmem:[#allocation77_spill] sm:$0xff] %v12135_v3  ;;  %v1507_v61 = vsel %vm1240_vm5, %v1505_v49, %v15976_v12  ;;  %v4113_v30 = vadd.f32 %v4022_v39, %v3869_v47  ;;  %v14718_v34 = vrot.slane %v12135_v3, 2  ;;  %v1749_v60 = vsel %vm1240_vm5, %v1747_v57, %v14717_v9 }
 0x3b4   : > { %v1588_v63 = vadd.f32 %v1507_v61, %v1357_v25  ;;  %v15977_v26 = vrot.slane %v12121_v48, 1  ;;  %v12152_v49 = vmul.f32 %v15247_v18, %v15842_v4  ;;  %v2776_v14 = vmul.f32 %v15248_v33, %v15963_v38 }
 0x3b5   : > { %v4344_v39 = vadd.f32 %v12036_v62, %v4113_v30  ;;  %v2212_v31 = vsel %vm1240_vm5, %v2210_v28, %v14716_v19  ;;  %v12162_v57 = vmul.f32 %v15248_v33, %v15970_v42  ;;  %v2648_v47 = vrot.slane %v2542_v21, 2 }
 0x3b6   : > { %v1987_v10 = vsel %vm1240_vm5, %v1985_v0, %v15977_v26  ;;  %15978 = vst [vmem:[#allocation135_spill] sm:$0xff] %v12152_v49  ;;  %v1832_v25 = vadd.f32 %v1749_v60, %v1588_v63  ;;  %v3020_v0 = vmul.f32 %v7558_v46, %v15964_v1  ;;  %v12169_v12 = vmul.f32 %v7558_v46, %v15972_v17 }
 0x3b7   : > { %15979 = vst [vmem:[#allocation129_spill] sm:$0xff] %v12162_v57  ;;  %v4562_v62 = vadd.f32 %v12041_v7, %v4344_v39  ;;  %v2421_v61 = vsel %vm2383_vm6, %v2419_v5, %v14718_v34  ;;  %v3251_v28 = vmul.f32 %v15927_v24, %v15965_v23  ;;  %v2890_v21 = vrot.slane %v2776_v14, 2 }
 0x3b8   : > { %15980 = vst [vmem:[#allocation81_spill] sm:$0xff] %v12169_v12  ;;  %v2063_v30 = vadd.f32 %v1987_v10, %v1832_v25  ;;  %v14721_v63 = vrot.slane %v12162_v57, 2  ;;  %v3128_v60 = vrot.slane %v3020_v0, 2  ;;  %v12180_v19 = vmul.f32 %v15927_v24, %v15973_v20 }
 0x3b9   : > { %v4780_v9 = vadd.f32 %v12048_v2, %v4562_v62  ;;  %v14723_v7 = vrot.slane %v12169_v12, 2  ;;  %v3353_v10 = vrot.slane %v3251_v28, 2  ;;  %v15982_v39 = vrot.slane %v12152_v49, 2 }
 0x3ba   : > { %15981 = vst [vmem:[#allocation126_spill] sm:$0xff] %v12180_v19  ;;  %v2281_v26 = vadd.f32 %v2212_v31, %v2063_v30  ;;  %v3463_v14 = vmul.f32 %v15339_v58, %v15955_v35  ;;  %v12192_v0 = vmul.f32 %v15339_v58, %v15840_v50  ;;  %v15984_v31 = vld [vmem:[#allocation16_spill] sm:$0xff]  ;;  %v3919_v25 = vmul.f32 %v7567_v52, %v15963_v38 }
 0x3bb   : > { %v2650_v5 = vsel %vm2383_vm6, %v2648_v47, %v15982_v39  ;;  %v5011_v34 = vadd.f32 %v12062_v40, %v4780_v9  ;;  %v3685_v62 = vmul.f32 %v15984_v31, %v15960_v56  ;;  %v12199_v30 = vmul.f32 %v15984_v31, %v15842_v4 }
 0x3bc   : > { %15983 = vst [vmem:[#allocation30_spill] sm:$0xff] %v12192_v0  ;;  %v2500_v2 = vadd.f32 %v2421_v61, %v2281_v26  ;;  %v2892_v47 = vsel %vm2383_vm6, %v2890_v21, %v14721_v63  ;;  %v3562_v28 = vrot.slane %v3463_v14, 3  ;;  %v14722_v39 = vrot.slane %v12192_v0, 3 }
 0x3bd   : > { %15985 = vst [vmem:[#allocation74_spill] sm:$0xff] %v12199_v30  ;;  %v5255_v40 = vadd.f32 %v12067_v36, %v5011_v34  ;;  %v3130_v26 = vsel %vm2383_vm6, %v3128_v60, %v14723_v7  ;;  %v15986_v61 = vrot.slane %v12180_v19, 2  ;;  %v3791_v57 = vrot.slane %v3685_v62, 3 }
 0x3be   : > { %v2731_v9 = vadd.f32 %v2650_v5, %v2500_v2  ;;  %v14724_v21 = vrot.slane %v12199_v30, 3  ;;  %v12217_v14 = vmul.f32 %v7567_v52, %v15970_v42  ;;  %v4163_v63 = vmul.f32 %v15606_v41, %v15964_v1 }
 0x3bf   : > { %v3355_v49 = vsel %vm2383_vm6, %v3353_v10, %v15986_v61  ;;  %v5486_v36 = vadd.f32 %v12099_v15, %v5255_v40  ;;  %v3564_v60 = vsel %vm3526_vm7, %v3562_v28, %v14722_v39  ;;  %v12227_v10 = vmul.f32 %v15606_v41, %v15972_v17 }
 0x3c0   : > { %15987 = vst [vmem:[#allocation39_spill] sm:$0xff] %v12217_v14  ;;  %v2975_v34 = vadd.f32 %v2892_v47, %v2731_v9  ;;  %v4033_v5 = vrot.slane %v3919_v25, 3  ;;  %v4394_v62 = vmul.f32 %v15941_v59, %v15965_v23  ;;  %v12234_v61 = vmul.f32 %v15941_v59, %v15973_v20 }
 0x3c1   : > { %15988 = vst [vmem:[#allocation108_spill] sm:$0xff] %v12227_v10  ;;  %v12237_v15 = vadd.f32 %v12111_v45, %v5486_v36  ;;  %v4271_v40 = vrot.slane %v4163_v63, 3  ;;  %v4606_v28 = vmul.f32 %v15607_v53, %v15955_v35  ;;  %v12245_v7 = vmul.f32 %v15607_v53, %v15840_v50 }
 0x3c2   : > { %15989 = vst [vmem:[#allocation111_spill] sm:$0xff] %v12234_v61  ;;  %v3206_v47 = vadd.f32 %v3130_v26, %v2975_v34  ;;  %v4496_v25 = vrot.slane %v4394_v62, 3  ;;  %v3793_v45 = vsel %vm3526_vm7, %v3791_v57, %v14724_v21  ;;  %v4827_v26 = vmul.f32 %v15263_v13, %v15960_v56 }
 0x3c3   : > { %15990 = vst [vmem:[#allocation41_spill] sm:$0xff] %v12237_v15  ;;  %15991 = vst [vmem:[#allocation2_spill] sm:$0xff] %v12245_v7  ;;  %5781 = vrot.lane.b32.xlu1 %v12237_v15, %s7431_s7  ;;  %v4704_v63 = vrot.slane %v4606_v28, 4  ;;  %v15992_v36 = vrot.slane %v12217_v14, 3  ;;  %v12260_v39 = vmul.f32 %v15263_v13, %v15842_v4  ;;  %v12266_v57 = vmul.f32 %v14991_v54, %v15970_v42  ;;  %v16009_v14 = vld [vmem:[#allocation98_spill] sm:$0xff] }
 0x3c4   : > { %v3424_v2 = vadd.f32 %v3355_v49, %v3206_v47  ;;  %v5061_v49 = vmul.f32 %v14991_v54, %v15963_v38  ;;  %v4933_v9 = vrot.slane %v4827_v26, 4  ;;  %v5305_v28 = vmul.f32 %v14993_v51, %v15964_v1 }
 0x3c5   : > { %v4035_v34 = vsel %vm3526_vm7, %v4033_v5, %v15992_v36  ;;  %15993 = vst [vmem:[#allocation123_spill] sm:$0xff] %v12260_v39  ;;  %15994 = vst [vmem:[#allocation133_spill] sm:$0xff] %v12266_v57  ;;  %v15995_v5 = vrot.slane %v12227_v10, 3  ;;  %v15996_v21 = vrot.slane %v12234_v61, 3  ;;  %v15998_v26 = vrot.slane %v12245_v7, 4  ;;  %v16004_v7 = vld [vmem:[#allocation28_spill] sm:$0xff] }
 0x3c6   : > { %v3643_v47 = vadd.f32 %v3564_v60, %v3424_v2  ;;  %v12279_v60 = vmul.f32 %v14993_v51, %v15972_v17  ;;  %v5175_v1 = vrot.slane %v5061_v49, 4  ;;  %v5536_v35 = vmul.f32 %v12053_v6, %v15965_v23  ;;  %v16002_v49 = vld [vmem:[#allocation90_spill] sm:$0xff] }
 0x3c7   : > { %v4273_v36 = vsel %vm3526_vm7, %v4271_v40, %v15995_v5  ;;  %v4498_v62 = vsel %vm3526_vm7, %v4496_v25, %v15996_v21  ;;  %v4706_v38 = vsel %vm368_vm0, %v4704_v63, %v15998_v26  ;;  %v5413_v5 = vrot.slane %v5305_v28, 4  ;;  %v16000_v25 = vld [vmem:[#allocation99_spill] sm:$0xff]  ;;  %v16003_v40 = vld [vmem:[#allocation105_spill] sm:$0xff] }
 0x3c8   : > { %15997 = vst [vmem:[#allocation33_spill] sm:$0xff] %v12279_v60  ;;  %v3874_v2 = vadd.f32 %v3793_v45, %v3643_v47  ;;  %v12289_v21 = vmul.f32 %v12053_v6, %v15973_v20  ;;  %v857_v56 = vmul.f32 %v15566_v37, %v16000_v25  ;;  %v16001_v45 = vrot.slane %v12260_v39, 4 }
 0x3c9   : > { %v919_v23 = vmul.f32 %v15223_v16, %v16002_v49  ;;  %v5638_v26 = vrot.slane %v5536_v35, 4  ;;  %v987_v6 = vmul.f32 %v15042_v22, %v16003_v40  ;;  %v1055_v10 = vmul.f32 %v15117_v29, %v16004_v7  ;;  %v16008_v49 = vld [vmem:[#allocation102_spill] sm:$0xff] }
 0x3ca   : > { %15999 = vst [vmem:[#allocation114_spill] sm:$0xff] %v12289_v21  ;;  %v4118_v61 = vadd.f32 %v4035_v34, %v3874_v2  ;;  %v4935_v47 = vsel %vm368_vm0, %v4933_v9, %v16001_v45  ;;  %v16005_v2 = vld [vmem:[#allocation83_spill] sm:$0xff]  ;;  %v16007_v63 = vrot.slane %v12266_v57, 4  ;;  %v1650_v28 = vmul.f32 %v15780_v11, %v16008_v49 }
 0x3cb   : > { %v951_v34 = vadd.f32 %v919_v23, %v857_v56  ;;  %v1194_v39 = vmul.f32 %v15682_v27, %v16005_v2  ;;  %v16006_v9 = vld [vmem:[#allocation79_spill] sm:$0xff]  ;;  %v1894_v40 = vmul.f32 %v15782_v44, %v16009_v14  ;;  %v16010_v30 = vrot.slane %v12279_v60, 4 }
 0x3cc   : > { %v4349_v25 = vadd.f32 %v4273_v36, %v4118_v61  ;;  %v1416_v45 = vmul.f32 %v15732_v8, %v16006_v9  ;;  %v5177_v35 = vsel %vm368_vm0, %v5175_v1, %v16007_v63  ;;  %v2337_v61 = vmul.f32 %v15844_v43, %v16005_v2 }
 0x3cd   : > { %v1019_v36 = vadd.f32 %v987_v6, %v951_v34  ;;  %v1304_v23 = vrot.slane %v1194_v39, 1  ;;  %v5415_v0 = vsel %vm368_vm0, %v5413_v5, %v16010_v30  ;;  %v1775_v57 = vrot.slane %v1650_v28, 1  ;;  %v16016_v5 = vld [vmem:[#allocation20_spill] sm:$0xff] }
 0x3ce   : > { %v4567_v56 = vadd.f32 %v4498_v62, %v4349_v25  ;;  %v1533_v7 = vrot.slane %v1416_v45, 1  ;;  %v2013_v59 = vrot.slane %v1894_v40, 1  ;;  %v2559_v1 = vmul.f32 %v15247_v18, %v16006_v9  ;;  %v16012_v62 = vld [vmem:[#allocation107_spill] sm:$0xff]  ;;  %v16014_v25 = vld [vmem:[#allocation142_spill] sm:$0xff] }
 0x3cf   : > { %v16011_v19 = vrot.slane %v12289_v21, 4  ;;  %v1085_v3 = vadd.f32 %v1055_v10, %v1019_v36  ;;  %v2447_v32 = vrot.slane %v2337_v61, 2  ;;  %v16013_v6 = vrot.slane %v16012_v62, 1  ;;  %v16021_v62 = vld [vmem:[#allocation13_spill] sm:$0xff] }
 0x3d0   : > { %v4785_v63 = vadd.f32 %v4706_v38, %v4567_v56  ;;  %v16015_v34 = vrot.slane %v16014_v25, 1  ;;  %v16017_v40 = vrot.slane %v16016_v5, 1  ;;  %v2676_v45 = vrot.slane %v2559_v1, 2  ;;  %v16018_v56 = vld [vmem:[#allocation155_spill] sm:$0xff] }
 0x3d1   : > { %v5640_v12 = vsel %vm368_vm0, %v5638_v26, %v16011_v19  ;;  %v1305_v39 = vsel %vm1240_vm5, %v16013_v6, %v1304_v23  ;;  %v1149_v21 = vadd.f32 %v16018_v56, %v1085_v3  ;;  %v2793_v19 = vmul.f32 %v15248_v33, %v16008_v49  ;;  %v16019_v26 = vld [vmem:[#allocation12_spill] sm:$0xff] }
 0x3d2   : > { %v1534_v30 = vsel %vm1240_vm5, %v16015_v34, %v1533_v7  ;;  %v1776_v28 = vsel %vm1240_vm5, %v16017_v40, %v1775_v57  ;;  %v5016_v38 = vadd.f32 %v4935_v47, %v4785_v63  ;;  %v3037_v10 = vmul.f32 %v7558_v46, %v16009_v14 }
 0x3d3   : > { %v16020_v61 = vrot.slane %v16019_v26, 1  ;;  %v3480_v7 = vmul.f32 %v15339_v58, %v16005_v2  ;;  %v3702_v57 = vmul.f32 %v15984_v31, %v16006_v9  ;;  %v3936_v47 = vmul.f32 %v7567_v52, %v16008_v49  ;;  %v16023_v26 = vld [vmem:[#allocation144_spill] sm:$0xff] }
 0x3d4   : > { %v5260_v3 = vadd.f32 %v5177_v35, %v5016_v38  ;;  %v1368_v23 = vadd.f32 %v1305_v39, %v1149_v21  ;;  %v2918_v1 = vrot.slane %v2793_v19, 2  ;;  %v3156_v63 = vrot.slane %v3037_v10, 2  ;;  %v16025_v35 = vld [vmem:[#allocation24_spill] sm:$0xff]  ;;  %v16027_v38 = vld [vmem:[#allocation43_spill] sm:$0xff] }
 0x3d5   : > { %v2014_v36 = vsel %vm1240_vm5, %v16020_v61, %v2013_v59  ;;  %v16022_v6 = vrot.slane %v16021_v62, 2  ;;  %v3590_v34 = vrot.slane %v3480_v7, 3  ;;  %v3819_v5 = vrot.slane %v3702_v57, 3  ;;  %v16029_v10 = vld [vmem:[#allocation131_spill] sm:$0xff] }
 0x3d6   : > { %v4180_v59 = vmul.f32 %v15606_v41, %v16009_v14  ;;  %v5491_v40 = vadd.f32 %v5415_v0, %v5260_v3  ;;  %v1599_v56 = vadd.f32 %v1534_v30, %v1368_v23  ;;  %v16024_v61 = vrot.slane %v16023_v26, 2  ;;  %v16032_v23 = vld [vmem:[#allocation150_spill] sm:$0xff]  ;;  %v16036_v26 = vld [vmem:[#allocation152_spill] sm:$0xff] }
 0x3d7   : > { %v2448_v25 = vsel %vm2383_vm6, %v16022_v6, %v2447_v32  ;;  %v4061_v52 = vrot.slane %v3936_v47, 3  ;;  %v16026_v21 = vrot.slane %v16025_v35, 2  ;;  %v16028_v19 = vrot.slane %v16027_v38, 2 }
 0x3d8   : > { %v2677_v60 = vsel %vm2383_vm6, %v16024_v61, %v2676_v45  ;;  %v16030_v7 = vrot.slane %v16029_v10, 3  ;;  %v4299_v0 = vrot.slane %v4180_v59, 3  ;;  %v12367_v30 = vadd.f32 %v5640_v12, %v5491_v40 }
 0x3d9   : > { %v2919_v39 = vsel %vm2383_vm6, %v16026_v21, %v2918_v1  ;;  %v3157_v32 = vsel %vm2383_vm6, %v16028_v19, %v3156_v63  ;;  %v1843_v3 = vadd.f32 %v1776_v28, %v1599_v56  ;;  %v4623_v45 = vmul.f32 %v15607_v53, %v16005_v2  ;;  %v16038_v19 = vld [vmem:[#allocation4_spill] sm:$0xff] }
 0x3da   : > { %v12365_v57 = vsel %vm3526_vm7, %v16030_v7, %v3590_v34  ;;  %16031 = vst [vmem:[#allocation136_spill] sm:$0xff] %v12367_v30  ;;  %v4844_v47 = vmul.f32 %v15263_v13, %v16006_v9  ;;  %v16033_v1 = vrot.slane %v16032_v23, 3  ;;  %v5078_v63 = vmul.f32 %v14991_v54, %v16008_v49  ;;  %5791 = vrot.lane.b32.xlu0 %v12367_v30, %s7431_s7  ;;  %v16041_v23 = vld [vmem:[#allocation158_spill] sm:$0xff]  ;;  %v16052_v9 = vld [vmem:[#allocation159_spill] sm:$0xff]  ;;  %v16054_v30 = vld [vmem:[#allocation100_spill] sm:$0xff] }
 0x3db   : > { %v5322_v6 = vmul.f32 %v14993_v51, %v16009_v14  ;;  %v847_v12 = vmul.f32 %v15566_v37, %v15840_v50  ;;  %v2074_v2 = vadd.f32 %v2014_v36, %v1843_v3  ;;  %v4732_v28 = vrot.slane %v4623_v45, 4  ;;  %v16039_v45 = vld [vmem:[#allocation6_spill] sm:$0xff] }
 0x3dc   : > { %v12376_v62 = vsel %vm3526_vm7, %v16033_v1, %v3819_v5  ;;  %v4961_v34 = vrot.slane %v4844_v47, 4  ;;  %v909_v59 = vmul.f32 %v15223_v16, %v15842_v4  ;;  %v16034_v5 = vld [vmem:[#allocation52_spill] sm:$0xff]  ;;  %v16037_v61 = vrot.slane %v16036_v26, 3  ;;  %v16046_v26 = vld [vmem:[#allocation47_spill] sm:$0xff] }
 0x3dd   : > { %v16035_v40 = vrot.slane %v16034_v5, 3  ;;  %v5203_v21 = vrot.slane %v5078_v63, 4  ;;  %v5441_v38 = vrot.slane %v5322_v6, 4  ;;  %v2292_v10 = vadd.f32 %v16038_v19, %v2074_v2  ;;  %v16043_v63 = vld [vmem:[#allocation10_spill] sm:$0xff] }
 0x3de   : > { %v12396_v35 = vsel %vm3526_vm7, %v16037_v61, %v4299_v0  ;;  %v941_v36 = vadd.f32 %v909_v59, %v847_v12  ;;  %v977_v7 = vmul.f32 %v15042_v22, %v15970_v42  ;;  %v1045_v3 = vmul.f32 %v15117_v29, %v15972_v17  ;;  %v16044_v12 = vld [vmem:[#allocation93_spill] sm:$0xff]  ;;  %5974 = vrot.lane.b32.xlu0 %v12237_v15, %s7432_s8 }
 0x3df   : > { %v12391_v56 = vsel %vm3526_vm7, %v16035_v40, %v4061_v52  ;;  %v16040_v47 = vrot.slane %v16039_v45, 4  ;;  %v16042_v1 = vrot.slane %v16041_v23, 4  ;;  %v1111_v6 = vmul.f32 %v16043_v63, %v15973_v20  ;;  %v16045_v40 = vld [vmem:[#allocation55_spill] sm:$0xff]  ;;  %v16049_v20 = vld [vmem:[#allocation14_spill] sm:$0xff] }
 0x3e0   : > { %v1179_v2 = vmul.f32 %v15682_v27, %v16044_v12  ;;  %v2511_v59 = vadd.f32 %v2448_v25, %v2292_v10  ;;  %v1009_v5 = vadd.f32 %v977_v7, %v941_v36  ;;  %v1635_v61 = vmul.f32 %v15780_v11, %v16046_v26  ;;  %v16050_v7 = vld [vmem:[#allocation68_spill] sm:$0xff] }
 0x3e1   : > { %v12406_v52 = vsel %vm368_vm0, %v16040_v47, %v4732_v28  ;;  %v12411_v0 = vsel %vm368_vm0, %v16042_v1, %v4961_v34  ;;  %v1401_v28 = vmul.f32 %v15732_v8, %v16045_v40  ;;  %v16047_v34 = vld [vmem:[#allocation64_spill] sm:$0xff]  ;;  %v16048_v47 = vld [vmem:[#allocation62_spill] sm:$0xff]  ;;  %v2322_v25 = vmul.f32 %v15844_v43, %v16044_v12 }
 0x3e2   : > { %v1279_v19 = vrot.slane %v1179_v2, 1  ;;  %v1879_v45 = vmul.f32 %v15782_v44, %v16047_v34  ;;  %v2110_v23 = vmul.f32 %v16049_v20, %v16048_v47  ;;  %v2742_v10 = vadd.f32 %v2677_v60, %v2511_v59 }
 0x3e3   : > { %v1075_v1 = vadd.f32 %v1045_v3, %v1009_v5  ;;  %v1508_v15 = vrot.slane %v1401_v28, 1  ;;  %v1750_v36 = vrot.slane %v1635_v61, 1  ;;  %v16051_v14 = vrot.slane %v16050_v7, 4  ;;  %v16056_v5 = vld [vmem:[#allocation162_spill] sm:$0xff] }
 0x3e4   : > { %v16053_v2 = vrot.slane %v16052_v9, 4  ;;  %v16055_v42 = vrot.slane %v16054_v30, 1  ;;  %v1988_v4 = vrot.slane %v1879_v45, 1  ;;  %v2986_v43 = vadd.f32 %v2919_v39, %v2742_v10  ;;  %v16060_v45 = vld [vmem:[#allocation117_spill] sm:$0xff] }
 0x3e5   : > { %v12432_v49 = vsel %vm368_vm0, %v16051_v14, %v5203_v21  ;;  %v1139_v60 = vadd.f32 %v1111_v6, %v1075_v1  ;;  %v2213_v3 = vrot.slane %v2110_v23, 1  ;;  %v2422_v59 = vrot.slane %v2322_v25, 2  ;;  %v16061_v25 = vld [vmem:[#allocation163_spill] sm:$0xff] }
 0x3e6   : > { %v12437_v17 = vsel %vm368_vm0, %v16053_v2, %v5441_v38  ;;  %v1280_v20 = vsel %vm1240_vm5, %v16055_v42, %v1279_v19  ;;  %v16057_v28 = vrot.slane %v16056_v5, 1  ;;  %v16058_v14 = vrot.slane %v12106_v55, 1 }
 0x3e7   : > { %v16059_v21 = vrot.slane %v12121_v48, 1  ;;  %v2544_v42 = vmul.f32 %v15247_v18, %v16045_v40  ;;  %v3217_v30 = vadd.f32 %v3157_v32, %v2986_v43  ;;  %v1358_v39 = vadd.f32 %v1280_v20, %v1139_v60  ;;  %v16065_v60 = vld [vmem:[#allocation135_spill] sm:$0xff] }
 0x3e8   : > { %v1509_v61 = vsel %vm1240_vm5, %v16057_v28, %v1508_v15  ;;  %v1751_v9 = vsel %vm1240_vm5, %v16058_v14, %v1750_v36  ;;  %v2778_v6 = vmul.f32 %v15248_v33, %v16046_v26  ;;  %v3022_v19 = vmul.f32 %v7558_v46, %v16047_v34  ;;  %v16063_v36 = vld [vmem:[#allocation77_spill] sm:$0xff] }
 0x3e9   : > { %v1989_v38 = vsel %vm1240_vm5, %v16059_v21, %v1988_v4  ;;  %v2651_v15 = vrot.slane %v2544_v42, 2  ;;  %v3253_v55 = vmul.f32 %v15927_v24, %v16048_v47  ;;  %v3465_v48 = vmul.f32 %v15339_v58, %v16044_v12 }
 0x3ea   : > { %v3687_v4 = vmul.f32 %v15984_v31, %v16045_v40  ;;  %v3435_v23 = vadd.f32 %v16060_v45, %v3217_v30  ;;  %v1589_v43 = vadd.f32 %v1509_v61, %v1358_v39  ;;  %v2893_v32 = vrot.slane %v2778_v6, 2  ;;  %v16067_v39 = vld [vmem:[#allocation129_spill] sm:$0xff] }
 0x3eb   : > { %v3131_v20 = vrot.slane %v3022_v19, 2  ;;  %v16062_v10 = vrot.slane %v16061_v25, 1  ;;  %v16064_v7 = vrot.slane %v16063_v36, 2  ;;  %v16066_v5 = vrot.slane %v16065_v60, 2  ;;  %v16069_v45 = vld [vmem:[#allocation81_spill] sm:$0xff] }
 0x3ec   : > { %v3356_v14 = vrot.slane %v3253_v55, 2  ;;  %v3654_v21 = vadd.f32 %v12365_v57, %v3435_v23  ;;  %v1833_v42 = vadd.f32 %v1751_v9, %v1589_v43  ;;  %v3565_v30 = vrot.slane %v3465_v48, 3 }
 0x3ed   : > { %v2214_v1 = vsel %vm1240_vm5, %v16062_v10, %v2213_v3  ;;  %v2423_v2 = vsel %vm2383_vm6, %v16064_v7, %v2422_v59  ;;  %v2652_v28 = vsel %vm2383_vm6, %v16066_v5, %v2651_v15  ;;  %v3794_v61 = vrot.slane %v3687_v4, 3  ;;  %v16071_v10 = vld [vmem:[#allocation126_spill] sm:$0xff]  ;;  %v16074_v4 = vld [vmem:[#allocation32_spill] sm:$0xff] }
 0x3ee   : > { %v16068_v6 = vrot.slane %v16067_v39, 2  ;;  %v16070_v3 = vrot.slane %v16069_v45, 2  ;;  %v16072_v59 = vrot.slane %v16071_v10, 2  ;;  %v16073_v15 = vld [vmem:[#allocation18_spill] sm:$0xff]  ;;  %v3885_v57 = vadd.f32 %v12376_v62, %v3654_v21 }
 0x3ef   : > { %v3921_v55 = vmul.f32 %v16073_v15, %v16046_v26  ;;  %v2064_v9 = vadd.f32 %v1989_v38, %v1833_v42  ;;  %v4165_v48 = vmul.f32 %v15606_v41, %v16047_v34  ;;  %v4396_v23 = vmul.f32 %v16074_v4, %v16048_v47 }
 0x3f0   : > { %v2894_v19 = vsel %vm2383_vm6, %v16068_v6, %v2893_v32  ;;  %v3132_v25 = vsel %vm2383_vm6, %v16070_v3, %v3131_v20  ;;  %v3357_v36 = vsel %vm2383_vm6, %v16072_v59, %v3356_v14  ;;  %v4608_v32 = vmul.f32 %v15607_v53, %v16044_v12  ;;  %v16075_v14 = vld [vmem:[#allocation30_spill] sm:$0xff] }
 0x3f1   : > { %v4036_v43 = vrot.slane %v3921_v55, 3  ;;  %v4829_v20 = vmul.f32 %v15263_v13, %v16045_v40  ;;  %v5063_v7 = vmul.f32 %v14991_v54, %v16046_v26  ;;  %v4129_v60 = vadd.f32 %v12391_v56, %v3885_v57  ;;  %v16077_v59 = vld [vmem:[#allocation74_spill] sm:$0xff]  ;;  %v16079_v26 = vld [vmem:[#allocation39_spill] sm:$0xff] }
 0x3f2   : > { %v2282_v62 = vadd.f32 %v2214_v1, %v2064_v9  ;;  %v4274_v38 = vrot.slane %v4165_v48, 3  ;;  %v4499_v5 = vrot.slane %v4396_v23, 3  ;;  %v16076_v21 = vrot.slane %v16075_v14, 3  ;;  %v16081_v1 = vld [vmem:[#allocation108_spill] sm:$0xff]  ;;  %v16083_v48 = vld [vmem:[#allocation111_spill] sm:$0xff] }
 0x3f3   : > { %v4707_v39 = vrot.slane %v4608_v32, 4  ;;  %v4936_v6 = vrot.slane %v4829_v20, 4  ;;  %v5178_v45 = vrot.slane %v5063_v7, 4  ;;  %v4360_v3 = vadd.f32 %v12396_v35, %v4129_v60  ;;  %v16085_v32 = vld [vmem:[#allocation2_spill] sm:$0xff]  ;;  %v16089_v60 = vld [vmem:[#allocation65_spill] sm:$0xff] }
 0x3f4   : > { %v3566_v42 = vsel %vm3526_vm7, %v16076_v21, %v3565_v30  ;;  %v2501_v10 = vadd.f32 %v2423_v2, %v2282_v62  ;;  %v16078_v55 = vrot.slane %v16077_v59, 3  ;;  %v16080_v12 = vrot.slane %v16079_v26, 3  ;;  %v16087_v26 = vld [vmem:[#allocation120_spill] sm:$0xff]  ;;  %v16092_v21 = vld [vmem:[#allocation133_spill] sm:$0xff] }
 0x3f5   : > { %v16082_v57 = vrot.slane %v16081_v1, 3  ;;  %v16084_v30 = vrot.slane %v16083_v48, 3  ;;  %v16086_v35 = vrot.slane %v16085_v32, 4  ;;  %v4578_v20 = vadd.f32 %v16087_v26, %v4360_v3  ;;  %v16095_v3 = vld [vmem:[#allocation86_spill] sm:$0xff]  ;;  %v16096_v48 = vld [vmem:[#allocation40_spill] sm:$0xff] }
 0x3f6   : > { %v3795_v40 = vsel %vm3526_vm7, %v16078_v55, %v3794_v61  ;;  %v4037_v56 = vsel %vm3526_vm7, %v16080_v12, %v4036_v43  ;;  %v5307_v61 = vmul.f32 %v14993_v51, %v16047_v34  ;;  %v2732_v12 = vadd.f32 %v2652_v28, %v2501_v10  ;;  %v16088_v43 = vld [vmem:[#allocation160_spill] sm:$0xff]  ;;  %v16094_v55 = vld [vmem:[#allocation91_spill] sm:$0xff] }
 0x3f7   : > { %v4275_v9 = vsel %vm3526_vm7, %v16082_v57, %v4274_v38  ;;  %v12513_v23 = vsel %vm3526_vm7, %v16084_v30, %v4499_v5  ;;  %v12518_v2 = vsel %vm368_vm0, %v16086_v35, %v4707_v39  ;;  %v12525_v7 = vmul.f32 %v16088_v43, %v16048_v47  ;;  %v16090_v38 = vld [vmem:[#allocation123_spill] sm:$0xff]  ;;  %v16097_v35 = vld [vmem:[#allocation80_spill] sm:$0xff] }
 0x3f8   : > { %v842_v62 = vmul.f32 %v15566_v37, %v16089_v60  ;;  %v16091_v5 = vrot.slane %v16090_v38, 4  ;;  %v16093_v39 = vrot.slane %v16092_v21, 4  ;;  %v904_v28 = vmul.f32 %v15223_v16, %v16094_v55  ;;  %v16099_v21 = vld [vmem:[#allocation35_spill] sm:$0xff] }
 0x3f9   : > { %v972_v47 = vmul.f32 %v15042_v22, %v16095_v3  ;;  %v4796_v10 = vadd.f32 %v12406_v52, %v4578_v20  ;;  %v2976_v1 = vadd.f32 %v2894_v19, %v2732_v12  ;;  %v5416_v57 = vrot.slane %v5307_v61, 4 }
 0x3fa   : > { %v12532_v14 = vsel %vm368_vm0, %v16091_v5, %v4936_v6  ;;  %v12537_v59 = vsel %vm368_vm0, %v16093_v39, %v5178_v45  ;;  %v1040_v30 = vmul.f32 %v15117_v29, %v16096_v48  ;;  %v936_v32 = vadd.f32 %v904_v28, %v842_v62  ;;  %v16100_v62 = vld [vmem:[#allocation103_spill] sm:$0xff] }
 0x3fb   : > { %v1171_v45 = vmul.f32 %v15682_v27, %v16089_v60  ;;  %v12551_v26 = vmul.f32 %v15682_v27, %v16097_v35  ;;  %v5027_v38 = vadd.f32 %v12411_v0, %v4796_v10  ;;  %v3207_v5 = vadd.f32 %v3132_v25, %v2976_v1 }
 0x3fc   : > { %v1106_v52 = vmul.f32 %v16043_v63, %v16099_v21  ;;  %v1393_v19 = vmul.f32 %v15732_v8, %v16094_v55  ;;  %v1004_v61 = vadd.f32 %v972_v47, %v936_v32  ;;  %v12561_v39 = vmul.f32 %v15732_v8, %v16100_v62 }
 0x3fd   : > { %16098 = vst [vmem:[#allocation9_spill] sm:$0xff] %v12551_v26  ;;  %v1266_v20 = vrot.slane %v1171_v45, 1  ;;  %v14762_v12 = vrot.slane %v12551_v26, 1  ;;  %v5271_v28 = vadd.f32 %v12432_v49, %v5027_v38  ;;  %v3425_v6 = vadd.f32 %v3357_v36, %v3207_v5 }
 0x3fe   : > { %16101 = vst [vmem:[#allocation137_spill] sm:$0xff] %v12561_v39  ;;  %v1495_v34 = vrot.slane %v1393_v19, 1  ;;  %v1627_v0 = vmul.f32 %v15780_v11, %v16095_v3  ;;  %v1070_v25 = vadd.f32 %v1040_v30, %v1004_v61  ;;  %v14763_v47 = vrot.slane %v12561_v39, 1  ;;  %v16103_v19 = vld [vmem:[#allocation63_spill] sm:$0xff] }
 0x3ff   : > { %v1268_v10 = vsel %vm1240_vm5, %v1266_v20, %v14762_v12  ;;  %v12572_v1 = vmul.f32 %v15780_v11, %v15840_v50  ;;  %v5502_v32 = vadd.f32 %v12437_v17, %v5271_v28  ;;  %v3644_v45 = vadd.f32 %v3566_v42, %v3425_v6  ;;  %v16105_v20 = vld [vmem:[#allocation42_spill] sm:$0xff] }
 0x400   : > { %v1737_v49 = vrot.slane %v1627_v0, 1  ;;  %v1871_v36 = vmul.f32 %v15782_v44, %v16096_v48  ;;  %v1134_v38 = vadd.f32 %v1106_v52, %v1070_v25  ;;  %v1497_v30 = vsel %vm1240_vm5, %v1495_v34, %v14763_v47  ;;  %v16107_v6 = vld [vmem:[#allocation14_spill] sm:$0xff]  ;;  %v16108_v25 = vld [vmem:[#allocation44_spill] sm:$0xff] }
 0x401   : > { %16102 = vst [vmem:[#allocation130_spill] sm:$0xff] %v12572_v1  ;;  %v14764_v5 = vrot.slane %v12572_v1, 1  ;;  %v12583_v61 = vmul.f32 %v15782_v44, %v16103_v19  ;;  %v12586_v12 = vadd.f32 %v16105_v20, %v5502_v32  ;;  %v3875_v17 = vadd.f32 %v3795_v40, %v3644_v45 }
 0x402   : > { %v1975_v42 = vrot.slane %v1871_v36, 1  ;;  %v2102_v28 = vmul.f32 %v16107_v6, %v16099_v21  ;;  %v1353_v0 = vadd.f32 %v1268_v10, %v1134_v38  ;;  %v12596_v47 = vmul.f32 %v16107_v6, %v16108_v25  ;;  %v16110_v10 = vld [vmem:[#allocation11_spill] sm:$0xff]  ;;  %v16112_v36 = vld [vmem:[#allocation33_spill] sm:$0xff] }
 0x403   : > { %16104 = vst [vmem:[#allocation138_spill] sm:$0xff] %v12583_v61  ;;  %16106 = vst [vmem:[#allocation109_spill] sm:$0xff] %v12586_v12  ;;  %v1739_v52 = vsel %vm1240_vm5, %v1737_v49, %v14764_v5  ;;  %5813 = vrot.lane.b32.xlu1 %v12586_v12, %s7431_s7  ;;  %6006 = vrot.lane.b32.xlu0 %v12586_v12, %s7432_s8  ;;  %v4119_v40 = vadd.f32 %v4037_v56, %v3875_v17  ;;  %v16113_v38 = vrot.slane %v16112_v36, 4 }
 0x404   : > { %16109 = vst [vmem:[#allocation56_spill] sm:$0xff] %v12596_v47  ;;  %v2200_v32 = vrot.slane %v2102_v28, 1  ;;  %v2314_v45 = vmul.f32 %v16110_v10, %v16089_v60  ;;  %v12606_v49 = vmul.f32 %v16110_v10, %v16097_v35  ;;  %v1584_v5 = vadd.f32 %v1497_v30, %v1353_v0  ;;  %v16116_v0 = vld [vmem:[#allocation136_spill] sm:$0xff] }
 0x405   : > { %v5417_v20 = vsel %vm368_vm0, %v16113_v38, %v5416_v57  ;;  %v14769_v34 = vrot.slane %v12596_v47, 1  ;;  %v2536_v1 = vmul.f32 %v15247_v18, %v16094_v55  ;;  %v4350_v12 = vadd.f32 %v4275_v9, %v4119_v40 }
 0x406   : > { %16111 = vst [vmem:[#allocation140_spill] sm:$0xff] %v12606_v49  ;;  %v2409_v56 = vrot.slane %v2314_v45, 2  ;;  %v14770_v17 = vrot.slane %v12606_v49, 2  ;;  %v12617_v28 = vmul.f32 %v15247_v18, %v16100_v62  ;;  %v1828_v39 = vadd.f32 %v1739_v52, %v1584_v5  ;;  %v16145_v49 = vld [vmem:[#allocation57_spill] sm:$0xff] }
 0x407   : > { %v16115_v26 = vrot.slane %v12583_v61, 1  ;;  %v2638_v57 = vrot.slane %v2536_v1, 2  ;;  %v2770_v30 = vmul.f32 %v15248_v33, %v16095_v3  ;;  %5984 = vrot.lane.b32.xlu1 %v16116_v0, %s7432_s8  ;;  %v4568_v9 = vadd.f32 %v12513_v23, %v4350_v12 }
 0x408   : > { %16114 = vst [vmem:[#allocation75_spill] sm:$0xff] %v12617_v28  ;;  %v2202_v40 = vsel %vm1240_vm5, %v2200_v32, %v14769_v34  ;;  %v14771_v45 = vrot.slane %v12617_v28, 2  ;;  %v12633_v5 = vmul.f32 %v15248_v33, %v15840_v50  ;;  %v12639_v52 = vmul.f32 %v7558_v46, %v16103_v19 }
 0x409   : > { %v1977_v36 = vsel %vm1240_vm5, %v1975_v42, %v16115_v26  ;;  %v2880_v1 = vrot.slane %v2770_v30, 2  ;;  %v3014_v42 = vmul.f32 %v7558_v46, %v16096_v48  ;;  %v4786_v23 = vadd.f32 %v12518_v2, %v4568_v9 }
 0x40a   : > { %16117 = vst [vmem:[#allocation16_spill] sm:$0xff] %v12633_v5  ;;  %v2059_v26 = vadd.f32 %v1977_v36, %v1828_v39  ;;  %16118 = vst [vmem:[#allocation99_spill] sm:$0xff] %v12639_v52  ;;  %v2411_v12 = vsel %vm2383_vm6, %v2409_v56, %v14770_v17  ;;  %v14772_v32 = vrot.slane %v12633_v5, 2  ;;  %v3245_v38 = vmul.f32 %v15927_v24, %v16099_v21 }
 0x40b   : > { %v2640_v36 = vsel %vm2383_vm6, %v2638_v57, %v14771_v45  ;;  %v3118_v30 = vrot.slane %v3014_v42, 2  ;;  %v12653_v34 = vmul.f32 %v15927_v24, %v16108_v25  ;;  %v5017_v2 = vadd.f32 %v12532_v14, %v4786_v23 }
 0x40c   : > { %v2277_v39 = vadd.f32 %v2202_v40, %v2059_v26  ;;  %v2882_v56 = vsel %vm2383_vm6, %v2880_v1, %v14772_v32  ;;  %v3457_v40 = vmul.f32 %v15339_v58, %v16089_v60  ;;  %v3343_v17 = vrot.slane %v3245_v38, 2 }
 0x40d   : > { %16119 = vst [vmem:[#allocation83_spill] sm:$0xff] %v12653_v34  ;;  %v12665_v42 = vmul.f32 %v15339_v58, %v16097_v35  ;;  %v5261_v45 = vadd.f32 %v12537_v59, %v5017_v2  ;;  %v3679_v23 = vmul.f32 %v15984_v31, %v16094_v55  ;;  %v12672_v1 = vmul.f32 %v15984_v31, %v16100_v62 }
 0x40e   : > { %v2496_v26 = vadd.f32 %v2411_v12, %v2277_v39  ;;  %v3552_v14 = vrot.slane %v3457_v40, 3  ;;  %v16122_v32 = vrot.slane %v12525_v7, 4  ;;  %v16123_v12 = vld [vmem:[#allocation114_spill] sm:$0xff]  ;;  %v3913_v59 = vmul.f32 %v16073_v15, %v16095_v3 }
 0x40f   : > { %16120 = vst [vmem:[#allocation107_spill] sm:$0xff] %v12665_v42  ;;  %16121 = vst [vmem:[#allocation142_spill] sm:$0xff] %v12672_v1  ;;  %v16124_v38 = vrot.slane %v16123_v12, 4  ;;  %v14775_v9 = vrot.slane %v12665_v42, 3  ;;  %v5492_v2 = vadd.f32 %v5417_v20, %v5261_v45  ;;  %v3781_v40 = vrot.slane %v3679_v23, 3 }
 0x410   : > { %v2727_v57 = vadd.f32 %v2640_v36, %v2496_v26  ;;  %v14776_v0 = vrot.slane %v12672_v1, 3  ;;  %v12685_v5 = vmul.f32 %v16073_v15, %v15840_v50  ;;  %v16126_v7 = vrot.slane %v12639_v52, 2 }
 0x411   : > { %v5642_v39 = vsel %vm368_vm0, %v16124_v38, %v16122_v32  ;;  %v16127_v32 = vrot.slane %v12653_v34, 2  ;;  %v4157_v26 = vmul.f32 %v15606_v41, %v16096_v48  ;;  %v3554_v45 = vsel %vm3526_vm7, %v3552_v14, %v14775_v9 }
 0x412   : > { %16125 = vst [vmem:[#allocation20_spill] sm:$0xff] %v12685_v5  ;;  %v2971_v28 = vadd.f32 %v2882_v56, %v2727_v57  ;;  %v3120_v12 = vsel %vm2383_vm6, %v3118_v30, %v16126_v7  ;;  %v12695_v20 = vadd.f32 %v5642_v39, %v5492_v2  ;;  %v4023_v23 = vrot.slane %v3913_v59, 3 }
 0x413   : > { %v3345_v36 = vsel %vm2383_vm6, %v3343_v17, %v16127_v32  ;;  %v12702_v56 = vmul.f32 %v15606_v41, %v16103_v19  ;;  %v4388_v17 = vmul.f32 %v16074_v4, %v16099_v21  ;;  %v12709_v38 = vmul.f32 %v16074_v4, %v16108_v25 }
 0x414   : > { %16128 = vst [vmem:[#allocation155_spill] sm:$0xff] %v12695_v20  ;;  %v3202_v57 = vadd.f32 %v3120_v12, %v2971_v28  ;;  %5793 = vrot.lane.b32.xlu1 %v12695_v20, %s7431_s7  ;;  %v3783_v14 = vsel %vm3526_vm7, %v3781_v40, %v14776_v0  ;;  %v4261_v39 = vrot.slane %v4157_v26, 3  ;;  %v4600_v28 = vmul.f32 %v15607_v53, %v16089_v60 }
 0x415   : > { %16129 = vst [vmem:[#allocation12_spill] sm:$0xff] %v12702_v56  ;;  %16130 = vst [vmem:[#allocation13_spill] sm:$0xff] %v12709_v38  ;;  %v12720_v59 = vmul.f32 %v15607_v53, %v16097_v35  ;;  %v4486_v12 = vrot.slane %v4388_v17, 3  ;;  %v4821_v32 = vmul.f32 %v15263_v13, %v16094_v55  ;;  %v12729_v26 = vmul.f32 %v15263_v13, %v16100_v62 }
 0x416   : > { %v3420_v2 = vadd.f32 %v3345_v36, %v3202_v57  ;;  %v4694_v30 = vrot.slane %v4600_v28, 4  ;;  %v16133_v0 = vrot.slane %v12685_v5, 3  ;;  %v5055_v57 = vmul.f32 %v14991_v54, %v16095_v3 }
 0x417   : > { %16131 = vst [vmem:[#allocation144_spill] sm:$0xff] %v12720_v59  ;;  %16132 = vst [vmem:[#allocation24_spill] sm:$0xff] %v12729_v26  ;;  %v4923_v17 = vrot.slane %v4821_v32, 4  ;;  %v12739_v28 = vmul.f32 %v14991_v54, %v15840_v50  ;;  %v5299_v40 = vmul.f32 %v14993_v51, %v16096_v48  ;;  %v16138_v7 = vrot.slane %v12720_v59, 4 }
 0x418   : > { %v3639_v60 = vadd.f32 %v3554_v45, %v3420_v2  ;;  %v4025_v36 = vsel %vm3526_vm7, %v4023_v23, %v16133_v0  ;;  %v12745_v45 = vmul.f32 %v14993_v51, %v16103_v19  ;;  %v16136_v0 = vrot.slane %v12702_v56, 3 }
 0x419   : > { %16134 = vst [vmem:[#allocation43_spill] sm:$0xff] %v12739_v28  ;;  %v16137_v2 = vrot.slane %v12709_v38, 3  ;;  %v4696_v20 = vsel %vm368_vm0, %v4694_v30, %v16138_v7  ;;  %v5165_v1 = vrot.slane %v5055_v57, 4  ;;  %v16139_v56 = vrot.slane %v12729_v26, 4 }
 0x41a   : > { %v3870_v9 = vadd.f32 %v3783_v14, %v3639_v60  ;;  %16135 = vst [vmem:[#allocation131_spill] sm:$0xff] %v12745_v45  ;;  %v4263_v23 = vsel %vm3526_vm7, %v4261_v39, %v16136_v0  ;;  %v5530_v14 = vmul.f32 %v16088_v43, %v16099_v21  ;;  %v844_v60 = vmul.f32 %v15566_v37, %v16094_v55 }
 0x41b   : > { %v4488_v32 = vsel %vm3526_vm7, %v4486_v12, %v16137_v2  ;;  %v4925_v39 = vsel %vm368_vm0, %v4923_v17, %v16139_v56  ;;  %v5403_v38 = vrot.slane %v5299_v40, 4  ;;  %v906_v12 = vmul.f32 %v15223_v16, %v16095_v3 }
 0x41c   : > { %v4114_v5 = vadd.f32 %v4025_v36, %v3870_v9  ;;  %v12769_v30 = vmul.f32 %v16088_v43, %v16108_v25  ;;  %v974_v7 = vmul.f32 %v15042_v22, %v16096_v48  ;;  %v1042_v56 = vmul.f32 %v15117_v29, %v16099_v21 }
 0x41d   : > { %v938_v36 = vadd.f32 %v906_v12, %v844_v60  ;;  %v1174_v40 = vmul.f32 %v15682_v27, %v16094_v55  ;;  %v12779_v57 = vmul.f32 %v15682_v27, %v16100_v62  ;;  %v1396_v17 = vmul.f32 %v15732_v8, %v16095_v3 }
 0x41e   : > { %v4345_v2 = vadd.f32 %v4263_v23, %v4114_v5  ;;  %16140 = vst [vmem:[#allocation150_spill] sm:$0xff] %v12769_v30  ;;  %v12785_v43 = vmul.f32 %v15732_v8, %v15840_v50  ;;  %v1630_v23 = vmul.f32 %v15780_v11, %v16096_v48  ;;  %v12792_v0 = vmul.f32 %v15780_v11, %v16103_v19 }
 0x41f   : > { %16141 = vst [vmem:[#allocation52_spill] sm:$0xff] %v12779_v57  ;;  %v1006_v60 = vadd.f32 %v974_v7, %v938_v36  ;;  %v1271_v12 = vrot.slane %v1174_v40, 1  ;;  %v16144_v42 = vrot.slane %v12739_v28, 4  ;;  %v1108_v7 = vmul.f32 %v16043_v63, %v16145_v49 }
 0x420   : > { %v4563_v5 = vadd.f32 %v4488_v32, %v4345_v2  ;;  %16142 = vst [vmem:[#allocation152_spill] sm:$0xff] %v12785_v43  ;;  %16143 = vst [vmem:[#allocation4_spill] sm:$0xff] %v12792_v0  ;;  %v5628_v32 = vrot.slane %v5530_v14, 4  ;;  %v1500_v2 = vrot.slane %v1396_v17, 1  ;;  %v14789_v59 = vrot.slane %v12785_v43, 1 }
 0x421   : > { %v5167_v34 = vsel %vm368_vm0, %v5165_v1, %v16144_v42  ;;  %v1072_v52 = vadd.f32 %v1042_v56, %v1006_v60  ;;  %v1874_v36 = vmul.f32 %v15782_v44, %v16099_v21  ;;  %v1742_v42 = vrot.slane %v1630_v23, 1 }
 0x422   : > { %v4781_v26 = vadd.f32 %v4696_v20, %v4563_v5  ;;  %v16146_v20 = vrot.slane %v12779_v57, 1  ;;  %v12808_v5 = vmul.f32 %v15782_v44, %v16108_v25  ;;  %v2105_v56 = vmul.f32 %v16107_v6, %v16145_v49 }
 0x423   : > { %v1136_v17 = vadd.f32 %v1108_v7, %v1072_v52  ;;  %v16150_v52 = vrot.slane %v12745_v45, 4  ;;  %v12834_v1 = vmul.f32 %v15247_v18, %v15840_v50  ;;  %v16153_v45 = vrot.slane %v12769_v30, 4 }
 0x424   : > { %v5012_v40 = vadd.f32 %v4925_v39, %v4781_v26  ;;  %v1273_v14 = vsel %vm1240_vm5, %v1271_v12, %v16146_v20  ;;  %16147 = vst [vmem:[#allocation6_spill] sm:$0xff] %v12808_v5  ;;  %v1502_v26 = vsel %vm1240_vm5, %v1500_v2, %v14789_v59  ;;  %v16148_v39 = vld [vmem:[#allocation76_spill] sm:$0xff]  ;;  %v2317_v12 = vmul.f32 %v16110_v10, %v16094_v55 }
 0x425   : > { %v12818_v9 = vmul.f32 %v16107_v6, %v16148_v39  ;;  %v5405_v23 = vsel %vm368_vm0, %v5403_v38, %v16150_v52  ;;  %v1355_v7 = vadd.f32 %v1273_v14, %v1136_v17  ;;  %v1980_v20 = vrot.slane %v1874_v36, 1  ;;  %16152 = vst [vmem:[#allocation62_spill] sm:$0xff] %v12834_v1 }
 0x426   : > { %v5256_v60 = vadd.f32 %v5167_v34, %v5012_v40  ;;  %v12827_v34 = vmul.f32 %v16110_v10, %v16100_v62  ;;  %v2539_v59 = vmul.f32 %v15247_v18, %v16095_v3  ;;  %v5630_v38 = vsel %vm368_vm0, %v5628_v32, %v16153_v45 }
 0x427   : > { %16149 = vst [vmem:[#allocation158_spill] sm:$0xff] %v12818_v9  ;;  %v1586_v14 = vadd.f32 %v1502_v26, %v1355_v7  ;;  %v16154_v36 = vrot.slane %v12792_v0, 1  ;;  %v2205_v52 = vrot.slane %v2105_v56, 1  ;;  %v2414_v2 = vrot.slane %v2317_v12, 2 }
 0x428   : > { %16151 = vst [vmem:[#allocation10_spill] sm:$0xff] %v12827_v34  ;;  %v5487_v40 = vadd.f32 %v5405_v23, %v5256_v60  ;;  %v14796_v23 = vrot.slane %v12818_v9, 1  ;;  %v14798_v28 = vrot.slane %v12827_v34, 2  ;;  %v2773_v57 = vmul.f32 %v15248_v33, %v16096_v48 }
 0x429   : > { %v1744_v17 = vsel %vm1240_vm5, %v1742_v42, %v16154_v36  ;;  %v12850_v45 = vmul.f32 %v15248_v33, %v16103_v19  ;;  %v16157_v32 = vrot.slane %v12808_v5, 1  ;;  %v2643_v56 = vrot.slane %v2539_v59, 2 }
 0x42a   : > { %v12842_v60 = vadd.f32 %v5630_v38, %v5487_v40  ;;  %v1830_v43 = vadd.f32 %v1744_v17, %v1586_v14  ;;  %v14797_v26 = vrot.slane %v12834_v1, 2  ;;  %v3017_v12 = vmul.f32 %v7558_v46, %v16099_v21 }
 0x42b   : > { %16156 = vst [vmem:[#allocation159_spill] sm:$0xff] %v12850_v45  ;;  %v1982_v42 = vsel %vm1240_vm5, %v1980_v20, %v16157_v32  ;;  %v12864_v40 = vmul.f32 %v7558_v46, %v16108_v25  ;;  %v3248_v38 = vmul.f32 %v15927_v24, %v16145_v49  ;;  %v12870_v14 = vmul.f32 %v15927_v24, %v16148_v39 }
 0x42c   : > { %16155 = vst [vmem:[#allocation68_spill] sm:$0xff] %v12842_v60  ;;  %5783 = vrot.lane.b32.xlu0 %v12842_v60, %s7431_s7  ;;  %5976 = vrot.lane.b32.xlu1 %v12842_v60, %s7432_s8  ;;  %v2061_v7 = vadd.f32 %v1982_v42, %v1830_v43  ;;  %v2207_v59 = vsel %vm1240_vm5, %v2205_v52, %v14796_v23  ;;  %v2885_v36 = vrot.slane %v2773_v57, 2  ;;  %v14799_v17 = vrot.slane %v12850_v45, 2 }
 0x42d   : > { %16158 = vst [vmem:[#allocation100_spill] sm:$0xff] %v12864_v40  ;;  %16159 = vst [vmem:[#allocation162_spill] sm:$0xff] %v12870_v14  ;;  %v2416_v20 = vsel %vm2383_vm6, %v2414_v2, %v14798_v28  ;;  %v2645_v32 = vsel %vm2383_vm6, %v2643_v56, %v14797_v26  ;;  %v3123_v42 = vrot.slane %v3017_v12, 2  ;;  %v3460_v60 = vmul.f32 %v15339_v58, %v16094_v55 }
 0x42e   : > { %v2279_v43 = vadd.f32 %v2207_v59, %v2061_v7  ;;  %v12886_v30 = vmul.f32 %v15339_v58, %v16100_v62  ;;  %v3348_v2 = vrot.slane %v3248_v38, 2  ;;  %v3682_v7 = vmul.f32 %v15984_v31, %v16095_v3 }
 0x42f   : > { %v12894_v56 = vmul.f32 %v15984_v31, %v15840_v50  ;;  %v3916_v12 = vmul.f32 %v16073_v15, %v16096_v48  ;;  %v12900_v59 = vmul.f32 %v16073_v15, %v16103_v19  ;;  %v2887_v38 = vsel %vm2383_vm6, %v2885_v36, %v14799_v17 }
 0x430   : > { %16160 = vst [vmem:[#allocation117_spill] sm:$0xff] %v12886_v30  ;;  %v2498_v52 = vadd.f32 %v2416_v20, %v2279_v43  ;;  %v4160_v43 = vmul.f32 %v15606_v41, %v16099_v21  ;;  %v12909_v26 = vmul.f32 %v15606_v41, %v16108_v25  ;;  %v3557_v28 = vrot.slane %v3460_v60, 3 }
 0x431   : > { %16161 = vst [vmem:[#allocation163_spill] sm:$0xff] %v12894_v56  ;;  %16162 = vst [vmem:[#allocation77_spill] sm:$0xff] %v12900_v59  ;;  %v4391_v23 = vmul.f32 %v16074_v4, %v16145_v49  ;;  %v16165_v36 = vrot.slane %v12864_v40, 2  ;;  %v16166_v45 = vrot.slane %v12870_v14, 2  ;;  %v3786_v34 = vrot.slane %v3682_v7, 3 }
 0x432   : > { %v2729_v20 = vadd.f32 %v2645_v32, %v2498_v52  ;;  %16163 = vst [vmem:[#allocation135_spill] sm:$0xff] %v12909_v26  ;;  %v12916_v32 = vmul.f32 %v16074_v4, %v16148_v39  ;;  %v14810_v60 = vrot.slane %v12894_v56, 3  ;;  %v4028_v57 = vrot.slane %v3916_v12, 3 }
 0x433   : > { %v3125_v17 = vsel %vm2383_vm6, %v3123_v42, %v16165_v36  ;;  %v3350_v1 = vsel %vm2383_vm6, %v3348_v2, %v16166_v45  ;;  %v14808_v9 = vrot.slane %v12900_v59, 3  ;;  %v4266_v0 = vrot.slane %v4160_v43, 3 }
 0x434   : > { %16164 = vst [vmem:[#allocation129_spill] sm:$0xff] %v12916_v32  ;;  %v2973_v52 = vadd.f32 %v2887_v38, %v2729_v20  ;;  %v14807_v4 = vrot.slane %v12909_v26, 3  ;;  %v4603_v20 = vmul.f32 %v15607_v53, %v16094_v55  ;;  %v16167_v38 = vrot.slane %v12886_v30, 3 }
 0x435   : > { %v4491_v36 = vrot.slane %v4391_v23, 3  ;;  %v14809_v45 = vrot.slane %v12916_v32, 3  ;;  %v12935_v2 = vmul.f32 %v15607_v53, %v16100_v62  ;;  %v3788_v12 = vsel %vm3526_vm7, %v3786_v34, %v14810_v60 }
 0x436   : > { %v3204_v5 = vadd.f32 %v3125_v17, %v2973_v52  ;;  %v3559_v42 = vsel %vm3526_vm7, %v3557_v28, %v16167_v38  ;;  %v4824_v17 = vmul.f32 %v15263_v13, %v16095_v3  ;;  %v4030_v55 = vsel %vm3526_vm7, %v4028_v57, %v14808_v9  ;;  %v16170_v57 = vld [vmem:[#allocation66_spill] sm:$0xff] }
 0x437   : > { %16168 = vst [vmem:[#allocation81_spill] sm:$0xff] %v12935_v2  ;;  %v4268_v23 = vsel %vm3526_vm7, %v4266_v0, %v14807_v4  ;;  %v4699_v43 = vrot.slane %v4603_v20, 4  ;;  %v4493_v3 = vsel %vm3526_vm7, %v4491_v36, %v14809_v45  ;;  %v5058_v34 = vmul.f32 %v14991_v54, %v16096_v48  ;;  %v16171_v0 = vld [vmem:[#allocation92_spill] sm:$0xff]  ;;  %v16174_v45 = vld [vmem:[#allocation90_spill] sm:$0xff] }
 0x438   : > { %v3422_v7 = vadd.f32 %v3350_v1, %v3204_v5  ;;  %v12950_v5 = vmul.f32 %v15263_v13, %v15840_v50  ;;  %v858_v52 = vmul.f32 %v15566_v37, %v16170_v57  ;;  %v920_v20 = vmul.f32 %v15223_v16, %v16171_v0  ;;  %v16176_v1 = vld [vmem:[#allocation105_spill] sm:$0xff] }
 0x439   : > { %v12966_v9 = vmul.f32 %v14991_v54, %v16103_v19  ;;  %v1195_v36 = vmul.f32 %v15682_v27, %v16170_v57  ;;  %v12972_v48 = vmul.f32 %v15682_v27, %v16174_v45  ;;  %v12979_v32 = vmul.f32 %v15732_v8, %v16176_v1 }
 0x43a   : > { %v3641_v28 = vadd.f32 %v3559_v42, %v3422_v7  ;;  %16169 = vst [vmem:[#allocation126_spill] sm:$0xff] %v12950_v5  ;;  %v4928_v42 = vrot.slane %v4824_v17, 4  ;;  %v16172_v7 = vld [vmem:[#allocation88_spill] sm:$0xff]  ;;  %v1417_v17 = vmul.f32 %v15732_v8, %v16171_v0  ;;  %v952_v60 = vadd.f32 %v920_v20, %v858_v52 }
 0x43b   : > { %v988_v4 = vmul.f32 %v15042_v22, %v16172_v7  ;;  %16173 = vst [vmem:[#allocation18_spill] sm:$0xff] %v12966_v9  ;;  %16175 = vst [vmem:[#allocation30_spill] sm:$0xff] %v12972_v48  ;;  %v5302_v26 = vmul.f32 %v14993_v51, %v16099_v21  ;;  %v1306_v59 = vrot.slane %v1195_v36, 1  ;;  %v1651_v30 = vmul.f32 %v15780_v11, %v16172_v7  ;;  %v16179_v52 = vld [vmem:[#allocation28_spill] sm:$0xff]  ;;  %v12997_v21 = vld [vmem:[%s14034_s3 + $0x18] ss:$0 sm:$0xff] }
 0x43c   : > { %v3872_v38 = vadd.f32 %v3788_v12, %v3641_v28  ;;  %16177 = vst [vmem:[#allocation74_spill] sm:$0xff] %v12979_v32  ;;  %v12992_v20 = vmul.f32 %v15780_v11, %v16179_v52  ;;  %16181 = vst [vmem:[#allocation111_spill] sm:$0xff] %v12997_v21  ;;  %v5533_v36 = vmul.f32 %v12997_v21, %v16145_v49  ;;  %v5170_v40 = vrot.slane %v5058_v34, 4 }
 0x43d   : > { %v14827_v47 = vrot.slane %v12966_v9, 4  ;;  %v16185_v61 = vrot.slane %v12972_v48, 1  ;;  %v1777_v24 = vrot.slane %v1651_v30, 1  ;;  %v16186_v28 = vrot.slane %v12950_v5, 4 }
 0x43e   : > { %v4116_v12 = vadd.f32 %v4030_v55, %v3872_v38  ;;  %v12988_v55 = vmul.f32 %v14993_v51, %v16108_v25  ;;  %v1020_v38 = vadd.f32 %v988_v4, %v952_v60  ;;  %16180 = vst [vmem:[#allocation108_spill] sm:$0xff] %v12992_v20  ;;  %v16183_v60 = vrot.slane %v12935_v2, 4  ;;  %v16184_v51 = vld [vmem:[#allocation139_spill] sm:$0xff]  ;;  %v16187_v2 = vld [vmem:[#allocation118_spill] sm:$0xff] }
 0x43f   : > { %v1308_v49 = vsel %vm1240_vm5, %v1306_v59, %v16185_v61 }
 0x440   : > { %v4347_v14 = vadd.f32 %v4268_v23, %v4116_v12  ;;  %16178 = vst [vmem:[#allocation39_spill] sm:$0xff] %v12988_v55  ;;  %v13003_v23 = vmul.f32 %v12997_v21, %v16148_v39  ;;  %v1535_v12 = vrot.slane %v1417_v17, 1  ;;  %v4701_v56 = vsel %vm368_vm0, %v4699_v43, %v16183_v60 }
 0x441   : > { %v1086_v41 = vadd.f32 %v16184_v51, %v1020_v38  ;;  %v14832_v21 = vrot.slane %v12992_v20, 1  ;;  %v14826_v34 = vrot.slane %v12988_v55, 4  ;;  %v5633_v51 = vrot.slane %v5533_v36, 4 }
 0x442   : > { %16182 = vst [vmem:[#allocation2_spill] sm:$0xff] %v13003_v23  ;;  %v4565_v4 = vadd.f32 %v4493_v3, %v4347_v14  ;;  %v4930_v14 = vsel %vm368_vm0, %v4928_v42, %v16186_v28  ;;  %v5408_v3 = vrot.slane %v5302_v26, 4  ;;  %v14828_v38 = vrot.slane %v13003_v23, 4 }
 0x443   : > { %v1150_v43 = vadd.f32 %v16187_v2, %v1086_v41  ;;  %v16188_v60 = vrot.slane %v12979_v32, 1  ;;  %v13028_v42 = vmul.f32 %v16110_v10, %v16174_v45  ;;  %v5172_v41 = vsel %vm368_vm0, %v5170_v40, %v14827_v47 }
 0x444   : > { %v4783_v17 = vadd.f32 %v4701_v56, %v4565_v4  ;;  %v2338_v56 = vmul.f32 %v16110_v10, %v16170_v57  ;;  %v1779_v26 = vsel %vm1240_vm5, %v1777_v24, %v14832_v21  ;;  %v2560_v2 = vmul.f32 %v15247_v18, %v16171_v0 }
 0x445   : > { %v1537_v61 = vsel %vm1240_vm5, %v1535_v12, %v16188_v60  ;;  %v1369_v59 = vadd.f32 %v1308_v49, %v1150_v43  ;;  %16189 = vst [vmem:[#allocation120_spill] sm:$0xff] %v13028_v42  ;;  %v13040_v28 = vmul.f32 %v15247_v18, %v16176_v1  ;;  %v2794_v4 = vmul.f32 %v15248_v33, %v16172_v7 }
 0x446   : > { %v5014_v30 = vadd.f32 %v4930_v14, %v4783_v17  ;;  %v13046_v49 = vmul.f32 %v15248_v33, %v16179_v52  ;;  %v5410_v24 = vsel %vm368_vm0, %v5408_v3, %v14826_v34  ;;  %v5635_v40 = vsel %vm368_vm0, %v5633_v51, %v14828_v38  ;;  %v16194_v34 = vld [vmem:[#allocation146_spill] sm:$0xff] }
 0x447   : > { %16190 = vst [vmem:[#allocation160_spill] sm:$0xff] %v13040_v28  ;;  %v1600_v12 = vadd.f32 %v1537_v61, %v1369_v59  ;;  %v2449_v43 = vrot.slane %v2338_v56, 2  ;;  %v14831_v60 = vrot.slane %v13028_v42, 2  ;;  %v2678_v61 = vrot.slane %v2560_v2, 2  ;;  %v16195_v2 = vld [vmem:[#allocation143_spill] sm:$0xff] }
 0x448   : > { %v5258_v36 = vadd.f32 %v5172_v41, %v5014_v30  ;;  %16191 = vst [vmem:[#allocation65_spill] sm:$0xff] %v13046_v49  ;;  %v14830_v30 = vrot.slane %v13040_v28, 2  ;;  %v3481_v59 = vmul.f32 %v15339_v58, %v16170_v57  ;;  %v13060_v41 = vmul.f32 %v15339_v58, %v16174_v45 }
 0x449   : > { %v1844_v14 = vadd.f32 %v1779_v26, %v1600_v12  ;;  %v2920_v51 = vrot.slane %v2794_v4, 2  ;;  %v14829_v26 = vrot.slane %v13046_v49, 2  ;;  %v3703_v56 = vmul.f32 %v15984_v31, %v16171_v0 }
 0x44a   : > { %v5489_v17 = vadd.f32 %v5410_v24, %v5258_v36  ;;  %16192 = vst [vmem:[#allocation123_spill] sm:$0xff] %v13060_v41  ;;  %v13075_v12 = vmul.f32 %v15984_v31, %v16176_v1  ;;  %v2680_v4 = vsel %vm2383_vm6, %v2678_v61, %v14830_v30  ;;  %v3592_v24 = vrot.slane %v3481_v59, 3 }
 0x44b   : > { %v2075_v47 = vadd.f32 %v16194_v34, %v1844_v14  ;;  %v2451_v34 = vsel %vm2383_vm6, %v2449_v43, %v14831_v60  ;;  %v843_v14 = vmul.f32 %v15566_v37, %v16097_v35  ;;  %v3821_v38 = vrot.slane %v3703_v56, 3  ;;  %v16199_v60 = vld [vmem:[#allocation101_spill] sm:$0xff] }
 0x44c   : > { %v13062_v3 = vadd.f32 %v5635_v40, %v5489_v17  ;;  %16196 = vst [vmem:[#allocation91_spill] sm:$0xff] %v13075_v12  ;;  %v14835_v40 = vrot.slane %v13060_v41, 3  ;;  %v3937_v43 = vmul.f32 %v16073_v15, %v16172_v7  ;;  %v13095_v61 = vmul.f32 %v16073_v15, %v16179_v52  ;;  %v16201_v41 = vld [vmem:[#allocation151_spill] sm:$0xff] }
 0x44d   : > { %v2293_v36 = vadd.f32 %v16195_v2, %v2075_v47  ;;  %v2922_v47 = vsel %vm2383_vm6, %v2920_v51, %v14829_v26  ;;  %v905_v2 = vmul.f32 %v15223_v16, %v16100_v62  ;;  %v973_v59 = vmul.f32 %v15042_v22, %v15840_v50  ;;  %v16198_v26 = vld [vmem:[#allocation78_spill] sm:$0xff] }
 0x44e   : > { %16193 = vst [vmem:[#allocation133_spill] sm:$0xff] %v13062_v3  ;;  %5787 = vrot.lane.b32.xlu0 %v13062_v3, %s7431_s7  ;;  %5980 = vrot.lane.b32.xlu1 %v13062_v3, %s7432_s8  ;;  %16197 = vst [vmem:[#allocation86_spill] sm:$0xff] %v13095_v61  ;;  %v1173_v35 = vmul.f32 %v15682_v27, %v16198_v26  ;;  %v3594_v56 = vsel %vm3526_vm7, %v3592_v24, %v14835_v40  ;;  %v16200_v3 = vld [vmem:[#allocation93_spill] sm:$0xff]  ;;  %v4063_v51 = vrot.slane %v3937_v43, 3  ;;  %v16203_v43 = vld [vmem:[#allocation55_spill] sm:$0xff] }
 0x44f   : > { %v2512_v17 = vadd.f32 %v2451_v34, %v2293_v36  ;;  %v937_v34 = vadd.f32 %v905_v2, %v843_v14  ;;  %v4624_v30 = vmul.f32 %v15607_v53, %v16170_v57  ;;  %v1395_v21 = vmul.f32 %v15732_v8, %v16199_v60 }
 0x450   : > { %v1629_v23 = vmul.f32 %v15780_v11, %v16200_v3  ;;  %v1041_v2 = vmul.f32 %v15117_v29, %v16103_v19  ;;  %v1269_v40 = vrot.slane %v1173_v35, 1  ;;  %v4845_v49 = vmul.f32 %v15263_v13, %v16171_v0  ;;  %v16204_v35 = vld [vmem:[#allocation147_spill] sm:$0xff] }
 0x451   : > { %v2743_v36 = vadd.f32 %v2680_v4, %v2512_v17  ;;  %v13113_v17 = vmul.f32 %v15607_v53, %v16174_v45  ;;  %v1005_v14 = vadd.f32 %v973_v59, %v937_v34  ;;  %v1498_v57 = vrot.slane %v1395_v21, 1 }
 0x452   : > { %v4734_v34 = vrot.slane %v4624_v30, 4  ;;  %v1740_v28 = vrot.slane %v1629_v23, 1  ;;  %v1873_v24 = vmul.f32 %v15782_v44, %v16203_v43  ;;  %v13132_v0 = vmul.f32 %v15263_v13, %v16176_v1  ;;  %v16208_v30 = vld [vmem:[#allocation137_spill] sm:$0xff] }
 0x453   : > { %v2987_v4 = vadd.f32 %v2922_v47, %v2743_v36  ;;  %v1071_v9 = vadd.f32 %v1041_v2, %v1005_v14  ;;  %v1107_v47 = vmul.f32 %v16043_v63, %v16108_v25  ;;  %v16202_v36 = vrot.slane %v13075_v12, 3  ;;  %v16206_v12 = vld [vmem:[#allocation9_spill] sm:$0xff] }
 0x454   : > { %v16205_v14 = vrot.slane %v13095_v61, 3  ;;  %v4963_v5 = vrot.slane %v4845_v49, 4  ;;  %v16211_v61 = vld [vmem:[#allocation130_spill] sm:$0xff] }
 0x455   : > { %v3218_v55 = vadd.f32 %v16201_v41, %v2987_v4  ;;  %v3823_v59 = vsel %vm3526_vm7, %v3821_v38, %v16202_v36  ;;  %v1135_v4 = vadd.f32 %v1107_v47, %v1071_v9  ;;  %v16207_v38 = vrot.slane %v16206_v12, 1 }
 0x456   : > { %v4065_v2 = vsel %vm3526_vm7, %v4063_v51, %v16205_v14  ;;  %v16209_v36 = vrot.slane %v16208_v30, 1  ;;  %v5079_v9 = vmul.f32 %v14991_v54, %v16172_v7  ;;  %v16212_v20 = vrot.slane %v16211_v61, 1  ;;  %v16216_v61 = vld [vmem:[#allocation161_spill] sm:$0xff] }
 0x457   : > { %v3436_v21 = vadd.f32 %v16204_v35, %v3218_v55  ;;  %v1270_v23 = vsel %vm1240_vm5, %v16207_v38, %v1269_v40  ;;  %v16210_v55 = vld [vmem:[#allocation47_spill] sm:$0xff]  ;;  %v1978_v12 = vrot.slane %v1873_v24, 1  ;;  %v2316_v40 = vmul.f32 %v16110_v10, %v16198_v26 }
 0x458   : > { %v1499_v42 = vsel %vm1240_vm5, %v16209_v36, %v1498_v57  ;;  %v2104_v35 = vmul.f32 %v16107_v6, %v16210_v55  ;;  %v1354_v47 = vadd.f32 %v1270_v23, %v1135_v4  ;;  %v1741_v51 = vsel %vm1240_vm5, %v16212_v20, %v1740_v28  ;;  %v16213_v28 = vld [vmem:[#allocation23_spill] sm:$0xff]  ;;  %v16214_v23 = vld [vmem:[#allocation138_spill] sm:$0xff] }
 0x459   : > { %v3655_v41 = vadd.f32 %v3594_v56, %v3436_v21  ;;  %v2538_v57 = vmul.f32 %v15247_v18, %v16199_v60  ;;  %v13156_v56 = vmul.f32 %v14991_v54, %v16179_v52  ;;  %v2772_v7 = vmul.f32 %v15248_v33, %v16200_v3 }
 0x45a   : > { %v1585_v49 = vadd.f32 %v1499_v42, %v1354_v47  ;;  %v2203_v21 = vrot.slane %v2104_v35, 1  ;;  %v3016_v20 = vmul.f32 %v7558_v46, %v16203_v43  ;;  %v3247_v24 = vmul.f32 %v16213_v28, %v16210_v55 }
 0x45b   : > { %v3886_v14 = vadd.f32 %v3823_v59, %v3655_v41  ;;  %v5205_v38 = vrot.slane %v5079_v9, 4  ;;  %v3459_v41 = vmul.f32 %v15339_v58, %v16198_v26  ;;  %v16215_v42 = vrot.slane %v16214_v23, 1  ;;  %v16217_v9 = vld [vmem:[#allocation56_spill] sm:$0xff]  ;;  %v16219_v23 = vld [vmem:[#allocation154_spill] sm:$0xff] }
 0x45c   : > { %v1829_v59 = vadd.f32 %v1741_v51, %v1585_v49  ;;  %v2412_v36 = vrot.slane %v2316_v40, 2  ;;  %v2641_v47 = vrot.slane %v2538_v57, 2  ;;  %v3681_v35 = vmul.f32 %v15984_v31, %v16199_v60 }
 0x45d   : > { %v4130_v4 = vadd.f32 %v4065_v2, %v3886_v14  ;;  %v1979_v30 = vsel %vm1240_vm5, %v16215_v42, %v1978_v12  ;;  %v5206_v48 = vrot.slane %v13156_v56, 4  ;;  %v2883_v2 = vrot.slane %v2772_v7, 2 }
 0x45e   : > { %v2060_v52 = vadd.f32 %v1979_v30, %v1829_v59  ;;  %v16218_v51 = vrot.slane %v16217_v9, 1  ;;  %v3121_v49 = vrot.slane %v3016_v20, 2  ;;  %v3346_v1 = vrot.slane %v3247_v24, 2  ;;  %v16222_v59 = vld [vmem:[#allocation140_spill] sm:$0xff]  ;;  %v16224_v9 = vld [vmem:[#allocation75_spill] sm:$0xff] }
 0x45f   : > { %v4361_v32 = vadd.f32 %v16216_v61, %v4130_v4  ;;  %v16220_v12 = vrot.slane %v13113_v17, 4  ;;  %v3555_v42 = vrot.slane %v3459_v41, 3  ;;  %v16221_v61 = vrot.slane %v13132_v0, 4  ;;  %v16226_v41 = vld [vmem:[#allocation16_spill] sm:$0xff] }
 0x460   : > { %v2204_v14 = vsel %vm1240_vm5, %v16218_v51, %v2203_v21  ;;  %v16223_v7 = vrot.slane %v16222_v59, 2  ;;  %v16225_v21 = vrot.slane %v16224_v9, 2  ;;  %v3784_v24 = vrot.slane %v3681_v35, 3 }
 0x461   : > { %v4579_v45 = vadd.f32 %v16219_v23, %v4361_v32  ;;  %v4736_v40 = vsel %vm368_vm0, %v4734_v34, %v16220_v12  ;;  %v2278_v57 = vadd.f32 %v2204_v14, %v2060_v52  ;;  %v4965_v4 = vsel %vm368_vm0, %v4963_v5, %v16221_v61  ;;  %v16228_v5 = vld [vmem:[#allocation99_spill] sm:$0xff] }
 0x462   : > { %v2413_v30 = vsel %vm2383_vm6, %v16223_v7, %v2412_v36  ;;  %v2642_v20 = vsel %vm2383_vm6, %v16225_v21, %v2641_v47  ;;  %v5207_v34 = vsel %vm368_vm0, %v5205_v38, %v5206_v48  ;;  %v16227_v51 = vrot.slane %v16226_v41, 2  ;;  %v16230_v36 = vld [vmem:[#allocation83_spill] sm:$0xff] }
 0x463   : > { %v4797_v32 = vadd.f32 %v4736_v40, %v4579_v45  ;;  %v2497_v52 = vadd.f32 %v2413_v30, %v2278_v57  ;;  %v16229_v23 = vrot.slane %v16228_v5, 2  ;;  %v16231_v61 = vrot.slane %v16230_v36, 2  ;;  %v16232_v40 = vld [vmem:[#allocation107_spill] sm:$0xff] }
 0x464   : > { %v2884_v14 = vsel %vm2383_vm6, %v16227_v51, %v2883_v2  ;;  %v845_v45 = vmul.f32 %v15566_v37, %v16100_v62  ;;  %v907_v47 = vmul.f32 %v15223_v16, %v15840_v50  ;;  %v16233_v57 = vrot.slane %v16232_v40, 3 }
 0x465   : > { %v3122_v12 = vsel %vm2383_vm6, %v16229_v23, %v3121_v49  ;;  %v3347_v59 = vsel %vm2383_vm6, %v16231_v61, %v3346_v1  ;;  %v5028_v38 = vadd.f32 %v4965_v4, %v4797_v32  ;;  %v2728_v35 = vadd.f32 %v2642_v20, %v2497_v52  ;;  %v16234_v49 = vld [vmem:[#allocation142_spill] sm:$0xff]  ;;  %v16236_v1 = vld [vmem:[#allocation19_spill] sm:$0xff]  ;;  %v16237_v32 = vld [vmem:[#allocation32_spill] sm:$0xff] }
 0x466   : > { %v3556_v2 = vsel %vm3526_vm7, %v16233_v57, %v3555_v42  ;;  %v3915_v7 = vmul.f32 %v16073_v15, %v16200_v3  ;;  %v16235_v30 = vrot.slane %v16234_v49, 3  ;;  %v4159_v21 = vmul.f32 %v16236_v1, %v16203_v43  ;;  %v16238_v23 = vld [vmem:[#allocation53_spill] sm:$0xff] }
 0x467   : > { %v939_v62 = vadd.f32 %v907_v47, %v845_v45  ;;  %v975_v50 = vmul.f32 %v15042_v22, %v16103_v19  ;;  %v5272_v4 = vadd.f32 %v5207_v34, %v5028_v38  ;;  %v2972_v20 = vadd.f32 %v2884_v14, %v2728_v35  ;;  %v16239_v38 = vld [vmem:[#allocation51_spill] sm:$0xff] }
 0x468   : > { %v3785_v9 = vsel %vm3526_vm7, %v16235_v30, %v3784_v24  ;;  %v4390_v52 = vmul.f32 %v16237_v32, %v16210_v55  ;;  %v1176_v42 = vmul.f32 %v15682_v27, %v16199_v60  ;;  %v4602_v41 = vmul.f32 %v15607_v53, %v16198_v26 }
 0x469   : > { %v1007_v51 = vadd.f32 %v975_v50, %v939_v62  ;;  %v1043_v24 = vmul.f32 %v15117_v29, %v16108_v25  ;;  %v1398_v5 = vmul.f32 %v15732_v8, %v16200_v3  ;;  %v5503_v19 = vadd.f32 %v16238_v23, %v5272_v4  ;;  %v16240_v25 = vld [vmem:[#allocation52_spill] sm:$0xff] }
 0x46a   : > { %v3203_v34 = vadd.f32 %v3122_v12, %v2972_v20  ;;  %v1274_v14 = vrot.slane %v1176_v42, 1  ;;  %v1632_v36 = vmul.f32 %v15780_v11, %v16203_v43  ;;  %v4026_v61 = vrot.slane %v3915_v7, 3  ;;  %v16242_v62 = vld [vmem:[#allocation64_spill] sm:$0xff] }
 0x46b   : > { %v1073_v45 = vadd.f32 %v1043_v24, %v1007_v51  ;;  %v1109_v47 = vmul.f32 %v16043_v63, %v16148_v39  ;;  %v1503_v26 = vrot.slane %v1398_v5, 1  ;;  %v13234_v35 = vadd.f32 %v16239_v38, %v5503_v19  ;;  %v16245_v20 = vld [vmem:[#allocation20_spill] sm:$0xff] }
 0x46c   : > { %v3421_v29 = vadd.f32 %v3347_v59, %v3203_v34  ;;  %v16241_v40 = vrot.slane %v16240_v25, 1  ;;  %v1876_v12 = vmul.f32 %v15782_v44, %v16210_v55  ;;  %v4264_v49 = vrot.slane %v4159_v21, 3  ;;  %v16243_v59 = vld [vmem:[#allocation152_spill] sm:$0xff] }
 0x46d   : > { %v4823_v7 = vmul.f32 %v15263_v13, %v16199_v60  ;;  %v1137_v30 = vadd.f32 %v1109_v47, %v1073_v45  ;;  %v2107_v63 = vmul.f32 %v16107_v6, %v16242_v62  ;;  %5815 = vrot.lane.b32.xlu0 %v13234_v35, %s7431_s7  ;;  %6008 = vrot.lane.b32.xlu1 %v13234_v35, %s7432_s8  ;;  %v16244_v50 = vrot.slane %v16243_v59, 1 }
 0x46e   : > { %v1275_v57 = vsel %vm1240_vm5, %v16241_v40, %v1274_v14  ;;  %v3640_v39 = vadd.f32 %v3556_v2, %v3421_v29  ;;  %v1745_v44 = vrot.slane %v1632_v36, 1  ;;  %v2319_v21 = vmul.f32 %v16110_v10, %v16199_v60  ;;  %v16247_v14 = vld [vmem:[#allocation12_spill] sm:$0xff] }
 0x46f   : > { %v1504_v4 = vsel %vm1240_vm5, %v16244_v50, %v1503_v26  ;;  %v16246_v42 = vrot.slane %v16245_v20, 3  ;;  %v4489_v6 = vrot.slane %v4390_v52, 3  ;;  %v4697_v24 = vrot.slane %v4602_v41, 4  ;;  %v16249_v26 = vld [vmem:[#allocation29_spill] sm:$0xff]  ;;  %v16250_v52 = vld [vmem:[#allocation155_spill] sm:$0xff]  ;;  %v16251_v41 = vld [vmem:[#allocation4_spill] sm:$0xff] }
 0x470   : > { %v1356_v5 = vadd.f32 %v1275_v57, %v1137_v30  ;;  %v3871_v23 = vadd.f32 %v3785_v9, %v3640_v39  ;;  %v5057_v19 = vmul.f32 %v14991_v54, %v16200_v3  ;;  %v1983_v2 = vrot.slane %v1876_v12, 1  ;;  %v16253_v12 = vld [vmem:[#allocation13_spill] sm:$0xff]  ;;  %v16256_v20 = vld [vmem:[#allocation6_spill] sm:$0xff] }
 0x471   : > { %v4027_v51 = vsel %vm3526_vm7, %v16246_v42, %v4026_v61  ;;  %v2541_v34 = vmul.f32 %v15247_v18, %v16200_v3  ;;  %v16248_v36 = vrot.slane %v16247_v14, 3  ;;  %v4926_v47 = vrot.slane %v4823_v7, 4  ;;  %5986 = vrot.lane.b32.xlu0 %v16250_v52, %s7432_s8 }
 0x472   : > { %v5301_v38 = vmul.f32 %v16249_v26, %v16203_v43  ;;  %v1587_v61 = vadd.f32 %v1504_v4, %v1356_v5  ;;  %v4115_v9 = vadd.f32 %v4027_v51, %v3871_v23  ;;  %v16252_v29 = vrot.slane %v16251_v41, 1 }
 0x473   : > { %v4265_v45 = vsel %vm3526_vm7, %v16248_v36, %v4264_v49  ;;  %v2208_v40 = vrot.slane %v2107_v63, 1  ;;  %v2417_v57 = vrot.slane %v2319_v21, 2  ;;  %v16254_v30 = vrot.slane %v16253_v12, 3  ;;  %v16255_v49 = vld [vmem:[#allocation111_spill] sm:$0xff] }
 0x474   : > { %v1746_v25 = vsel %vm1240_vm5, %v16252_v29, %v1745_v44  ;;  %v5532_v7 = vmul.f32 %v16255_v49, %v16210_v55  ;;  %v2775_v50 = vmul.f32 %v15248_v33, %v16203_v43  ;;  %v4346_v4 = vadd.f32 %v4265_v45, %v4115_v9  ;;  %v16258_v44 = vld [vmem:[#allocation144_spill] sm:$0xff]  ;;  %v16260_v45 = vld [vmem:[#allocation158_spill] sm:$0xff] }
 0x475   : > { %v4490_v39 = vsel %vm3526_vm7, %v16254_v30, %v4489_v6  ;;  %v1831_v59 = vadd.f32 %v1746_v25, %v1587_v61  ;;  %v16257_v42 = vrot.slane %v16256_v20, 1  ;;  %v2646_v5 = vrot.slane %v2541_v34, 2 }
 0x476   : > { %v3019_v63 = vmul.f32 %v7558_v46, %v16210_v55  ;;  %v16259_v21 = vrot.slane %v16258_v44, 4  ;;  %v5168_v23 = vrot.slane %v5057_v19, 4  ;;  %v3250_v36 = vmul.f32 %v16213_v28, %v16242_v62 }
 0x477   : > { %v1984_v51 = vsel %vm1240_vm5, %v16257_v42, %v1983_v2  ;;  %v4564_v61 = vadd.f32 %v4490_v39, %v4346_v4  ;;  %v5406_v41 = vrot.slane %v5301_v38, 4  ;;  %v16261_v9 = vrot.slane %v16260_v45, 1  ;;  %v16262_v2 = vld [vmem:[#allocation10_spill] sm:$0xff]  ;;  %v16266_v39 = vld [vmem:[#allocation24_spill] sm:$0xff] }
 0x478   : > { %v4698_v6 = vsel %vm368_vm0, %v16259_v21, %v4697_v24  ;;  %v2062_v14 = vadd.f32 %v1984_v51, %v1831_v59  ;;  %v16263_v34 = vrot.slane %v16262_v2, 2  ;;  %v5631_v46 = vrot.slane %v5532_v7, 4  ;;  %v16264_v59 = vld [vmem:[#allocation62_spill] sm:$0xff]  ;;  %v16270_v21 = vld [vmem:[#allocation131_spill] sm:$0xff] }
 0x479   : > { %v2209_v29 = vsel %vm1240_vm5, %v16261_v9, %v2208_v40  ;;  %v2888_v30 = vrot.slane %v2775_v50, 2  ;;  %v3462_v24 = vmul.f32 %v15339_v58, %v16199_v60  ;;  %v4782_v19 = vadd.f32 %v4698_v6, %v4564_v61 }
 0x47a   : > { %v2418_v25 = vsel %vm2383_vm6, %v16263_v34, %v2417_v57  ;;  %v2280_v12 = vadd.f32 %v2209_v29, %v2062_v14  ;;  %v16265_v20 = vrot.slane %v16264_v59, 2  ;;  %v3126_v38 = vrot.slane %v3019_v63, 2  ;;  %v16268_v57 = vld [vmem:[#allocation43_spill] sm:$0xff]  ;;  %v16279_v59 = vld [vmem:[#allocation105_spill] sm:$0xff] }
 0x47b   : > { %v16267_v4 = vrot.slane %v16266_v39, 4  ;;  %v3351_v51 = vrot.slane %v3250_v36, 2  ;;  %v16269_v7 = vrot.slane %v16268_v57, 4  ;;  %v16271_v14 = vrot.slane %v16270_v21, 4  ;;  %v16283_v57 = vld [vmem:[#allocation79_spill] sm:$0xff] }
 0x47c   : > { %v2647_v28 = vsel %vm2383_vm6, %v16265_v20, %v2646_v5  ;;  %v2499_v42 = vadd.f32 %v2418_v25, %v2280_v12  ;;  %v3684_v61 = vmul.f32 %v15984_v31, %v16200_v3  ;;  %v16272_v5 = vld [vmem:[#allocation150_spill] sm:$0xff]  ;;  %v3560_v2 = vrot.slane %v3462_v24, 3  ;;  %v16276_v25 = vld [vmem:[#allocation100_spill] sm:$0xff] }
 0x47d   : > { %v4927_v40 = vsel %vm368_vm0, %v16267_v4, %v4926_v47  ;;  %v5169_v50 = vsel %vm368_vm0, %v16269_v7, %v5168_v23  ;;  %v5407_v6 = vsel %vm368_vm0, %v16271_v14, %v5406_v41  ;;  %v16273_v63 = vrot.slane %v16272_v5, 4  ;;  %v16274_v47 = vld [vmem:[#allocation159_spill] sm:$0xff]  ;;  %v16280_v4 = vld [vmem:[#allocation162_spill] sm:$0xff]  ;;  %v16282_v24 = vld [vmem:[#allocation28_spill] sm:$0xff] }
 0x47e   : > { %v5013_v44 = vadd.f32 %v4927_v40, %v4782_v19  ;;  %v2730_v9 = vadd.f32 %v2647_v28, %v2499_v42  ;;  %v16275_v29 = vrot.slane %v16274_v47, 2  ;;  %v16277_v23 = vrot.slane %v16276_v25, 2  ;;  %v16278_v19 = vld [vmem:[#allocation90_spill] sm:$0xff]  ;;  %v13353_v25 = vpop.permute.xlu1 %5759 }
 0x47f   : > { %v5632_v45 = vsel %vm368_vm0, %v16273_v63, %v5631_v46  ;;  %v859_v41 = vmul.f32 %v15566_v37, %v16278_v19  ;;  %v921_v20 = vmul.f32 %v15223_v16, %v16279_v59  ;;  %v16281_v46 = vrot.slane %v16280_v4, 2  ;;  %v16286_v14 = vld [vmem:[#allocation102_spill] sm:$0xff] }
 0x480   : > { %v2889_v36 = vsel %vm2383_vm6, %v16275_v29, %v2888_v30  ;;  %v5257_v34 = vadd.f32 %v5169_v50, %v5013_v44  ;;  %v3127_v12 = vsel %vm2383_vm6, %v16277_v23, %v3126_v38  ;;  %v3918_v30 = vmul.f32 %v16073_v15, %v16203_v43  ;;  %v16284_v50 = vld [vmem:[#allocation117_spill] sm:$0xff]  ;;  %v16288_v29 = vld [vmem:[#allocation163_spill] sm:$0xff]  ;;  %v16291_v23 = vld [vmem:[#allocation30_spill] sm:$0xff] }
 0x481   : > { %v2974_v39 = vadd.f32 %v2889_v36, %v2730_v9  ;;  %v3352_v28 = vsel %vm2383_vm6, %v16281_v46, %v3351_v51  ;;  %v989_v40 = vmul.f32 %v15042_v22, %v16282_v24  ;;  %v3789_v44 = vrot.slane %v3684_v61, 3  ;;  %v16287_v61 = vld [vmem:[#allocation98_spill] sm:$0xff]  ;;  %v16296_v24 = vld [vmem:[#allocation77_spill] sm:$0xff] }
 0x482   : > { %v5488_v42 = vadd.f32 %v5407_v6, %v5257_v34  ;;  %v953_v38 = vadd.f32 %v921_v20, %v859_v41  ;;  %v1197_v37 = vmul.f32 %v15682_v27, %v16283_v57  ;;  %v16285_v16 = vrot.slane %v16284_v50, 3  ;;  %v16298_v50 = vld [vmem:[#allocation108_spill] sm:$0xff] }
 0x483   : > { %v3205_v7 = vadd.f32 %v3127_v12, %v2974_v39  ;;  %v4162_v51 = vmul.f32 %v16236_v1, %v16210_v55  ;;  %v1419_v5 = vmul.f32 %v15732_v8, %v16286_v14  ;;  %v1653_v9 = vmul.f32 %v15780_v11, %v16287_v61  ;;  %v16293_v39 = vld [vmem:[#allocation132_spill] sm:$0xff] }
 0x484   : > { %v3561_v21 = vsel %vm3526_vm7, %v16285_v16, %v3560_v2  ;;  %v13339_v63 = vadd.f32 %v5632_v45, %v5488_v42  ;;  %v1021_v22 = vadd.f32 %v989_v40, %v953_v38  ;;  %v1309_v6 = vrot.slane %v1197_v37, 1  ;;  %v16290_v2 = vld [vmem:[#allocation125_spill] sm:$0xff] }
 0x485   : > { %v3423_v47 = vadd.f32 %v3352_v28, %v3205_v7  ;;  %v1538_v27 = vrot.slane %v1419_v5, 1  ;;  %v16289_v1 = vrot.slane %v16288_v29, 3  ;;  %v4031_v8 = vrot.slane %v3918_v30, 3  ;;  %v16294_v28 = vld [vmem:[#allocation74_spill] sm:$0xff]  ;;  %v16300_v5 = vld [vmem:[#allocation135_spill] sm:$0xff]  ;;  %v13383_v29 = vpop.permute.xlu1 %5952 }
 0x486   : > { %5785 = vrot.lane.b32.xlu1 %v13339_v63, %s7431_s7  ;;  %5978 = vrot.lane.b32.xlu0 %v13339_v63, %s7432_s8  ;;  %v4393_v45 = vmul.f32 %v16237_v32, %v16242_v62  ;;  %v1087_v34 = vadd.f32 %v16290_v2, %v1021_v22  ;;  %v16292_v12 = vrot.slane %v16291_v23, 1  ;;  %v1780_v41 = vrot.slane %v1653_v9, 1 }
 0x487   : > { %v3790_v36 = vsel %vm3526_vm7, %v16289_v1, %v3789_v44  ;;  %v3642_v11 = vadd.f32 %v3561_v21, %v3423_v47  ;;  %v4269_v59 = vrot.slane %v4162_v51, 3  ;;  %v4605_v20 = vmul.f32 %v15607_v53, %v16199_v60 }
 0x488   : > { %v1310_v19 = vsel %vm1240_vm5, %v16292_v12, %v1309_v6  ;;  %v1151_v4 = vadd.f32 %v16293_v39, %v1087_v34  ;;  %v16295_v30 = vrot.slane %v16294_v28, 1  ;;  %v16297_v40 = vrot.slane %v16296_v24, 3  ;;  %v16304_v12 = vld [vmem:[#allocation81_spill] sm:$0xff]  ;;  %v16307_v28 = vld [vmem:[#allocation126_spill] sm:$0xff] }
 0x489   : > { %v3873_v46 = vadd.f32 %v3790_v36, %v3642_v11  ;;  %v4494_v44 = vrot.slane %v4393_v45, 3  ;;  %v4826_v38 = vmul.f32 %v15263_v13, %v16200_v3  ;;  %v16299_v16 = vrot.slane %v16298_v50, 1  ;;  %v16302_v36 = vld [vmem:[#allocation129_spill] sm:$0xff] }
 0x48a   : > { %v1539_v32 = vsel %vm1240_vm5, %v16295_v30, %v1538_v27  ;;  %v4032_v42 = vsel %vm3526_vm7, %v16297_v40, %v4031_v8  ;;  %v1370_v37 = vadd.f32 %v1310_v19, %v1151_v4  ;;  %v2340_v21 = vmul.f32 %v16110_v10, %v16283_v57  ;;  %v13381_v27 = vpop.permute.xlu0 %5954 }
 0x48b   : > { %v4117_v7 = vadd.f32 %v4032_v42, %v3873_v46  ;;  %v1781_v60 = vsel %vm1240_vm5, %v16299_v16, %v1780_v41  ;;  %v2562_v51 = vmul.f32 %v15247_v18, %v16286_v14  ;;  %v16301_v22 = vrot.slane %v16300_v5, 3  ;;  %v16314_v16 = vld [vmem:[#allocation18_spill] sm:$0xff] }
 0x48c   : > { %v4702_v9 = vrot.slane %v4605_v20, 4  ;;  %v5060_v3 = vmul.f32 %v14991_v54, %v16203_v43  ;;  %v1601_v47 = vadd.f32 %v1539_v32, %v1370_v37  ;;  %v2796_v10 = vmul.f32 %v15248_v33, %v16287_v61  ;;  %v16306_v20 = vld [vmem:[#allocation124_spill] sm:$0xff]  ;;  %v16309_v32 = vld [vmem:[#allocation54_spill] sm:$0xff] }
 0x48d   : > { %v4270_v6 = vsel %vm3526_vm7, %v16301_v22, %v4269_v59  ;;  %v16303_v8 = vrot.slane %v16302_v36, 3  ;;  %v4931_v45 = vrot.slane %v4826_v38, 4  ;;  %v5304_v2 = vmul.f32 %v16249_v26, %v16210_v55  ;;  %v16310_v38 = vld [vmem:[#allocation120_spill] sm:$0xff] }
 0x48e   : > { %v4348_v1 = vadd.f32 %v4270_v6, %v4117_v7  ;;  %v1845_v34 = vadd.f32 %v1781_v60, %v1601_v47  ;;  %v2452_v43 = vrot.slane %v2340_v21, 2  ;;  %v2681_v23 = vrot.slane %v2562_v51, 2  ;;  %v13402_v40 = vpop.permute.xlu0 %5755  ;;  %v16316_v6 = vld [vmem:[#allocation65_spill] sm:$0xff] }
 0x48f   : > { %v4495_v18 = vsel %vm3526_vm7, %v16303_v8, %v4494_v44  ;;  %v16305_v19 = vrot.slane %v16304_v12, 4  ;;  %v5173_v59 = vrot.slane %v5060_v3, 4  ;;  %v5535_v33 = vmul.f32 %v16255_v49, %v16242_v62  ;;  %v13404_v44 = vpop.permute.xlu1 %5761  ;;  %v16312_v49 = vld [vmem:[#allocation160_spill] sm:$0xff] }
 0x490   : > { %v4566_v11 = vadd.f32 %v4495_v18, %v4348_v1  ;;  %v2076_v39 = vadd.f32 %v16306_v20, %v1845_v34  ;;  %v2923_v46 = vrot.slane %v2796_v10, 2  ;;  %v16308_v30 = vrot.slane %v16307_v28, 4  ;;  %v16318_v10 = vld [vmem:[#allocation39_spill] sm:$0xff]  ;;  %v16320_v34 = vld [vmem:[#allocation2_spill] sm:$0xff]  ;;  %v16323_v20 = vld [vmem:[#allocation156_spill] sm:$0xff] }
 0x491   : > { %v4703_v41 = vsel %vm368_vm0, %v16305_v19, %v4702_v9  ;;  %v5411_v26 = vrot.slane %v5304_v2, 4  ;;  %v16311_v37 = vrot.slane %v16310_v38, 2  ;;  %v16313_v7 = vrot.slane %v16312_v49, 2 }
 0x492   : > { %v4784_v4 = vadd.f32 %v4703_v41, %v4566_v11  ;;  %v4932_v55 = vsel %vm368_vm0, %v16308_v30, %v4931_v45  ;;  %v2294_v24 = vadd.f32 %v16309_v32, %v2076_v39  ;;  %v16315_v60 = vrot.slane %v16314_v16, 4  ;;  %v16326_v30 = vld [vmem:[#allocation91_spill] sm:$0xff] }
 0x493   : > { %v2453_v62 = vsel %vm2383_vm6, %v16311_v37, %v2452_v43  ;;  %v2682_v50 = vsel %vm2383_vm6, %v16313_v7, %v2681_v23  ;;  %v5636_v51 = vrot.slane %v5535_v33, 4  ;;  %v16317_v9 = vrot.slane %v16316_v6, 2 }
 0x494   : > { %v5015_v42 = vadd.f32 %v4932_v55, %v4784_v4  ;;  %v5174_v21 = vsel %vm368_vm0, %v16315_v60, %v5173_v59  ;;  %v2513_v5 = vadd.f32 %v2453_v62, %v2294_v24  ;;  %v3483_v47 = vmul.f32 %v15339_v58, %v16283_v57  ;;  %v5949_v58 = vpop.permute.xlu0 %5948  ;;  %v16322_v59 = vld [vmem:[#allocation104_spill] sm:$0xff]  ;;  %v16324_v4 = vld [vmem:[#allocation123_spill] sm:$0xff]  ;;  %v16328_v24 = vld [vmem:[#allocation86_spill] sm:$0xff] }
 0x495   : > { %v2924_v3 = vsel %vm2383_vm6, %v16317_v9, %v2923_v46  ;;  %v3705_v1 = vmul.f32 %v15984_v31, %v16286_v14  ;;  %v16319_v36 = vrot.slane %v16318_v10, 4  ;;  %v3939_v2 = vmul.f32 %v16073_v15, %v16287_v61  ;;  %v13432_v31 = vpop.permute.xlu1 %5950 }
 0x496   : > { %v5259_v22 = vadd.f32 %v5174_v21, %v5015_v42  ;;  %v2744_v18 = vadd.f32 %v2682_v50, %v2513_v5  ;;  %v16321_v11 = vrot.slane %v16320_v34, 4  ;;  %v3595_v19 = vrot.slane %v3483_v47, 3  ;;  %v16330_v5 = vld [vmem:[#allocation15_spill] sm:$0xff]  ;;  %v16335_v34 = vld [vmem:[#allocation110_spill] sm:$0xff] }
 0x497   : > { %v5412_v8 = vsel %vm368_vm0, %v16319_v36, %v5411_v26  ;;  %v3824_v41 = vrot.slane %v3705_v1, 3  ;;  %v4066_v15 = vrot.slane %v3939_v2, 3  ;;  %v16325_v46 = vrot.slane %v16324_v4, 3 }
 0x498   : > { %v5490_v45 = vadd.f32 %v5412_v8, %v5259_v22  ;;  %v5637_v43 = vsel %vm368_vm0, %v16321_v11, %v5636_v51  ;;  %v2988_v23 = vadd.f32 %v2924_v3, %v2744_v18  ;;  %v16327_v55 = vrot.slane %v16326_v30, 3  ;;  %v5758_v49 = vpop.permute.xlu0 %5757  ;;  %v16331_v3 = vld [vmem:[#allocation157_spill] sm:$0xff] }
 0x499   : > { %v3596_v28 = vsel %vm3526_vm7, %v16325_v46, %v3595_v19  ;;  %v16329_v42 = vrot.slane %v16328_v24, 3  ;;  %v4626_v37 = vmul.f32 %v15607_v53, %v16283_v57  ;;  %v4847_v62 = vmul.f32 %v15263_v13, %v16286_v14  ;;  %v13453_v7 = vpop.permute.xlu1 %5956 }
 0x49a   : > { %v13430_v12 = vadd.f32 %v5637_v43, %v5490_v45  ;;  %v3219_v33 = vadd.f32 %v16322_v59, %v2988_v23  ;;  %v3825_v26 = vsel %vm3526_vm7, %v16327_v55, %v3824_v41  ;;  %v5081_v51 = vmul.f32 %v14991_v54, %v16287_v61  ;;  %v16334_v45 = vld [vmem:[#allocation5_spill] sm:$0xff] }
 0x49b   : > { %v4067_v38 = vsel %vm3526_vm7, %v16329_v42, %v4066_v15  ;;  %v4737_v60 = vrot.slane %v4626_v37, 4  ;;  %v4966_v21 = vrot.slane %v4847_v62, 4  ;;  %v16332_v57 = vrot.slane %v13113_v17, 4 }
 0x49c   : > { %5789 = vrot.lane.b32.xlu1 %v13430_v12, %s7431_s7  ;;  %5982 = vrot.lane.b32.xlu0 %v13430_v12, %s7432_s8  ;;  %v3437_v39 = vadd.f32 %v16323_v20, %v3219_v33  ;;  %v5764_v6 = vpop.permute.xlu0 %5763  ;;  %v16333_v14 = vrot.slane %v13132_v0, 4  ;;  %v5208_v1 = vrot.slane %v5081_v51, 4  ;;  %v5861_v4 = vsel %vm5851_vm8, %v13404_v44, 0.0 }
 0x49d   : > { %v13458_v9 = vpop.permute.xlu1 %5988  ;;  %v4738_v13 = vsel %vm368_vm0, %v16332_v57, %v4737_v60  ;;  %v6051_v46 = vsel %vm6044_vm9, %v13383_v29, 0.0  ;;  %v6054_v55 = vsel %vm6044_vm9, %v13381_v27, 0.0  ;;  %v5852_v44 = vsel %vm5851_vm8, %v13402_v40, 0.0 }
 0x49e   : > { %v3656_v32 = vadd.f32 %v3596_v28, %v3437_v39  ;;  %v4967_v47 = vsel %vm368_vm0, %v16333_v14, %v4966_v21  ;;  %v5209_v54 = vsel %vm368_vm0, %v5206_v48, %v5208_v1  ;;  %v5858_v39 = vsel %vm5851_vm8, %v13353_v25, 0.0 }
 0x49f   : > { %v5855_v24 = vsel %vm5851_vm8, %v5758_v49, 0.0  ;;  %v6048_v29 = vsel %vm6044_vm9, %v13432_v31, 0.0  ;;  %v5864_v27 = vsel %vm5851_vm8, %v5764_v6, 0.0  ;;  %v6057_v31 = vsel %vm6044_vm9, %v13453_v7, 0.0 }
 0x4a0   : > { %v3887_v50 = vadd.f32 %v3825_v26, %v3656_v32  ;;  %v5796_v61 = vpop.permute.xlu0 %5795  ;;  %v6045_v26 = vsel %vm6044_vm9, %v5949_v58, 0.0  ;;  %v6105_v21 = vsel %vm6044_vm9, %v13458_v9, 0.0 }
 0x4a1   : > { %v5766_v8 = vpop.permute.xlu1 %5765  ;;  %v5912_v37 = vsel %vm5851_vm8, %v5796_v61, 0.0 }
 0x4a2   : > { %v4131_v16 = vadd.f32 %v4067_v38, %v3887_v50  ;;  %v5867_v58 = vsel %vm5851_vm8, %v5766_v8, 0.0 }
 0x4a4   : > { %v4362_v22 = vadd.f32 %v16330_v5, %v4131_v16  ;;  %v5959_v11 = vpop.permute.xlu0 %5958 }
 0x4a5   : > { %v5798_v43 = vpop.permute.xlu1 %5797  ;;  %v6060_v50 = vsel %vm6044_vm9, %v5959_v11, 0.0 }
 0x4a6   : > { %v4580_v53 = vadd.f32 %v16331_v3, %v4362_v22  ;;  %v5915_v49 = vsel %vm5851_vm8, %v5798_v43, 0.0 }
 0x4a8   : > { %v4798_v10 = vadd.f32 %v4738_v13, %v4580_v53  ;;  %v5991_v0 = vpop.permute.xlu0 %5990 }
 0x4a9   : > { %v13478_v56 = vpop.permute.xlu1 %5960  ;;  %v6108_v51 = vsel %vm6044_vm9, %v5991_v0, 0.0 }
 0x4aa   : > { %v5029_v36 = vadd.f32 %v4967_v47, %v4798_v10  ;;  %v6063_v13 = vsel %vm6044_vm9, %v13478_v56, 0.0 }
 0x4ac   : > { %v5273_v18 = vadd.f32 %v5209_v54, %v5029_v36  ;;  %v5768_v48 = vpop.permute.xlu0 %5767 }
 0x4ad   : > { %v13480_v23 = vpop.permute.xlu1 %5992  ;;  %v5870_v5 = vsel %vm5851_vm8, %v5768_v48, 0.0 }
 0x4ae   : > { %v5504_v2 = vadd.f32 %v16334_v45, %v5273_v18  ;;  %v6111_v47 = vsel %vm6044_vm9, %v13480_v23, 0.0 }
 0x4b0   : > { %v13472_v17 = vadd.f32 %v16335_v34, %v5504_v2  ;;  %v5800_v19 = vpop.permute.xlu0 %5799 }
 0x4b1   : > { %v5770_v41 = vpop.permute.xlu1 %5769  ;;  %v5918_v3 = vsel %vm5851_vm8, %v5800_v19, 0.0 }
 0x4b2   : > { %5817 = vrot.lane.b32.xlu1 %v13472_v17, %s7431_s7  ;;  %6010 = vrot.lane.b32.xlu0 %v13472_v17, %s7432_s8  ;;  %v5873_v7 = vsel %vm5851_vm8, %v5770_v41, 0.0 }
 0x4b4   : > { %v5963_v59 = vpop.permute.xlu0 %5962 }
 0x4b5   : > { %v5802_v33 = vpop.permute.xlu1 %5801  ;;  %v6066_v14 = vsel %vm6044_vm9, %v5963_v59, 0.0 }
 0x4b6   : > { %v5921_v53 = vsel %vm5851_vm8, %v5802_v33, 0.0 }
 0x4b8   : > { %v13482_v15 = vpop.permute.xlu0 %5994 }
 0x4b9   : > { %v13484_v20 = vpop.permute.xlu1 %5964  ;;  %v6114_v36 = vsel %vm6044_vm9, %v13482_v15, 0.0 }
 0x4ba   : > { %v6069_v34 = vsel %vm6044_vm9, %v13484_v20, 0.0 }
 0x4bc   : > { %v5772_v28 = vpop.permute.xlu0 %5771 }
 0x4bd   : > { %v13492_v30 = vpop.permute.xlu1 %5996  ;;  %v5876_v54 = vsel %vm5851_vm8, %v5772_v28, 0.0 }
 0x4be   : > { %v6117_v56 = vsel %vm6044_vm9, %v13492_v30, 0.0 }
 0x4c0   : > { %v5804_v25 = vpop.permute.xlu0 %5803 }
 0x4c1   : > { %v5774_v32 = vpop.permute.xlu1 %5773  ;;  %v5924_v45 = vsel %vm5851_vm8, %v5804_v25, 0.0 }
 0x4c2   : > { %v5879_v61 = vsel %vm5851_vm8, %v5774_v32, 0.0 }
 0x4c4   : > { %v5967_v42 = vpop.permute.xlu0 %5966 }
 0x4c5   : > { %v5806_v38 = vpop.permute.xlu1 %5805  ;;  %v6072_v0 = vsel %vm6044_vm9, %v5967_v42, 0.0 }
 0x4c6   : > { %v5927_v2 = vsel %vm5851_vm8, %v5806_v38, 0.0 }
 0x4c8   : > { %v5999_v40 = vpop.permute.xlu0 %5998 }
 0x4c9   : > { %v13505_v62 = vpop.permute.xlu1 %5968  ;;  %v6120_v48 = vsel %vm6044_vm9, %v5999_v40, 0.0 }
 0x4cc   : > { %v5776_v16 = vpop.permute.xlu0 %5775 }
 0x4cd   : > { %v13511_v60 = vpop.permute.xlu1 %6000  ;;  %v5882_v41 = vsel %vm5851_vm8, %v5776_v16, 0.0 }
 0x4d0   : > { %v5808_v22 = vpop.permute.xlu0 %5807 }
 0x4d1   : > { %5859 = vadd.xlane.f32.xlu0 %v5858_v39  ;;  %v5778_v6 = vpop.permute.xlu1 %5777  ;;  %v5930_v33 = vsel %vm5851_vm8, %v5808_v22, 0.0 }
 0x4d2   : > { %v5885_v59 = vsel %vm5851_vm8, %v5778_v6, 0.0 }
 0x4d4   : > { %v5971_v57 = vpop.permute.xlu0 %5970 }
 0x4d5   : > { %5862 = vadd.xlane.f32.xlu0 %v5861_v4  ;;  %v5810_v9 = vpop.permute.xlu1 %5809  ;;  %v6075_v4 = vsel %vm6044_vm9, %v13505_v62, 0.0 }
 0x4d6   : > { %6052 = vadd.xlane.f32.xlu1 %v6051_v46  ;;  %v5933_v39 = vsel %vm5851_vm8, %v5810_v9, 0.0  ;;  %v6078_v46 = vsel %vm6044_vm9, %v5971_v57, 0.0 }
 0x4d8   : > { %v6003_v1 = vpop.permute.xlu0 %6002 }
 0x4d9   : > { %6055 = vadd.xlane.f32.xlu0 %v6054_v55  ;;  %v5973_v10 = vpop.permute.xlu1 %5972  ;;  %v6123_v55 = vsel %vm6044_vm9, %v13511_v60, 0.0 }
 0x4da   : > { %6046 = vadd.xlane.f32.xlu1 %v6045_v26  ;;  %v6126_v26 = vsel %vm6044_vm9, %v6003_v1, 0.0 }
 0x4dc   : > { %v5780_v8 = vpop.permute.xlu0 %5779 }
 0x4dd   : > { %5853 = vadd.xlane.f32.xlu0 %v5852_v44  ;;  %v6005_v18 = vpop.permute.xlu1 %6004  ;;  %v5888_v25 = vsel %vm5851_vm8, %v5780_v8, 0.0 }
 0x4de   : > { %5856 = vadd.xlane.f32.xlu1 %v5855_v24  ;;  %v6129_v40 = vsel %vm6044_vm9, %v6005_v18, 0.0 }
 0x4e0   : > { %v5812_v11 = vpop.permute.xlu0 %5811 }
 0x4e1   : > { %6049 = vadd.xlane.f32.xlu0 %v6048_v29  ;;  %v5782_v43 = vpop.permute.xlu1 %5781  ;;  %v5936_v29 = vsel %vm5851_vm8, %v5812_v11, 0.0 }
 0x4e2   : > { %5865 = vadd.xlane.f32.xlu1 %v5864_v27  ;;  %v5891_v24 = vsel %vm5851_vm8, %v5782_v43, 0.0 }
 0x4e4   : > { %v5792_v23 = vpop.permute.xlu0 %5791 }
 0x4e5   : > { %5868 = vadd.xlane.f32.xlu0 %v5867_v58  ;;  %v5814_v19 = vpop.permute.xlu1 %5813  ;;  %v6081_v58 = vsel %vm6044_vm9, %v5973_v10, 0.0 }
 0x4e6   : > { %5913 = vadd.xlane.f32.xlu1 %v5912_v37 }
 0x4e8   : > { %v5975_v15 = vpop.permute.xlu0 %5974 }
 0x4e9   : > { %5916 = vadd.xlane.f32.xlu0 %v5915_v49  ;;  %v5985_v20 = vpop.permute.xlu1 %5984  ;;  %v6084_v42 = vsel %vm6044_vm9, %v5975_v15, 0.0 }
 0x4ea   : > { %6058 = vadd.xlane.f32.xlu1 %v6057_v31  ;;  %v6099_v22 = vsel %vm6044_vm9, %v5985_v20, 0.0 }
 0x4ec   : > { %v6007_v28 = vpop.permute.xlu0 %6006 }
 0x4ed   : > { %6061 = vadd.xlane.f32.xlu0 %v6060_v50  ;;  %v5794_v30 = vpop.permute.xlu1 %5793  ;;  %v6132_v37 = vsel %vm6044_vm9, %v6007_v28, 0.0  ;;  %v5906_v50 = vsel %vm5851_vm8, %v5792_v23, 0.0 }
 0x4ee   : > { %6106 = vadd.xlane.f32.xlu1 %v6105_v21  ;;  %v5909_v31 = vsel %vm5851_vm8, %v5794_v30, 0.0  ;;  %v16339_v30 = vld [vmem:[#allocation141_spill] sm:$0xff] }
 0x4f0   : > { %v5784_v32 = vpop.permute.xlu0 %5783 }
 0x4f1   : > { %6109 = vadd.xlane.f32.xlu0 %v6108_v51  ;;  %v5977_v44 = vpop.permute.xlu1 %5976  ;;  %v5939_v51 = vsel %vm5851_vm8, %v5814_v19, 0.0 }
 0x4f2   : > { %5871 = vadd.xlane.f32.xlu1 %v5870_v5 }
 0x4f4   : > { %v5788_v27 = vpop.permute.xlu0 %5787 }
 0x4f5   : > { %5874 = vadd.xlane.f32.xlu0 %v5873_v7  ;;  %v5981_v38 = vpop.permute.xlu1 %5980 }
 0x4f6   : > { %5919 = vadd.xlane.f32.xlu1 %v5918_v3  ;;  %v5894_v3 = vsel %vm5851_vm8, %v5784_v32, 0.0 }
 0x4f8   : > { %v5816_v62 = vpop.permute.xlu0 %5815 }
 0x4f9   : > { %5922 = vadd.xlane.f32.xlu0 %v5921_v53  ;;  %v6009_v49 = vpop.permute.xlu1 %6008  ;;  %v5942_v16 = vsel %vm5851_vm8, %v5816_v62, 0.0 }
 0x4fa   : > { %6064 = vadd.xlane.f32.xlu1 %v6063_v13  ;;  %v5900_v13 = vsel %vm5851_vm8, %v5788_v27, 0.0  ;;  %v6135_v8 = vsel %vm6044_vm9, %v6009_v49, 0.0 }
 0x4fc   : > { %v5987_v60 = vpop.permute.xlu0 %5986 }
 0x4fd   : > { %6067 = vadd.xlane.f32.xlu0 %v6066_v14  ;;  %v5786_v21 = vpop.permute.xlu1 %5785  ;;  %v6102_v5 = vsel %vm6044_vm9, %v5987_v60, 0.0 }
 0x4fe   : > { %6112 = vadd.xlane.f32.xlu1 %v6111_v47  ;;  %v5897_v7 = vsel %vm5851_vm8, %v5786_v21, 0.0  ;;  %v6087_v47 = vsel %vm6044_vm9, %v5977_v44, 0.0  ;;  %v16341_v21 = vld [vmem:[#allocation31_spill] sm:$0xff] }
 0x500   : > { %v5979_v57 = vpop.permute.xlu0 %5978 }
 0x501   : > { %6115 = vadd.xlane.f32.xlu0 %v6114_v36  ;;  %v6090_v10 = vsel %vm6044_vm9, %v5979_v57, 0.0  ;;  %v6093_v36 = vsel %vm6044_vm9, %v5981_v38, 0.0 }
 0x502   : > { %5877 = vadd.xlane.f32.xlu1 %v5876_v54 }
 0x505   : > { %5880 = vadd.xlane.f32.xlu0 %v5879_v61 }
 0x506   : > { %5925 = vadd.xlane.f32.xlu1 %v5924_v45 }
 0x509   : > { %5928 = vadd.xlane.f32.xlu0 %v5927_v2 }
 0x50a   : > { %6070 = vadd.xlane.f32.xlu1 %v6069_v34  ;;  %v16336_v34 = vld [vmem:[#allocation115_spill] sm:$0xff] }
 0x50d   : > { %6073 = vadd.xlane.f32.xlu0 %v6072_v0 }
 0x50e   : > { %6118 = vadd.xlane.f32.xlu1 %v6117_v56  ;;  %v5790_v6 = vpop.permute.xlu1 %5789  ;;  %v5983_v1 = vpop.permute.xlu0 %5982 }
 0x50f   : > { %v5903_v53 = vsel %vm5851_vm8, %v5790_v6, 0.0  ;;  %v6096_v54 = vsel %vm6044_vm9, %v5983_v1, 0.0  ;;  %v16343_v1 = vld [vmem:[#allocation3_spill] sm:$0xff] }
 0x511   : > { %6121 = vadd.xlane.f32.xlu0 %v6120_v48  ;;  %v16337_v48 = vld [vmem:[#allocation122_spill] sm:$0xff] }
 0x512   : > { %5883 = vadd.xlane.f32.xlu1 %v5882_v41 }
 0x515   : > { %5886 = vadd.xlane.f32.xlu0 %v5885_v59 }
 0x516   : > { %5931 = vadd.xlane.f32.xlu1 %v5930_v33 }
 0x519   : > { %5934 = vadd.xlane.f32.xlu0 %v5933_v39  ;;  %v16338_v39 = vld [vmem:[#allocation116_spill] sm:$0xff] }
 0x51a   : > { %6076 = vadd.xlane.f32.xlu1 %v6075_v4 }
 0x51d   : > { %6079 = vadd.xlane.f32.xlu0 %v6078_v46 }
 0x51e   : > { %6124 = vadd.xlane.f32.xlu1 %v6123_v55 }
 0x521   : > { %6127 = vadd.xlane.f32.xlu0 %v6126_v26 }
 0x522   : > { %5889 = vadd.xlane.f32.xlu1 %v5888_v25 }
 0x524   : > { %v5818_v9 = vpop.permute.xlu1 %5817  ;;  %v6011_v61 = vpop.permute.xlu0 %6010 }
 0x525   : > { %5892 = vadd.xlane.f32.xlu0 %v5891_v24  ;;  %v5945_v14 = vsel %vm5851_vm8, %v5818_v9, 0.0  ;;  %v6138_v18 = vsel %vm6044_vm9, %v6011_v61, 0.0 }
 0x526   : > { %5937 = vadd.xlane.f32.xlu1 %v5936_v29 }
 0x529   : > { %6085 = vadd.xlane.f32.xlu0 %v6084_v42 }
 0x52a   : > { %6082 = vadd.xlane.f32.xlu1 %v6081_v58 }
 0x52d   : > { %6133 = vadd.xlane.f32.xlu0 %v6132_v37 }
 0x52e   : > { %6130 = vadd.xlane.f32.xlu1 %v6129_v40  ;;  %v16340_v40 = vld [vmem:[#allocation148_spill] sm:$0xff] }
 0x531   : > { %5910 = vadd.xlane.f32.xlu0 %v5909_v31 }
 0x532   : > { %5907 = vadd.xlane.f32.xlu1 %v5906_v50 }
 0x535   : > { %5943 = vadd.xlane.f32.xlu0 %v5942_v16 }
 0x536   : > { %5940 = vadd.xlane.f32.xlu1 %v5939_v51 }
 0x539   : > { %6103 = vadd.xlane.f32.xlu0 %v6102_v5 }
 0x53a   : > { %6100 = vadd.xlane.f32.xlu1 %v6099_v22  ;;  %v16342_v22 = vld [vmem:[#allocation127_spill] sm:$0xff] }
 0x53d   : > { %5898 = vadd.xlane.f32.xlu0 %v5897_v7 }
 0x53e   : > { %5895 = vadd.xlane.f32.xlu1 %v5894_v3 }
 0x541   : > { %5904 = vadd.xlane.f32.xlu0 %v5903_v53 }
 0x542   : > { %5901 = vadd.xlane.f32.xlu1 %v5900_v13 }
 0x545   : > { %5946 = vadd.xlane.f32.xlu0 %v5945_v14 }
 0x546   : > { %6088 = vadd.xlane.f32.xlu1 %v6087_v47 }
 0x549   : > { %6091 = vadd.xlane.f32.xlu0 %v6090_v10 }
 0x54a   : > { %6094 = vadd.xlane.f32.xlu1 %v6093_v36 }
 0x54d   : > { %6097 = vadd.xlane.f32.xlu0 %v6096_v54 }
 0x54e   : > { %6136 = vadd.xlane.f32.xlu1 %v6135_v8 }
 0x551   : > { %6139 = vadd.xlane.f32.xlu0 %v6138_v18 }
 0x55e   : > { %v5860_v45 = vpop.xlane.xlu0 %5859 }
 0x55f   : > { %v6144_v11 = vsel %vm6141_vm10, %v16336_v34, %v5860_v45 }
 0x562   : > { %v5863_v2 = vpop.xlane.xlu0 %5862 }
 0x563   : > { %v6053_v43 = vpop.xlane.xlu1 %6052  ;;  %v6145_v23 = vsel %vm6141_vm10, %v16337_v48, %v5863_v2 }
 0x564   : > { %v6177_v0 = vsel %vm6174_vm11, %v6144_v11, %v6053_v43 }
 0x565   : > { %v7173_v56 = vmul.f32 -1.442695, %v6177_v0 }
 0x566   : > { %v6056_v19 = vpop.xlane.xlu0 %6055 }
 0x567   : > { %7290 = vpow2.f32 %v7173_v56  ;;  %v6047_v41 = vpop.xlane.xlu1 %6046  ;;  %v6178_v59 = vsel %vm6174_vm11, %v6145_v23, %v6056_v19  ;;  %v16344_v23 = vld [vmem:[#allocation145_spill] sm:$0xff] }
 0x568   : > { %v7174_v33 = vmul.f32 -1.442695, %v6178_v59 }
 0x56a   : > { %7292 = vpow2.f32 %v7174_v33  ;;  %v5854_v15 = vpop.xlane.xlu0 %5853 }
 0x56b   : > { %v5857_v20 = vpop.xlane.xlu1 %5856  ;;  %v6142_v4 = vsel %vm6141_vm10, %v16338_v39, %v5854_v15 }
 0x56c   : > { %v6175_v46 = vsel %vm6174_vm11, %v6142_v4, %v6047_v41  ;;  %v6143_v55 = vsel %vm6141_vm10, %v16339_v30, %v5857_v20 }
 0x56d   : > { %v7171_v28 = vmul.f32 -1.442695, %v6175_v46 }
 0x56e   : > { %v6050_v26 = vpop.xlane.xlu0 %6049 }
 0x56f   : > { %7294 = vpow2.f32 %v7171_v28  ;;  %v5866_v25 = vpop.xlane.xlu1 %5865  ;;  %v6176_v32 = vsel %vm6174_vm11, %v6143_v55, %v6050_v26  ;;  %v16345_v28 = vld [vmem:[#allocation113_spill] sm:$0xff] }
 0x570   : > { %v7172_v44 = vmul.f32 -1.442695, %v6176_v32  ;;  %v6146_v62 = vsel %vm6141_vm10, %v16340_v40, %v5866_v25  ;;  %v16346_v32 = vld [vmem:[#allocation96_spill] sm:$0xff]  ;;  %v16347_v40 = vld [vmem:[#allocation134_spill] sm:$0xff] }
 0x571   : > { %v7291_v24 = vpop.eup %7290 }
 0x572   : > { %v6305_v29 = vadd.f32 1.0, %v7291_v24  ;;  %7296 = vpow2.f32 %v7172_v44  ;;  %v5869_v42 = vpop.xlane.xlu0 %5868 }
 0x573   : > { %v5914_v27 = vpop.xlane.xlu1 %5913  ;;  %v6147_v51 = vsel %vm6141_vm10, %v16341_v21, %v5869_v42 }
 0x574   : > { %v7293_v38 = vpop.eup %7292  ;;  %7298 = vrcp.f32 %v6305_v29  ;;  %v6162_v6 = vsel %vm6141_vm10, %v16342_v22, %v5914_v27 }
 0x575   : > { %v6306_v58 = vadd.f32 1.0, %v7293_v38 }
 0x576   : > { %v5917_v37 = vpop.xlane.xlu0 %5916 }
 0x577   : > { %7300 = vrcp.f32 %v6306_v58  ;;  %v6059_v49 = vpop.xlane.xlu1 %6058  ;;  %v6163_v10 = vsel %vm6141_vm10, %v16343_v1, %v5917_v37 }
 0x578   : > { %v6179_v31 = vsel %vm6174_vm11, %v6146_v62, %v6059_v49 }
 0x579   : > { %v7295_v50 = vpop.eup %7294  ;;  %v7175_v16 = vmul.f32 -1.442695, %v6179_v31 }
 0x57a   : > { %v6303_v60 = vadd.f32 1.0, %v7295_v50  ;;  %v6062_v5 = vpop.xlane.xlu0 %6061 }
 0x57b   : > { %7302 = vpow2.f32 %v7175_v16  ;;  %v6107_v7 = vpop.xlane.xlu1 %6106  ;;  %v6180_v3 = vsel %vm6174_vm11, %v6147_v51, %v6062_v5 }
 0x57c   : > { %v7297_v53 = vpop.eup %7296  ;;  %7304 = vrcp.f32 %v6303_v60  ;;  %v6195_v57 = vsel %vm6174_vm11, %v6162_v6, %v6107_v7  ;;  %v7176_v9 = vmul.f32 -1.442695, %v6180_v3 }
 0x57d   : > { %v6304_v13 = vadd.f32 1.0, %v7297_v53  ;;  %v7191_v14 = vmul.f32 -1.442695, %v6195_v57 }
 0x57e   : > { %v7299_v47 = vpop.eup %7298  ;;  %7306 = vpow2.f32 %v7176_v9  ;;  %v6110_v36 = vpop.xlane.xlu0 %6109  ;;  %v16348_v9 = vld [vmem:[#allocation121_spill] sm:$0xff] }
 0x57f   : > { %7308 = vrcp.f32 %v6304_v13  ;;  %v5872_v54 = vpop.xlane.xlu1 %5871  ;;  %v6196_v61 = vsel %vm6174_vm11, %v6163_v10, %v6110_v36  ;;  %v6406_v8 = vsel %vm6399_vm12, %v7299_v47, 0.0 }
 0x580   : > { %7310 = vpow2.f32 %v7191_v14  ;;  %v7192_v18 = vmul.f32 -1.442695, %v6196_v61  ;;  %6407 = vadd.xlane.f32.xlu1 %v6406_v8  ;;  %v6148_v19 = vsel %vm6141_vm10, %v16344_v23, %v5872_v54 }
 0x581   : > { %v7301_v45 = vpop.eup %7300 }
 0x582   : > { %7312 = vpow2.f32 %v7192_v18  ;;  %v5875_v2 = vpop.xlane.xlu0 %5874  ;;  %v6409_v34 = vsel %vm6399_vm12, %v7301_v45, 0.0  ;;  %v16349_v18 = vld [vmem:[#allocation106_spill] sm:$0xff] }
 0x583   : > { %v5920_v11 = vpop.xlane.xlu1 %5919  ;;  %6410 = vadd.xlane.f32.xlu0 %v6409_v34  ;;  %v6149_v30 = vsel %vm6141_vm10, %v16345_v28, %v5875_v2 }
 0x584   : > { %v6164_v44 = vsel %vm6141_vm10, %v16346_v32, %v5920_v11 }
 0x585   : > { %v7303_v43 = vpop.eup %7302 }
 0x586   : > { %v7305_v0 = vpop.eup %7304  ;;  %v6307_v56 = vadd.f32 1.0, %v7303_v43  ;;  %v5923_v48 = vpop.xlane.xlu0 %5922  ;;  %v16350_v43 = vld [vmem:[#allocation153_spill] sm:$0xff] }
 0x587   : > { %v6065_v41 = vpop.xlane.xlu1 %6064  ;;  %v6400_v59 = vsel %vm6399_vm12, %v7305_v0, 0.0  ;;  %v6165_v62 = vsel %vm6141_vm10, %v16347_v40, %v5923_v48 }
 0x588   : > { %v7307_v33 = vpop.eup %7306  ;;  %7314 = vrcp.f32 %v6307_v56  ;;  %v6181_v15 = vsel %vm6174_vm11, %v6148_v19, %v6065_v41  ;;  %6401 = vadd.xlane.f32.xlu1 %v6400_v59 }
 0x589   : > { %v7309_v20 = vpop.eup %7308  ;;  %v6308_v39 = vadd.f32 1.0, %v7307_v33  ;;  %v7177_v4 = vmul.f32 -1.442695, %v6181_v15  ;;  %v16351_v15 = vld [vmem:[#allocation128_spill] sm:$0xff] }
 0x58a   : > { %v7311_v46 = vpop.eup %7310  ;;  %v6068_v55 = vpop.xlane.xlu0 %6067  ;;  %v6403_v26 = vsel %vm6399_vm12, %v7309_v20, 0.0 }
 0x58b   : > { %v6323_v25 = vadd.f32 1.0, %v7311_v46  ;;  %7316 = vrcp.f32 %v6308_v39  ;;  %v6113_v24 = vpop.xlane.xlu1 %6112  ;;  %v6182_v29 = vsel %vm6174_vm11, %v6149_v30, %v6068_v55  ;;  %6404 = vadd.xlane.f32.xlu0 %v6403_v26 }
 0x58c   : > { %v7313_v42 = vpop.eup %7312  ;;  %7318 = vpow2.f32 %v7177_v4  ;;  %v6197_v27 = vsel %vm6174_vm11, %v6164_v44, %v6113_v24  ;;  %v7178_v38 = vmul.f32 -1.442695, %v6182_v29 }
 0x58d   : > { %7320 = vrcp.f32 %v6323_v25  ;;  %v6324_v58 = vadd.f32 1.0, %v7313_v42  ;;  %v7193_v37 = vmul.f32 -1.442695, %v6197_v27 }
 0x58e   : > { %7322 = vpow2.f32 %v7178_v38  ;;  %v6116_v49 = vpop.xlane.xlu0 %6115  ;;  %v16352_v38 = vld [vmem:[#allocation119_spill] sm:$0xff] }
 0x58f   : > { %7324 = vrcp.f32 %v6324_v58  ;;  %v5878_v31 = vpop.xlane.xlu1 %5877  ;;  %v6198_v50 = vsel %vm6174_vm11, %v6165_v62, %v6116_v49 }
 0x590   : > { %7326 = vpow2.f32 %v7193_v37  ;;  %v7194_v16 = vmul.f32 -1.442695, %v6198_v50  ;;  %v6150_v13 = vsel %vm6141_vm10, %v16348_v9, %v5878_v31 }
 0x592   : > { %v7315_v60 = vpop.eup %7314  ;;  %7328 = vpow2.f32 %v7194_v16  ;;  %v5881_v21 = vpop.xlane.xlu0 %5880 }
 0x593   : > { %v5926_v51 = vpop.xlane.xlu1 %5925  ;;  %v6412_v5 = vsel %vm6399_vm12, %v7315_v60, 0.0  ;;  %v6151_v45 = vsel %vm6141_vm10, %v16349_v18, %v5881_v21  ;;  %v16353_v21 = vld [vmem:[#allocation112_spill] sm:$0xff] }
 0x594   : > { %6413 = vadd.xlane.f32.xlu1 %v6412_v5  ;;  %v6166_v0 = vsel %vm6141_vm10, %v16350_v43, %v5926_v51 }
 0x595   : > { %v7317_v22 = vpop.eup %7316 }
 0x596   : > { %v7319_v6 = vpop.eup %7318  ;;  %v5929_v7 = vpop.xlane.xlu0 %5928  ;;  %v6415_v3 = vsel %vm6399_vm12, %v7317_v22, 0.0 }
 0x597   : > { %v7321_v53 = vpop.eup %7320  ;;  %v6309_v57 = vadd.f32 1.0, %v7319_v6  ;;  %v6071_v14 = vpop.xlane.xlu1 %6070  ;;  %6416 = vadd.xlane.f32.xlu0 %v6415_v3  ;;  %v6167_v20 = vsel %vm6141_vm10, %v16351_v15, %v5929_v7  ;;  %v16354_v7 = vld [vmem:[#allocation7_spill] sm:$0xff] }
 0x598   : > { %v7323_v47 = vpop.eup %7322  ;;  %v6183_v1 = vsel %vm6174_vm11, %v6150_v13, %v6071_v14  ;;  %v6460_v10 = vsel %vm6399_vm12, %v7321_v53, 0.0 }
 0x599   : > { %v7325_v36 = vpop.eup %7324  ;;  %7330 = vrcp.f32 %v6309_v57  ;;  %v6310_v54 = vadd.f32 1.0, %v7323_v47  ;;  %v7179_v61 = vmul.f32 -1.442695, %v6183_v1  ;;  %6461 = vadd.xlane.f32.xlu1 %v6460_v10  ;;  %v16355_v10 = vld [vmem:[#allocation8_spill] sm:$0xff] }
 0x59a   : > { %v7327_v8 = vpop.eup %7326  ;;  %v6074_v2 = vpop.xlane.xlu0 %6073  ;;  %v6463_v34 = vsel %vm6399_vm12, %v7325_v36, 0.0 }
 0x59b   : > { %v6325_v11 = vadd.f32 1.0, %v7327_v8  ;;  %7332 = vrcp.f32 %v6310_v54  ;;  %v6119_v56 = vpop.xlane.xlu1 %6118  ;;  %v6184_v48 = vsel %vm6174_vm11, %v6151_v45, %v6074_v2  ;;  %6464 = vadd.xlane.f32.xlu0 %v6463_v34 }
 0x59c   : > { %v7329_v23 = vpop.eup %7328  ;;  %7334 = vpow2.f32 %v7179_v61  ;;  %v6199_v19 = vsel %vm6174_vm11, %v6166_v0, %v6119_v56  ;;  %v7180_v41 = vmul.f32 -1.442695, %v6184_v48  ;;  %v16356_v56 = vld [vmem:[#allocation41_spill] sm:$0xff] }
 0x59d   : > { %7336 = vrcp.f32 %v6325_v11  ;;  %v6326_v59 = vadd.f32 1.0, %v7329_v23  ;;  %v7195_v33 = vmul.f32 -1.442695, %v6199_v19 }
 0x59e   : > { %7338 = vpow2.f32 %v7180_v41  ;;  %v6122_v39 = vpop.xlane.xlu0 %6121 }
 0x59f   : > { %7340 = vrcp.f32 %v6326_v59  ;;  %v5884_v4 = vpop.xlane.xlu1 %5883  ;;  %v6200_v46 = vsel %vm6174_vm11, %v6167_v20, %v6122_v39 }
 0x5a0   : > { %7342 = vpow2.f32 %v7195_v33  ;;  %v7196_v28 = vmul.f32 -1.442695, %v6200_v46  ;;  %v6152_v58 = vsel %vm6141_vm10, %v16352_v38, %v5884_v4  ;;  %v16357_v33 = vld [vmem:[#allocation149_spill] sm:$0xff] }
 0x5a2   : > { %7344 = vpow2.f32 %v7196_v28  ;;  %v5887_v30 = vpop.xlane.xlu0 %5886 }
 0x5a3   : > { %v7331_v55 = vpop.eup %7330  ;;  %v5932_v26 = vpop.xlane.xlu1 %5931  ;;  %v6153_v51 = vsel %vm6141_vm10, %v16353_v21, %v5887_v30 }
 0x5a4   : > { %v6418_v25 = vsel %vm6399_vm12, %v7331_v55, 0.0  ;;  %v6168_v3 = vsel %vm6141_vm10, %v16354_v7, %v5932_v26 }
 0x5a5   : > { %v7333_v32 = vpop.eup %7332  ;;  %6419 = vadd.xlane.f32.xlu1 %v6418_v25 }
 0x5a6   : > { %v7335_v44 = vpop.eup %7334  ;;  %v5935_v24 = vpop.xlane.xlu0 %5934  ;;  %v6421_v29 = vsel %vm6399_vm12, %v7333_v32, 0.0 }
 0x5a7   : > { %v7337_v42 = vpop.eup %7336  ;;  %v6311_v27 = vadd.f32 1.0, %v7335_v44  ;;  %v6077_v37 = vpop.xlane.xlu1 %6076  ;;  %6422 = vadd.xlane.f32.xlu0 %v6421_v29  ;;  %v6169_v36 = vsel %vm6141_vm10, %v16355_v10, %v5935_v24  ;;  %v16360_v10 = vld [vmem:[#allocation136_spill] sm:$0xff] }
 0x5a8   : > { %v7339_v40 = vpop.eup %7338  ;;  %v6185_v62 = vsel %vm6174_vm11, %v6152_v58, %v6077_v37  ;;  %v6466_v49 = vsel %vm6399_vm12, %v7337_v42, 0.0  ;;  %v16358_v42 = vld [vmem:[#allocation97_spill] sm:$0xff] }
 0x5a9   : > { %v7341_v31 = vpop.eup %7340  ;;  %7346 = vrcp.f32 %v6311_v27  ;;  %v6312_v50 = vadd.f32 1.0, %v7339_v40  ;;  %v7181_v16 = vmul.f32 -1.442695, %v6185_v62  ;;  %6467 = vadd.xlane.f32.xlu1 %v6466_v49 }
 0x5aa   : > { %v7343_v60 = vpop.eup %7342  ;;  %v6080_v5 = vpop.xlane.xlu0 %6079  ;;  %v6469_v22 = vsel %vm6399_vm12, %v7341_v31, 0.0 }
 0x5ab   : > { %v6327_v6 = vadd.f32 1.0, %v7343_v60  ;;  %7348 = vrcp.f32 %v6312_v50  ;;  %v6125_v53 = vpop.xlane.xlu1 %6124  ;;  %v6186_v57 = vsel %vm6174_vm11, %v6153_v51, %v6080_v5  ;;  %6470 = vadd.xlane.f32.xlu0 %v6469_v22  ;;  %v16359_v51 = vld [vmem:[#allocation109_spill] sm:$0xff] }
 0x5ac   : > { %v7345_v9 = vpop.eup %7344  ;;  %7350 = vpow2.f32 %v7181_v16  ;;  %v6201_v13 = vsel %vm6174_vm11, %v6168_v3, %v6125_v53  ;;  %v7182_v14 = vmul.f32 -1.442695, %v6186_v57 }
 0x5ad   : > { %7352 = vrcp.f32 %v6327_v6  ;;  %v6328_v47 = vadd.f32 1.0, %v7345_v9  ;;  %v7197_v1 = vmul.f32 -1.442695, %v6201_v13 }
 0x5ae   : > { %7354 = vpow2.f32 %v7182_v14  ;;  %v6128_v54 = vpop.xlane.xlu0 %6127 }
 0x5af   : > { %7356 = vrcp.f32 %v6328_v47  ;;  %v5890_v61 = vpop.xlane.xlu1 %5889  ;;  %v6202_v8 = vsel %vm6174_vm11, %v6169_v36, %v6128_v54 }
 0x5b0   : > { %7358 = vpow2.f32 %v7197_v1  ;;  %v7198_v18 = vmul.f32 -1.442695, %v6202_v8  ;;  %v6154_v15 = vsel %vm6141_vm10, %v16357_v33, %v5890_v61 }
 0x5b2   : > { %7360 = vpow2.f32 %v7198_v18  ;;  %v5893_v45 = vpop.xlane.xlu0 %5892 }
 0x5b3   : > { %v7347_v2 = vpop.eup %7346  ;;  %v5938_v34 = vpop.xlane.xlu1 %5937  ;;  %v6155_v48 = vsel %vm6141_vm10, %v16356_v56, %v5893_v45 }
 0x5b4   : > { %v6424_v11 = vsel %vm6399_vm12, %v7347_v2, 0.0  ;;  %v6170_v27 = vsel %vm6141_vm10, %v16358_v42, %v5938_v34 }
 0x5b5   : > { %v7349_v43 = vpop.eup %7348  ;;  %6425 = vadd.xlane.f32.xlu1 %v6424_v11 }
 0x5b6   : > { %v7351_v0 = vpop.eup %7350  ;;  %v6086_v23 = vpop.xlane.xlu0 %6085  ;;  %v6427_v19 = vsel %vm6399_vm12, %v7349_v43, 0.0 }
 0x5b7   : > { %v7353_v41 = vpop.eup %7352  ;;  %v6313_v59 = vadd.f32 1.0, %v7351_v0  ;;  %v6083_v20 = vpop.xlane.xlu1 %6082  ;;  %v6188_v39 = vsel %vm6174_vm11, %v6155_v48, %v6086_v23  ;;  %6428 = vadd.xlane.f32.xlu0 %v6427_v19 }
 0x5b8   : > { %v7355_v4 = vpop.eup %7354  ;;  %v6187_v46 = vsel %vm6174_vm11, %v6154_v15, %v6083_v20  ;;  %v7184_v28 = vmul.f32 -1.442695, %v6188_v39  ;;  %v6472_v30 = vsel %vm6399_vm12, %v7353_v41, 0.0  ;;  %v16361_v39 = vld [vmem:[#allocation68_spill] sm:$0xff] }
 0x5b9   : > { %v7357_v55 = vpop.eup %7356  ;;  %7362 = vrcp.f32 %v6313_v59  ;;  %v6314_v26 = vadd.f32 1.0, %v7355_v4  ;;  %v7183_v25 = vmul.f32 -1.442695, %v6187_v46  ;;  %6473 = vadd.xlane.f32.xlu1 %v6472_v30 }
 0x5ba   : > { %v7359_v32 = vpop.eup %7358  ;;  %7364 = vpow2.f32 %v7184_v28  ;;  %v6134_v44 = vpop.xlane.xlu0 %6133  ;;  %v6475_v24 = vsel %vm6399_vm12, %v7357_v55, 0.0 }
 0x5bb   : > { %v6329_v29 = vadd.f32 1.0, %v7359_v32  ;;  %7366 = vrcp.f32 %v6314_v26  ;;  %v6131_v38 = vpop.xlane.xlu1 %6130  ;;  %6476 = vadd.xlane.f32.xlu0 %v6475_v24 }
 0x5bc   : > { %v7361_v58 = vpop.eup %7360  ;;  %7368 = vpow2.f32 %v7183_v25  ;;  %v6203_v37 = vsel %vm6174_vm11, %v6170_v27, %v6131_v38  ;;  %v16362_v27 = vld [vmem:[#allocation133_spill] sm:$0xff] }
 0x5bd   : > { %7370 = vrcp.f32 %v6329_v29  ;;  %v6330_v40 = vadd.f32 1.0, %v7361_v58  ;;  %v7199_v62 = vmul.f32 -1.442695, %v6203_v37 }
 0x5be   : > { %v5911_v49 = vpop.xlane.xlu0 %5910 }
 0x5bf   : > { %7372 = vrcp.f32 %v6330_v40  ;;  %v5908_v31 = vpop.xlane.xlu1 %5907  ;;  %v6161_v57 = vsel %vm6141_vm10, %v16250_v52, %v5911_v49 }
 0x5c0   : > { %7374 = vpow2.f32 %v7199_v62  ;;  %v6160_v36 = vsel %vm6141_vm10, %v16360_v10, %v5908_v31 }
 0x5c2   : > { %v13656_v50 = vpop.xlane.xlu0 %5943 }
 0x5c3   : > { %v7363_v16 = vpop.eup %7362  ;;  %v5941_v60 = vpop.xlane.xlu1 %5940 }
 0x5c4   : > { %v7365_v21 = vpop.eup %7364  ;;  %v6171_v5 = vsel %vm6141_vm10, %v16359_v51, %v5941_v60  ;;  %v6430_v22 = vsel %vm6399_vm12, %v7363_v16, 0.0  ;;  %v6172_v60 = vsel %vm6141_vm10, %v13234_v35, %v13656_v50 }
 0x5c5   : > { %v7367_v6 = vpop.eup %7366  ;;  %v6316_v7 = vadd.f32 1.0, %v7365_v21  ;;  %v6204_v3 = vsel %vm6174_vm11, %v6171_v5, %v6134_v44  ;;  %6431 = vadd.xlane.f32.xlu1 %v6430_v22 }
 0x5c6   : > { %v7369_v53 = vpop.eup %7368  ;;  %v7200_v9 = vmul.f32 -1.442695, %v6204_v3  ;;  %v6104_v13 = vpop.xlane.xlu0 %6103  ;;  %v6433_v14 = vsel %vm6399_vm12, %v7367_v6, 0.0 }
 0x5c7   : > { %v7371_v47 = vpop.eup %7370  ;;  %v6315_v1 = vadd.f32 1.0, %v7369_v53  ;;  %7376 = vrcp.f32 %v6316_v7  ;;  %v6101_v54 = vpop.xlane.xlu1 %6100  ;;  %v6194_v61 = vsel %vm6174_vm11, %v6161_v57, %v6104_v13  ;;  %6434 = vadd.xlane.f32.xlu0 %v6433_v14 }
 0x5c8   : > { %7378 = vpow2.f32 %v7200_v9  ;;  %v6193_v8 = vsel %vm6174_vm11, %v6160_v36, %v6101_v54  ;;  %v7190_v18 = vmul.f32 -1.442695, %v6194_v61  ;;  %v6478_v52 = vsel %vm6399_vm12, %v7371_v47, 0.0 }
 0x5c9   : > { %v7373_v45 = vpop.eup %7372  ;;  %7380 = vrcp.f32 %v6315_v1  ;;  %v7189_v2 = vmul.f32 -1.442695, %v6193_v8  ;;  %6479 = vadd.xlane.f32.xlu1 %v6478_v52 }
 0x5ca   : > { %v7375_v34 = vpop.eup %7374  ;;  %7382 = vpow2.f32 %v7190_v18  ;;  %v5899_v11 = vpop.xlane.xlu0 %5898  ;;  %v6481_v43 = vsel %vm6399_vm12, %v7373_v45, 0.0 }
 0x5cb   : > { %v6331_v0 = vadd.f32 1.0, %v7375_v34  ;;  %7384 = vpow2.f32 %v7189_v2  ;;  %v5896_v56 = vpop.xlane.xlu1 %5895  ;;  %6482 = vadd.xlane.f32.xlu0 %v6481_v43  ;;  %v6157_v24 = vsel %vm6141_vm10, %v13339_v63, %v5899_v11 }
 0x5cc   : > { %v6156_v4 = vsel %vm6141_vm10, %v16361_v39, %v5896_v56 }
 0x5cd   : > { %7386 = vrcp.f32 %v6331_v0 }
 0x5ce   : > { %v5905_v48 = vpop.xlane.xlu0 %5904 }
 0x5cf   : > { %v5902_v23 = vpop.xlane.xlu1 %5901  ;;  %v6159_v63 = vsel %vm6141_vm10, %v13430_v12, %v5905_v48 }
 0x5d0   : > { %v6158_v38 = vsel %vm6141_vm10, %v16362_v27, %v5902_v23 }
 0x5d1   : > { %v7377_v19 = vpop.eup %7376 }
 0x5d2   : > { %v7379_v41 = vpop.eup %7378  ;;  %v5947_v59 = vpop.xlane.xlu0 %5946  ;;  %v6439_v33 = vsel %vm6399_vm12, %v7377_v19, 0.0 }
 0x5d3   : > { %v7381_v15 = vpop.eup %7380  ;;  %v6332_v20 = vadd.f32 1.0, %v7379_v41  ;;  %v6089_v46 = vpop.xlane.xlu1 %6088  ;;  %6440 = vadd.xlane.f32.xlu0 %v6439_v33  ;;  %v6173_v7 = vsel %vm6141_vm10, %v13472_v17, %v5947_v59 }
 0x5d4   : > { %v7383_v28 = vpop.eup %7382  ;;  %v6189_v30 = vsel %vm6174_vm11, %v6156_v4, %v6089_v46  ;;  %v6436_v55 = vsel %vm6399_vm12, %v7381_v15, 0.0 }
 0x5d5   : > { %v7385_v26 = vpop.eup %7384  ;;  %7388 = vrcp.f32 %v6332_v20  ;;  %v6322_v25 = vadd.f32 1.0, %v7383_v28  ;;  %v7185_v32 = vmul.f32 -1.442695, %v6189_v30  ;;  %6437 = vadd.xlane.f32.xlu1 %v6436_v55 }
 0x5d6   : > { %v6321_v44 = vadd.f32 1.0, %v7385_v26  ;;  %v6092_v29 = vpop.xlane.xlu0 %6091 }
 0x5d7   : > { %v7387_v42 = vpop.eup %7386  ;;  %7390 = vrcp.f32 %v6322_v25  ;;  %v6095_v58 = vpop.xlane.xlu1 %6094  ;;  %v6190_v37 = vsel %vm6174_vm11, %v6157_v24, %v6092_v29 }
 0x5d8   : > { %7392 = vrcp.f32 %v6321_v44  ;;  %v6191_v40 = vsel %vm6174_vm11, %v6158_v38, %v6095_v58  ;;  %v7186_v62 = vmul.f32 -1.442695, %v6190_v37  ;;  %v6484_v49 = vsel %vm6399_vm12, %v7387_v42, 0.0  ;;  %v16363_v44 = vld [vmem:[#allocation17_spill] sm:$0xff] }
 0x5d9   : > { %7394 = vpow2.f32 %v7185_v32  ;;  %v7187_v31 = vmul.f32 -1.442695, %v6191_v40  ;;  %6485 = vadd.xlane.f32.xlu1 %v6484_v49  ;;  %v16364_v58 = vld [vmem:[#allocation25_spill] sm:$0xff] }
 0x5da   : > { %7396 = vpow2.f32 %v7186_v62  ;;  %v6098_v16 = vpop.xlane.xlu0 %6097 }
 0x5db   : > { %7398 = vpow2.f32 %v7187_v31  ;;  %v6137_v21 = vpop.xlane.xlu1 %6136  ;;  %v6192_v51 = vsel %vm6174_vm11, %v6159_v63, %v6098_v16  ;;  %v16365_v16 = vld [vmem:[#allocation21_spill] sm:$0xff] }
 0x5dc   : > { %v6205_v5 = vsel %vm6174_vm11, %v6172_v60, %v6137_v21  ;;  %v7188_v22 = vmul.f32 -1.442695, %v6192_v51  ;;  %v16366_v51 = vld [vmem:[#allocation27_spill] sm:$0xff] }
 0x5dd   : > { %v7201_v6 = vmul.f32 -1.442695, %v6205_v5 }
 0x5de   : > { %7400 = vpow2.f32 %v7188_v22  ;;  %v6140_v3 = vpop.xlane.xlu0 %6139 }
 0x5df   : > { %v7389_v12 = vpop.eup %7388  ;;  %7402 = vpow2.f32 %v7201_v6  ;;  %v6206_v53 = vsel %vm6174_vm11, %v6173_v7, %v6140_v3 }
 0x5e0   : > { %v7202_v57 = vmul.f32 -1.442695, %v6206_v53  ;;  %v6487_v35 = vsel %vm6399_vm12, %v7389_v12, 0.0 }
 0x5e1   : > { %v7391_v50 = vpop.eup %7390  ;;  %6488 = vadd.xlane.f32.xlu0 %v6487_v35 }
 0x5e2   : > { %v7393_v9 = vpop.eup %7392  ;;  %7404 = vpow2.f32 %v7202_v57  ;;  %v6457_v13 = vsel %vm6399_vm12, %v7391_v50, 0.0 }
 0x5e3   : > { %v7395_v14 = vpop.eup %7394  ;;  %v6454_v47 = vsel %vm6399_vm12, %v7393_v9, 0.0 }
 0x5e4   : > { %v7397_v1 = vpop.eup %7396  ;;  %v6317_v17 = vadd.f32 1.0, %v7395_v14  ;;  %6455 = vadd.xlane.f32.xlu1 %v6454_v47 }
 0x5e5   : > { %v7399_v10 = vpop.eup %7398  ;;  %v6318_v36 = vadd.f32 1.0, %v7397_v1  ;;  %6458 = vadd.xlane.f32.xlu0 %v6457_v13  ;;  %v16367_v1 = vld [vmem:[#allocation36_spill] sm:$0xff] }
 0x5e6   : > { %7406 = vrcp.f32 %v6317_v17  ;;  %v6319_v54 = vadd.f32 1.0, %v7399_v10 }
 0x5e7   : > { %7408 = vrcp.f32 %v6318_v36 }
 0x5e8   : > { %v7401_v61 = vpop.eup %7400  ;;  %7410 = vrcp.f32 %v6319_v54 }
 0x5e9   : > { %v7403_v8 = vpop.eup %7402  ;;  %v6320_v18 = vadd.f32 1.0, %v7401_v61 }
 0x5ea   : > { %v6333_v52 = vadd.f32 1.0, %v7403_v8 }
 0x5eb   : > { %7412 = vrcp.f32 %v6320_v18  ;;  %v16368_v18 = vld [vmem:[#allocation45_spill] sm:$0xff] }
 0x5ec   : > { %v7405_v45 = vpop.eup %7404  ;;  %7414 = vrcp.f32 %v6333_v52 }
 0x5ed   : > { %v6334_v2 = vadd.f32 1.0, %v7405_v45 }
 0x5ef   : > { %7416 = vrcp.f32 %v6334_v2  ;;  %v16369_v2 = vld [vmem:[#allocation49_spill] sm:$0xff] }
 0x5f0   : > { %v7407_v34 = vpop.eup %7406 }
 0x5f1   : > { %v7409_v11 = vpop.eup %7408  ;;  %v6442_v43 = vsel %vm6399_vm12, %v7407_v34, 0.0 }
 0x5f2   : > { %v7411_v0 = vpop.eup %7410  ;;  %6443 = vadd.xlane.f32.xlu1 %v6442_v43  ;;  %v6445_v56 = vsel %vm6399_vm12, %v7409_v11, 0.0  ;;  %v16370_v43 = vld [vmem:[#allocation58_spill] sm:$0xff] }
 0x5f3   : > { %v6448_v48 = vsel %vm6399_vm12, %v7411_v0, 0.0  ;;  %6446 = vadd.xlane.f32.xlu0 %v6445_v56 }
 0x5f5   : > { %v7413_v23 = vpop.eup %7412 }
 0x5f6   : > { %v7415_v19 = vpop.eup %7414  ;;  %6449 = vadd.xlane.f32.xlu1 %v6448_v48  ;;  %v6451_v41 = vsel %vm6399_vm12, %v7413_v23, 0.0 }
 0x5f7   : > { %v6490_v59 = vsel %vm6399_vm12, %v7415_v19, 0.0  ;;  %6452 = vadd.xlane.f32.xlu0 %v6451_v41 }
 0x5f9   : > { %v7417_v33 = vpop.eup %7416 }
 0x5fa   : > { %6491 = vadd.xlane.f32.xlu1 %v6490_v59  ;;  %v6493_v15 = vsel %vm6399_vm12, %v7417_v33, 0.0 }
 0x5fb   : > { %6494 = vadd.xlane.f32.xlu0 %v6493_v15 }
 0x60d   : > { %v6408_v20 = vpop.xlane.xlu1 %6407 }
 0x60e   : > { %v13702_v39 = vmul.f32 0.33333334, %v6408_v20 }
 0x610   : > { %v6594_v4 = vsub.f32 1.0, %v13702_v39  ;;  %v6411_v46 = vpop.xlane.xlu0 %6410 }
 0x611   : > { %v13705_v28 = vmul.f32 0.33333334, %v6411_v46 }
 0x612   : > { %v6626_v30 = vmax.f32 %v6594_v4, 0.0 }
 0x613   : > { %v6595_v55 = vsub.f32 1.0, %v13705_v28 }
 0x614   : > { %v6658_v26 = vmin.f32 %v6626_v30, 1.0 }
 0x615   : > { %v6627_v25 = vmax.f32 %v6595_v55, 0.0  ;;  %v6402_v32 = vpop.xlane.xlu1 %6401 }
 0x616   : > { %v6722_v24 = vmul.f32 %v6658_v26, %v16363_v44  ;;  %v13709_v29 = vmul.f32 0.33333334, %v6402_v32 }
 0x617   : > { %v6659_v42 = vmin.f32 %v6627_v25, 1.0  ;;  %v16371_v25 = vld [vmem:[#allocation34_spill] sm:$0xff] }
 0x618   : > { %v6592_v27 = vsub.f32 1.0, %v13709_v29  ;;  %6788 = vrot.lane.b32.xlu1 %v6722_v24, %s7433_s21  ;;  %v6405_v38 = vpop.xlane.xlu0 %6404 }
 0x619   : > { %v6723_v37 = vmul.f32 %v6659_v42, %v16364_v58  ;;  %v13714_v40 = vmul.f32 0.33333334, %v6405_v38 }
 0x61a   : > { %v6624_v62 = vmax.f32 %v6592_v27, 0.0 }
 0x61b   : > { %v6593_v49 = vsub.f32 1.0, %v13714_v40 }
 0x61c   : > { %v6656_v31 = vmin.f32 %v6624_v62, 1.0  ;;  %6790 = vrot.lane.b32.xlu1 %v6723_v37, %s7433_s21  ;;  %v16372_v37 = vld [vmem:[#allocation38_spill] sm:$0xff] }
 0x61d   : > { %v6625_v63 = vmax.f32 %v6593_v49, 0.0 }
 0x61e   : > { %v6720_v60 = vmul.f32 %v6656_v31, %v16365_v16  ;;  %v16373_v31 = vld [vmem:[#allocation48_spill] sm:$0xff] }
 0x61f   : > { %v6657_v21 = vmin.f32 %v6625_v63, 1.0 }
 0x620   : > { %6784 = vrot.lane.b32.xlu1 %v6720_v60, %s7433_s21 }
 0x621   : > { %v6721_v5 = vmul.f32 %v6657_v21, %v16366_v51  ;;  %v6414_v22 = vpop.xlane.xlu1 %6413  ;;  %v16374_v21 = vld [vmem:[#allocation50_spill] sm:$0xff] }
 0x622   : > { %v13721_v6 = vmul.f32 0.33333334, %v6414_v22 }
 0x623   : > { %6786 = vrot.lane.b32.xlu0 %v6721_v5, %s7433_s21 }
 0x624   : > { %v6596_v7 = vsub.f32 1.0, %v13721_v6  ;;  %v6417_v3 = vpop.xlane.xlu0 %6416 }
 0x625   : > { %v13725_v12 = vmul.f32 0.33333334, %v6417_v3 }
 0x626   : > { %v6628_v53 = vmax.f32 %v6596_v7, 0.0  ;;  %v6462_v57 = vpop.xlane.xlu1 %6461 }
 0x627   : > { %v13727_v35 = vmul.f32 0.33333334, %v6462_v57  ;;  %v6597_v50 = vsub.f32 1.0, %v13725_v12 }
 0x628   : > { %v6660_v9 = vmin.f32 %v6628_v53, 1.0  ;;  %v6465_v13 = vpop.xlane.xlu0 %6464 }
 0x629   : > { %v6612_v14 = vsub.f32 1.0, %v13727_v35  ;;  %v6629_v47 = vmax.f32 %v6597_v50, 0.0  ;;  %v13732_v10 = vmul.f32 0.33333334, %v6465_v13 }
 0x62a   : > { %v6724_v17 = vmul.f32 %v6660_v9, %v16367_v1 }
 0x62b   : > { %v6644_v36 = vmax.f32 %v6612_v14, 0.0  ;;  %v6661_v54 = vmin.f32 %v6629_v47, 1.0  ;;  %v6613_v61 = vsub.f32 1.0, %v13732_v10 }
 0x62c   : > { %6792 = vrot.lane.b32.xlu0 %v6724_v17, %s7433_s21 }
 0x62d   : > { %v6676_v8 = vmin.f32 %v6644_v36, 1.0  ;;  %v6725_v52 = vmul.f32 %v6661_v54, %v16368_v18  ;;  %v6645_v45 = vmax.f32 %v6613_v61, 0.0 }
 0x62f   : > { %v6740_v34 = vmul.f32 %v6676_v8, %v16369_v2  ;;  %6794 = vrot.lane.b32.xlu1 %v6725_v52, %s7433_s21  ;;  %v6677_v11 = vmin.f32 %v6645_v45, 1.0  ;;  %v16375_v8 = vld [vmem:[#allocation61_spill] sm:$0xff] }
 0x631   : > { %6824 = vrot.lane.b32.xlu0 %v6740_v34, %s7433_s21  ;;  %v6741_v0 = vmul.f32 %v6677_v11, %v16370_v43 }
 0x632   : > { %v6420_v56 = vpop.xlane.xlu1 %6419 }
 0x633   : > { %v13741_v48 = vmul.f32 0.33333334, %v6420_v56  ;;  %6826 = vrot.lane.b32.xlu1 %v6741_v0, %s7433_s21  ;;  %v16376_v56 = vld [vmem:[#allocation71_spill] sm:$0xff] }
 0x634   : > { %v6423_v23 = vpop.xlane.xlu0 %6422 }
 0x635   : > { %v6598_v19 = vsub.f32 1.0, %v13741_v48  ;;  %v13745_v41 = vmul.f32 0.33333334, %v6423_v23 }
 0x636   : > { %v6468_v59 = vpop.xlane.xlu1 %6467 }
 0x637   : > { %v6630_v33 = vmax.f32 %v6598_v19, 0.0  ;;  %v13747_v15 = vmul.f32 0.33333334, %v6468_v59  ;;  %v6599_v20 = vsub.f32 1.0, %v13745_v41  ;;  %v16377_v59 = vld [vmem:[#allocation67_spill] sm:$0xff] }
 0x638   : > { %v6471_v4 = vpop.xlane.xlu0 %6470 }
 0x639   : > { %v6662_v46 = vmin.f32 %v6630_v33, 1.0  ;;  %v6614_v30 = vsub.f32 1.0, %v13747_v15  ;;  %v6631_v55 = vmax.f32 %v6599_v20, 0.0  ;;  %v13751_v26 = vmul.f32 0.33333334, %v6471_v4  ;;  %v16378_v4 = vld [vmem:[#allocation72_spill] sm:$0xff] }
 0x63b   : > { %v6726_v32 = vmul.f32 %v6662_v46, %v16371_v25  ;;  %v6646_v24 = vmax.f32 %v6614_v30, 0.0  ;;  %v6663_v42 = vmin.f32 %v6631_v55, 1.0  ;;  %v6615_v27 = vsub.f32 1.0, %v13751_v26 }
 0x63d   : > { %v6678_v38 = vmin.f32 %v6646_v24, 1.0  ;;  %6796 = vrot.lane.b32.xlu0 %v6726_v32, %s7433_s21  ;;  %v6727_v62 = vmul.f32 %v6663_v42, %v16372_v37  ;;  %v6647_v49 = vmax.f32 %v6615_v27, 0.0 }
 0x63f   : > { %v6742_v63 = vmul.f32 %v6678_v38, %v16373_v31  ;;  %v6679_v60 = vmin.f32 %v6647_v49, 1.0  ;;  %6798 = vrot.lane.b32.xlu1 %v6727_v62, %s7433_s21 }
 0x641   : > { %6828 = vrot.lane.b32.xlu0 %v6742_v63, %s7433_s21  ;;  %v6743_v5 = vmul.f32 %v6679_v60, %v16374_v21 }
 0x642   : > { %v6426_v22 = vpop.xlane.xlu1 %6425 }
 0x643   : > { %v13761_v7 = vmul.f32 0.33333334, %v6426_v22  ;;  %6830 = vrot.lane.b32.xlu1 %v6743_v5, %s7433_s21 }
 0x644   : > { %v6429_v3 = vpop.xlane.xlu0 %6428 }
 0x645   : > { %v6600_v53 = vsub.f32 1.0, %v13761_v7  ;;  %v13765_v57 = vmul.f32 0.33333334, %v6429_v3 }
 0x646   : > { %v6474_v50 = vpop.xlane.xlu1 %6473 }
 0x647   : > { %v6632_v9 = vmax.f32 %v6600_v53, 0.0  ;;  %v13767_v13 = vmul.f32 0.33333334, %v6474_v50  ;;  %v6601_v14 = vsub.f32 1.0, %v13765_v57  ;;  %v16379_v53 = vld [vmem:[#allocation59_spill] sm:$0xff] }
 0x648   : > { %v6477_v47 = vpop.xlane.xlu0 %6476 }
 0x649   : > { %v6664_v17 = vmin.f32 %v6632_v9, 1.0  ;;  %v6616_v36 = vsub.f32 1.0, %v13767_v13  ;;  %v6633_v54 = vmax.f32 %v6601_v14, 0.0  ;;  %v13771_v61 = vmul.f32 0.33333334, %v6477_v47 }
 0x64b   : > { %v6728_v52 = vmul.f32 %v6664_v17, %v16375_v8  ;;  %v6648_v45 = vmax.f32 %v6616_v36, 0.0  ;;  %v6665_v34 = vmin.f32 %v6633_v54, 1.0  ;;  %v6617_v11 = vsub.f32 1.0, %v13771_v61  ;;  %v16380_v36 = vld [vmem:[#allocation69_spill] sm:$0xff] }
 0x64d   : > { %v6680_v0 = vmin.f32 %v6648_v45, 1.0  ;;  %6800 = vrot.lane.b32.xlu0 %v6728_v52, %s7433_s21  ;;  %v6729_v23 = vmul.f32 %v6665_v34, %v16376_v56  ;;  %v6649_v19 = vmax.f32 %v6617_v11, 0.0  ;;  %v16381_v45 = vld [vmem:[#allocation60_spill] sm:$0xff] }
 0x64f   : > { %v6744_v33 = vmul.f32 %v6680_v0, %v16377_v59  ;;  %v6681_v20 = vmin.f32 %v6649_v19, 1.0  ;;  %6802 = vrot.lane.b32.xlu1 %v6729_v23, %s7433_s21  ;;  %v16382_v19 = vld [vmem:[#allocation70_spill] sm:$0xff] }
 0x651   : > { %6832 = vrot.lane.b32.xlu0 %v6744_v33, %s7433_s21  ;;  %v6745_v46 = vmul.f32 %v6681_v20, %v16378_v4 }
 0x652   : > { %v6432_v30 = vpop.xlane.xlu1 %6431 }
 0x653   : > { %v13781_v55 = vmul.f32 0.33333334, %v6432_v30  ;;  %6834 = vrot.lane.b32.xlu1 %v6745_v46, %s7433_s21 }
 0x654   : > { %v6435_v32 = vpop.xlane.xlu0 %6434 }
 0x655   : > { %v6602_v24 = vsub.f32 1.0, %v13781_v55  ;;  %v13785_v42 = vmul.f32 0.33333334, %v6435_v32 }
 0x656   : > { %v6480_v27 = vpop.xlane.xlu1 %6479 }
 0x657   : > { %v6634_v38 = vmax.f32 %v6602_v24, 0.0  ;;  %v13787_v62 = vmul.f32 0.33333334, %v6480_v27  ;;  %v6603_v49 = vsub.f32 1.0, %v13785_v42 }
 0x658   : > { %v6483_v63 = vpop.xlane.xlu0 %6482 }
 0x659   : > { %v6666_v60 = vmin.f32 %v6634_v38, 1.0  ;;  %v6618_v5 = vsub.f32 1.0, %v13787_v62  ;;  %v6635_v22 = vmax.f32 %v6603_v49, 0.0  ;;  %v13791_v3 = vmul.f32 0.33333334, %v6483_v63 }
 0x65b   : > { %v6730_v50 = vmul.f32 %v6666_v60, %v16379_v53  ;;  %v6650_v9 = vmax.f32 %v6618_v5, 0.0  ;;  %v6667_v14 = vmin.f32 %v6635_v22, 1.0  ;;  %v6619_v47 = vsub.f32 1.0, %v13791_v3  ;;  %v16383_v5 = vld [vmem:[#allocation94_spill] sm:$0xff] }
 0x65d   : > { %v6682_v17 = vmin.f32 %v6650_v9, 1.0  ;;  %6804 = vrot.lane.b32.xlu0 %v6730_v50, %s7433_s21  ;;  %v6731_v54 = vmul.f32 %v6667_v14, %v16380_v36  ;;  %v6651_v52 = vmax.f32 %v6619_v47, 0.0  ;;  %v16384_v9 = vld [vmem:[#allocation84_spill] sm:$0xff] }
 0x65f   : > { %v6746_v34 = vmul.f32 %v6682_v17, %v16381_v45  ;;  %v6683_v11 = vmin.f32 %v6651_v52, 1.0  ;;  %6806 = vrot.lane.b32.xlu1 %v6731_v54, %s7433_s21  ;;  %v16385_v52 = vld [vmem:[#allocation85_spill] sm:$0xff] }
 0x660   : > { %v6441_v0 = vpop.xlane.xlu0 %6440 }
 0x661   : > { %6836 = vrot.lane.b32.xlu0 %v6746_v34, %s7433_s21  ;;  %v13800_v23 = vmul.f32 0.33333334, %v6441_v0  ;;  %v6747_v33 = vmul.f32 %v6683_v11, %v16382_v19 }
 0x662   : > { %v6438_v20 = vpop.xlane.xlu1 %6437 }
 0x663   : > { %v13803_v46 = vmul.f32 0.33333334, %v6438_v20  ;;  %v6605_v30 = vsub.f32 1.0, %v13800_v23  ;;  %6838 = vrot.lane.b32.xlu1 %v6747_v33, %s7433_s21 }
 0x665   : > { %v6604_v32 = vsub.f32 1.0, %v13803_v46  ;;  %v6637_v24 = vmax.f32 %v6605_v30, 0.0 }
 0x666   : > { %v6486_v27 = vpop.xlane.xlu1 %6485 }
 0x667   : > { %v6636_v38 = vmax.f32 %v6604_v32, 0.0  ;;  %v6669_v49 = vmin.f32 %v6637_v24, 1.0  ;;  %v13808_v63 = vmul.f32 0.33333334, %v6486_v27 }
 0x669   : > { %v6668_v60 = vmin.f32 %v6636_v38, 1.0  ;;  %v6733_v22 = vmul.f32 %v6669_v49, %v16383_v5  ;;  %v6620_v50 = vsub.f32 1.0, %v13808_v63 }
 0x66b   : > { %v6732_v14 = vmul.f32 %v6668_v60, %v16384_v9  ;;  %v6652_v47 = vmax.f32 %v6620_v50, 0.0  ;;  %6810 = vrot.lane.b32.xlu1 %v6733_v22, %s7433_s21  ;;  %v16389_v22 = vld [vmem:[#allocation95_spill] sm:$0xff] }
 0x66d   : > { %v6684_v17 = vmin.f32 %v6652_v47, 1.0  ;;  %6808 = vrot.lane.b32.xlu0 %v6732_v14, %s7433_s21 }
 0x66e   : > { %v6489_v54 = vpop.xlane.xlu0 %6488 }
 0x66f   : > { %v6748_v34 = vmul.f32 %v6684_v17, %v16385_v52  ;;  %v13816_v11 = vmul.f32 0.33333334, %v6489_v54  ;;  %v16390_v54 = vld [vmem:[#allocation22_spill] sm:$0xff] }
 0x671   : > { %16386 = vst [vmem:[#allocation40_spill] sm:$0xff] %v13816_v11  ;;  %v6621_v0 = vsub.f32 1.0, %v13816_v11  ;;  %6840 = vrot.lane.b32.xlu0 %v6748_v34, %s7433_s21  ;;  %v6456_v33 = vpop.xlane.xlu1 %6455 }
 0x672   : > { %v13820_v20 = vmul.f32 0.33333334, %v6456_v33  ;;  %v6459_v30 = vpop.xlane.xlu0 %6458  ;;  %v16391_v33 = vld [vmem:[#allocation37_spill] sm:$0xff] }
 0x673   : > { %v6653_v32 = vmax.f32 %v6621_v0, 0.0  ;;  %v13822_v24 = vmul.f32 0.33333334, %v6459_v30 }
 0x674   : > { %16387 = vst [vmem:[#allocation80_spill] sm:$0xff] %v13820_v20  ;;  %v6610_v27 = vsub.f32 1.0, %v13820_v20 }
 0x675   : > { %16388 = vst [vmem:[#allocation35_spill] sm:$0xff] %v13822_v24  ;;  %v6685_v38 = vmin.f32 %v6653_v32, 1.0  ;;  %v6611_v49 = vsub.f32 1.0, %v13822_v24 }
 0x676   : > { %v6642_v60 = vmax.f32 %v6610_v27, 0.0 }
 0x677   : > { %v6749_v50 = vmul.f32 %v6685_v38, %v16389_v22  ;;  %v6643_v14 = vmax.f32 %v6611_v49, 0.0  ;;  %v16396_v22 = vld [vmem:[#allocation73_spill] sm:$0xff] }
 0x678   : > { %v6674_v47 = vmin.f32 %v6642_v60, 1.0 }
 0x679   : > { %v6675_v17 = vmin.f32 %v6643_v14, 1.0  ;;  %6842 = vrot.lane.b32.xlu1 %v6749_v50, %s7433_s21 }
 0x67a   : > { %v6738_v34 = vmul.f32 %v6674_v47, %v16390_v54 }
 0x67b   : > { %v6739_v52 = vmul.f32 %v6675_v17, %v16391_v33 }
 0x67c   : > { %6820 = vrot.lane.b32.xlu0 %v6738_v34, %s7433_s21 }
 0x67d   : > { %6822 = vrot.lane.b32.xlu1 %v6739_v52, %s7433_s21 }
 0x67f   : > { %v6444_v0 = vpop.xlane.xlu1 %6443 }
 0x680   : > { %v13832_v30 = vmul.f32 0.33333334, %v6444_v0  ;;  %v6447_v32 = vpop.xlane.xlu0 %6446 }
 0x681   : > { %v13834_v27 = vmul.f32 0.33333334, %v6447_v32 }
 0x682   : > { %16392 = vst [vmem:[#allocation103_spill] sm:$0xff] %v13832_v30  ;;  %v6606_v38 = vsub.f32 1.0, %v13832_v30 }
 0x683   : > { %16393 = vst [vmem:[#allocation63_spill] sm:$0xff] %v13834_v27  ;;  %v6450_v49 = vpop.xlane.xlu1 %6449  ;;  %v6607_v60 = vsub.f32 1.0, %v13834_v27 }
 0x684   : > { %v6638_v50 = vmax.f32 %v6606_v38, 0.0  ;;  %v13838_v14 = vmul.f32 0.33333334, %v6450_v49  ;;  %v6453_v47 = vpop.xlane.xlu0 %6452  ;;  %v16398_v38 = vld [vmem:[#allocation87_spill] sm:$0xff] }
 0x685   : > { %v6639_v17 = vmax.f32 %v6607_v60, 0.0  ;;  %v13840_v33 = vmul.f32 0.33333334, %v6453_v47  ;;  %v6530_v60 = vmax.f32 %v13702_v39, 0.0 }
 0x686   : > { %16394 = vst [vmem:[#allocation42_spill] sm:$0xff] %v13838_v14  ;;  %v6670_v34 = vmin.f32 %v6638_v50, 1.0  ;;  %v6608_v52 = vsub.f32 1.0, %v13838_v14 }
 0x687   : > { %16395 = vst [vmem:[#allocation14_spill] sm:$0xff] %v13840_v33  ;;  %v6671_v0 = vmin.f32 %v6639_v17, 1.0  ;;  %v6492_v54 = vpop.xlane.xlu1 %6491  ;;  %v6609_v32 = vsub.f32 1.0, %v13840_v33  ;;  %v6531_v17 = vmax.f32 %v13705_v28, 0.0  ;;  %v6562_v39 = vmin.f32 %v6530_v60, 1.0 }
 0x688   : > { %v6734_v24 = vmul.f32 %v6670_v34, %v16396_v22  ;;  %v6640_v30 = vmax.f32 %v6608_v52, 0.0  ;;  %v13845_v20 = vmul.f32 0.33333334, %v6492_v54  ;;  %v6495_v27 = vpop.xlane.xlu0 %6494  ;;  %v16400_v52 = vld [vmem:[#allocation26_spill] sm:$0xff]  ;;  %v6529_v28 = vmax.f32 %v13714_v40, 0.0 }
 0x689   : > { %v6735_v49 = vmul.f32 %v6671_v0, %v16398_v38  ;;  %v6641_v11 = vmax.f32 %v6609_v32, 0.0  ;;  %v13848_v9 = vmul.f32 0.33333334, %v6495_v27  ;;  %v16401_v27 = vld [vmem:[#allocation46_spill] sm:$0xff]  ;;  %v6532_v40 = vmax.f32 %v13721_v6, 0.0 }
 0x68a   : > { %16397 = vst [vmem:[#allocation44_spill] sm:$0xff] %v13845_v20  ;;  %v6672_v50 = vmin.f32 %v6640_v30, 1.0  ;;  %v6622_v47 = vsub.f32 1.0, %v13845_v20  ;;  %6812 = vrot.lane.b32.xlu0 %v6734_v24, %s7433_s21  ;;  %v6528_v30 = vmax.f32 %v13709_v29, 0.0  ;;  %v6563_v24 = vmin.f32 %v6531_v17, 1.0 }
 0x68b   : > { %16399 = vst [vmem:[#allocation11_spill] sm:$0xff] %v13848_v9  ;;  %v6673_v33 = vmin.f32 %v6641_v11, 1.0  ;;  %v6623_v34 = vsub.f32 1.0, %v13848_v9  ;;  %v6789_v54 = vpop.permute.xlu1 %6788  ;;  %6814 = vrot.lane.b32.xlu1 %v6735_v49, %s7433_s21  ;;  %v16402_v49 = vld [vmem:[#allocation82_spill] sm:$0xff]  ;;  %v6561_v29 = vmin.f32 %v6529_v28, 1.0  ;;  %v6549_v6 = vmax.f32 %v13732_v10, 0.0 }
 0x68c   : > { %v6736_v0 = vmul.f32 %v6672_v50, %v16400_v52  ;;  %v6654_v32 = vmax.f32 %v6622_v47, 0.0  ;;  %v16403_v50 = vld [vmem:[#allocation89_spill] sm:$0xff]  ;;  %v6560_v52 = vmin.f32 %v6528_v30, 1.0  ;;  %v6691_v60 = vmul.f32 %v6563_v24, %v16364_v58 }
 0x68d   : > { %v6737_v38 = vmul.f32 %v6673_v33, %v16401_v27  ;;  %v6655_v22 = vmax.f32 %v6623_v34, 0.0  ;;  %v6690_v33 = vmul.f32 %v6562_v39, %v16363_v44  ;;  %v6689_v44 = vmul.f32 %v6561_v29, %v16366_v51 }
 0x68e   : > { %v6686_v20 = vmin.f32 %v6654_v32, 1.0  ;;  %6816 = vrot.lane.b32.xlu0 %v6736_v0, %s7433_s21  ;;  %v6564_v0 = vmin.f32 %v6532_v40, 1.0  ;;  %v6551_v40 = vmax.f32 %v13751_v26, 0.0  ;;  %v6536_v26 = vmax.f32 %v13761_v7, 0.0 }
 0x68f   : > { %v6687_v11 = vmin.f32 %v6655_v22, 1.0  ;;  %v6791_v9 = vpop.permute.xlu1 %6790  ;;  %6818 = vrot.lane.b32.xlu1 %v6737_v38, %s7433_s21  ;;  %v6882_v17 = vadd.f32 %v6789_v54, %v6690_v33  ;;  %v6688_v38 = vmul.f32 %v6560_v52, %v16365_v16  ;;  %v6548_v54 = vmax.f32 %v13727_v35, 0.0 }
 0x690   : > { %v6750_v14 = vmul.f32 %v6686_v20, %v16402_v49  ;;  %v6883_v22 = vadd.f32 %v6791_v9, %v6691_v60  ;;  %v6692_v9 = vmul.f32 %v6564_v0, %v16367_v1  ;;  %v6534_v1 = vmax.f32 %v13741_v48, 0.0 }
 0x691   : > { %v6751_v47 = vmul.f32 %v6687_v11, %v16403_v50  ;;  %v6580_v52 = vmin.f32 %v6548_v54, 1.0  ;;  %v6583_v48 = vmin.f32 %v6551_v40, 1.0  ;;  %v6568_v54 = vmin.f32 %v6536_v26, 1.0 }
 0x692   : > { %6844 = vrot.lane.b32.xlu0 %v6750_v14, %s7433_s21  ;;  %v6533_v14 = vmax.f32 %v13725_v12, 0.0  ;;  %v6581_v12 = vmin.f32 %v6549_v6, 1.0  ;;  %v6566_v60 = vmin.f32 %v6534_v1, 1.0  ;;  %v6553_v6 = vmax.f32 %v13771_v61, 0.0 }
 0x693   : > { %6846 = vrot.lane.b32.xlu1 %v6751_v47, %s7433_s21  ;;  %v6785_v34 = vpop.permute.xlu1 %6784  ;;  %v6708_v35 = vmul.f32 %v6580_v52, %v16369_v2  ;;  %v6696_v52 = vmul.f32 %v6568_v54, %v16375_v8  ;;  %v6538_v61 = vmax.f32 %v13781_v55, 0.0 }
 0x694   : > { %v6880_v58 = vadd.f32 %v6785_v34, %v6688_v38  ;;  %v6565_v16 = vmin.f32 %v6533_v14, 1.0  ;;  %v6709_v10 = vmul.f32 %v6581_v12, %v16370_v43  ;;  %v6694_v34 = vmul.f32 %v6566_v60, %v16371_v25 }
 0x695   : > { %v6787_v20 = vpop.permute.xlu0 %6786  ;;  %v6585_v7 = vmin.f32 %v6553_v6, 1.0  ;;  %v16409_v6 = vld [vmem:[#allocation95_spill] sm:$0xff] }
 0x696   : > { %6948 = vrot.lane.b32.xlu0 %v6882_v17, %s7434_s22  ;;  %v6881_v32 = vadd.f32 %v6787_v20, %v6689_v44  ;;  %v6693_v30 = vmul.f32 %v6565_v16, %v16368_v18  ;;  %v6535_v18 = vmax.f32 %v13745_v41, 0.0  ;;  %v6550_v17 = vmax.f32 %v13747_v15, 0.0 }
 0x697   : > { %6950 = vrot.lane.b32.xlu1 %v6883_v22, %s7434_s22  ;;  %v6711_v15 = vmul.f32 %v6583_v48, %v16374_v21 }
 0x698   : > { %v6567_v2 = vmin.f32 %v6535_v18, 1.0  ;;  %v6582_v22 = vmin.f32 %v6550_v17, 1.0 }
 0x69a   : > { %6944 = vrot.lane.b32.xlu0 %v6880_v58, %s7434_s22  ;;  %v6695_v20 = vmul.f32 %v6567_v2, %v16372_v37  ;;  %v6710_v41 = vmul.f32 %v6582_v22, %v16373_v31  ;;  %v6537_v37 = vmax.f32 %v13765_v57, 0.0  ;;  %v6552_v31 = vmax.f32 %v13767_v13, 0.0 }
 0x69b   : > { %6946 = vrot.lane.b32.xlu1 %v6881_v32, %s7434_s22  ;;  %v6713_v13 = vmul.f32 %v6585_v7, %v16378_v4 }
 0x69c   : > { %v6569_v16 = vmin.f32 %v6537_v37, 1.0  ;;  %v16408_v37 = vld [vmem:[#allocation35_spill] sm:$0xff] }
 0x69d   : > { %v6547_v54 = vmax.f32 %v16408_v37, 0.0 }
 0x69e   : > { %v6793_v51 = vpop.permute.xlu0 %6792 }
 0x69f   : > { %v6884_v39 = vadd.f32 %v6793_v51, %v6692_v9  ;;  %v6584_v9 = vmin.f32 %v6552_v31, 1.0 }
 0x6a1   : > { %6952 = vrot.lane.b32.xlu0 %v6884_v39, %s7434_s22  ;;  %v6795_v24 = vpop.permute.xlu1 %6794  ;;  %v6697_v39 = vmul.f32 %v6569_v16, %v16376_v56  ;;  %v6712_v57 = vmul.f32 %v6584_v9, %v16377_v59  ;;  %v6539_v56 = vmax.f32 %v13785_v42, 0.0  ;;  %v6554_v59 = vmax.f32 %v13787_v62, 0.0 }
 0x6a2   : > { %v6885_v28 = vadd.f32 %v6795_v24, %v6693_v30  ;;  %v6541_v62 = vmax.f32 %v13800_v23, 0.0  ;;  %v6579_v16 = vmin.f32 %v6547_v54, 1.0 }
 0x6a3   : > { %v6825_v11 = vpop.permute.xlu0 %6824  ;;  %v6586_v1 = vmin.f32 %v6554_v59, 1.0 }
 0x6a4   : > { %v6900_v47 = vadd.f32 %v6825_v11, %v6708_v35  ;;  %6954 = vrot.lane.b32.xlu1 %v6885_v28, %s7434_s22  ;;  %v6570_v11 = vmin.f32 %v6538_v61, 1.0 }
 0x6a5   : > { %v6827_v33 = vpop.permute.xlu1 %6826  ;;  %v6714_v42 = vmul.f32 %v6586_v1, %v16381_v45  ;;  %v6556_v45 = vmax.f32 %v13808_v63, 0.0  ;;  %v16407_v63 = vld [vmem:[#allocation80_spill] sm:$0xff] }
 0x6a6   : > { %6984 = vrot.lane.b32.xlu0 %v6900_v47, %s7434_s22  ;;  %v6901_v29 = vadd.f32 %v6827_v33, %v6709_v10  ;;  %v6571_v47 = vmin.f32 %v6539_v56, 1.0  ;;  %v6555_v10 = vmax.f32 %v13791_v3, 0.0  ;;  %v6698_v33 = vmul.f32 %v6570_v11, %v16379_v53  ;;  %v16414_v11 = vld [vmem:[#allocation42_spill] sm:$0xff] }
 0x6a7   : > { %v6540_v53 = vmax.f32 %v13803_v46, 0.0  ;;  %v6588_v48 = vmin.f32 %v6556_v45, 1.0  ;;  %v16405_v46 = vld [vmem:[#allocation40_spill] sm:$0xff]  ;;  %v6544_v59 = vmax.f32 %v16414_v11, 0.0 }
 0x6a8   : > { %6986 = vrot.lane.b32.xlu1 %v6901_v29, %s7434_s22  ;;  %v6587_v55 = vmin.f32 %v6555_v10, 1.0  ;;  %v6699_v18 = vmul.f32 %v6571_v47, %v16380_v36  ;;  %v16415_v10 = vld [vmem:[#allocation14_spill] sm:$0xff] }
 0x6a9   : > { %v6545_v1 = vmax.f32 %v16415_v10, 0.0 }
 0x6aa   : > { %v6715_v3 = vmul.f32 %v6587_v55, %v16382_v19  ;;  %v16417_v55 = vld [vmem:[#allocation73_spill] sm:$0xff] }
 0x6af   : > { %v6797_v43 = vpop.permute.xlu0 %6796 }
 0x6b0   : > { %v6886_v38 = vadd.f32 %v6797_v43, %v6694_v34  ;;  %v6573_v34 = vmin.f32 %v6541_v62, 1.0  ;;  %v6572_v43 = vmin.f32 %v6540_v53, 1.0  ;;  %v16419_v62 = vld [vmem:[#allocation87_spill] sm:$0xff] }
 0x6b1   : > { %v6799_v44 = vpop.permute.xlu1 %6798 }
 0x6b2   : > { %6956 = vrot.lane.b32.xlu0 %v6886_v38, %s7434_s22  ;;  %v6887_v14 = vadd.f32 %v6799_v44, %v6695_v20  ;;  %v6701_v38 = vmul.f32 %v6573_v34, %v16383_v5  ;;  %v16404_v44 = vld [vmem:[#allocation84_spill] sm:$0xff]  ;;  %v16420_v34 = vld [vmem:[#allocation26_spill] sm:$0xff] }
 0x6b3   : > { %v6829_v58 = vpop.permute.xlu0 %6828 }
 0x6b4   : > { %v6902_v0 = vadd.f32 %v6829_v58, %v6710_v41  ;;  %6958 = vrot.lane.b32.xlu1 %v6887_v14, %s7434_s22  ;;  %v6700_v41 = vmul.f32 %v6572_v43, %v16404_v44  ;;  %v6557_v58 = vmax.f32 %v16405_v46, 0.0 }
 0x6b5   : > { %v6831_v25 = vpop.permute.xlu1 %6830 }
 0x6b6   : > { %6988 = vrot.lane.b32.xlu0 %v6902_v0, %s7434_s22  ;;  %v6903_v32 = vadd.f32 %v6831_v25, %v6711_v15  ;;  %v16406_v0 = vld [vmem:[#allocation85_spill] sm:$0xff]  ;;  %v6589_v5 = vmin.f32 %v6557_v58, 1.0 }
 0x6b7   : > { %v6716_v15 = vmul.f32 %v6588_v48, %v16406_v0 }
 0x6b8   : > { %6990 = vrot.lane.b32.xlu1 %v6903_v32, %s7434_s22  ;;  %v6546_v32 = vmax.f32 %v16407_v63, 0.0  ;;  %v6717_v9 = vmul.f32 %v6589_v5, %v16409_v6 }
 0x6ba   : > { %v6578_v31 = vmin.f32 %v6546_v32, 1.0 }
 0x6bf   : > { %v6801_v21 = vpop.permute.xlu0 %6800 }
 0x6c0   : > { %v6888_v51 = vadd.f32 %v6801_v21, %v6696_v52 }
 0x6c1   : > { %v6803_v30 = vpop.permute.xlu1 %6802 }
 0x6c2   : > { %6960 = vrot.lane.b32.xlu0 %v6888_v51, %s7434_s22  ;;  %v6889_v12 = vadd.f32 %v6803_v30, %v6697_v39  ;;  %v16410_v51 = vld [vmem:[#allocation22_spill] sm:$0xff]  ;;  %v16411_v30 = vld [vmem:[#allocation37_spill] sm:$0xff] }
 0x6c3   : > { %v6833_v24 = vpop.permute.xlu0 %6832  ;;  %v6706_v7 = vmul.f32 %v6578_v31, %v16410_v51 }
 0x6c4   : > { %v6904_v28 = vadd.f32 %v6833_v24, %v6712_v57  ;;  %6962 = vrot.lane.b32.xlu1 %v6889_v12, %s7434_s22  ;;  %v6707_v57 = vmul.f32 %v6579_v16, %v16411_v30 }
 0x6c5   : > { %v6835_v8 = vpop.permute.xlu1 %6834 }
 0x6c6   : > { %6992 = vrot.lane.b32.xlu0 %v6904_v28, %s7434_s22  ;;  %v6905_v35 = vadd.f32 %v6835_v8, %v6713_v13  ;;  %v16412_v13 = vld [vmem:[#allocation103_spill] sm:$0xff] }
 0x6c7   : > { %v6542_v61 = vmax.f32 %v16412_v13, 0.0  ;;  %v16413_v8 = vld [vmem:[#allocation63_spill] sm:$0xff] }
 0x6c8   : > { %6994 = vrot.lane.b32.xlu1 %v6905_v35, %s7434_s22  ;;  %v6543_v35 = vmax.f32 %v16413_v8, 0.0 }
 0x6c9   : > { %v6574_v56 = vmin.f32 %v6542_v61, 1.0 }
 0x6ca   : > { %v6575_v47 = vmin.f32 %v6543_v35, 1.0 }
 0x6cf   : > { %v6805_v4 = vpop.permute.xlu0 %6804 }
 0x6d0   : > { %v6890_v29 = vadd.f32 %v6805_v4, %v6698_v33  ;;  %v6576_v33 = vmin.f32 %v6544_v59, 1.0  ;;  %v16416_v4 = vld [vmem:[#allocation44_spill] sm:$0xff] }
 0x6d1   : > { %v6807_v60 = vpop.permute.xlu1 %6806 }
 0x6d2   : > { %6964 = vrot.lane.b32.xlu0 %v6890_v29, %s7434_s22  ;;  %v6891_v17 = vadd.f32 %v6807_v60, %v6699_v18  ;;  %v6558_v29 = vmax.f32 %v16416_v4, 0.0  ;;  %v6702_v18 = vmul.f32 %v6574_v56, %v16417_v55  ;;  %v6577_v60 = vmin.f32 %v6545_v1, 1.0 }
 0x6d3   : > { %v6837_v2 = vpop.permute.xlu0 %6836  ;;  %v6704_v43 = vmul.f32 %v6576_v33, %v16420_v34 }
 0x6d4   : > { %v6906_v40 = vadd.f32 %v6837_v2, %v6714_v42  ;;  %6966 = vrot.lane.b32.xlu1 %v6891_v17, %s7434_s22  ;;  %v16418_v42 = vld [vmem:[#allocation11_spill] sm:$0xff] }
 0x6d5   : > { %v6839_v22 = vpop.permute.xlu1 %6838  ;;  %v6559_v17 = vmax.f32 %v16418_v42, 0.0 }
 0x6d6   : > { %6996 = vrot.lane.b32.xlu0 %v6906_v40, %s7434_s22  ;;  %v6907_v36 = vadd.f32 %v6839_v22, %v6715_v3  ;;  %v6703_v40 = vmul.f32 %v6575_v47, %v16419_v62 }
 0x6d7   : > { %v6591_v45 = vmin.f32 %v6559_v17, 1.0 }
 0x6d8   : > { %6998 = vrot.lane.b32.xlu1 %v6907_v36, %s7434_s22  ;;  %v6590_v36 = vmin.f32 %v6558_v29, 1.0 }
 0x6dd   : > { %v6811_v23 = vpop.permute.xlu1 %6810 }
 0x6de   : > { %v6893_v20 = vadd.f32 %v6811_v23, %v6701_v38  ;;  %v6705_v23 = vmul.f32 %v6577_v60, %v16401_v27 }
 0x6df   : > { %v6809_v19 = vpop.permute.xlu0 %6808 }
 0x6e0   : > { %v6892_v14 = vadd.f32 %v6809_v19, %v6700_v41  ;;  %6970 = vrot.lane.b32.xlu1 %v6893_v20, %s7434_s22  ;;  %v6718_v41 = vmul.f32 %v6590_v36, %v16402_v49 }
 0x6e2   : > { %6968 = vrot.lane.b32.xlu0 %v6892_v14, %s7434_s22  ;;  %v6719_v14 = vmul.f32 %v6591_v45, %v16403_v50 }
 0x6e3   : > { %v6841_v26 = vpop.permute.xlu0 %6840 }
 0x6e4   : > { %v6908_v25 = vadd.f32 %v6841_v26, %v6716_v15 }
 0x6e6   : > { %7000 = vrot.lane.b32.xlu0 %v6908_v25, %s7434_s22 }
 0x6eb   : > { %v6843_v52 = vpop.permute.xlu1 %6842 }
 0x6ec   : > { %v6909_v21 = vadd.f32 %v6843_v52, %v6717_v9 }
 0x6ee   : > { %7002 = vrot.lane.b32.xlu1 %v6909_v21, %s7434_s22  ;;  %v6821_v39 = vpop.permute.xlu0 %6820 }
 0x6ef   : > { %v6898_v12 = vadd.f32 %v6821_v39, %v6706_v7  ;;  %v6823_v24 = vpop.permute.xlu1 %6822 }
 0x6f0   : > { %v6899_v28 = vadd.f32 %v6823_v24, %v6707_v57 }
 0x6f1   : > { %6980 = vrot.lane.b32.xlu0 %v6898_v12, %s7434_s22 }
 0x6f2   : > { %6982 = vrot.lane.b32.xlu1 %v6899_v28, %s7434_s22 }
 0x6fc   : > { %v6813_v2 = vpop.permute.xlu0 %6812 }
 0x6fd   : > { %v6894_v3 = vadd.f32 %v6813_v2, %v6702_v18  ;;  %v6815_v53 = vpop.permute.xlu1 %6814 }
 0x6fe   : > { %v6895_v22 = vadd.f32 %v6815_v53, %v6703_v40 }
 0x6ff   : > { %6972 = vrot.lane.b32.xlu0 %v6894_v3, %s7434_s22 }
 0x700   : > { %v6817_v38 = vpop.permute.xlu0 %6816  ;;  %6974 = vrot.lane.b32.xlu1 %v6895_v22, %s7434_s22 }
 0x701   : > { %v6896_v48 = vadd.f32 %v6817_v38, %v6704_v43  ;;  %v6819_v20 = vpop.permute.xlu1 %6818 }
 0x702   : > { %v6897_v44 = vadd.f32 %v6819_v20, %v6705_v23 }
 0x703   : > { %6976 = vrot.lane.b32.xlu0 %v6896_v48, %s7434_s22 }
 0x704   : > { %v6845_v19 = vpop.permute.xlu0 %6844  ;;  %6978 = vrot.lane.b32.xlu1 %v6897_v44, %s7434_s22 }
 0x705   : > { %v6910_v46 = vadd.f32 %v6845_v19, %v6718_v41  ;;  %v6847_v58 = vpop.permute.xlu1 %6846 }
 0x706   : > { %v6911_v0 = vadd.f32 %v6847_v58, %v6719_v14 }
 0x707   : > { %7004 = vrot.lane.b32.xlu0 %v6910_v46, %s7434_s22 }
 0x708   : > { %v6949_v27 = vpop.permute.xlu0 %6948  ;;  %7006 = vrot.lane.b32.xlu1 %v6911_v0, %s7434_s22 }
 0x709   : > { %7043 = vst.msk [vmem:[%s13960_s26 + $0x10] sm:$0xff] %vm7040_vm13, %v6949_v27  ;;  %v6951_v49 = vpop.permute.xlu1 %6950 }
 0x70a   : > { %7044 = vst.msk [vmem:[%s13960_s26 + $0x18] sm:$0xff] %vm7040_vm13, %v6951_v49 }
 0x70c   : > { %v6945_v50 = vpop.permute.xlu0 %6944 }
 0x70d   : > { %7041 = vst.msk [vmem:[%s13960_s26] sm:$0xff] %vm7040_vm13, %v6945_v50  ;;  %v6947_v15 = vpop.permute.xlu1 %6946 }
 0x70e   : > { %7042 = vst.msk [vmem:[%s13960_s26 + $0x8] sm:$0xff] %vm7040_vm13, %v6947_v15 }
 0x713   : > { %v6953_v26 = vpop.permute.xlu0 %6952 }
 0x714   : > { %7045 = vst.msk [vmem:[%s13960_s26 + $0x20] sm:$0xff] %vm7040_vm13, %v6953_v26 }
 0x716   : > { %v6955_v25 = vpop.permute.xlu1 %6954 }
 0x717   : > { %7046 = vst.msk [vmem:[%s13960_s26 + $0x28] sm:$0xff] %vm7040_vm13, %v6955_v25 }
 0x718   : > { %v6985_v63 = vpop.permute.xlu0 %6984 }
 0x719   : > { %7061 = vst.msk [vmem:[%s13960_s26 + $0xa0] sm:$0xff] %vm7040_vm13, %v6985_v63 }
 0x71a   : > { %v6987_v32 = vpop.permute.xlu1 %6986 }
 0x71b   : > { %7062 = vst.msk [vmem:[%s13960_s26 + $0xa8] sm:$0xff] %vm7040_vm13, %v6987_v32 }
 0x724   : > { %v6957_v5 = vpop.permute.xlu0 %6956 }
 0x725   : > { %7047 = vst.msk [vmem:[%s13960_s26 + $0x30] sm:$0xff] %vm7040_vm13, %v6957_v5 }
 0x726   : > { %v6959_v37 = vpop.permute.xlu1 %6958 }
 0x727   : > { %7048 = vst.msk [vmem:[%s13960_s26 + $0x38] sm:$0xff] %vm7040_vm13, %v6959_v37 }
 0x728   : > { %v6989_v54 = vpop.permute.xlu0 %6988 }
 0x729   : > { %7063 = vst.msk [vmem:[%s13960_s26 + $0xb0] sm:$0xff] %vm7040_vm13, %v6989_v54 }
 0x72a   : > { %v6991_v31 = vpop.permute.xlu1 %6990 }
 0x72b   : > { %7064 = vst.msk [vmem:[%s13960_s26 + $0xb8] sm:$0xff] %vm7040_vm13, %v6991_v31 }
 0x734   : > { %v6961_v16 = vpop.permute.xlu0 %6960 }
 0x735   : > { %7049 = vst.msk [vmem:[%s13960_s26 + $0x40] sm:$0xff] %vm7040_vm13, %v6961_v16 }
 0x736   : > { %v6963_v6 = vpop.permute.xlu1 %6962 }
 0x737   : > { %7050 = vst.msk [vmem:[%s13960_s26 + $0x48] sm:$0xff] %vm7040_vm13, %v6963_v6 }
 0x738   : > { %v6993_v9 = vpop.permute.xlu0 %6992 }
 0x739   : > { %7065 = vst.msk [vmem:[%s13960_s26 + $0xc0] sm:$0xff] %vm7040_vm13, %v6993_v9 }
 0x73a   : > { %v6995_v52 = vpop.permute.xlu1 %6994 }
 0x73b   : > { %7066 = vst.msk [vmem:[%s13960_s26 + $0xc8] sm:$0xff] %vm7040_vm13, %v6995_v52 }
 0x744   : > { %v6965_v21 = vpop.permute.xlu0 %6964 }
 0x745   : > { %7051 = vst.msk [vmem:[%s13960_s26 + $0x50] sm:$0xff] %vm7040_vm13, %v6965_v21 }
 0x746   : > { %v6967_v51 = vpop.permute.xlu1 %6966 }
 0x747   : > { %7052 = vst.msk [vmem:[%s13960_s26 + $0x58] sm:$0xff] %vm7040_vm13, %v6967_v51 }
 0x748   : > { %v6997_v7 = vpop.permute.xlu0 %6996 }
 0x749   : > { %7067 = vst.msk [vmem:[%s13960_s26 + $0xd0] sm:$0xff] %vm7040_vm13, %v6997_v7 }
 0x74a   : > { %v6999_v39 = vpop.permute.xlu1 %6998 }
 0x74b   : > { %7068 = vst.msk [vmem:[%s13960_s26 + $0xd8] sm:$0xff] %vm7040_vm13, %v6999_v39 }
 0x752   : > { %v6971_v30 = vpop.permute.xlu1 %6970 }
 0x753   : > { %7054 = vst.msk [vmem:[%s13960_s26 + $0x68] sm:$0xff] %vm7040_vm13, %v6971_v30 }
 0x754   : > { %v6969_v57 = vpop.permute.xlu0 %6968 }
 0x755   : > { %7053 = vst.msk [vmem:[%s13960_s26 + $0x60] sm:$0xff] %vm7040_vm13, %v6969_v57 }
 0x758   : > { %v7001_v12 = vpop.permute.xlu0 %7000 }
 0x759   : > { %7069 = vst.msk [vmem:[%s13960_s26 + $0xe0] sm:$0xff] %vm7040_vm13, %v7001_v12 }
 0x760   : > { %v7003_v24 = vpop.permute.xlu1 %7002 }
 0x761   : > { %7070 = vst.msk [vmem:[%s13960_s26 + $0xe8] sm:$0xff] %vm7040_vm13, %v7003_v24 }
 0x763   : > { %v6981_v28 = vpop.permute.xlu0 %6980 }
 0x764   : > { %7059 = vst.msk [vmem:[%s13960_s26 + $0x90] sm:$0xff] %vm7040_vm13, %v6981_v28  ;;  %v6983_v13 = vpop.permute.xlu1 %6982 }
 0x765   : > { %7060 = vst.msk [vmem:[%s13960_s26 + $0x98] sm:$0xff] %vm7040_vm13, %v6983_v13 }
 0x771   : > { %v6973_v61 = vpop.permute.xlu0 %6972 }
 0x772   : > { %7055 = vst.msk [vmem:[%s13960_s26 + $0x70] sm:$0xff] %vm7040_vm13, %v6973_v61  ;;  %v6975_v8 = vpop.permute.xlu1 %6974 }
 0x773   : > { %7056 = vst.msk [vmem:[%s13960_s26 + $0x78] sm:$0xff] %vm7040_vm13, %v6975_v8 }
 0x775   : > { %v6977_v35 = vpop.permute.xlu0 %6976 }
 0x776   : > { %7057 = vst.msk [vmem:[%s13960_s26 + $0x80] sm:$0xff] %vm7040_vm13, %v6977_v35  ;;  %v6979_v56 = vpop.permute.xlu1 %6978 }
 0x777   : > { %7058 = vst.msk [vmem:[%s13960_s26 + $0x88] sm:$0xff] %vm7040_vm13, %v6979_v56 }
 0x779   : > { %v7005_v11 = vpop.permute.xlu0 %7004 }
 0x77a   : > { %7071 = vst.msk [vmem:[%s13960_s26 + $0xf0] sm:$0xff] %vm7040_vm13, %v7005_v11  ;;  %v7007_v59 = vpop.permute.xlu1 %7006 }
 0x77b   : > { %7072 = vst.msk [vmem:[%s13960_s26 + $0xf8] sm:$0xff] %vm7040_vm13, %v7007_v59 }
 0x77c PF: > { %s14_s15 = sadd.s32 1, %s7429_s15  }
 0x77d   : > { %p11_p4 = scmp.ge.s32.totalorder %s14_s15, 4  }
 0x77f   :  { %13 = sbr.rel (!%p11_p4) target bundleno = 1 (0x1), region = 66 }

</bundles_post_ra>
